<compile_context>
chip_gen: v5e
topology: v5e:2x2
jax: 0.10.0
libtpu: 0.0.40
codegen_flags: <defaults>
</compile_context>

<pallas_src>
import functools
import math

import jax
import jax.numpy as jnp
from jax.experimental import pallas as pl
from jax.experimental.pallas import tpu as pltpu


# ----------------------------- kernel body -----------------------------


def _sine_layer_kernel(x_ref, w_ref, b_ref, o_ref, *, omega_0, epilogue_dtype):
    # x_ref: (tm, K)  streamed row tile
    # w_ref: (K, tn)  pre-transposed weight block (resident when tn == N)
    # b_ref: (1, tn)  f32 bias block
    # o_ref: (tm, tn) output tile
    acc = jnp.dot(x_ref[...], w_ref[...], preferred_element_type=jnp.float32)  # MXU, f32 acc
    b = b_ref[...]
    if epilogue_dtype != jnp.float32:          # optional bf16 epilogue (v6e/v7x only)
        acc = acc.astype(epilogue_dtype)
        b = b.astype(epilogue_dtype)
    o_ref[...] = jnp.sin((acc + b) * omega_0).astype(o_ref.dtype)


# ----------------------------- tiling heuristics -----------------------------


def _round_up(x, m):
    return (x + m - 1) // m * m


def _vmem_capacity_bytes():
    """Physical VMEM of the current generation; conservative (v7x per-TC) if unknown."""
    try:
        info = pltpu.get_tpu_info()
        for name in ("vmem_capacity_bytes", "vmem_bytes", "vmem_size_bytes"):
            v = getattr(info, name, None)
            if v:
                return int(v)
    except Exception:
        pass
    return 64 << 20


def _pick_col_tile(K, N, in_item, budget):
    """Keep the whole (K, N) weight resident if it fits in half the budget; otherwise tile N
    in multiples of 128 lanes (prefer an exact divisor of N to avoid a masked lane tail)."""
    if N <= 128:
        return N
    if K * N * in_item + N * 4 <= budget // 2:
        return N
    tn = (budget // 2) // (K * in_item + 4)
    tn = max(128, (tn // 128) * 128)
    start = min(tn, (N // 128) * 128)
    for t in range(start, 127, -128):
        if N % t == 0:
            return t
    return min(tn, N)


def _row_tile_cap(K, tn, N, in_item, out_item, budget, max_tm=4096):
    """Largest 128-aligned row tile whose streamed x/out double-buffers plus the resident
    (single-buffered) weight block + bias fit the VMEM budget."""
    resident = K * tn * in_item + N * 4
    per_row = 2 * (K * in_item + tn * out_item)
    avail = budget - resident
    if avail <= per_row * 128:
        return 128
    return int(min(max_tm, (avail // per_row) // 128 * 128))


def _pick_row_tile(M, tm_cap):
    """No pad/slice copies: exact 128-aligned divisor of M if one exists, else let Pallas
    mask the ragged last block."""
    tm_cap = max(8, int(tm_cap))
    if M <= tm_cap:
        return M                                  # single block == full dim (always legal)
    cap128 = max(128, (tm_cap // 128) * 128)
    for t in range(cap128, 127, -128):            # largest exact divisor first
        if M % t == 0:
            return t
    return cap128                                 # ragged tail handled by masking


def _vmem_limit(K, tn, N, tm, in_item, out_item, vmem_cap):
    """Explicit scoped-VMEM limit from the actual footprint (covers the double-buffered
    fallback for the resident weight), clamped below physical VMEM."""
    footprint = 2 * (K * tn * in_item + N * 4) + 2 * tm * (K * in_item + tn * out_item)
    limit = max(2 * footprint, 16 << 20)
    return int(min(limit, (vmem_cap * 3) // 4))


# ----------------------------- wrappers -----------------------------


def prepare_sine_layer_params(weight, bias, compute_dtype=None):
    """One-time prep (do this OUTSIDE the per-step hot path): transpose the nn.Linear weight
    (N, K) -> (K, N) so the kernel RHS is lane-dense, optionally cast to compute_dtype
    (e.g. bf16 to halve HBM traffic), and keep the bias in f32 for the epilogue."""
    weight = jnp.asarray(weight)
    N, K = weight.shape
    w_kn = weight.T
    if compute_dtype is not None:
        w_kn = w_kn.astype(compute_dtype)
    bias2d = jnp.asarray(bias).astype(jnp.float32).reshape(1, N)
    return w_kn, bias2d


def sine_layer_apply(x, w_kn, bias2d, omega_0=30.0, *, tm=None, tn=None,
                     out_dtype=None, epilogue_dtype=None, vmem_limit_bytes=None):
    """y = sin(omega_0 * (x @ w_kn + bias)) with prepared params.

    x:      (M, K)   (already in the streaming dtype, e.g. bf16)
    w_kn:   (K, N)   pre-transposed weight
    bias2d: (1, N)   f32 bias
    """
    M, K = x.shape
    K2, N = w_kn.shape
    assert K == K2, "weight / in_features mismatch"
    assert bias2d.shape == (1, N), "bias shape mismatch"

    out_dtype = x.dtype if out_dtype is None else out_dtype
    # f32 epilogue by default (accurate everywhere; v5e has no bf16 VALU/EUP).
    # Pass epilogue_dtype=jnp.bfloat16 on v6e/v7x to halve elementwise sin cost.
    epilogue_dtype = jnp.result_type(jnp.float32 if epilogue_dtype is None else epilogue_dtype)

    in_item = x.dtype.itemsize
    out_item = jnp.result_type(out_dtype).itemsize

    vmem_cap = _vmem_capacity_bytes()
    budget = min(vmem_cap // 3, 40 << 20)

    if tn is None:
        tn = _pick_col_tile(K, N, in_item, budget)
    if tm is None:
        tm_cap = _row_tile_cap(K, tn, N, in_item, out_item, budget)
        if M >= 256:
            # Guarantee >= 2 grid steps so "parallel" semantics can shard across TCs (v7x).
            tm_cap = min(tm_cap, max(128, _round_up(pl.cdiv(M, 2), 128)))
        tm = _pick_row_tile(M, tm_cap)

    grid = (pl.cdiv(M, tm), pl.cdiv(N, tn))
    if vmem_limit_bytes is None:
        vmem_limit_bytes = _vmem_limit(K, tn, N, tm, in_item, out_item, vmem_cap)

    kernel = functools.partial(_sine_layer_kernel, omega_0=float(omega_0),
                               epilogue_dtype=epilogue_dtype)

    def run(single_buffer_resident):
        resident_mode = {}
        if single_buffer_resident:
            # Constant index map across the grid -> fetch once, no double-buffer VMEM cost.
            resident_mode = dict(pipeline_mode=pl.Buffered(1))
        in_specs = [
            pl.BlockSpec((tm, K), lambda i, j: (i, 0)),                    # streamed x tile
            pl.BlockSpec((K, tn), lambda i, j: (0, j), **resident_mode),   # weight block
            pl.BlockSpec((1, tn), lambda i, j: (0, j), **resident_mode),   # bias block
        ]
        return pl.pallas_call(
            kernel,
            out_shape=jax.ShapeDtypeStruct((M, N), out_dtype),
            grid=grid,
            in_specs=in_specs,
            out_specs=pl.BlockSpec((tm, tn), lambda i, j: (i, j)),
            compiler_params=pltpu.CompilerParams(
                dimension_semantics=("parallel", "parallel"),
                vmem_limit_bytes=int(vmem_limit_bytes),
            ),
        )(x, w_kn, bias2d)

    # Single-buffer the resident weight/bias only when there is no N tiling (index map truly
    # constant); fall back to default buffering if this runtime rejects pipeline_mode.
    want_single = grid[1] == 1
    try:
        return run(want_single)
    except Exception:
        if not want_single:
            raise
        return run(False)


def sine_layer(x, weight, bias, omega_0=30.0, *, compute_dtype=None, out_dtype=None, **kwargs):
    """Convenience wrapper matching the PyTorch module: y = sin(omega_0 * (x @ weight.T + b)).

    weight: (out_features, in_features)  -- PyTorch nn.Linear layout.
    For repeated calls, use prepare_sine_layer_params() once + sine_layer_apply() so the
    weight transpose/cast (a full HBM pass) stays out of the hot path.
    """
    orig_dtype = x.dtype
    w_kn, bias2d = prepare_sine_layer_params(weight, bias, compute_dtype)
    if compute_dtype is not None:
        x = x.astype(compute_dtype)
    if out_dtype is None:
        out_dtype = orig_dtype                    # no silent downcast of the output
    return sine_layer_apply(x, w_kn, bias2d, omega_0, out_dtype=out_dtype, **kwargs)


def init_sine_layer_params(key, in_features, out_features, is_first=False, omega_0=30.0):
    """Deterministic init matching SineLayer.init_weights (uniform ranges)."""
    kw, kb = jax.random.split(key)
    if is_first:
        bound_w = 1.0 / in_features
    else:
        bound_w = math.sqrt(6.0 / in_features) / omega_0
    weight = jax.random.uniform(
        kw, (out_features, in_features), jnp.float32, minval=-bound_w, maxval=bound_w
    )
    # nn.Linear default bias init: U(-1/sqrt(in_features), 1/sqrt(in_features))
    bound_b = 1.0 / math.sqrt(in_features)
    bias = jax.random.uniform(
        kb, (out_features,), jnp.float32, minval=-bound_b, maxval=bound_b
    )
    return weight, bias


if __name__ == "__main__":
    key = jax.random.PRNGKey(0)
    k_x, k_p, k_x2 = jax.random.split(key, 3)

    batch = 256
    in_features = 64
    out_features = 128       # multiple of 128 -> lane-dense output stores
    omega_0 = 30.0

    x = jax.random.normal(k_x, (batch, in_features), jnp.float32)
    weight, bias = init_sine_layer_params(
        k_p, in_features, out_features, is_first=True, omega_0=omega_0
    )

    # --- f32 path: matches the PyTorch module's forward() semantics exactly. ---
    y = jax.block_until_ready(sine_layer(x, weight, bias, omega_0=omega_0))
    y_ref = jnp.sin(omega_0 * (x @ weight.T + bias))
    assert y.shape == (batch, out_features)
    assert y.dtype == jnp.float32
    assert jnp.allclose(y, y_ref, atol=1e-4, rtol=1e-4), "f32 mismatch vs reference"

    # --- ragged batch (not a multiple of the row tile): masked tail, no pad/slice copies. ---
    x_rag = jax.random.normal(k_x2, (200, in_features), jnp.float32)
    y_rag = jax.block_until_ready(sine_layer(x_rag, weight, bias, omega_0=omega_0, tm=128))
    y_rag_ref = jnp.sin(omega_0 * (x_rag @ weight.T + bias))
    assert y_rag.shape == (200, out_features)
    assert jnp.allclose(y_rag, y_rag_ref, atol=1e-4, rtol=1e-4), "ragged-batch mismatch"

    # --- bf16 streaming path: prepared (cached) bf16 weight, f32 MXU accum, f32 epilogue. ---
    w_kn_bf16, bias2d = prepare_sine_layer_params(weight, bias, compute_dtype=jnp.bfloat16)
    y_bf16 = jax.block_until_ready(
        sine_layer_apply(x.astype(jnp.bfloat16), w_kn_bf16, bias2d, omega_0,
                         out_dtype=jnp.bfloat16)
    )
    y_bf16_ref = jnp.sin(
        omega_0 * (jnp.dot(x.astype(jnp.bfloat16), weight.T.astype(jnp.bfloat16),
                           preferred_element_type=jnp.float32) + bias)
    ).astype(jnp.bfloat16)
    assert y_bf16.shape == (batch, out_features)
    assert jnp.allclose(y_bf16.astype(jnp.float32), y_bf16_ref.astype(jnp.float32),
                        atol=5e-2, rtol=5e-2), "bf16 mismatch vs reference"

    print("KERNEL_OK")
</pallas_src>

<mosaic_0001>
module attributes {stable_mosaic.version = 11 : i64} {
  func.func @_sine_layer_kernel(%arg0: i32, %arg1: i32, %arg2: memref<128x64xf32, #tpu.memory_space<vmem>>, %arg3: memref<64x128xf32, #tpu.memory_space<vmem>>, %arg4: memref<1x128xf32, #tpu.memory_space<vmem>>, %arg5: memref<128x128xf32, #tpu.memory_space<vmem>>) attributes {dimension_semantics = [#tpu.dimension_semantics<parallel>, #tpu.dimension_semantics<parallel>], iteration_bounds = array<i64: 2, 1>, scalar_prefetch = 0 : i64, scratch_operands = 0 : i64, tpu.core_type = #tpu.core_type<tc>, window_params = [{transform_indices = @transform_0, window_bounds = array<i64: 128, 64>}, {pipeline_mode = #tpu.pipeline_mode<synchronous>, transform_indices = @transform_1, window_bounds = array<i64: 64, 128>}, {pipeline_mode = #tpu.pipeline_mode<synchronous>, transform_indices = @transform_2, window_bounds = array<i64: 1, 128>}, {transform_indices = @transform_3, window_bounds = array<i64: 128, 128>}]} {
    %c0 = arith.constant 0 : index
    %c0_0 = arith.constant 0 : index
    %0 = vector.load %arg2[%c0, %c0_0] : memref<128x64xf32, #tpu.memory_space<vmem>>, vector<128x64xf32>
    %c0_1 = arith.constant 0 : index
    %c0_2 = arith.constant 0 : index
    %1 = vector.load %arg3[%c0_1, %c0_2] : memref<64x128xf32, #tpu.memory_space<vmem>>, vector<64x128xf32>
    %cst = arith.constant dense<0.000000e+00> : vector<128x128xf32>
    %2 = tpu.matmul %0, %1, %cst {dimension_numbers = #tpu.dot_dimension_numbers<[1], [0], [0], [1], [0, 0, 1, 1], [], []>} : vector<128x64xf32>, vector<64x128xf32>, vector<128x128xf32> -> vector<128x128xf32>
    %c0_3 = arith.constant 0 : index
    %c0_4 = arith.constant 0 : index
    %3 = vector.load %arg4[%c0_3, %c0_4] : memref<1x128xf32, #tpu.memory_space<vmem>>, vector<1x128xf32>
    %4 = vector.broadcast %3 : vector<1x128xf32> to vector<128x128xf32>
    %5 = arith.addf %2, %4 : vector<128x128xf32>
    %cst_5 = arith.constant 3.000000e+01 : f32
    %6 = vector.broadcast %cst_5 : f32 to vector<128x128xf32>
    %7 = arith.mulf %5, %6 : vector<128x128xf32>
    %8 = math.sin %7 : vector<128x128xf32>
    %c0_6 = arith.constant 0 : index
    %c0_7 = arith.constant 0 : index
    %9 = vector.load %arg5[%c0_6, %c0_7] : memref<128x128xf32, #tpu.memory_space<vmem>>, vector<128x128xf32>
    tpu.vector_store %arg5[%c0_6, %c0_7], %8 {strides = array<i32>} : memref<128x128xf32, #tpu.memory_space<vmem>>, vector<128x128xf32>,
    return
  }
  func.func @transform_0(%arg0: i32, %arg1: i32) -> (i32, i32) {
    %c0_i32 = arith.constant 0 : i32
    %c0_i32_0 = arith.constant 0 : i32
    return %arg0, %c0_i32 : i32, i32
  }
  func.func @transform_1(%arg0: i32, %arg1: i32) -> (i32, i32) {
    %c0_i32 = arith.constant 0 : i32
    %c0_i32_0 = arith.constant 0 : i32
    return %c0_i32, %arg1 : i32, i32
  }
  func.func @transform_2(%arg0: i32, %arg1: i32) -> (i32, i32) {
    %c0_i32 = arith.constant 0 : i32
    %c0_i32_0 = arith.constant 0 : i32
    return %c0_i32, %arg1 : i32, i32
  }
  func.func @transform_3(%arg0: i32, %arg1: i32) -> (i32, i32) {
    %c0_i32 = arith.constant 0 : i32
    return %arg0, %arg1 : i32, i32
  }
}

module attributes {stable_mosaic.version = 11 : i64} {
  func.func @_sine_layer_kernel(%arg0: i32, %arg1: i32, %arg2: memref<128x64xf32, #tpu.memory_space<vmem>>, %arg3: memref<64x128xf32, #tpu.memory_space<vmem>>, %arg4: memref<1x128xf32, #tpu.memory_space<vmem>>, %arg5: memref<128x128xf32, #tpu.memory_space<vmem>>) attributes {dimension_semantics = [#tpu.dimension_semantics<parallel>, #tpu.dimension_semantics<parallel>], iteration_bounds = array<i64: 2, 1>, scalar_prefetch = 0 : i64, scratch_operands = 0 : i64, tpu.core_type = #tpu.core_type<tc>, window_params = [{transform_indices = @transform_0, window_bounds = array<i64: 128, 64>}, {transform_indices = @transform_1, window_bounds = array<i64: 64, 128>}, {transform_indices = @transform_2, window_bounds = array<i64: 1, 128>}, {transform_indices = @transform_3, window_bounds = array<i64: 128, 128>}]} {
    %c0 = arith.constant 0 : index
    %c0_0 = arith.constant 0 : index
    %0 = vector.load %arg2[%c0, %c0_0] : memref<128x64xf32, #tpu.memory_space<vmem>>, vector<128x64xf32>
    %c0_1 = arith.constant 0 : index
    %c0_2 = arith.constant 0 : index
    %1 = vector.load %arg3[%c0_1, %c0_2] : memref<64x128xf32, #tpu.memory_space<vmem>>, vector<64x128xf32>
    %cst = arith.constant dense<0.000000e+00> : vector<128x128xf32>
    %2 = tpu.matmul %0, %1, %cst {dimension_numbers = #tpu.dot_dimension_numbers<[1], [0], [0], [1], [0, 0, 1, 1], [], []>} : vector<128x64xf32>, vector<64x128xf32>, vector<128x128xf32> -> vector<128x128xf32>
    %c0_3 = arith.constant 0 : index
    %c0_4 = arith.constant 0 : index
    %3 = vector.load %arg4[%c0_3, %c0_4] : memref<1x128xf32, #tpu.memory_space<vmem>>, vector<1x128xf32>
    %4 = vector.broadcast %3 : vector<1x128xf32> to vector<128x128xf32>
    %5 = arith.addf %2, %4 : vector<128x128xf32>
    %cst_5 = arith.constant 3.000000e+01 : f32
    %6 = vector.broadcast %cst_5 : f32 to vector<128x128xf32>
    %7 = arith.mulf %5, %6 : vector<128x128xf32>
    %8 = math.sin %7 : vector<128x128xf32>
    %c0_6 = arith.constant 0 : index
    %c0_7 = arith.constant 0 : index
    %9 = vector.load %arg5[%c0_6, %c0_7] : memref<128x128xf32, #tpu.memory_space<vmem>>, vector<128x128xf32>
    tpu.vector_store %arg5[%c0_6, %c0_7], %8 {strides = array<i32>} : memref<128x128xf32, #tpu.memory_space<vmem>>, vector<128x128xf32>,
    return
  }
  func.func @transform_0(%arg0: i32, %arg1: i32) -> (i32, i32) {
    %c0_i32 = arith.constant 0 : i32
    %c0_i32_0 = arith.constant 0 : i32
    return %arg0, %c0_i32 : i32, i32
  }
  func.func @transform_1(%arg0: i32, %arg1: i32) -> (i32, i32) {
    %c0_i32 = arith.constant 0 : i32
    %c0_i32_0 = arith.constant 0 : i32
    return %c0_i32, %arg1 : i32, i32
  }
  func.func @transform_2(%arg0: i32, %arg1: i32) -> (i32, i32) {
    %c0_i32 = arith.constant 0 : i32
    %c0_i32_0 = arith.constant 0 : i32
    return %c0_i32, %arg1 : i32, i32
  }
  func.func @transform_3(%arg0: i32, %arg1: i32) -> (i32, i32) {
    %c0_i32 = arith.constant 0 : i32
    return %arg0, %arg1 : i32, i32
  }
}

</mosaic_0001>

<bundles_post_ra>
// kernel: tpu_custom_call.1
= control target key start
LH: loop header
LB: loop body
LE: loop exit
PB: predicated region body
PF: predicated region fallthrough
CT: control target
= control target key end

     0   :  { %8 = vsyncpa [#allocation3], 0  ;;  %s5130_s0 = inlined_call_operand.vmem [shape: f32[256,64], index: 0, kind: input, shape index: {}]   ;;  %s5131_s1 = inlined_call_operand.vmem [shape: f32[64,128], index: 1, kind: input, shape index: {}]   ;;  %s5132_s2 = inlined_call_operand.vmem [shape: f32[1,128], index: 2, kind: input, shape index: {}]   ;;  %s5133_s3 = inlined_call_operand.hbm [shape: f32[256,128], index: 3, kind: output, shape index: {}]  }
   0x1   :  { %10 = vsyncpa [#allocation3 + $0x1], 0  ;;  %s3268_s12 = smov 0   ;;  %s3270_s13 = smov 0  }
   0x2   :  { %s3272_s14 = smov 0   ;;  %s3274_s15 = smov 0  }
   0x3   :  { %s3276_s16 = smov 0   ;;  %s3278_s17 = smov 0  }
   0x4 LB: > { %s2987_s18 = sadd.s32 4294967295, %s3237_s17   ;;  %s2988_s19 = sadd.s32 4294967294, %s3237_s17   ;;  %s3237_s17 = sphi %s3278_s17, %s16_s17   ;;  %s3233_s16 = sphi %s3276_s16, %s5160_s16   ;;  %s3229_s15 = sphi %s3274_s15, %s5159_s15   ;;  %s3225_s14 = sphi %s3272_s14, %s5158_s14   ;;  %s3221_s13 = sphi %s3270_s13, %s5157_s13   ;;  %s3217_s12 = sphi %s3268_s12, %s5156_s12  }
   0x5   : > { %s28_s20 = sadd.s32 1, %s3233_s16  ;;  %s115_s21 = sadd.s32 1, %s3225_s14 }
   0x6   : > { %p30_p0 = scmp.ge.s32.totalorder %s28_s20, 2  ;;  %p125_p1 = scmp.ne.s32.totalorder %s3225_s14, %s3221_s13 }
   0x7   : > { %p126_p2 = scmp.eq.s32.totalorder %s2987_s18, 1  ;;  %p131_p3 = scmp.ne.s32.totalorder %s3221_s13, %s3217_s12 }
   0x8   : > { %s5162_s20 = smov (%p30_p0, %s28_s20), 0  ;;  %p132_p5 = scmp.eq.s32.totalorder %s2988_s19, 1 }
   0x9   : > { %p3308_p4 = por %p126_p2, %p125_p1  ;;  %s110_s23 = ssub.s32 %s3233_s16, %s5162_s20 }
   0xa   : > { %p2993_p6 = scmp.ge.s32.totalorder %s3237_s17, 1  ;;  %p113_p7 = scmp.eq.s32.totalorder %s110_s23, 0 }
   0xb   : > { %p3315_p8 = por %p132_p5, %p131_p3  ;;  %p172_p9 = scmp.lt.s32.totalorder %s3237_s17, 3 }
   0xc   : > { %s3321_s25 = scalar_select %p113_p7, %s3225_s14, %s115_s21  }
   0xd   : > { %p173_p10 = pnand %p2993_p6, %p172_p9 }
   0xe   : > { %s2995_s30 = sshll.u32 (!%p173_p10), %s3229_s15, 4  ;;  %s200_s5 = sand.u32 (!%p173_p10), 1, %s3221_s13  }
   0xf   : > { %176 = sbr.rel (%p173_p10) target bundleno = 814 (0x32e), region = 32  ;;  %p204_p11 = scmp.lt.s32.totalorder (!%p173_p10), %s2995_s30, 31 }
  0x10   : > { %s2994_s6 = sshll.u32 (!%p173_p10), %s200_s5, 7  ;;  %s3066_s21 = sshll.u32 (!%p173_p10), %s3229_s15, 7 }
  0x11   : > { %s3701_s7 = scalar_lea.vmem (!%p173_p10), [#allocation2], %s2994_s6  ;;  %s2872_s15 = scalar_lea.sflag (!%p173_p10), [#allocation3], %s200_s5 }
  0x12   : > { %s2885_s28 = sshll.u32 (!%p173_p10), %s3701_s7, 4  ;;  %s3179_s9 = scalar_lea.hbm (!%p173_p10), %s5133_s3, 256  ;;  %s2886_s28 = int_to_ptr.vmem [resolvable:$true] %s2885_s28 }
  0x14   : > { %v240_v0 = vld [vmem:[%s5131_s1 + $0x38] sm:$0xff]  ;;  %v239_v1 = vld [vmem:[%s5131_s1 + $0x30] sm:$0xff]  ;;  %v238_v2 = vld [vmem:[%s5131_s1 + $0x28] sm:$0xff]  ;;  %s5164_s30 = smov (!%p204_p11, %s2995_s30), 31  ;;  %vm245_vm0 = vcmask 523264  }
  0x15   : > { %302 = vmatpush.msra.mxu0 %v240_v0  ;;  %3067 = vmatpush.msra.mxu1 %v240_v0  ;;  %v237_v3 = vld [vmem:[%s5131_s1 + $0x20] sm:$0xff]  ;;  %v236_v4 = vld [vmem:[%s5131_s1 + $0x18] sm:$0xff]  ;;  %v235_v5 = vld [vmem:[%s5131_s1 + $0x10] sm:$0xff]  ;;  %s2996_s18 = sshll.u32 %s5164_s30, 3  ;;  %v3239_v55 = vmov 683565275  }
  0x16   : > { %3068 = vmatpush.msra.mxu2 %v240_v0  ;;  %3069 = vmatpush.msra.mxu3 %v240_v0  ;;  %v234_v6 = vld [vmem:[%s5131_s1 + $0x8] sm:$0xff]  ;;  %s3348_s27 = scalar_lea.vmem %s5130_s0, %s2996_s18  ;;  %v233_v7 = vld [vmem:[%s5131_s1] sm:$0xff]  ;;  %v3240_v57 = vmov 2475754826   ;;  %v3241_v59 = vmov 2131351028  }
  0x17   : > { %303 = vmatpush.msra.mxu0 %v239_v1  ;;  %3070 = vmatpush.msra.mxu1 %v239_v1  ;;  %v217_v8 = vld [vmem:[%s3348_s27] sm:$0xff]  ;;  %v218_v12 = vld [vmem:[%s3348_s27 + $0x8] sm:$0xff]  ;;  %v219_v16 = vld [vmem:[%s3348_s27 + $0x10] sm:$0xff]  ;;  %v3242_v61 = vmov 2102212464  }
  0x18   : > { %3071 = vmatpush.msra.mxu2 %v239_v1  ;;  %3072 = vmatpush.msra.mxu3 %v239_v1  ;;  %v221_v9 = vld [vmem:[%s3348_s27 + $0x20] sm:$0xff]  ;;  %v222_v13 = vld [vmem:[%s3348_s27 + $0x28] sm:$0xff]  ;;  %v223_v17 = vld [vmem:[%s3348_s27 + $0x30] sm:$0xff]  ;;  %v3243_v63 = vmov 920167782  }
  0x19   : > { %304 = vmatpush.msra.mxu0 %v238_v2  ;;  %3073 = vmatpush.msra.mxu1 %v238_v2  ;;  %v225_v10 = vld [vmem:[%s3348_s27 + $0x40] sm:$0xff]  ;;  %v226_v14 = vld [vmem:[%s3348_s27 + $0x48] sm:$0xff]  ;;  %v227_v18 = vld [vmem:[%s3348_s27 + $0x50] sm:$0xff] }
  0x1a   : > { %3074 = vmatpush.msra.mxu2 %v238_v2  ;;  %3075 = vmatpush.msra.mxu3 %v238_v2  ;;  %v229_v11 = vld [vmem:[%s3348_s27 + $0x60] sm:$0xff]  ;;  %v230_v15 = vld [vmem:[%s3348_s27 + $0x68] sm:$0xff]  ;;  %v231_v19 = vld [vmem:[%s3348_s27 + $0x70] sm:$0xff] }
  0x1b   : > { %305 = vmatpush.msra.mxu0 %v237_v3  ;;  %3076 = vmatpush.msra.mxu1 %v237_v3  ;;  %v220_v20 = vld [vmem:[%s3348_s27 + $0x18] sm:$0xff]  ;;  %v3388_v24 = vld [vmem:[%s5132_s2] ss:$0 sm:$0xff] }
  0x1c   : > { %3077 = vmatpush.msra.mxu2 %v237_v3  ;;  %3078 = vmatpush.msra.mxu3 %v237_v3  ;;  %v224_v21 = vld [vmem:[%s3348_s27 + $0x38] sm:$0xff] }
  0x1d   : > { %306 = vmatpush.msra.mxu0 %v236_v4  ;;  %3079 = vmatpush.msra.mxu1 %v236_v4  ;;  %v228_v22 = vld [vmem:[%s3348_s27 + $0x58] sm:$0xff] }
  0x1e   : > { %3080 = vmatpush.msra.mxu2 %v236_v4  ;;  %3081 = vmatpush.msra.mxu3 %v236_v4  ;;  %v232_v23 = vld [vmem:[%s3348_s27 + $0x78] sm:$0xff]  ;;  %s2884_s27 = scalar_lea.hbm %s5133_s3, %s3066_s21 }
  0x1f   : > { %307 = vmatpush.msra.mxu0 %v235_v5  ;;  %3082 = vmatpush.msra.mxu1 %v235_v5  ;;  %s2887_s29 = sshll.u32 %s2884_s27, 4  ;;  %s2888_s29 = int_to_ptr.hbm [resolvable:$true] %s2887_s29 }
  0x20   : > { %3083 = vmatpush.msra.mxu2 %v235_v5  ;;  %3084 = vmatpush.msra.mxu3 %v235_v5  ;;  %s3173_s30 = sshra.s32 %s2888_s29, 4  ;;  %s3174_s30 = int_to_ptr.hbm [resolvable:$true] %s3173_s30 }
  0x21   : > { %308 = vmatpush.msra.mxu0 %v234_v6  ;;  %3085 = vmatpush.msra.mxu1 %v234_v6  ;;  %s3175_s4 = scalar_lea.hbm %s3174_s30, 128  ;;  %p3180_p1 = scmp.lt.s32.totalorder %s3174_s30, %s5133_s3 }
  0x22   : > { %3086 = vmatpush.msra.mxu2 %v234_v6  ;;  %3087 = vmatpush.msra.mxu3 %v234_v6  ;;  %p3176_p12 = scmp.ne.s32.totalorder %s3174_s30, %s3175_s4  ;;  %p3181_p2 = scmp.lt.s32.totalorder %s3179_s9, %s3175_s4 }
  0x23   : > { %309 = vmatpush.msra.mxu0 %v233_v7  ;;  %3088 = vmatpush.msra.mxu1 %v233_v7 }
  0x24   : > { %3089 = vmatpush.msra.mxu2 %v233_v7  ;;  %3090 = vmatpush.msra.mxu3 %v233_v7  ;;  %p3177_p13 = pnand %p3176_p12, %p3308_p4  ;;  %p3182_p3 = por %p3181_p2, %p3180_p1 }
  0x25   : > { %2997 = vmatmul.msk.f32.vlgmr.msra.gmra.mxu0 %vm245_vm0, %v217_v8  ;;  %3001 = vmatmul.msk.f32.vlgmr.msra.gmra.mxu1 %vm245_vm0, %v221_v9  ;;  %v3244_v8 = vmov 1326507024  }
  0x26   : > { %3005 = vmatmul.msk.f32.vlgmr.msra.gmra.mxu2 %vm245_vm0, %v225_v10  ;;  %3009 = vmatmul.msk.f32.vlgmr.msra.gmra.mxu3 %vm245_vm0, %v229_v11  ;;  %p3178_p0 = pneg %p3177_p13 }
  0x28   : > { %p3183_p5 = pnand %p3182_p3, %p3178_p0 }
  0x2d   : > { %2998 = vmatmul.msk.f32.gmra.mxu0 %vm245_vm0, %v218_v12  ;;  %3002 = vmatmul.msk.f32.gmra.mxu1 %vm245_vm0, %v222_v13 }
  0x2e   : > { %3006 = vmatmul.msk.f32.gmra.mxu2 %vm245_vm0, %v226_v14  ;;  %3010 = vmatmul.msk.f32.gmra.mxu3 %vm245_vm0, %v230_v15 }
  0x35   : > { %2999 = vmatmul.msk.f32.gmra.mxu0 %vm245_vm0, %v219_v16  ;;  %3003 = vmatmul.msk.f32.gmra.mxu1 %vm245_vm0, %v223_v17 }
  0x36   : > { %3007 = vmatmul.msk.f32.gmra.mxu2 %vm245_vm0, %v227_v18  ;;  %3011 = vmatmul.msk.f32.gmra.mxu3 %vm245_vm0, %v231_v19 }
  0x3d   : > { %3000 = vmatmul.msk.f32.gmra.mxu0 %vm245_vm0, %v220_v20  ;;  %3004 = vmatmul.msk.f32.gmra.mxu1 %vm245_vm0, %v224_v21 }
  0x3e   : > { %3008 = vmatmul.msk.f32.gmra.mxu2 %vm245_vm0, %v228_v22  ;;  %3012 = vmatmul.msk.f32.gmra.mxu3 %vm245_vm0, %v232_v23 }
  0xa2   : > { %v311_v25 = vpop.f32.mrf.mxu0  ;;  %v323_v26 = vpop.f32.mrf.mxu1 }
  0xa3   : > { %v312_v27 = vadd.f32 %v3388_v24, %v311_v25  ;;  %v324_v28 = vadd.f32 %v3388_v24, %v323_v26 }
  0xa5   : > { %v3392_v29 = vmul.f32 30.0, %v312_v27  ;;  %v3394_v30 = vmul.f32 30.0, %v324_v28 }
  0xa7   : > { %v375_v31 = vand.u32 2147483647, %v3392_v29  ;;  %v378_v32 = vand.u32 2139095040, %v3392_v29  ;;  %v995_v33 = vand.u32 2147483647, %v3394_v30  ;;  %v998_v34 = vand.u32 2139095040, %v3394_v30 }
  0xa9   : > { %v379_v35 = vshrl.u32 %v378_v32, 23  ;;  %v382_v36 = vand.u32 8388607, %v375_v31  ;;  %v999_v37 = vshrl.u32 %v998_v34, 23  ;;  %v335_v39 = vpop.f32.mrf.mxu2  ;;  %v1002_v42 = vand.u32 8388607, %v995_v33 }
  0xaa   : > { %v336_v45 = vadd.f32 %v3388_v24, %v335_v39 }
  0xab   : > { %v3013_v38 = vadd.s32 4294967169, %v379_v35  ;;  %v383_v40 = vor.u32 8388608, %v382_v36  ;;  %v3025_v41 = vadd.s32 4294967169, %v999_v37  ;;  %v1003_v48 = vor.u32 8388608, %v1002_v42 }
  0xac   : > { %v3411_v53 = vmul.f32 30.0, %v336_v45 }
  0xad   : > { %v385_v43 = vadd.s32 1, %v3013_v38  ;;  %v1005_v44 = vadd.s32 1, %v3025_v41  ;;  %v3405_v47 = vshll.u32 %v383_v40, 8  ;;  %v3419_v2 = vshll.u32 %v1003_v48, 8 }
  0xae   : > { %v1618_v16 = vand.u32 2139095040, %v3411_v53 }
  0xaf   : > { %vm386_vm1 = vcmp.gt.s32.totalorder %v385_v43, 0  ;;  %vm1006_vm2 = vcmp.gt.s32.totalorder %v1005_v44, 0  ;;  %v424_v1 = vand.u32 65535, %v3405_v47  ;;  %v425_v6 = vshrl.u32 %v3405_v47, 16 }
  0xb0   : > { %v387_v46 = vsel %vm386_vm1, %v385_v43, 0  ;;  %v1007_v50 = vsel %vm1006_vm2, %v1005_v44, 0  ;;  %v3463_v36 = vand.u32 65535, %v3419_v2 }
  0xb1   : > { %v389_v49 = vand.u32 31, %v387_v46  ;;  %v3407_v51 = vshrl.u32 %v387_v46, 5  ;;  %v3409_v52 = vand.u32 31, %v1007_v50  ;;  %v3469_v43 = vshrl.u32 %v1007_v50, 5 }
  0xb3   : > { %v390_v54 = vsub.s32 32, %v389_v49  ;;  %v392_v56 = vshll.u32 %v3239_v55, %v389_v49  ;;  %v395_v58 = vshll.u32 %v3240_v57, %v389_v49  ;;  %v398_v60 = vshll.u32 %v3241_v59, %v389_v49 }
  0xb4   : > { %v401_v62 = vshll.u32 %v3242_v61, %v389_v49  ;;  %v404_v0 = vshll.u32 %v3243_v63, %v389_v49  ;;  %vm407_vm3 = vcmp.lt.s32.totalorder %v3407_v51, 1  ;;  %vm410_vm4 = vcmp.lt.s32.totalorder %v3407_v51, 4 }
  0xb5   : > { %v393_v3 = vshrl.u32 %v3240_v57, %v390_v54  ;;  %v396_v4 = vshrl.u32 %v3241_v59, %v390_v54  ;;  %v399_v5 = vshrl.u32 %v3242_v61, %v390_v54  ;;  %v402_v7 = vshrl.u32 %v3243_v63, %v390_v54 }
  0xb6   : > { %v405_v9 = vshrl.u32 %v3244_v8, %v390_v54  ;;  %v3430_v13 = vsub.s32 32, %v3409_v52  ;;  %vm409_vm5 = vcmp.lt.s32.totalorder %v3407_v51, 3  ;;  %v391_v17 = vshrl.u32 %v3239_v55, %v390_v54 }
  0xb7   : > { %v394_v10 = vor.u32 %v393_v3, %v392_v56  ;;  %v397_v11 = vor.u32 %v396_v4, %v395_v58  ;;  %v400_v12 = vor.u32 %v399_v5, %v398_v60  ;;  %v403_v14 = vor.u32 %v402_v7, %v401_v62 }
  0xb8   : > { %v406_v15 = vor.u32 %v405_v9, %v404_v0  ;;  %vm408_vm6 = vcmp.lt.s32.totalorder %v3407_v51, 2  ;;  %v1012_v22 = vshll.u32 %v3239_v55, %v3409_v52  ;;  %v1015_v23 = vshll.u32 %v3240_v57, %v3409_v52 }
  0xb9   : > { %v415_v18 = vsel %vm407_vm3, %v394_v10, %v397_v11  ;;  %v419_v19 = vsel %vm407_vm3, %v397_v11, %v400_v12  ;;  %v416_v20 = vsel %vm410_vm4, %v403_v14, 920167782  ;;  %v412_v25 = vsel %vm410_vm4, %v400_v12, 2102212464 }
  0xba   : > { %v420_v21 = vsel %vm410_vm4, %v406_v15, 1326507024  ;;  %v417_v26 = vsel %vm409_vm5, %v400_v12, %v416_v20  ;;  %v1013_v28 = vshrl.u32 %v3240_v57, %v3430_v13  ;;  %v1016_v35 = vshrl.u32 %v3241_v59, %v3430_v13 }
  0xbb   : > { %v421_v27 = vsel %vm409_vm5, %v403_v14, %v420_v21  ;;  %v418_v32 = vsel %vm408_vm6, %v415_v18, %v417_v26  ;;  %v411_v41 = vsel %vm407_vm3, %v391_v17, %v394_v10  ;;  %v413_v42 = vsel %vm409_vm5, %v397_v11, %v412_v25 }
  0xbc   : > { %v422_v34 = vsel %vm408_vm6, %v419_v19, %v421_v27  ;;  %v448_v39 = vand.u32 65535, %v418_v32  ;;  %v449_v40 = vshrl.u32 %v418_v32, 16  ;;  %v3471_v44 = vor.u32 %v1013_v28, %v1012_v22 }
  0xbd   : > { %v426_v37 = vand.u32 65535, %v422_v34  ;;  %v427_v38 = vshrl.u32 %v422_v34, 16  ;;  %v3473_v48 = vor.u32 %v1016_v35, %v1015_v23  ;;  %v1018_v49 = vshll.u32 %v3241_v59, %v3409_v52 }
  0xbe   : > { %v451_v56 = vmul.u32 %v449_v40, %v424_v1  ;;  %v452_v58 = vmul.u32 %v448_v39, %v425_v6  ;;  %v1019_v60 = vshrl.u32 %v3242_v61, %v3430_v13  ;;  %v450_v3 = vmul.u32 %v448_v39, %v424_v1 }
  0xbf   : > { %v429_v45 = vmul.u32 %v427_v38, %v424_v1  ;;  %v430_v46 = vmul.u32 %v426_v37, %v425_v6  ;;  %v428_v54 = vmul.u32 %v426_v37, %v424_v1  ;;  %v431_v62 = vmul.u32 %v427_v38, %v425_v6 }
  0xc0   : > { %v453_v50 = vmul.u32 %v449_v40, %v425_v6  ;;  %v454_v9 = vshll.u32 %v451_v56, 16  ;;  %v456_v11 = vshll.u32 %v452_v58, 16  ;;  %v1021_v12 = vshll.u32 %v3242_v61, %v3409_v52 }
  0xc1   : > { %v432_v0 = vshll.u32 %v429_v45, 16  ;;  %v433_v4 = vshrl.u32 %v429_v45, 16  ;;  %v434_v5 = vshll.u32 %v430_v46, 16  ;;  %v435_v7 = vshrl.u32 %v430_v46, 16 }
  0xc2   : > { %v3245_v14 = vmov 0   ;;  %vm458_vm8 = vc.u32 %v450_v3, %v454_v9  ;;  %v460_v17 = vadd.s32 %v454_v9, %v450_v3  ;;  %v1022_v18 = vshrl.u32 %v3243_v63, %v3430_v13 }
  0xc3   : > { %vm436_vm7 = vc.u32 %v428_v54, %v432_v0  ;;  %v438_v10 = vadd.s32 %v432_v0, %v428_v54  ;;  %v459_v6 = vsel %vm458_vm8, 1, %v3245_v14  ;;  %v1024_v19 = vshll.u32 %v3243_v63, %v3409_v52 }
  0xc4   : > { %v437_v15 = vsel %vm436_vm7, 1, %v3245_v14  ;;  %v461_v21 = vadd.s32 %v459_v6, %v453_v50  ;;  %vm462_vm10 = vc.u32 %v460_v17, %v456_v11  ;;  %v1020_v22 = vor.u32 %v1019_v60, %v1018_v49 }
  0xc5   : > { %v439_v1 = vadd.s32 %v437_v15, %v431_v62  ;;  %vm440_vm9 = vc.u32 %v438_v10, %v434_v5  ;;  %v463_v25 = vsel %vm462_vm10, 1, %v3245_v14  ;;  %v1023_v26 = vor.u32 %v1022_v18, %v1021_v12 }
  0xc6   : > { %v441_v20 = vsel %vm440_vm9, 1, %v3245_v14  ;;  %v1025_v27 = vshrl.u32 %v3244_v8, %v3430_v13  ;;  %v455_v28 = vshrl.u32 %v451_v56, 16  ;;  %v465_v32 = vadd.s32 %v463_v25, %v461_v21 }
  0xc7   : > { %v443_v23 = vadd.s32 %v441_v20, %v439_v1  ;;  %vm1027_vm11 = vcmp.lt.s32.totalorder %v3469_v43, 1  ;;  %vm1029_vm12 = vcmp.lt.s32.totalorder %v3469_v43, 3  ;;  %v457_v52 = vshrl.u32 %v452_v58, 16 }
  0xc8   : > { %v1026_v35 = vor.u32 %v1025_v27, %v1024_v19  ;;  %vm1030_vm13 = vcmp.lt.s32.totalorder %v3469_v43, 4  ;;  %v3494_v37 = vadd.s32 %v460_v17, %v456_v11  ;;  %v466_v38 = vadd.s32 %v465_v32, %v455_v28 }
  0xc9   : > { %v444_v34 = vadd.s32 %v443_v23, %v433_v4  ;;  %v1035_v39 = vsel %vm1027_vm11, %v3471_v44, %v3473_v48  ;;  %v1036_v40 = vsel %vm1030_vm13, %v1023_v26, 920167782  ;;  %vm1028_vm14 = vcmp.lt.s32.totalorder %v3469_v43, 2 }
  0xca   : > { %v1037_v46 = vsel %vm1029_vm12, %v1020_v22, %v1036_v40  ;;  %v1039_v49 = vsel %vm1027_vm11, %v3473_v48, %v1020_v22  ;;  %v414_v54 = vsel %vm408_vm6, %v411_v41, %v413_v42  ;;  %v467_v56 = vadd.s32 %v466_v38, %v457_v52 }
  0xcb   : > { %v3502_v45 = vadd.s32 %v444_v34, %v435_v7  ;;  %v1038_v58 = vsel %vm1028_vm14, %v1035_v39, %v1037_v46  ;;  %v1040_v60 = vsel %vm1030_vm13, %v1026_v35, 1326507024  ;;  %v1045_v0 = vshrl.u32 %v3419_v2, 16 }
  0xcc   : > { %v1041_v62 = vsel %vm1029_vm12, %v1023_v26, %v1040_v60  ;;  %v1068_v3 = vand.u32 65535, %v1038_v58  ;;  %v471_v50 = vadd.s32 1, %v467_v56  ;;  %v1069_v41 = vshrl.u32 %v1038_v58, 16 }
  0xcd   : > { %vm470_vm15 = vc.u32 %v3502_v45, %v3494_v37  ;;  %v1042_v51 = vsel %vm1028_vm14, %v1039_v49, %v1041_v62  ;;  %v1619_v42 = vshrl.u32 %v1618_v16, 23  ;;  %v468_v4 = vmul.u32 %v3405_v47, %v414_v54 }
  0xce   : > { %v1046_v5 = vand.u32 65535, %v1042_v51  ;;  %v1047_v7 = vshrl.u32 %v1042_v51, 16  ;;  %v1615_v9 = vand.u32 2147483647, %v3411_v53  ;;  %v472_v10 = vsel %vm470_vm15, %v471_v50, %v467_v56 }
  0xcf   : > { %v1011_v11 = vshrl.u32 %v3239_v55, %v3430_v13  ;;  %v1071_v12 = vmul.u32 %v1069_v41, %v3463_v36  ;;  %v1072_v15 = vmul.u32 %v1068_v3, %v1045_v0  ;;  %v473_v17 = vadd.s32 %v472_v10, %v468_v4 }
  0xd0   : > { %v1032_v18 = vsel %vm1030_vm13, %v1020_v22, 2102212464  ;;  %v1049_v1 = vmul.u32 %v1047_v7, %v3463_v36  ;;  %v1050_v16 = vmul.u32 %v1046_v5, %v1045_v0  ;;  %v1070_v47 = vmul.u32 %v1068_v3, %v3463_v36 }
  0xd1   : > { %v1073_v6 = vmul.u32 %v1069_v41, %v1045_v0  ;;  %v1074_v19 = vshll.u32 %v1071_v12, 16  ;;  %v3037_v20 = vadd.s32 4294967169, %v1619_v42  ;;  %v474_v21 = vadd.s32 536870912, %v473_v17 }
  0xd2   : > { %v1048_v23 = vmul.u32 %v1046_v5, %v3463_v36  ;;  %v1051_v25 = vmul.u32 %v1047_v7, %v1045_v0  ;;  %v1052_v13 = vshll.u32 %v1049_v1, 16  ;;  %v1054_v26 = vshll.u32 %v1050_v16, 16 }
  0xd3   : > { %v1076_v27 = vshll.u32 %v1072_v15, 16  ;;  %vm1078_vm0 = vc.u32 %v1070_v47, %v1074_v19  ;;  %v1080_v28 = vadd.s32 %v1074_v19, %v1070_v47  ;;  %v475_v32 = vshrl.u32 %v474_v21, 30 }
  0xd4   : > { %vm1056_vm1 = vc.u32 %v1048_v23, %v1052_v13  ;;  %v1058_v22 = vadd.s32 %v1052_v13, %v1048_v23  ;;  %v1079_v34 = vsel %vm1078_vm0, 1, %v3245_v14  ;;  %v1622_v38 = vand.u32 8388607, %v1615_v9 }
  0xd5   : > { %v1057_v52 = vsel %vm1056_vm1, 1, %v3245_v14  ;;  %v1081_v35 = vadd.s32 %v1079_v34, %v1073_v6  ;;  %vm1082_vm2 = vc.u32 %v1080_v28, %v1076_v27  ;;  %v476_v39 = vshll.u32 %v475_v32, 30 }
  0xd6   : > { %v1031_v36 = vsel %vm1027_vm11, %v1011_v11, %v3471_v44  ;;  %v1059_v40 = vadd.s32 %v1057_v52, %v1051_v25  ;;  %vm1060_vm3 = vc.u32 %v1058_v22, %v1054_v26  ;;  %v1033_v46 = vsel %vm1029_vm12, %v3473_v48, %v1032_v18 }
  0xd7   : > { %v1061_v49 = vsel %vm1060_vm3, 1, %v3245_v14  ;;  %v1083_v54 = vsel %vm1082_vm2, 1, %v3245_v14  ;;  %v1625_v56 = vadd.s32 1, %v3037_v20  ;;  %v477_v58 = vsub.s32 %v473_v17, %v476_v39 }
  0xd8   : > { %v1053_v60 = vshrl.u32 %v1049_v1, 16  ;;  %v1063_v62 = vadd.s32 %v1061_v49, %v1059_v40  ;;  %v1085_v0 = vadd.s32 %v1083_v54, %v1081_v35  ;;  %vm377_vm4 = vcmp.lt.s32.totalorder %v3392_v29, 0 }
  0xd9   : > { %v499_v3 = vsub.s32 4, %v475_v32  ;;  %v1075_v50 = vshrl.u32 %v1071_v12, 16  ;;  %vm1626_vm5 = vcmp.gt.s32.totalorder %v1625_v56, 0  ;;  %vm478_vm6 = vcmp.lt.s32.totalorder %v477_v58, 0 }
  0xda   : > { %v479_v44 = vsub.s32 0, %v477_v58  ;;  %v1055_v51 = vshrl.u32 %v1050_v16, 16  ;;  %v1064_v41 = vadd.s32 %v1063_v62, %v1053_v60  ;;  %v1034_v48 = vsel %vm1028_vm14, %v1031_v36, %v1033_v46 }
  0xdb   : > { %v1077_v42 = vshrl.u32 %v1072_v15, 16  ;;  %v1086_v4 = vadd.s32 %v1085_v0, %v1075_v50  ;;  %v1627_v5 = vsel %vm1626_vm5, %v1625_v56, 0  ;;  %v3552_v11 = vadd.s32 %v1080_v28, %v1076_v27 }
  0xdc   : > { %v480_v7 = vsel %vm478_vm6, %v479_v44, %v477_v58  ;;  %v3550_v10 = vadd.s32 %v1064_v41, %v1055_v51  ;;  %v1623_v17 = vor.u32 8388608, %v1622_v38  ;;  %v500_v12 = vsel %vm377_vm4, %v499_v3, %v475_v32 }
  0xdd   : > { %v481_v18 = vclz %v480_v7  ;;  %v1087_v1 = vadd.s32 %v1086_v4, %v1077_v42  ;;  %v1629_v47 = vand.u32 31, %v1627_v5  ;;  %vm3558_vm7 = vcmp.le.f32.partialorder %v375_v31, 0.7853982 }
  0xde   : > { %v469_v15 = vadd.s32 %v3494_v37, %v3502_v45  ;;  %v1088_v16 = vmul.u32 %v3419_v2, %v1034_v48  ;;  %vm1090_vm8 = vc.u32 %v3550_v10, %v3552_v11  ;;  %v502_v21 = vsel %vm3558_vm7, 0, %v500_v12 }
  0xdf   : > { %v3014_v6 = vadd.s32 4294967294, %v481_v18  ;;  %v1091_v19 = vadd.s32 1, %v1087_v1  ;;  %v1630_v20 = vsub.s32 32, %v1629_v47  ;;  %v3569_v23 = vshrl.u32 %v1627_v5, 5 }
  0xe0   : > { %v1632_v31 = vshll.u32 %v3239_v55, %v1629_v47  ;;  %v3572_v25 = vshll.u32 %v1623_v17, 8  ;;  %v1635_v2 = vshll.u32 %v3240_v57, %v1629_v47  ;;  %v1638_v28 = vshll.u32 %v3241_v59, %v1629_v47 }
  0xe1   : > { %vm3015_vm9 = vcmp.lt.s32.totalorder %v3014_v6, 0  ;;  %v1092_v13 = vsel %vm1090_vm8, %v1091_v19, %v1087_v1  ;;  %v1633_v37 = vshrl.u32 %v3240_v57, %v1630_v20  ;;  %v1636_v27 = vshrl.u32 %v3241_v59, %v1630_v20 }
  0xe2   : > { %v484_v45 = vsel %vm3015_vm9, 0, %v3014_v6  ;;  %v1093_v26 = vadd.s32 %v1092_v13, %v1088_v16  ;;  %v1639_v34 = vshrl.u32 %v3242_v61, %v1630_v20  ;;  %v1641_v52 = vshll.u32 %v3242_v61, %v1629_v47  ;;  %v347_v13 = vpop.f32.mrf.mxu3 }
  0xe3   : > { %v485_v32 = vsub.s32 32, %v484_v45  ;;  %v489_v22 = vsub.s32 4294967266, %v484_v45  ;;  %v486_v35 = vshll.u32 %v477_v58, %v484_v45  ;;  %v1634_v39 = vor.u32 %v1633_v37, %v1632_v31 }
  0xe4   : > { %v1094_v38 = vadd.s32 536870912, %v1093_v26  ;;  %v1642_v36 = vshrl.u32 %v3243_v63, %v1630_v20  ;;  %v1637_v49 = vor.u32 %v1636_v27, %v1635_v2  ;;  %v1645_v54 = vshrl.u32 %v3244_v8, %v1630_v20 }
  0xe5   : > { %v487_v40 = vshrl.u32 %v469_v15, %v485_v32  ;;  %v490_v46 = vadd.s32 127, %v489_v22  ;;  %v519_v56 = vadd.s32 3, %v502_v21  ;;  %v1640_v50 = vor.u32 %v1639_v34, %v1638_v28 }
  0xe6   : > { %v1095_v60 = vshrl.u32 %v1094_v38, 30  ;;  %v1643_v62 = vor.u32 %v1642_v36, %v1641_v52  ;;  %v1644_v44 = vshll.u32 %v3243_v63, %v1629_v47  ;;  %vm997_vm10 = vcmp.lt.s32.totalorder %v3394_v30, 0 }
  0xe7   : > { %v488_v0 = vor.u32 %v487_v40, %v486_v35  ;;  %v491_v3 = vshll.u32 %v490_v46, 23  ;;  %vm1647_vm11 = vcmp.lt.s32.totalorder %v3569_v23, 1  ;;  %v1664_v51 = vand.u32 65535, %v3572_v25 }
  0xe8   : > { %v1096_v58 = vshll.u32 %v1095_v60, 30  ;;  %v1665_v41 = vshrl.u32 %v3572_v25, 16  ;;  %v1646_v42 = vor.u32 %v1645_v54, %v1644_v44  ;;  %vm1650_vm12 = vcmp.lt.s32.totalorder %v3569_v23, 4 }
  0xe9   : > { %v492_v48 = vor.u32 4788187, %v491_v3  ;;  %v1655_v4 = vsel %vm1647_vm11, %v1634_v39, %v1637_v49  ;;  %v3590_v5 = vand.u32 3, %v519_v56  ;;  %vm1649_vm13 = vcmp.lt.s32.totalorder %v3569_v23, 3 }
  0xea   : > { %v3592_v7 = vsub.s32 %v1093_v26, %v1096_v58  ;;  %v1656_v17 = vsel %vm1650_vm12, %v1643_v62, 920167782  ;;  %v495_v12 = vcvt.s32.f32 %v488_v0  ;;  %vm1648_vm14 = vcmp.lt.s32.totalorder %v3569_v23, 2 }
  0xeb   : > { %v493_v18 = vand.u32 2147483647, %v492_v48  ;;  %v1657_v1 = vsel %vm1649_vm13, %v1640_v50, %v1656_v17  ;;  %v1631_v15 = vshrl.u32 %v3239_v55, %v1630_v20  ;;  %v1119_v19 = vsub.s32 4, %v1095_v60 }
  0xec   : > { %vm1098_vm15 = vcmp.lt.s32.totalorder %v3592_v7, 0  ;;  %v1099_v47 = vsub.s32 0, %v3592_v7  ;;  %v1658_v16 = vsel %vm1648_vm14, %v1655_v4, %v1657_v1  ;;  %v1659_v21 = vsel %vm1647_vm11, %v1637_v49, %v1640_v50 }
  0xed   : > { %v496_v6 = vmul.f32 %v495_v12, %v493_v18  ;;  %v1660_v31 = vsel %vm1650_vm12, %v1646_v42, 1326507024  ;;  %v1652_v2 = vsel %vm1650_vm12, %v1640_v50, 2102212464  ;;  %v1688_v45 = vand.u32 65535, %v1658_v16 }
  0xee   : > { %v1100_v37 = vsel %vm1098_vm15, %v1099_v47, %v3592_v7  ;;  %v1661_v20 = vsel %vm1649_vm13, %v1643_v62, %v1660_v31  ;;  %v1689_v32 = vshrl.u32 %v1658_v16, 16  ;;  %v1089_v22 = vadd.s32 %v3552_v11, %v3550_v10 }
  0xef   : > { %v497_v26 = vxor.u32 2147483648, %v496_v6  ;;  %v1101_v27 = vclz %v1100_v37  ;;  %v1662_v28 = vsel %vm1648_vm14, %v1659_v21, %v1661_v20  ;;  %v3620_v34 = vsel %vm1647_vm11, %v1631_v15, %v1634_v39 }
  0xf0   : > { %v1666_v52 = vand.u32 65535, %v1662_v28  ;;  %v3623_v35 = vadd.f32 %v3388_v24, %v347_v13  ;;  %v3629_v40 = vsel %vm997_vm10, %v1119_v19, %v1095_v60  ;;  %v1667_v46 = vshrl.u32 %v1662_v28, 16 }
  0xf1   : > { %v498_v38 = vsel %vm377_vm4, %v497_v26, %v496_v6  ;;  %v3026_v36 = vadd.s32 4294967294, %v1101_v27  ;;  %v3638_v11 = vsel %vm1649_vm13, %v1637_v49, %v1652_v2  ;;  %v1690_v54 = vmul.u32 %v1688_v45, %v1664_v51 }
  0xf2   : > { %v3634_v10 = vsel %vm3558_vm7, %v3392_v29, %v498_v38  ;;  %v1670_v39 = vmul.u32 %v1666_v52, %v1665_v41  ;;  %v1669_v62 = vmul.u32 %v1667_v46, %v1664_v51  ;;  %v3642_v0 = vmul.u32 %v1689_v32, %v1664_v51 }
  0xf3   : > { %v503_v56 = vmul.f32 %v3634_v10, %v3634_v10  ;;  %vm3027_vm0 = vcmp.lt.s32.totalorder %v3026_v36, 0  ;;  %v1668_v3 = vmul.u32 %v1666_v52, %v1664_v51  ;;  %v1671_v50 = vmul.u32 %v1667_v46, %v1665_v41 }
  0xf4   : > { %v1104_v60 = vsel %vm3027_vm0, 0, %v3026_v36  ;;  %v3644_v44 = vmul.u32 %v1688_v45, %v1665_v41  ;;  %v1674_v42 = vshll.u32 %v1670_v39, 16  ;;  %v1672_v4 = vshll.u32 %v1669_v62, 16 }
  0xf5   : > { %v504_v43 = vmul.f32 -0.001358992, %v503_v56  ;;  %v511_v58 = vmul.f32 -0.00019511016, %v503_v56  ;;  %v1105_v48 = vsub.s32 32, %v1104_v60  ;;  %v1109_v49 = vsub.s32 4294967266, %v1104_v60 }
  0xf6   : > { %v1675_v17 = vshrl.u32 %v1670_v39, 16  ;;  %v1693_v18 = vmul.u32 %v1689_v32, %v1665_v41  ;;  %v1106_v47 = vshll.u32 %v3592_v7, %v1104_v60  ;;  %vm3649_vm1 = vcmp.le.f32.partialorder %v995_v33, 0.7853982 }
  0xf7   : > { %v505_v12 = vadd.f32 0.041655596, %v504_v43  ;;  %v512_v1 = vadd.f32 0.008332121, %v511_v58  ;;  %v1107_v15 = vshrl.u32 %v1089_v22, %v1105_v48  ;;  %v1110_v16 = vadd.s32 127, %v1109_v49 }
  0xf8   : > { %vm1676_vm2 = vc.u32 %v1668_v3, %v1672_v4  ;;  %v1678_v6 = vadd.s32 %v1672_v4, %v1668_v3  ;;  %v1694_v19 = vshll.u32 %v3642_v0, 16  ;;  %v1673_v2 = vshrl.u32 %v1669_v62, 16 }
  0xf9   : > { %v506_v21 = vmul.f32 %v505_v12, %v503_v56  ;;  %v513_v31 = vmul.f32 %v512_v1, %v503_v56  ;;  %v1108_v13 = vor.u32 %v1107_v15, %v1106_v47  ;;  %v1677_v41 = vsel %vm1676_vm2, 1, %v3245_v14 }
  0xfa   : > { %v1111_v37 = vshll.u32 %v1110_v16, 23  ;;  %v1679_v7 = vadd.s32 %v1677_v41, %v1671_v50  ;;  %vm1680_vm3 = vc.u32 %v1678_v6, %v1674_v42  ;;  %v1696_v26 = vshll.u32 %v3644_v44, 16  ;;  %v314_v42 = vpop.f32.mrf.mxu0 }
  0xfb   : > { %v507_v20 = vadd.f32 -0.4999988, %v506_v21  ;;  %v514_v45 = vadd.f32 -0.16666654, %v513_v31  ;;  %v1681_v33 = vsel %vm1680_vm3, 1, %v3245_v14  ;;  %vm522_vm4 = vcmp.eq.s32.totalorder %v3590_v5, 0 }
  0xfc   : > { %v1112_v27 = vor.u32 4788187, %v1111_v37  ;;  %v1683_v28 = vadd.s32 %v1681_v33, %v1679_v7  ;;  %vm1698_vm5 = vc.u32 %v1690_v54, %v1694_v19  ;;  %v1700_v32 = vadd.s32 %v1694_v19, %v1690_v54 }
  0xfd   : > { %v508_v22 = vmul.f32 %v507_v20, %v503_v56  ;;  %v515_v52 = vmul.f32 %v514_v45, %v503_v56  ;;  %vm521_vm6 = vcmp.lt.s32.totalorder %v3590_v5, 2  ;;  %v1115_v38 = vcvt.s32.f32 %v1108_v13 }
  0xfe   : > { %v1699_v36 = vsel %vm1698_vm5, 1, %v3245_v14  ;;  %vm518_vm7 = vweird.f32 %v3392_v29  ;;  %v1113_v46 = vand.u32 2147483647, %v1112_v27  ;;  %v1684_v39 = vadd.s32 %v1683_v28, %v1673_v2 }
  0xff   : > { %v1701_v62 = vadd.s32 %v1699_v36, %v1693_v18  ;;  %vm1702_vm8 = vc.u32 %v1700_v32, %v1696_v26  ;;  %v509_v60 = vadd.f32 1.0, %v508_v22  ;;  %v516_v3 = vadd.f32 1.0, %v515_v52 }
 0x100   : > { %v1695_v50 = vshrl.u32 %v3642_v0, 16  ;;  %v1703_v54 = vsel %vm1702_vm8, 1, %v3245_v14  ;;  %v1116_v56 = vmul.f32 %v1115_v38, %v1113_v46  ;;  %v3664_v43 = vadd.s32 %v1684_v39, %v1675_v17 }
 0x101   : > { %v1705_v58 = vadd.s32 %v1703_v54, %v1701_v62  ;;  %v3667_v48 = vmul.f32 30.0, %v3623_v35  ;;  %v517_v49 = vmul.f32 %v516_v3, %v3634_v10  ;;  %vm525_vm9 = vcmp.eq.s32.totalorder %v3590_v5, 2 }
 0x102   : > { %v526_v4 = vxor.u32 2147483648, %v509_v60  ;;  %v1122_v18 = vsel %vm3649_vm1, 0, %v3629_v40  ;;  %v1117_v0 = vxor.u32 2147483648, %v1116_v56  ;;  %v1697_v17 = vshrl.u32 %v3644_v44, 16 }
 0x103   : > { %v1704_v12 = vadd.s32 %v1700_v32, %v1696_v26  ;;  %v1706_v1 = vadd.s32 %v1705_v58, %v1695_v50  ;;  %v523_v47 = vxor.u32 2147483648, %v517_v49  ;;  %v1654_v35 = vsel %vm1648_vm14, %v3620_v34, %v3638_v11 }
 0x104   : > { %v2235_v10 = vand.u32 2147483647, %v3667_v48  ;;  %v315_v15 = vadd.f32 %v3388_v24, %v314_v42  ;;  %v1118_v40 = vsel %vm997_vm10, %v1117_v0, %v1116_v56  ;;  %v2238_v44 = vand.u32 2139095040, %v3667_v48 }
 0x105   : > { %v1707_v16 = vadd.s32 %v1706_v1, %v1697_v17  ;;  %vm1710_vm11 = vc.u32 %v3664_v43, %v1704_v12  ;;  %v524_v6 = vsel %vm522_vm4, %v509_v60, %v523_v47  ;;  %v527_v19 = vsel %vm525_vm9, %v526_v4, %v517_v49 }
 0x106   : > { %v1121_v23 = vsel %vm3649_vm1, %v3394_v30, %v1118_v40  ;;  %v2242_v24 = vand.u32 8388607, %v2235_v10  ;;  %v528_v34 = vsel %vm521_vm6, %v524_v6, %v527_v19  ;;  %v2239_v31 = vshrl.u32 %v2238_v44, 23 }
 0x107   : > { %v1123_v11 = vmul.f32 %v1121_v23, %v1121_v23  ;;  %v1711_v21 = vadd.s32 1, %v1707_v16  ;;  %v529_v13 = vsel %vm518_vm7, nan, %v528_v34  ;;  %v1139_v41 = vadd.s32 3, %v1122_v18 }
 0x108   : > { %v1708_v37 = vmul.u32 %v3572_v25, %v1654_v35  ;;  %2855 = vst [vmem:[%s3701_s7] sm:$0xff] %v529_v13  ;;  %v3049_v5 = vadd.s32 4294967169, %v2239_v31  ;;  %v3706_v45 = vmul.f32 30.0, %v315_v15  ;;  %v2243_v29 = vor.u32 8388608, %v2242_v24 }
 0x109   : > { %v1124_v51 = vmul.f32 -0.001358992, %v1123_v11  ;;  %v1131_v2 = vmul.f32 -0.00019511016, %v1123_v11  ;;  %v1712_v7 = vsel %vm1710_vm11, %v1711_v21, %v1707_v16  ;;  %v1140_v22 = vand.u32 3, %v1139_v41 }
 0x10a   : > { %v1713_v20 = vadd.s32 %v1712_v7, %v1708_v37  ;;  %v2245_v27 = vadd.s32 1, %v3049_v5  ;;  %v533_v36 = vand.u32 2139095040, %v3706_v45  ;;  %v3709_v60 = vshll.u32 %v2243_v29, 8 }
 0x10b   : > { %v1125_v33 = vadd.f32 0.041655596, %v1124_v51  ;;  %v1132_v26 = vadd.f32 0.008332121, %v1131_v2  ;;  %vm1617_vm12 = vcmp.lt.s32.totalorder %v3411_v53, 0  ;;  %vm1141_vm13 = vcmp.lt.s32.totalorder %v1140_v22, 2 }
 0x10c   : > { %v1714_v28 = vadd.s32 536870912, %v1713_v20  ;;  %vm2246_vm10 = vcmp.gt.s32.totalorder %v2245_v27, 0  ;;  %v530_v50 = vand.u32 2147483647, %v3706_v45  ;;  %vm1142_vm14 = vcmp.eq.s32.totalorder %v1140_v22, 0 }
 0x10d   : > { %v1126_v32 = vmul.f32 %v1125_v33, %v1123_v11  ;;  %v1133_v25 = vmul.f32 %v1132_v26, %v1123_v11  ;;  %v2247_v38 = vsel %vm2246_vm10, %v2245_v27, 0  ;;  %vm1138_vm15 = vweird.f32 %v3394_v30 }
 0x10e   : > { %v1715_v52 = vshrl.u32 %v1714_v28, 30  ;;  %v2249_v62 = vand.u32 31, %v2247_v38  ;;  %vm1145_vm0 = vcmp.eq.s32.totalorder %v1140_v22, 2  ;;  %v1709_v42 = vadd.s32 %v1704_v12, %v3664_v43 }
 0x10f   : > { %v1127_v46 = vadd.f32 -0.4999988, %v1126_v32  ;;  %v1134_v39 = vadd.f32 -0.16666654, %v1133_v25  ;;  %v534_v4 = vshrl.u32 %v533_v36, 23  ;;  %v3716_v1 = vand.u32 65535, %v3709_v60 }
 0x110   : > { %v1716_v3 = vshll.u32 %v1715_v52, 30  ;;  %v2250_v58 = vsub.s32 32, %v2249_v62  ;;  %v1739_v17 = vsub.s32 4, %v1715_v52  ;;  %v3721_v15 = vand.u32 8388607, %v530_v50 }
 0x111   : > { %v1128_v54 = vmul.f32 %v1127_v46, %v1123_v11  ;;  %v1135_v56 = vmul.f32 %v1134_v39, %v1123_v11  ;;  %v3723_v44 = vshrl.u32 %v2247_v38, 5  ;;  %v2252_v6 = vshll.u32 %v3239_v55, %v2249_v62 }
 0x112   : > { %v1717_v49 = vsub.s32 %v1713_v20, %v1716_v3  ;;  %v2253_v35 = vshrl.u32 %v3240_v57, %v2250_v58  ;;  %v2259_v43 = vshrl.u32 %v3242_v61, %v2250_v58  ;;  %v2256_v19 = vshrl.u32 %v3241_v59, %v2250_v58 }
 0x113   : > { %v1129_v18 = vadd.f32 1.0, %v1128_v54  ;;  %v1136_v0 = vadd.f32 1.0, %v1135_v56  ;;  %v3016_v24 = vadd.s32 4294967169, %v534_v4  ;;  %v3730_v21 = vsel %vm1617_vm12, %v1739_v17, %v1715_v52 }
 0x114   : > { %vm1718_vm1 = vcmp.lt.s32.totalorder %v1717_v49, 0  ;;  %v1719_v47 = vsub.s32 0, %v1717_v49  ;;  %v2258_v31 = vshll.u32 %v3241_v59, %v2249_v62  ;;  %v2254_v13 = vor.u32 %v2253_v35, %v2252_v6 }
 0x115   : > { %v1137_v40 = vmul.f32 %v1136_v0, %v1121_v23  ;;  %v1146_v16 = vxor.u32 2147483648, %v1129_v18  ;;  %v2255_v41 = vshll.u32 %v3240_v57, %v2249_v62  ;;  %v2261_v37 = vshll.u32 %v3242_v61, %v2249_v62 }
 0x116   : > { %v1720_v12 = vsel %vm1718_vm1, %v1719_v47, %v1717_v49  ;;  %v2260_v7 = vor.u32 %v2259_v43, %v2258_v31  ;;  %v2262_v5 = vshrl.u32 %v3243_v63, %v2250_v58  ;;  %v2264_v26 = vshll.u32 %v3243_v63, %v2249_v62 }
 0x117   : > { %v1143_v34 = vxor.u32 2147483648, %v1137_v40  ;;  %v1721_v11 = vclz %v1720_v12  ;;  %v1147_v23 = vsel %vm1145_vm0, %v1146_v16, %v1137_v40  ;;  %v2257_v33 = vor.u32 %v2256_v19, %v2255_v41 }
 0x118   : > { %v2265_v29 = vshrl.u32 %v3244_v8, %v2250_v58  ;;  %vm3745_vm2 = vcmp.le.f32.partialorder %v1615_v9, 0.7853982  ;;  %v2251_v32 = vshrl.u32 %v3239_v55, %v2250_v58  ;;  %v2263_v25 = vor.u32 %v2262_v5, %v2261_v37 }
 0x119   : > { %v1144_v51 = vsel %vm1142_vm14, %v1129_v18, %v1143_v34  ;;  %v3038_v2 = vadd.s32 4294967294, %v1721_v11  ;;  %vm2267_vm4 = vcmp.lt.s32.totalorder %v3723_v44, 1  ;;  %vm2270_vm5 = vcmp.lt.s32.totalorder %v3723_v44, 4 }
 0x11a   : > { %v1148_v20 = vsel %vm1141_vm13, %v1144_v51, %v1147_v23  ;;  %v2266_v52 = vor.u32 %v2265_v29, %v2264_v26  ;;  %vm2268_vm6 = vcmp.lt.s32.totalorder %v3723_v44, 2  ;;  %v2272_v9 = vsel %vm2270_vm5, %v2260_v7, 2102212464 }
 0x11b   : > { %v1149_v27 = vsel %vm1138_vm15, nan, %v1148_v20  ;;  %vm3039_vm3 = vcmp.lt.s32.totalorder %v3038_v2, 0  ;;  %vm2269_vm7 = vcmp.lt.s32.totalorder %v3723_v44, 3  ;;  %v2275_v46 = vsel %vm2267_vm4, %v2254_v13, %v2257_v33 }
 0x11c   : > { %2859 = vst [vmem:[%s3701_s7 + $0x20] sm:$0xff] %v1149_v27  ;;  %v1724_v22 = vsel %vm3039_vm3, 0, %v3038_v2  ;;  %v2276_v39 = vsel %vm2270_vm5, %v2263_v25, 920167782  ;;  %v2279_v56 = vsel %vm2267_vm4, %v2257_v33, %v2260_v7  ;;  %v2271_v58 = vsel %vm2267_vm4, %v2251_v32, %v2254_v13 }
 0x11d   : > { %v1725_v38 = vsub.s32 32, %v1724_v22  ;;  %v1729_v30 = vsub.s32 4294967266, %v1724_v22  ;;  %v1726_v36 = vshll.u32 %v1717_v49, %v1724_v22  ;;  %v2277_v54 = vsel %vm2269_vm7, %v2260_v7, %v2276_v39 }
 0x11e   : > { %v2273_v4 = vsel %vm2269_vm7, %v2257_v33, %v2272_v9  ;;  %v2278_v18 = vsel %vm2268_vm6, %v2275_v46, %v2277_v54  ;;  %v2280_v0 = vsel %vm2270_vm5, %v2266_v52, 1326507024  ;;  %v540_v43 = vadd.s32 1, %v3016_v24 }
 0x11f   : > { %v1727_v62 = vshrl.u32 %v1709_v42, %v1725_v38  ;;  %v1730_v3 = vadd.s32 127, %v1729_v30  ;;  %v2281_v47 = vsel %vm2269_vm7, %v2263_v25, %v2280_v0  ;;  %v2308_v35 = vand.u32 65535, %v2278_v18 }
 0x120   : > { %v2282_v40 = vsel %vm2268_vm6, %v2279_v56, %v2281_v47  ;;  %v2285_v42 = vshrl.u32 %v3709_v60, 16  ;;  %v2309_v16 = vshrl.u32 %v2278_v18, 16  ;;  %v538_v34 = vor.u32 8388608, %v3721_v15 }
 0x121   : > { %v1728_v17 = vor.u32 %v1727_v62, %v1726_v36  ;;  %v1731_v49 = vshll.u32 %v1730_v3, 23  ;;  %v2286_v6 = vand.u32 65535, %v2282_v40  ;;  %v2287_v19 = vshrl.u32 %v2282_v40, 16 }
 0x122   : > { %v1742_v11 = vsel %vm3745_vm2, 0, %v3730_v21  ;;  %v3772_v31 = vsel %vm2268_vm6, %v2271_v58, %v2273_v4  ;;  %v2311_v23 = vmul.u32 %v2309_v16, %v3716_v1  ;;  %v2312_v13 = vmul.u32 %v2308_v35, %v2285_v42 }
 0x123   : > { %v1732_v12 = vor.u32 4788187, %v1731_v49  ;;  %v1735_v37 = vcvt.s32.f32 %v1728_v17  ;;  %v2289_v24 = vmul.u32 %v2287_v19, %v3716_v1  ;;  %v2290_v51 = vmul.u32 %v2286_v6, %v2285_v42 }
 0x124   : > { %v2310_v2 = vmul.u32 %v2308_v35, %v3716_v1  ;;  %v2313_v7 = vmul.u32 %v2309_v16, %v2285_v42  ;;  %v2314_v5 = vshll.u32 %v2311_v23, 16  ;;  %vm541_vm8 = vcmp.gt.s32.totalorder %v540_v43, 0 }
 0x125   : > { %v1733_v41 = vand.u32 2147483647, %v1732_v12  ;;  %v2288_v21 = vmul.u32 %v2286_v6, %v3716_v1  ;;  %v2291_v33 = vmul.u32 %v2287_v19, %v2285_v42  ;;  %v2292_v44 = vshll.u32 %v2289_v24, 16 }
 0x126   : > { %v2294_v26 = vshll.u32 %v2290_v51, 16  ;;  %v2316_v29 = vshll.u32 %v2312_v13, 16  ;;  %vm2318_vm9 = vc.u32 %v2310_v2, %v2314_v5  ;;  %v2320_v27 = vadd.s32 %v2314_v5, %v2310_v2 }
 0x127   : > { %v1736_v20 = vmul.f32 %v1735_v37, %v1733_v41  ;;  %vm2296_vm11 = vc.u32 %v2288_v21, %v2292_v44  ;;  %v2298_v25 = vadd.s32 %v2292_v44, %v2288_v21  ;;  %v2319_v22 = vsel %vm2318_vm9, 1, %v3245_v14 }
 0x128   : > { %v2297_v52 = vsel %vm2296_vm11, 1, %v3245_v14  ;;  %v2315_v38 = vshrl.u32 %v2311_v23, 16  ;;  %v2321_v30 = vadd.s32 %v2319_v22, %v2313_v7  ;;  %vm2322_vm10 = vc.u32 %v2320_v27, %v2316_v29 }
 0x129   : > { %v1737_v32 = vxor.u32 2147483648, %v1736_v20  ;;  %v2299_v1 = vadd.s32 %v2297_v52, %v2291_v33  ;;  %vm2300_vm13 = vc.u32 %v2298_v25, %v2294_v26  ;;  %v2323_v36 = vsel %vm2322_vm10, 1, %v3245_v14 }
 0x12a   : > { %v2301_v39 = vsel %vm2300_vm13, 1, %v3245_v14  ;;  %v2325_v62 = vadd.s32 %v2323_v36, %v2321_v30  ;;  %v542_v3 = vsel %vm541_vm8, %v540_v43, 0  ;;  %v2293_v56 = vshrl.u32 %v2289_v24, 16 }
 0x12b   : > { %v1738_v9 = vsel %vm1617_vm12, %v1737_v32, %v1736_v20  ;;  %v2303_v58 = vadd.s32 %v2301_v39, %v2299_v1  ;;  %v544_v4 = vand.u32 31, %v542_v3  ;;  %v1759_v18 = vadd.s32 3, %v1742_v11 }
 0x12c   : > { %v1741_v46 = vsel %vm3745_vm2, %v3411_v53, %v1738_v9  ;;  %v2295_v0 = vshrl.u32 %v2290_v51, 16  ;;  %v2317_v17 = vshrl.u32 %v2312_v13, 16  ;;  %v2326_v49 = vadd.s32 %v2325_v62, %v2315_v38 }
 0x12d   : > { %v1743_v54 = vmul.f32 %v1741_v46, %v1741_v46  ;;  %v2304_v40 = vadd.s32 %v2303_v58, %v2293_v56  ;;  %v545_v42 = vsub.s32 32, %v544_v4  ;;  %v3788_v16 = vadd.s32 %v2320_v27, %v2316_v29 }
 0x12e   : > { %v2327_v28 = vadd.s32 %v2326_v49, %v2317_v17  ;;  %v2328_v12 = vmul.u32 %v3709_v60, %v3772_v31  ;;  %v547_v43 = vshll.u32 %v3239_v55, %v544_v4  ;;  %v550_v11 = vshll.u32 %v3240_v57, %v544_v4 }
 0x12f   : > { %v1744_v47 = vmul.f32 -0.001358992, %v1743_v54  ;;  %v1751_v35 = vmul.f32 -0.00019511016, %v1743_v54  ;;  %v3793_v23 = vadd.s32 %v2304_v40, %v2295_v0  ;;  %v548_v41 = vshrl.u32 %v3240_v57, %v545_v42 }
 0x130   : > { %v2331_v13 = vadd.s32 1, %v2327_v28  ;;  %v551_v37 = vshrl.u32 %v3241_v59, %v545_v42  ;;  %v553_v24 = vshll.u32 %v3241_v59, %v544_v4  ;;  %v554_v60 = vshrl.u32 %v3242_v61, %v545_v42 }
 0x131   : > { %v1745_v6 = vadd.f32 0.041655596, %v1744_v47  ;;  %v1752_v19 = vadd.f32 0.008332121, %v1751_v35  ;;  %vm2330_vm12 = vc.u32 %v3793_v23, %v3788_v16  ;;  %v1760_v31 = vand.u32 3, %v1759_v18 }
 0x132   : > { %v2332_v7 = vsel %vm2330_vm12, %v2331_v13, %v2327_v28  ;;  %v3802_v5 = vshrl.u32 %v542_v3, 5  ;;  %v549_v20 = vor.u32 %v548_v41, %v547_v43  ;;  %v556_v26 = vshll.u32 %v3242_v61, %v544_v4 }
 0x133   : > { %v1746_v51 = vmul.f32 %v1745_v6, %v1743_v54  ;;  %v1753_v2 = vmul.f32 %v1752_v19, %v1743_v54  ;;  %v2333_v44 = vadd.s32 %v2332_v7, %v2328_v12  ;;  %v3805_v29 = vor.u32 %v551_v37, %v550_v11 }
 0x134   : > { %v557_v27 = vshrl.u32 %v3243_v63, %v545_v42  ;;  %v559_v32 = vshll.u32 %v3243_v63, %v544_v4  ;;  %v560_v25 = vshrl.u32 %v3244_v8, %v545_v42  ;;  %v555_v30 = vor.u32 %v554_v60, %v553_v24 }
 0x135   : > { %v1747_v21 = vadd.f32 -0.4999988, %v1746_v51  ;;  %v1754_v33 = vadd.f32 -0.16666654, %v1753_v2  ;;  %v2334_v38 = vadd.s32 536870912, %v2333_v44  ;;  %vm562_vm14 = vcmp.lt.s32.totalorder %v3802_v5, 1 }
 0x136   : > { %v558_v9 = vor.u32 %v557_v27, %v556_v26  ;;  %v561_v1 = vor.u32 %v560_v25, %v559_v32  ;;  %vm565_vm15 = vcmp.lt.s32.totalorder %v3802_v5, 4  ;;  %vm564_vm0 = vcmp.lt.s32.totalorder %v3802_v5, 3 }
 0x137   : > { %v1748_v22 = vmul.f32 %v1747_v21, %v1743_v54  ;;  %v1755_v52 = vmul.f32 %v1754_v33, %v1743_v54  ;;  %v3812_v62 = vshrl.u32 %v2334_v38, 30  ;;  %vm1758_vm1 = vweird.f32 %v3411_v53 }
 0x138   : > { %vm1761_vm2 = vcmp.lt.s32.totalorder %v1760_v31, 2  ;;  %v571_v3 = vsel %vm565_vm15, %v558_v9, 920167782  ;;  %v570_v4 = vsel %vm562_vm14, %v549_v20, %v3805_v29  ;;  %vm1762_vm3 = vcmp.eq.s32.totalorder %v1760_v31, 0 }
 0x139   : > { %v1749_v36 = vadd.f32 1.0, %v1748_v22  ;;  %v1756_v39 = vadd.f32 1.0, %v1755_v52  ;;  %v2336_v58 = vshll.u32 %v3812_v62, 30  ;;  %v572_v18 = vsel %vm564_vm0, %v555_v30, %v571_v3  ;;  %v3857_v52 = vld [vmem:[%s5132_s2] ss:$0 sm:$0xff] }
 0x13a   : > { %v575_v0 = vsel %vm565_vm15, %v561_v1, 1326507024  ;;  %v3828_v17 = vshll.u32 %v538_v34, 8  ;;  %vm563_vm4 = vcmp.lt.s32.totalorder %v3802_v5, 2  ;;  %v574_v47 = vsel %vm562_vm14, %v3805_v29, %v555_v30 }
 0x13b   : > { %v1757_v54 = vmul.f32 %v1756_v39, %v1741_v46  ;;  %v1766_v56 = vxor.u32 2147483648, %v1749_v36  ;;  %v2337_v46 = vsub.s32 %v2333_v44, %v2336_v58  ;;  %vm1765_vm5 = vcmp.eq.s32.totalorder %v1760_v31, 2  ;;  %v326_v31 = vpop.f32.mrf.mxu1 }
 0x13c   : > { %v546_v35 = vshrl.u32 %v3239_v55, %v545_v42  ;;  %v573_v40 = vsel %vm563_vm4, %v570_v4, %v572_v18  ;;  %v576_v15 = vsel %vm564_vm0, %v558_v9, %v575_v0  ;;  %v579_v19 = vand.u32 65535, %v3828_v17 }
 0x13d   : > { %v1763_v49 = vxor.u32 2147483648, %v1757_v54  ;;  %v1767_v28 = vsel %vm1765_vm5, %v1766_v56, %v1757_v54  ;;  %vm2338_vm6 = vcmp.lt.s32.totalorder %v2337_v46, 0  ;;  %v2339_v12 = vsub.s32 0, %v2337_v46 }
 0x13e   : > { %v577_v6 = vsel %vm563_vm4, %v574_v47, %v576_v15  ;;  %v604_v11 = vshrl.u32 %v573_v40, 16  ;;  %v603_v37 = vand.u32 65535, %v573_v40  ;;  %v580_v51 = vshrl.u32 %v3828_v17, 16 }
 0x13f   : > { %v1764_v34 = vsel %vm1762_vm3, %v1749_v36, %v1763_v49  ;;  %v2340_v13 = vsel %vm2338_vm6, %v2339_v12, %v2337_v46  ;;  %v581_v41 = vand.u32 65535, %v577_v6  ;;  %v582_v2 = vshrl.u32 %v577_v6, 16  ;;  %v338_v12 = vpop.f32.mrf.mxu2 }
 0x140   : > { %v1768_v43 = vsel %vm1761_vm2, %v1764_v34, %v1767_v28  ;;  %v2341_v24 = vclz %v2340_v13  ;;  %v606_v60 = vmul.u32 %v604_v11, %v579_v19  ;;  %v2329_v7 = vadd.s32 %v3788_v16, %v3793_v23 }
 0x141   : > { %v1769_v42 = vsel %vm1758_vm1, nan, %v1768_v43  ;;  %v566_v21 = vsel %vm562_vm14, %v546_v35, %v549_v20  ;;  %v567_v53 = vsel %vm565_vm15, %v555_v30, 2102212464  ;;  %v2359_v44 = vsub.s32 4, %v3812_v62 }
 0x142   : > { %2863 = vst [vmem:[%s3701_s7 + $0x40] sm:$0xff] %v1769_v42  ;;  %v3050_v33 = vadd.s32 4294967294, %v2341_v24  ;;  %v584_v26 = vmul.u32 %v582_v2, %v579_v19  ;;  %v585_v27 = vmul.u32 %v581_v41, %v580_v51  ;;  %v605_v32 = vmul.u32 %v603_v37, %v579_v19 }
 0x143   : > { %v607_v25 = vmul.u32 %v603_v37, %v580_v51  ;;  %v609_v22 = vshll.u32 %v606_v60, 16  ;;  %v327_v16 = vadd.f32 %v3857_v52, %v326_v31  ;;  %v583_v23 = vmul.u32 %v581_v41, %v579_v19 }
 0x144   : > { %vm3051_vm7 = vcmp.lt.s32.totalorder %v3050_v33, 0  ;;  %v586_v20 = vmul.u32 %v582_v2, %v580_v51  ;;  %v587_v38 = vshll.u32 %v584_v26, 16  ;;  %v589_v9 = vshll.u32 %v585_v27, 16 }
 0x145   : > { %v2344_v30 = vsel %vm3051_vm7, 0, %v3050_v33  ;;  %v608_v1 = vmul.u32 %v604_v11, %v580_v51  ;;  %v611_v36 = vshll.u32 %v607_v25, 16  ;;  %vm613_vm9 = vc.u32 %v605_v32, %v609_v22 }
 0x146   : > { %v2345_v39 = vsub.s32 32, %v2344_v30  ;;  %v2346_v3 = vshll.u32 %v2337_v46, %v2344_v30  ;;  %v2349_v54 = vsub.s32 4294967266, %v2344_v30  ;;  %vm591_vm8 = vc.u32 %v583_v23, %v587_v38 }
 0x147   : > { %v592_v56 = vsel %vm591_vm8, 1, %v3245_v14  ;;  %v593_v58 = vadd.s32 %v587_v38, %v583_v23  ;;  %v615_v4 = vadd.s32 %v609_v22, %v605_v32  ;;  %v614_v47 = vsel %vm613_vm9, 1, %v3245_v14 }
 0x148   : > { %v2347_v18 = vshrl.u32 %v2329_v7, %v2345_v39  ;;  %v2350_v0 = vadd.s32 127, %v2349_v54  ;;  %v594_v49 = vadd.s32 %v592_v56, %v586_v20  ;;  %v610_v35 = vshrl.u32 %v606_v60, 16 }
 0x149   : > { %vm595_vm11 = vc.u32 %v593_v58, %v589_v9  ;;  %v616_v40 = vadd.s32 %v614_v47, %v608_v1  ;;  %vm617_vm10 = vc.u32 %v615_v4, %v611_v36  ;;  %v588_v43 = vshrl.u32 %v584_v26, 16 }
 0x14a   : > { %v2348_v15 = vor.u32 %v2347_v18, %v2346_v3  ;;  %v2351_v34 = vshll.u32 %v2350_v0, 23  ;;  %v596_v46 = vsel %vm595_vm11, 1, %v3245_v14  ;;  %v618_v28 = vsel %vm617_vm10, 1, %v3245_v14 }
 0x14b   : > { %v598_v6 = vadd.s32 %v596_v46, %v594_v49  ;;  %v620_v19 = vadd.s32 %v618_v28, %v616_v40  ;;  %v3864_v11 = vmul.f32 30.0, %v327_v16  ;;  %v568_v13 = vsel %vm564_vm0, %v3805_v29, %v567_v53 }
 0x14c   : > { %v2352_v42 = vor.u32 4788187, %v2351_v34  ;;  %v590_v41 = vshrl.u32 %v585_v27, 16  ;;  %v612_v37 = vshrl.u32 %v607_v25, 16  ;;  %v339_v60 = vadd.f32 %v3857_v52, %v338_v12 }
 0x14d   : > { %v599_v24 = vadd.s32 %v598_v6, %v588_v43  ;;  %v621_v51 = vadd.s32 %v620_v19, %v610_v35  ;;  %v1150_v2 = vand.u32 2147483647, %v3864_v11  ;;  %vm2237_vm13 = vcmp.lt.s32.totalorder %v3667_v48, 0 }
 0x14e   : > { %v2353_v31 = vand.u32 2147483647, %v2352_v42  ;;  %v2355_v7 = vcvt.s32.f32 %v2348_v15  ;;  %v1153_v33 = vand.u32 2139095040, %v3864_v11  ;;  %v569_v26 = vsel %vm563_vm4, %v566_v21, %v568_v13 }
 0x14f   : > { %v600_v32 = vadd.s32 %v599_v24, %v590_v41  ;;  %v619_v22 = vadd.s32 %v615_v4, %v611_v36  ;;  %v622_v29 = vadd.s32 %v621_v51, %v612_v37  ;;  %v2360_v27 = vsel %vm2237_vm13, %v2359_v44, %v3812_v62 }
 0x150   : > { %v2356_v53 = vmul.f32 %v2355_v7, %v2353_v31  ;;  %v1154_v25 = vshrl.u32 %v1153_v33, 23  ;;  %v1157_v16 = vand.u32 8388607, %v1150_v2  ;;  %v3880_v20 = vmul.f32 30.0, %v339_v60 }
 0x151   : > { %vm625_vm12 = vc.u32 %v600_v32, %v619_v22  ;;  %v626_v23 = vadd.s32 1, %v622_v29  ;;  %vm2236_vm14 = vcmp.le.f32.partialorder %v2235_v10, 0.7853982  ;;  %v623_v21 = vmul.u32 %v3828_v17, %v569_v26 }
 0x152   : > { %v2357_v5 = vxor.u32 2147483648, %v2356_v53  ;;  %v3028_v38 = vadd.s32 4294967169, %v1154_v25  ;;  %v2362_v30 = vsel %vm2236_vm14, 0, %v2360_v27  ;;  %v1158_v1 = vor.u32 8388608, %v1157_v16 }
 0x153   : > { %v627_v9 = vsel %vm625_vm12, %v626_v23, %v622_v29  ;;  %v1773_v3 = vand.u32 2139095040, %v3880_v20  ;;  %v2379_v56 = vadd.s32 3, %v2362_v30  ;;  %v1770_v17 = vand.u32 2147483647, %v3880_v20 }
 0x154   : > { %v2358_v62 = vsel %vm2237_vm13, %v2357_v5, %v2356_v53  ;;  %v628_v44 = vadd.s32 %v627_v9, %v623_v21  ;;  %v1160_v36 = vadd.s32 1, %v3028_v38  ;;  %v3890_v49 = vshll.u32 %v1158_v1, 8 }
 0x155   : > { %v2361_v39 = vsel %vm2236_vm14, %v3667_v48, %v2358_v62  ;;  %vm532_vm0 = vcmp.lt.s32.totalorder %v3706_v45, 0  ;;  %v1774_v35 = vshrl.u32 %v1773_v3, 23  ;;  %v3893_v34 = vand.u32 3, %v2379_v56 }
 0x156   : > { %v2363_v54 = vmul.f32 %v2361_v39, %v2361_v39  ;;  %v629_v58 = vadd.s32 536870912, %v628_v44  ;;  %vm1161_vm15 = vcmp.gt.s32.totalorder %v1160_v36, 0  ;;  %vm3897_vm1 = vcmp.le.f32.partialorder %v530_v50, 0.7853982 }
 0x157   : > { %v1162_v10 = vsel %vm1161_vm15, %v1160_v36, 0  ;;  %v624_v12 = vadd.s32 %v619_v22, %v600_v32  ;;  %v3903_v19 = vand.u32 8388607, %v1770_v17  ;;  %v3908_v37 = vand.u32 65535, %v3890_v49 }
 0x158   : > { %v2364_v4 = vmul.f32 -0.001358992, %v2363_v54  ;;  %v2371_v18 = vmul.f32 -0.00019511016, %v2363_v54  ;;  %v630_v0 = vshrl.u32 %v629_v58, 30  ;;  %v1164_v47 = vand.u32 31, %v1162_v10 }
 0x159   : > { %v3910_v24 = vshrl.u32 %v1162_v10, 5  ;;  %v3914_v51 = vshrl.u32 %v3890_v49, 16  ;;  %v3040_v60 = vadd.s32 4294967169, %v1774_v35  ;;  %vm2382_vm3 = vcmp.eq.s32.totalorder %v3893_v34, 0 }
 0x15a   : > { %v2365_v40 = vadd.f32 0.041655596, %v2364_v4  ;;  %v2372_v15 = vadd.f32 0.008332121, %v2371_v18  ;;  %v631_v28 = vshll.u32 %v630_v0, 30  ;;  %v654_v43 = vsub.s32 4, %v630_v0 }
 0x15b   : > { %v1165_v6 = vsub.s32 32, %v1164_v47  ;;  %v1167_v50 = vshll.u32 %v3239_v55, %v1164_v47  ;;  %vm2385_vm4 = vcmp.eq.s32.totalorder %v3893_v34, 2  ;;  %v1170_v22 = vshll.u32 %v3240_v57, %v1164_v47 }
 0x15c   : > { %v2366_v42 = vmul.f32 %v2365_v40, %v2363_v54  ;;  %v2373_v13 = vmul.f32 %v2372_v15, %v2363_v54  ;;  %v3905_v41 = vsub.s32 %v628_v44, %v631_v28  ;;  %v655_v26 = vsel %vm532_vm0, %v654_v43, %v630_v0 }
 0x15d   : > { %v1168_v32 = vshrl.u32 %v3240_v57, %v1165_v6  ;;  %v1171_v29 = vshrl.u32 %v3241_v59, %v1165_v6  ;;  %vm2381_vm5 = vcmp.lt.s32.totalorder %v3893_v34, 2  ;;  %v1176_v16 = vshll.u32 %v3242_v61, %v1164_v47 }
 0x15e   : > { %v2367_v31 = vadd.f32 -0.4999988, %v2366_v42  ;;  %v2374_v7 = vadd.f32 -0.16666654, %v2373_v13  ;;  %vm633_vm2 = vcmp.lt.s32.totalorder %v3905_v41, 0  ;;  %v634_v33 = vsub.s32 0, %v3905_v41 }
 0x15f   : > { %vm2378_vm6 = vweird.f32 %v3667_v48  ;;  %v1173_v5 = vshll.u32 %v3241_v59, %v1164_v47  ;;  %v1174_v21 = vshrl.u32 %v3242_v61, %v1165_v6  ;;  %v1177_v38 = vshrl.u32 %v3243_v63, %v1165_v6 }
 0x160   : > { %v2368_v53 = vmul.f32 %v2367_v31, %v2363_v54  ;;  %v2375_v27 = vmul.f32 %v2374_v7, %v2363_v54  ;;  %v635_v25 = vsel %vm633_vm2, %v634_v33, %v3905_v41  ;;  %v1179_v62 = vshll.u32 %v3243_v63, %v1164_v47 }
 0x161   : > { %v636_v23 = vclz %v635_v25  ;;  %v1180_v44 = vshrl.u32 %v3244_v8, %v1165_v6  ;;  %v657_v36 = vsel %vm3897_vm1, 0, %v655_v26  ;;  %v1169_v3 = vor.u32 %v1168_v32, %v1167_v50 }
 0x162   : > { %v2369_v30 = vadd.f32 1.0, %v2368_v53  ;;  %v2376_v9 = vadd.f32 1.0, %v2375_v27  ;;  %v1780_v54 = vadd.s32 1, %v3040_v60  ;;  %v1172_v10 = vor.u32 %v1171_v29, %v1170_v22 }
 0x163   : > { %v3017_v1 = vadd.s32 4294967294, %v636_v23  ;;  %v1178_v4 = vor.u32 %v1177_v38, %v1176_v16  ;;  %v1166_v18 = vshrl.u32 %v3239_v55, %v1165_v6  ;;  %v1175_v0 = vor.u32 %v1174_v21, %v1173_v5 }
 0x164   : > { %v2377_v56 = vmul.f32 %v2376_v9, %v2361_v39  ;;  %v2386_v58 = vxor.u32 2147483648, %v2369_v30  ;;  %vm1182_vm8 = vcmp.lt.s32.totalorder %v3910_v24, 1  ;;  %v1181_v40 = vor.u32 %v1180_v44, %v1179_v62 }
 0x165   : > { %vm3018_vm7 = vcmp.lt.s32.totalorder %v3017_v1, 0  ;;  %vm1185_vm9 = vcmp.lt.s32.totalorder %v3910_v24, 4  ;;  %vm1183_vm11 = vcmp.lt.s32.totalorder %v3910_v24, 2  ;;  %vm1184_vm10 = vcmp.lt.s32.totalorder %v3910_v24, 3 }
 0x166   : > { %v2383_v35 = vxor.u32 2147483648, %v2377_v56  ;;  %v639_v47 = vsel %vm3018_vm7, 0, %v3017_v1  ;;  %v2387_v43 = vsel %vm2385_vm4, %v2386_v58, %v2377_v56  ;;  %v1190_v6 = vsel %vm1182_vm8, %v1169_v3, %v1172_v10 }
 0x167   : > { %v640_v15 = vsub.s32 32, %v639_v47  ;;  %v644_v28 = vsub.s32 4294967266, %v639_v47  ;;  %v1191_v42 = vsel %vm1185_vm9, %v1178_v4, 920167782  ;;  %v641_v50 = vshll.u32 %v3905_v41, %v639_v47 }
 0x168   : > { %v2384_v39 = vsel %vm2382_vm3, %v2369_v30, %v2383_v35  ;;  %v1187_v33 = vsel %vm1185_vm9, %v1175_v0, 2102212464  ;;  %v1192_v26 = vsel %vm1184_vm10, %v1175_v0, %v1191_v42  ;;  %v1194_v32 = vsel %vm1182_vm8, %v1172_v10, %v1175_v0 }
 0x169   : > { %v2388_v13 = vsel %vm2381_vm5, %v2384_v39, %v2387_v43  ;;  %v642_v60 = vshrl.u32 %v624_v12, %v640_v15  ;;  %v645_v31 = vadd.s32 127, %v644_v28  ;;  %v1193_v41 = vsel %vm1183_vm11, %v1190_v6, %v1192_v26 }
 0x16a   : > { %v2389_v7 = vsel %vm2378_vm6, nan, %v2388_v13  ;;  %v1195_v12 = vsel %vm1185_vm9, %v1181_v40, 1326507024  ;;  %v674_v48 = vadd.s32 3, %v657_v36  ;;  %v1223_v53 = vand.u32 65535, %v1193_v41 }
 0x16b   : > { %2867 = vst [vmem:[%s3701_s7 + $0x60] sm:$0xff] %v2389_v7  ;;  %v643_v22 = vor.u32 %v642_v60, %v641_v50  ;;  %v646_v34 = vshll.u32 %v645_v31, 23  ;;  %v1196_v29 = vsel %vm1184_vm10, %v1178_v4, %v1195_v12  ;;  %v1224_v27 = vshrl.u32 %v1193_v41, 16 }
 0x16c   : > { %v1186_v16 = vsel %vm1182_vm8, %v1166_v18, %v1169_v3  ;;  %v1188_v23 = vsel %vm1184_vm10, %v1172_v10, %v1187_v33  ;;  %v1197_v5 = vsel %vm1183_vm11, %v1194_v32, %v1196_v29  ;;  %v1778_v9 = vor.u32 8388608, %v3903_v19 }
 0x16d   : > { %v647_v25 = vor.u32 4788187, %v646_v34  ;;  %v1201_v21 = vand.u32 65535, %v1197_v5  ;;  %v1202_v38 = vshrl.u32 %v1197_v5, 16  ;;  %v1226_v30 = vmul.u32 %v1224_v27, %v3908_v37 }
 0x16e   : > { %v650_v44 = vcvt.s32.f32 %v643_v22  ;;  %v1227_v1 = vmul.u32 %v1223_v53, %v3914_v51  ;;  %vm1781_vm13 = vcmp.gt.s32.totalorder %v1780_v54, 0  ;;  %v3976_v36 = vand.u32 3, %v674_v48 }
 0x16f   : > { %v648_v62 = vand.u32 2147483647, %v647_v25  ;;  %v3980_v3 = vsel %vm1183_vm11, %v1186_v16, %v1188_v23  ;;  %v1204_v56 = vmul.u32 %v1202_v38, %v3908_v37  ;;  %v1205_v58 = vmul.u32 %v1201_v21, %v3914_v51 }
 0x170   : > { %v1225_v4 = vmul.u32 %v1223_v53, %v3908_v37  ;;  %v1228_v18 = vmul.u32 %v1224_v27, %v3914_v51  ;;  %v1229_v0 = vshll.u32 %v1226_v30, 16  ;;  %v1203_v35 = vmul.u32 %v1201_v21, %v3908_v37 }
 0x171   : > { %v651_v10 = vmul.f32 %v650_v44, %v648_v62  ;;  %v1206_v47 = vmul.u32 %v1202_v38, %v3914_v51  ;;  %v1207_v40 = vshll.u32 %v1204_v56, 16  ;;  %v1782_v15 = vsel %vm1781_vm13, %v1780_v54, 0 }
 0x172   : > { %v1231_v24 = vshll.u32 %v1227_v1, 16  ;;  %vm1233_vm12 = vc.u32 %v1225_v4, %v1229_v0  ;;  %v1235_v39 = vadd.s32 %v1229_v0, %v1225_v4  ;;  %v1209_v43 = vshll.u32 %v1205_v58, 16 }
 0x173   : > { %v652_v28 = vxor.u32 2147483648, %v651_v10  ;;  %vm1211_vm14 = vc.u32 %v1203_v35, %v1207_v40  ;;  %v1213_v6 = vadd.s32 %v1207_v40, %v1203_v35  ;;  %v1234_v42 = vsel %vm1233_vm12, 1, %v3245_v14 }
 0x174   : > { %v1212_v50 = vsel %vm1211_vm14, 1, %v3245_v14  ;;  %v1236_v60 = vadd.s32 %v1234_v42, %v1228_v18  ;;  %vm1237_vm15 = vc.u32 %v1235_v39, %v1231_v24  ;;  %v1230_v33 = vshrl.u32 %v1226_v30, 16 }
 0x175   : > { %v653_v13 = vsel %vm532_vm0, %v652_v28, %v651_v10  ;;  %v1214_v51 = vadd.s32 %v1212_v50, %v1206_v47  ;;  %vm1215_vm2 = vc.u32 %v1213_v6, %v1209_v43  ;;  %v1238_v54 = vsel %vm1237_vm15, 1, %v3245_v14 }
 0x176   : > { %v656_v37 = vsel %vm3897_vm1, %v3706_v45, %v653_v13  ;;  %v1216_v7 = vsel %vm1215_vm2, 1, %v3245_v14  ;;  %v1240_v26 = vadd.s32 %v1238_v54, %v1236_v60  ;;  %v1208_v32 = vshrl.u32 %v1204_v56, 16 }
 0x177   : > { %v658_v31 = vmul.f32 %v656_v37, %v656_v37  ;;  %v1218_v22 = vadd.s32 %v1216_v7, %v1214_v51  ;;  %v1243_v34 = vmul.u32 %v3890_v49, %v3980_v3  ;;  %v1784_v41 = vand.u32 31, %v1782_v15 }
 0x178   : > { %v1232_v29 = vshrl.u32 %v1227_v1, 16  ;;  %v1241_v46 = vadd.s32 %v1240_v26, %v1230_v33  ;;  %v1210_v53 = vshrl.u32 %v1205_v58, 16  ;;  %v3999_v25 = vadd.s32 %v1235_v39, %v1231_v24 }
 0x179   : > { %v659_v12 = vmul.f32 -0.001358992, %v658_v31  ;;  %v666_v48 = vmul.f32 -0.00019511016, %v658_v31  ;;  %v1219_v27 = vadd.s32 %v1218_v22, %v1208_v32  ;;  %v4001_v16 = vsub.s32 32, %v1784_v41 }
 0x17a   : > { %v1242_v21 = vadd.s32 %v1241_v46, %v1232_v29  ;;  %v1787_v38 = vshll.u32 %v3239_v55, %v1784_v41  ;;  %v1790_v62 = vshll.u32 %v3240_v57, %v1784_v41  ;;  %v4015_v10 = vshrl.u32 %v1782_v15, 5 }
 0x17b   : > { %v660_v23 = vadd.f32 0.041655596, %v659_v12  ;;  %v667_v5 = vadd.f32 0.008332121, %v666_v48  ;;  %v4004_v30 = vadd.s32 %v1219_v27, %v1210_v53  ;;  %v1788_v49 = vshrl.u32 %v3240_v57, %v4001_v16 }
 0x17c   : > { %v1791_v44 = vshrl.u32 %v3241_v59, %v4001_v16  ;;  %v1246_v56 = vadd.s32 1, %v1242_v21  ;;  %v1794_v58 = vshrl.u32 %v3242_v61, %v4001_v16  ;;  %v1793_v18 = vshll.u32 %v3241_v59, %v1784_v41 }
 0x17d   : > { %v661_v1 = vmul.f32 %v660_v23, %v658_v31  ;;  %v668_v3 = vmul.f32 %v667_v5, %v658_v31  ;;  %vm1245_vm0 = vc.u32 %v4004_v30, %v3999_v25  ;;  %v4017_v4 = vor.u32 %v1788_v49, %v1787_v38 }
 0x17e   : > { %v1247_v47 = vsel %vm1245_vm0, %v1246_v56, %v1242_v21  ;;  %v1792_v40 = vor.u32 %v1791_v44, %v1790_v62  ;;  %v1795_v24 = vor.u32 %v1794_v58, %v1793_v18  ;;  %v1796_v39 = vshll.u32 %v3242_v61, %v1784_v41 }
 0x17f   : > { %v662_v0 = vadd.f32 -0.4999988, %v661_v1  ;;  %v669_v35 = vadd.f32 -0.16666654, %v668_v3  ;;  %v1248_v28 = vadd.s32 %v1247_v47, %v1243_v34  ;;  %v1797_v43 = vshrl.u32 %v3243_v63, %v4001_v16 }
 0x180   : > { %v1799_v15 = vshll.u32 %v3243_v63, %v1784_v41  ;;  %v1800_v13 = vshrl.u32 %v3244_v8, %v4001_v16  ;;  %vm1802_vm1 = vcmp.lt.s32.totalorder %v4015_v10, 1  ;;  %vm1803_vm3 = vcmp.lt.s32.totalorder %v4015_v10, 2 }
 0x181   : > { %v663_v6 = vmul.f32 %v662_v0, %v658_v31  ;;  %v670_v42 = vmul.f32 %v669_v35, %v658_v31  ;;  %v1249_v50 = vadd.s32 536870912, %v1248_v28  ;;  %v1798_v60 = vor.u32 %v1797_v43, %v1796_v39 }
 0x182   : > { %v1801_v7 = vor.u32 %v1800_v13, %v1799_v15  ;;  %vm1805_vm4 = vcmp.lt.s32.totalorder %v4015_v10, 4  ;;  %vm1804_vm5 = vcmp.lt.s32.totalorder %v4015_v10, 3  ;;  %v1810_v31 = vsel %vm1802_vm1, %v4017_v4, %v1792_v40 }
 0x183   : > { %v664_v51 = vadd.f32 1.0, %v663_v6  ;;  %v671_v54 = vadd.f32 1.0, %v670_v42  ;;  %v4029_v33 = vshrl.u32 %v1249_v50, 30  ;;  %v1811_v26 = vsel %vm1805_vm4, %v1798_v60, 920167782 }
 0x184   : > { %v1812_v34 = vsel %vm1804_vm5, %v1795_v24, %v1811_v26  ;;  %v1814_v41 = vsel %vm1802_vm1, %v1792_v40, %v1795_v24  ;;  %vm673_vm6 = vweird.f32 %v3706_v45  ;;  %v1815_v29 = vsel %vm1805_vm4, %v1801_v7, 1326507024 }
 0x185   : > { %v672_v32 = vmul.f32 %v671_v54, %v656_v37  ;;  %v681_v22 = vxor.u32 2147483648, %v664_v51  ;;  %v1251_v12 = vshll.u32 %v4029_v33, 30  ;;  %v1813_v48 = vsel %vm1803_vm3, %v1810_v31, %v1812_v34 }
 0x186   : > { %vm676_vm7 = vcmp.lt.s32.totalorder %v3976_v36, 2  ;;  %v1816_v46 = vsel %vm1804_vm5, %v1798_v60, %v1815_v29  ;;  %v4052_v53 = vshll.u32 %v1778_v9, 8  ;;  %vm677_vm8 = vcmp.eq.s32.totalorder %v3976_v36, 0 }
 0x187   : > { %v678_v37 = vxor.u32 2147483648, %v672_v32  ;;  %vm680_vm9 = vcmp.eq.s32.totalorder %v3976_v36, 2  ;;  %v1252_v27 = vsub.s32 %v1248_v28, %v1251_v12  ;;  %v1817_v23 = vsel %vm1803_vm3, %v1814_v41, %v1816_v46  ;;  %v317_v46 = vpop.f32.mrf.mxu0 }
 0x188   : > { %v682_v21 = vsel %vm680_vm9, %v681_v22, %v672_v32  ;;  %v1807_v38 = vsel %vm1805_vm4, %v1795_v24, 2102212464  ;;  %v1843_v49 = vand.u32 65535, %v1813_v48  ;;  %v1819_v9 = vand.u32 65535, %v4052_v53 }
 0x189   : > { %v679_v5 = vsel %vm677_vm8, %v664_v51, %v678_v37  ;;  %vm1253_vm11 = vcmp.lt.s32.totalorder %v1252_v27, 0  ;;  %v1254_v19 = vsub.s32 0, %v1252_v27  ;;  %v1820_v36 = vshrl.u32 %v4052_v53, 16  ;;  %v350_v37 = vpop.f32.mrf.mxu3 }
 0x18a   : > { %v683_v62 = vsel %vm676_vm7, %v679_v5, %v682_v21  ;;  %v1821_v1 = vand.u32 65535, %v1817_v23  ;;  %v1822_v3 = vshrl.u32 %v1817_v23, 16  ;;  %v1786_v58 = vshrl.u32 %v3239_v55, %v4001_v16 }
 0x18b   : > { %v684_v44 = vsel %vm673_vm6, nan, %v683_v62  ;;  %v1255_v56 = vsel %vm1253_vm11, %v1254_v19, %v1252_v27  ;;  %v1844_v18 = vshrl.u32 %v1813_v48, 16  ;;  %v1244_v28 = vadd.s32 %v3999_v25, %v4004_v30 }
 0x18c   : > { %2856 = vst [vmem:[%s3701_s7 + $0x8] sm:$0xff] %v684_v44  ;;  %v1256_v0 = vclz %v1255_v56  ;;  %v1824_v35 = vmul.u32 %v1822_v3, %v1819_v9  ;;  %v1825_v47 = vmul.u32 %v1821_v1, %v1820_v36  ;;  %v1274_v24 = vsub.s32 4, %v4029_v33 }
 0x18d   : > { %v1806_v45 = vsel %vm1802_vm1, %v1786_v58, %v4017_v4  ;;  %v1808_v39 = vsel %vm1804_vm5, %v1792_v40, %v1807_v38  ;;  %v1823_v6 = vmul.u32 %v1821_v1, %v1819_v9  ;;  %v1847_v16 = vmul.u32 %v1843_v49, %v1820_v36 }
 0x18e   : > { %v3029_v43 = vadd.s32 4294967294, %v1256_v0  ;;  %v1827_v42 = vshll.u32 %v1824_v35, 16  ;;  %v1826_v15 = vmul.u32 %v1822_v3, %v1820_v36  ;;  %v1828_v13 = vshrl.u32 %v1824_v35, 16 }
 0x18f   : > { %v1845_v50 = vmul.u32 %v1843_v49, %v1819_v9  ;;  %v1846_v60 = vmul.u32 %v1844_v18, %v1819_v9  ;;  %v1829_v51 = vshll.u32 %v1825_v47, 16  ;;  %v1848_v7 = vmul.u32 %v1844_v18, %v1820_v36 }
 0x190   : > { %vm3030_vm10 = vcmp.lt.s32.totalorder %v3029_v43, 0  ;;  %vm1831_vm13 = vc.u32 %v1823_v6, %v1827_v42  ;;  %v1833_v25 = vadd.s32 %v1827_v42, %v1823_v6  ;;  %v1851_v32 = vshll.u32 %v1847_v16, 16 }
 0x191   : > { %v1259_v30 = vsel %vm3030_vm10, 0, %v3029_v43  ;;  %v1832_v54 = vsel %vm1831_vm13, 1, %v3245_v14  ;;  %v1849_v4 = vshll.u32 %v1846_v60, 16  ;;  %v1830_v23 = vshrl.u32 %v1825_v47, 16 }
 0x192   : > { %v1260_v31 = vsub.s32 32, %v1259_v30  ;;  %v1264_v26 = vsub.s32 4294967266, %v1259_v30  ;;  %v1834_v40 = vadd.s32 %v1832_v54, %v1826_v15  ;;  %v1261_v22 = vshll.u32 %v1252_v27, %v1259_v30 }
 0x193   : > { %vm1835_vm12 = vc.u32 %v1833_v25, %v1829_v51  ;;  %vm1853_vm14 = vc.u32 %v1845_v50, %v1849_v4  ;;  %v1855_v34 = vadd.s32 %v1849_v4, %v1845_v50  ;;  %v1850_v62 = vshrl.u32 %v1846_v60, 16 }
 0x194   : > { %v1262_v41 = vshrl.u32 %v1244_v28, %v1260_v31  ;;  %v1265_v12 = vadd.s32 127, %v1264_v26  ;;  %v1836_v48 = vsel %vm1835_vm12, 1, %v3245_v14  ;;  %v1854_v29 = vsel %vm1853_vm14, 1, %v3245_v14 }
 0x195   : > { %v1838_v5 = vadd.s32 %v1836_v48, %v1834_v40  ;;  %v1856_v21 = vadd.s32 %v1854_v29, %v1848_v7  ;;  %vm1857_vm15 = vc.u32 %v1855_v34, %v1851_v32  ;;  %v351_v44 = vadd.f32 %v3857_v52, %v350_v37 }
 0x196   : > { %v1263_v38 = vor.u32 %v1262_v41, %v1261_v22  ;;  %v1266_v49 = vshll.u32 %v1265_v12, 23  ;;  %v1858_v27 = vsel %vm1857_vm15, 1, %v3245_v14  ;;  %v318_v36 = vadd.f32 %v3857_v52, %v317_v46 }
 0x197   : > { %v1839_v19 = vadd.s32 %v1838_v5, %v1828_v13  ;;  %v1860_v9 = vadd.s32 %v1858_v27, %v1856_v21  ;;  %vm1152_vm2 = vcmp.lt.s32.totalorder %v3864_v11, 0  ;;  %v1852_v56 = vshrl.u32 %v1847_v16, 16 }
 0x198   : > { %v1267_v1 = vor.u32 4788187, %v1266_v49  ;;  %v4082_v18 = vmul.f32 30.0, %v351_v44  ;;  %v1270_v35 = vcvt.s32.f32 %v1263_v38  ;;  %v1809_v47 = vsel %vm1803_vm3, %v1806_v45, %v1808_v39 }
 0x199   : > { %v1840_v3 = vadd.s32 %v1839_v19, %v1830_v23  ;;  %v1861_v58 = vadd.s32 %v1860_v9, %v1850_v62  ;;  %v1859_v28 = vadd.s32 %v1855_v34, %v1851_v32  ;;  %v1275_v43 = vsel %vm1152_vm2, %v1274_v24, %v4029_v33 }
 0x19a   : > { %v1268_v0 = vand.u32 2147483647, %v1267_v1  ;;  %v2390_v52 = vand.u32 2147483647, %v4082_v18  ;;  %v4090_v42 = vmul.f32 30.0, %v318_v36  ;;  %v2393_v16 = vand.u32 2139095040, %v4082_v18 }
 0x19b   : > { %v1862_v6 = vadd.s32 %v1861_v58, %v1852_v56  ;;  %vm1865_vm0 = vc.u32 %v1840_v3, %v1859_v28  ;;  %vm1151_vm1 = vcmp.le.f32.partialorder %v1150_v2, 0.7853982  ;;  %v1863_v33 = vmul.u32 %v4052_v53, %v1809_v47 }
 0x19c   : > { %v1271_v15 = vmul.f32 %v1270_v35, %v1268_v0  ;;  %v2397_v10 = vand.u32 8388607, %v2390_v52  ;;  %v1277_v39 = vsel %vm1151_vm1, 0, %v1275_v43  ;;  %v2394_v24 = vshrl.u32 %v2393_v16, 23 }
 0x19d   : > { %v1866_v13 = vadd.s32 1, %v1862_v6  ;;  %v688_v60 = vand.u32 2139095040, %v4090_v42  ;;  %v1294_v2 = vadd.s32 3, %v1277_v39  ;;  %v685_v48 = vand.u32 2147483647, %v4090_v42 }
 0x19e   : > { %v1272_v45 = vxor.u32 2147483648, %v1271_v15  ;;  %v3052_v30 = vadd.s32 4294967169, %v2394_v24  ;;  %v2398_v7 = vor.u32 8388608, %v2397_v10  ;;  %vm4109_vm4 = vcmp.le.f32.partialorder %v1770_v17, 0.7853982 }
 0x19f   : > { %v1867_v50 = vsel %vm1865_vm0, %v1866_v13, %v1862_v6  ;;  %v689_v40 = vshrl.u32 %v688_v60, 23  ;;  %v4102_v34 = vand.u32 3, %v1294_v2  ;;  %vm1772_vm5 = vcmp.lt.s32.totalorder %v3880_v20, 0 }
 0x1a0   : > { %v1273_v51 = vsel %vm1152_vm2, %v1272_v45, %v1271_v15  ;;  %v1868_v25 = vadd.s32 %v1867_v50, %v1863_v33  ;;  %v2400_v26 = vadd.s32 1, %v3052_v30  ;;  %v4104_v12 = vshll.u32 %v2398_v7, 8 }
 0x1a1   : > { %v1276_v54 = vsel %vm1151_vm1, %v3864_v11, %v1273_v51  ;;  %v3019_v38 = vadd.s32 4294967169, %v689_v40  ;;  %v1864_v27 = vadd.s32 %v1859_v28, %v1840_v3  ;;  %vm1300_vm6 = vcmp.eq.s32.totalorder %v4102_v34, 2 }
 0x1a2   : > { %v1278_v4 = vmul.f32 %v1276_v54, %v1276_v54  ;;  %v1869_v31 = vadd.s32 536870912, %v1868_v25  ;;  %vm2401_vm3 = vcmp.gt.s32.totalorder %v2400_v26, 0  ;;  %v4122_v17 = vand.u32 65535, %v4104_v12 }
 0x1a3   : > { %v2402_v41 = vsel %vm2401_vm3, %v2400_v26, 0  ;;  %v4126_v36 = vand.u32 8388607, %v685_v48  ;;  %vm1297_vm8 = vcmp.eq.s32.totalorder %v4102_v34, 0  ;;  %v4135_v47 = vadd.s32 1, %v3019_v38 }
 0x1a4   : > { %v1279_v32 = vmul.f32 -0.001358992, %v1278_v4  ;;  %v1286_v22 = vmul.f32 -0.00019511016, %v1278_v4  ;;  %v1870_v53 = vshrl.u32 %v1869_v31, 30  ;;  %v2404_v21 = vand.u32 31, %v2402_v41 }
 0x1a5   : > { %v4131_v58 = vshrl.u32 %v2402_v41, 5  ;;  %vm1296_vm9 = vcmp.lt.s32.totalorder %v4102_v34, 2  ;;  %vm1293_vm11 = vweird.f32 %v3864_v11  ;;  %vm696_vm2 = vcmp.gt.s32.totalorder %v4135_v47, 0 }
 0x1a6   : > { %v1280_v29 = vadd.f32 0.041655596, %v1279_v32  ;;  %v1287_v37 = vadd.f32 0.008332121, %v1286_v22  ;;  %v1871_v46 = vshll.u32 %v1870_v53, 30  ;;  %v1894_v23 = vsub.s32 4, %v1870_v53 }
 0x1a7   : > { %v2405_v44 = vsub.s32 32, %v2404_v21  ;;  %v2407_v10 = vshll.u32 %v3239_v55, %v2404_v21  ;;  %v2410_v45 = vshll.u32 %v3240_v57, %v2404_v21  ;;  %v2413_v24 = vshll.u32 %v3241_v59, %v2404_v21 }
 0x1a8   : > { %v1281_v49 = vmul.f32 %v1280_v29, %v1278_v4  ;;  %v1288_v62 = vmul.f32 %v1287_v37, %v1278_v4  ;;  %v4114_v19 = vsub.s32 %v1868_v25, %v1871_v46  ;;  %v4119_v9 = vsel %vm1772_vm5, %v1894_v23, %v1870_v53 }
 0x1a9   : > { %v2408_v0 = vshrl.u32 %v3240_v57, %v2405_v44  ;;  %v2411_v35 = vshrl.u32 %v3241_v59, %v2405_v44  ;;  %v1897_v15 = vsel %vm4109_vm4, 0, %v4119_v9  ;;  %v2406_v13 = vshrl.u32 %v3239_v55, %v2405_v44 }
 0x1aa   : > { %v1282_v1 = vadd.f32 -0.4999988, %v1281_v49  ;;  %v1289_v56 = vadd.f32 -0.16666654, %v1288_v62  ;;  %vm1873_vm7 = vcmp.lt.s32.totalorder %v4114_v19, 0  ;;  %v1874_v3 = vsub.s32 0, %v4114_v19 }
 0x1ab   : > { %v2414_v50 = vshrl.u32 %v3242_v61, %v2405_v44  ;;  %v2409_v51 = vor.u32 %v2408_v0, %v2407_v10  ;;  %v2412_v25 = vor.u32 %v2411_v35, %v2410_v45  ;;  %v2416_v30 = vshll.u32 %v3242_v61, %v2404_v21 }
 0x1ac   : > { %v1283_v28 = vmul.f32 %v1282_v1, %v1278_v4  ;;  %v1290_v43 = vmul.f32 %v1289_v56, %v1278_v4  ;;  %v1875_v6 = vsel %vm1873_vm7, %v1874_v3, %v4114_v19  ;;  %v2417_v31 = vshrl.u32 %v3243_v63, %v2405_v44 }
 0x1ad   : > { %v1876_v16 = vclz %v1875_v6  ;;  %v2415_v4 = vor.u32 %v2414_v50, %v2413_v24  ;;  %v2419_v26 = vshll.u32 %v3243_v63, %v2404_v21  ;;  %v2420_v40 = vshrl.u32 %v3244_v8, %v2405_v44 }
 0x1ae   : > { %v1284_v39 = vadd.f32 1.0, %v1283_v28  ;;  %v1291_v33 = vadd.f32 1.0, %v1290_v43  ;;  %vm2422_vm13 = vcmp.lt.s32.totalorder %v4131_v58, 1  ;;  %v2418_v41 = vor.u32 %v2417_v31, %v2416_v30 }
 0x1af   : > { %v3041_v60 = vadd.s32 4294967294, %v1876_v16  ;;  %v2421_v46 = vor.u32 %v2420_v40, %v2419_v26  ;;  %vm2423_vm12 = vcmp.lt.s32.totalorder %v4131_v58, 2  ;;  %vm2424_vm14 = vcmp.lt.s32.totalorder %v4131_v58, 3 }
 0x1b0   : > { %v1292_v2 = vmul.f32 %v1291_v33, %v1276_v54  ;;  %v1301_v7 = vxor.u32 2147483648, %v1284_v39  ;;  %vm2425_vm15 = vcmp.lt.s32.totalorder %v4131_v58, 4  ;;  %v2426_v62 = vsel %vm2422_vm13, %v2406_v13, %v2409_v51 }
 0x1b1   : > { %vm3042_vm10 = vcmp.lt.s32.totalorder %v3041_v60, 0  ;;  %v2427_v9 = vsel %vm2425_vm15, %v2415_v4, 2102212464  ;;  %v2430_v44 = vsel %vm2422_vm13, %v2409_v51, %v2412_v25  ;;  %v2431_v1 = vsel %vm2425_vm15, %v2418_v41, 920167782 }
 0x1b2   : > { %v1298_v32 = vxor.u32 2147483648, %v1292_v2  ;;  %v1302_v22 = vsel %vm1300_vm6, %v1301_v7, %v1292_v2  ;;  %v1879_v53 = vsel %vm3042_vm10, 0, %v3041_v60  ;;  %v2432_v3 = vsel %vm2424_vm14, %v2415_v4, %v2431_v1 }
 0x1b3   : > { %v1880_v29 = vsub.s32 32, %v1879_v53  ;;  %v1881_v54 = vshll.u32 %v4114_v19, %v1879_v53  ;;  %v1884_v37 = vsub.s32 4294967266, %v1879_v53  ;;  %v1914_v11 = vadd.s32 3, %v1897_v15 }
 0x1b4   : > { %v1299_v23 = vsel %vm1297_vm8, %v1284_v39, %v1298_v32  ;;  %v2433_v0 = vsel %vm2423_vm12, %v2430_v44, %v2432_v3  ;;  %v2434_v35 = vsel %vm2422_vm13, %v2412_v25, %v2415_v4  ;;  %v2435_v28 = vsel %vm2425_vm15, %v2421_v46, 1326507024 }
 0x1b5   : > { %v1303_v21 = vsel %vm1296_vm9, %v1299_v23, %v1302_v22  ;;  %v1882_v38 = vshrl.u32 %v1864_v27, %v1880_v29  ;;  %v1885_v49 = vadd.s32 127, %v1884_v37  ;;  %v2428_v27 = vsel %vm2424_vm14, %v2412_v25, %v2427_v9 }
 0x1b6   : > { %v1304_v19 = vsel %vm1293_vm11, nan, %v1303_v21  ;;  %v4186_v6 = vsel %vm2423_vm12, %v2426_v62, %v2428_v27  ;;  %v2436_v16 = vsel %vm2424_vm14, %v2418_v41, %v2435_v28  ;;  %v2463_v13 = vand.u32 65535, %v2433_v0 }
 0x1b7   : > { %2860 = vst [vmem:[%s3701_s7 + $0x28] sm:$0xff] %v1304_v19  ;;  %v1883_v34 = vor.u32 %v1882_v38, %v1881_v54  ;;  %v1886_v56 = vshll.u32 %v1885_v49, 23  ;;  %v2437_v15 = vsel %vm2423_vm12, %v2434_v35, %v2436_v16  ;;  %v2440_v10 = vshrl.u32 %v4104_v12, 16 }
 0x1b8   : > { %v2464_v45 = vshrl.u32 %v2433_v0, 16  ;;  %v2441_v24 = vand.u32 65535, %v2437_v15  ;;  %v2442_v50 = vshrl.u32 %v2437_v15, 16  ;;  %v4194_v60 = vand.u32 3, %v1914_v11 }
 0x1b9   : > { %v1887_v43 = vor.u32 4788187, %v1886_v56  ;;  %v1890_v33 = vcvt.s32.f32 %v1883_v34  ;;  %v2467_v25 = vmul.u32 %v2463_v13, %v2440_v10  ;;  %v2483_v30 = vmul.u32 %v4104_v12, %v4186_v6 }
 0x1ba   : > { %v2466_v51 = vmul.u32 %v2464_v45, %v4122_v17  ;;  %v2444_v58 = vmul.u32 %v2442_v50, %v4122_v17  ;;  %v2445_v7 = vmul.u32 %v2441_v24, %v2440_v10  ;;  %v697_v4 = vsel %vm696_vm2, %v4135_v47, 0 }
 0x1bb   : > { %v1888_v39 = vand.u32 2147483647, %v1887_v43  ;;  %v2465_v31 = vmul.u32 %v2463_v13, %v4122_v17  ;;  %v2468_v26 = vmul.u32 %v2464_v45, %v2440_v10  ;;  %v4202_v32 = vshrl.u32 %v697_v4, 5 }
 0x1bc   : > { %v2469_v40 = vshll.u32 %v2466_v51, 16  ;;  %v2443_v53 = vmul.u32 %v2441_v24, %v4122_v17  ;;  %v2446_v41 = vmul.u32 %v2442_v50, %v2440_v10  ;;  %v2447_v29 = vshll.u32 %v2444_v58, 16 }
 0x1bd   : > { %v1891_v2 = vmul.f32 %v1890_v33, %v1888_v39  ;;  %v2449_v54 = vshll.u32 %v2445_v7, 16  ;;  %v2471_v37 = vshll.u32 %v2467_v25, 16  ;;  %v2470_v1 = vshrl.u32 %v2466_v51, 16 }
 0x1be   : > { %vm2473_vm0 = vc.u32 %v2465_v31, %v2469_v40  ;;  %v2475_v46 = vadd.s32 %v2469_v40, %v2465_v31  ;;  %vm2451_vm1 = vc.u32 %v2443_v53, %v2447_v29  ;;  %v2453_v47 = vadd.s32 %v2447_v29, %v2443_v53 }
 0x1bf   : > { %v1892_v22 = vxor.u32 2147483648, %v1891_v2  ;;  %v2474_v21 = vsel %vm2473_vm0, 1, %v3245_v14  ;;  %v2452_v49 = vsel %vm2451_vm1, 1, %v3245_v14  ;;  %v699_v56 = vand.u32 31, %v697_v4 }
 0x1c0   : > { %v2476_v17 = vadd.s32 %v2474_v21, %v2468_v26  ;;  %vm2477_vm3 = vc.u32 %v2475_v46, %v2471_v37  ;;  %v2454_v19 = vadd.s32 %v2452_v49, %v2446_v41  ;;  %vm2455_vm6 = vc.u32 %v2453_v47, %v2449_v54 }
 0x1c1   : > { %v1893_v23 = vsel %vm1772_vm5, %v1892_v22, %v1891_v2  ;;  %v2478_v9 = vsel %vm2477_vm3, 1, %v3245_v14  ;;  %v2456_v44 = vsel %vm2455_vm6, 1, %v3245_v14  ;;  %v2448_v11 = vshrl.u32 %v2444_v58, 16 }
 0x1c2   : > { %v1896_v38 = vsel %vm4109_vm4, %v3880_v20, %v1893_v23  ;;  %v2480_v34 = vadd.s32 %v2478_v9, %v2476_v17  ;;  %v2458_v0 = vadd.s32 %v2456_v44, %v2454_v19  ;;  %v2450_v5 = vshrl.u32 %v2445_v7, 16 }
 0x1c3   : > { %v1898_v62 = vmul.f32 %v1896_v38, %v1896_v38  ;;  %v2472_v35 = vshrl.u32 %v2467_v25, 16  ;;  %v4214_v43 = vsub.s32 32, %v699_v56  ;;  %v4216_v10 = vadd.s32 %v2475_v46, %v2471_v37 }
 0x1c4   : > { %v2481_v28 = vadd.s32 %v2480_v34, %v2470_v1  ;;  %v2459_v15 = vadd.s32 %v2458_v0, %v2448_v11  ;;  %v702_v39 = vshll.u32 %v3239_v55, %v699_v56  ;;  %v705_v24 = vshll.u32 %v3240_v57, %v699_v56 }
 0x1c5   : > { %v1899_v27 = vmul.f32 -0.001358992, %v1898_v62  ;;  %v1906_v3 = vmul.f32 -0.00019511016, %v1898_v62  ;;  %v703_v33 = vshrl.u32 %v3240_v57, %v4214_v43  ;;  %v708_v25 = vshll.u32 %v3241_v59, %v699_v56 }
 0x1c6   : > { %v2482_v45 = vadd.s32 %v2481_v28, %v2472_v35  ;;  %v4222_v2 = vadd.s32 %v2459_v15, %v2450_v5  ;;  %v706_v7 = vshrl.u32 %v3241_v59, %v4214_v43  ;;  %v709_v4 = vshrl.u32 %v3242_v61, %v4214_v43 }
 0x1c7   : > { %v1900_v16 = vadd.f32 0.041655596, %v1899_v27  ;;  %v1907_v13 = vadd.f32 0.008332121, %v1906_v3  ;;  %v711_v31 = vshll.u32 %v3242_v61, %v699_v56  ;;  %vm717_vm5 = vcmp.lt.s32.totalorder %v4202_v32, 1 }
 0x1c8   : > { %v2486_v58 = vadd.s32 1, %v2482_v45  ;;  %vm2485_vm4 = vc.u32 %v4222_v2, %v4216_v10  ;;  %v4233_v53 = vor.u32 %v703_v33, %v702_v39  ;;  %v712_v41 = vshrl.u32 %v3243_v63, %v4214_v43 }
 0x1c9   : > { %v1901_v50 = vmul.f32 %v1900_v16, %v1898_v62  ;;  %v1908_v51 = vmul.f32 %v1907_v13, %v1898_v62  ;;  %v714_v29 = vshll.u32 %v3243_v63, %v699_v56  ;;  %v715_v23 = vshrl.u32 %v3244_v8, %v4214_v43 }
 0x1ca   : > { %v2487_v22 = vsel %vm2485_vm4, %v2486_v58, %v2482_v45  ;;  %v4243_v47 = vor.u32 %v706_v7, %v705_v24  ;;  %v710_v21 = vor.u32 %v709_v4, %v708_v25  ;;  %v713_v49 = vor.u32 %v712_v41, %v711_v31 }
 0x1cb   : > { %v1902_v26 = vadd.f32 -0.4999988, %v1901_v50  ;;  %v1909_v40 = vadd.f32 -0.16666654, %v1908_v51  ;;  %v2488_v46 = vadd.s32 %v2487_v22, %v2483_v30  ;;  %vm720_vm7 = vcmp.lt.s32.totalorder %v4202_v32, 4 }
 0x1cc   : > { %v716_v44 = vor.u32 %v715_v23, %v714_v29  ;;  %v693_v1 = vor.u32 8388608, %v4126_v36  ;;  %vm719_vm8 = vcmp.lt.s32.totalorder %v4202_v32, 3  ;;  %v726_v12 = vsel %vm720_vm7, %v713_v49, 920167782 }
 0x1cd   : > { %v1903_v54 = vmul.f32 %v1902_v26, %v1898_v62  ;;  %v1910_v37 = vmul.f32 %v1909_v40, %v1898_v62  ;;  %v2489_v9 = vadd.s32 536870912, %v2488_v46  ;;  %vm1916_vm9 = vcmp.lt.s32.totalorder %v4194_v60, 2 }
 0x1ce   : > { %vm1917_vm11 = vcmp.eq.s32.totalorder %v4194_v60, 0  ;;  %v729_v34 = vsel %vm717_vm5, %v4243_v47, %v710_v21  ;;  %v730_v36 = vsel %vm720_vm7, %v716_v44, 1326507024  ;;  %v727_v3 = vsel %vm719_vm8, %v710_v21, %v726_v12 }
 0x1cf   : > { %v1904_v17 = vadd.f32 1.0, %v1903_v54  ;;  %v1911_v19 = vadd.f32 1.0, %v1910_v37  ;;  %v4250_v62 = vshrl.u32 %v2489_v9, 30  ;;  %vm1920_vm10 = vcmp.eq.s32.totalorder %v4194_v60, 2 }
 0x1d0   : > { %vm718_vm13 = vcmp.lt.s32.totalorder %v4202_v32, 2  ;;  %v731_v11 = vsel %vm719_vm8, %v713_v49, %v730_v36  ;;  %v4270_v0 = vshll.u32 %v693_v1, 8  ;;  %vm1913_vm12 = vweird.f32 %v3880_v20  ;;  %v329_v20 = vpop.f32.mrf.mxu1 }
 0x1d1   : > { %v1912_v6 = vmul.f32 %v1911_v19, %v1896_v38  ;;  %v1921_v30 = vxor.u32 2147483648, %v1904_v17  ;;  %v2491_v27 = vshll.u32 %v4250_v62, 30  ;;  %v725_v38 = vsel %vm717_vm5, %v4233_v53, %v4243_v47 }
 0x1d2   : > { %v732_v16 = vsel %vm718_vm13, %v729_v34, %v731_v11  ;;  %v728_v15 = vsel %vm718_vm13, %v725_v38, %v727_v3  ;;  %v734_v33 = vand.u32 65535, %v4270_v0  ;;  %v735_v24 = vshrl.u32 %v4270_v0, 16 }
 0x1d3   : > { %v1918_v56 = vxor.u32 2147483648, %v1912_v6  ;;  %v1922_v35 = vsel %vm1920_vm10, %v1921_v30, %v1912_v6  ;;  %v2492_v28 = vsub.s32 %v2488_v46, %v2491_v27  ;;  %v736_v50 = vand.u32 65535, %v732_v16  ;;  %v4292_v46 = vld [vmem:[%s5132_s2] ss:$0 sm:$0xff] }
 0x1d4   : > { %v737_v51 = vshrl.u32 %v732_v16, 16  ;;  %v758_v58 = vand.u32 65535, %v728_v15  ;;  %v759_v7 = vshrl.u32 %v728_v15, 16  ;;  %v2484_v26 = vadd.s32 %v4216_v10, %v4222_v2 }
 0x1d5   : > { %v1919_v5 = vsel %vm1917_vm11, %v1904_v17, %v1918_v56  ;;  %vm2493_vm14 = vcmp.lt.s32.totalorder %v2492_v28, 0  ;;  %v2494_v39 = vsub.s32 0, %v2492_v28  ;;  %v740_v31 = vmul.u32 %v736_v50, %v735_v24 }
 0x1d6   : > { %v1923_v13 = vsel %vm1916_vm9, %v1919_v5, %v1922_v35  ;;  %v739_v60 = vmul.u32 %v737_v51, %v734_v33  ;;  %v2514_v40 = vsub.s32 4, %v4250_v62  ;;  %v701_v22 = vshrl.u32 %v3239_v55, %v4214_v43 }
 0x1d7   : > { %v1924_v45 = vsel %vm1913_vm12, nan, %v1923_v13  ;;  %v2495_v25 = vsel %vm2493_vm14, %v2494_v39, %v2492_v28  ;;  %v722_v41 = vsel %vm720_vm7, %v710_v21, 2102212464  ;;  %v738_v54 = vmul.u32 %v736_v50, %v734_v33 }
 0x1d8   : > { %2864 = vst [vmem:[%s3701_s7 + $0x48] sm:$0xff] %v1924_v45  ;;  %v2496_v4 = vclz %v2495_v25  ;;  %v742_v37 = vshll.u32 %v739_v60, 16  ;;  %v330_v23 = vadd.f32 %v4292_v46, %v329_v20  ;;  %v741_v49 = vmul.u32 %v737_v51, %v735_v24 }
 0x1d9   : > { %v743_v10 = vshrl.u32 %v739_v60, 16  ;;  %v761_v2 = vmul.u32 %v759_v7, %v734_v33  ;;  %v762_v17 = vmul.u32 %v758_v58, %v735_v24  ;;  %v744_v19 = vshll.u32 %v740_v31, 16 }
 0x1da   : > { %v3053_v29 = vadd.s32 4294967294, %v2496_v4  ;;  %vm746_vm2 = vc.u32 %v738_v54, %v742_v37  ;;  %v748_v43 = vadd.s32 %v742_v37, %v738_v54  ;;  %v760_v44 = vmul.u32 %v758_v58, %v734_v33  ;;  %v341_v58 = vpop.f32.mrf.mxu2 }
 0x1db   : > { %v747_v21 = vsel %vm746_vm2, 1, %v3245_v14  ;;  %v764_v1 = vshll.u32 %v761_v2, 16  ;;  %v763_v34 = vmul.u32 %v759_v7, %v735_v24  ;;  %v766_v56 = vshll.u32 %v762_v17, 16 }
 0x1dc   : > { %vm3054_vm15 = vcmp.lt.s32.totalorder %v3053_v29, 0  ;;  %v749_v30 = vadd.s32 %v747_v21, %v741_v49  ;;  %vm750_vm0 = vc.u32 %v748_v43, %v744_v19  ;;  %v4298_v13 = vmul.f32 30.0, %v330_v23 }
 0x1dd   : > { %v2499_v9 = vsel %vm3054_vm15, 0, %v3053_v29  ;;  %vm768_vm1 = vc.u32 %v760_v44, %v764_v1  ;;  %v751_v3 = vsel %vm750_vm0, 1, %v3245_v14  ;;  %v770_v35 = vadd.s32 %v764_v1, %v760_v44 }
 0x1de   : > { %v2500_v12 = vsub.s32 32, %v2499_v9  ;;  %v2504_v6 = vsub.s32 4294967266, %v2499_v9  ;;  %v2501_v36 = vshll.u32 %v2492_v28, %v2499_v9  ;;  %v769_v11 = vsel %vm768_vm1, 1, %v3245_v14 }
 0x1df   : > { %v753_v5 = vadd.s32 %v751_v3, %v749_v30  ;;  %v771_v16 = vadd.s32 %v769_v11, %v763_v34  ;;  %vm2392_vm3 = vcmp.lt.s32.totalorder %v4082_v18, 0  ;;  %v721_v28 = vsel %vm717_vm5, %v701_v22, %v4233_v53 }
 0x1e0   : > { %v2502_v27 = vshrl.u32 %v2484_v26, %v2500_v12  ;;  %v2505_v38 = vadd.s32 127, %v2504_v6  ;;  %vm772_vm6 = vc.u32 %v770_v35, %v766_v56  ;;  %v1305_v33 = vand.u32 2147483647, %v4298_v13 }
 0x1e1   : > { %v754_v39 = vadd.s32 %v753_v5, %v743_v10  ;;  %v723_v50 = vsel %vm719_vm8, %v4243_v47, %v722_v41  ;;  %v745_v51 = vshrl.u32 %v740_v31, 16  ;;  %v773_v25 = vsel %vm772_vm6, 1, %v3245_v14 }
 0x1e2   : > { %v2503_v15 = vor.u32 %v2502_v27, %v2501_v36  ;;  %v2506_v45 = vshll.u32 %v2505_v38, 23  ;;  %v2515_v7 = vsel %vm2392_vm3, %v2514_v40, %v4250_v62  ;;  %v765_v20 = vshrl.u32 %v761_v2, 16 }
 0x1e3   : > { %v775_v4 = vadd.s32 %v773_v25, %v771_v16  ;;  %v1308_v53 = vand.u32 2139095040, %v4298_v13  ;;  %v755_v22 = vadd.s32 %v754_v39, %v745_v51  ;;  %v767_v29 = vshrl.u32 %v762_v17, 16 }
 0x1e4   : > { %v2507_v24 = vor.u32 4788187, %v2506_v45  ;;  %v2510_v26 = vcvt.s32.f32 %v2503_v15  ;;  %v1312_v47 = vand.u32 8388607, %v1305_v33  ;;  %v342_v31 = vadd.f32 %v4292_v46, %v341_v58 }
 0x1e5   : > { %v776_v54 = vadd.s32 %v775_v4, %v765_v20  ;;  %v1309_v37 = vshrl.u32 %v1308_v53, 23  ;;  %v774_v23 = vadd.s32 %v770_v35, %v766_v56  ;;  %vm2391_vm4 = vcmp.le.f32.partialorder %v2390_v52, 0.7853982 }
 0x1e6   : > { %v2508_v60 = vand.u32 2147483647, %v2507_v24  ;;  %v724_v62 = vsel %vm718_vm13, %v721_v28, %v723_v50  ;;  %v2517_v2 = vsel %vm2391_vm4, 0, %v2515_v7  ;;  %v1313_v19 = vor.u32 8388608, %v1312_v47 }
 0x1e7   : > { %v777_v40 = vadd.s32 %v776_v54, %v767_v29  ;;  %v3031_v49 = vadd.s32 4294967169, %v1309_v37  ;;  %vm780_vm5 = vc.u32 %v755_v22, %v774_v23  ;;  %v4320_v9 = vmul.f32 30.0, %v342_v31 }
 0x1e8   : > { %v2511_v41 = vmul.f32 %v2510_v26, %v2508_v60  ;;  %v778_v44 = vmul.u32 %v4270_v0, %v724_v62  ;;  %v2534_v1 = vadd.s32 3, %v2517_v2  ;;  %v4326_v36 = vshll.u32 %v1313_v19, 8 }
 0x1e9   : > { %v781_v17 = vadd.s32 1, %v777_v40  ;;  %v1315_v43 = vadd.s32 1, %v3031_v49  ;;  %v1928_v56 = vand.u32 2139095040, %v4320_v9  ;;  %v4331_v16 = vadd.s32 %v774_v23, %v755_v22 }
 0x1ea   : > { %v2512_v10 = vxor.u32 2147483648, %v2511_v41  ;;  %v4329_v11 = vand.u32 3, %v2534_v1  ;;  %v4335_v28 = vand.u32 65535, %v4326_v36  ;;  %v1925_v39 = vand.u32 2147483647, %v4320_v9 }
 0x1eb   : > { %v782_v32 = vsel %vm780_vm5, %v781_v17, %v777_v40  ;;  %vm1316_vm7 = vcmp.gt.s32.totalorder %v1315_v43, 0  ;;  %v1929_v24 = vshrl.u32 %v1928_v56, 23  ;;  %vm687_vm8 = vcmp.lt.s32.totalorder %v4090_v42, 0 }
 0x1ec   : > { %v2513_v21 = vsel %vm2392_vm3, %v2512_v10, %v2511_v41  ;;  %v783_v6 = vadd.s32 %v782_v32, %v778_v44  ;;  %v1317_v30 = vsel %vm1316_vm7, %v1315_v43, 0  ;;  %vm2540_vm9 = vcmp.eq.s32.totalorder %v4329_v11, 2 }
 0x1ed   : > { %v2516_v52 = vsel %vm2391_vm4, %v4082_v18, %v2513_v21  ;;  %v1319_v34 = vand.u32 31, %v1317_v30  ;;  %v4347_v29 = vshrl.u32 %v1317_v30, 5  ;;  %vm2537_vm11 = vcmp.eq.s32.totalorder %v4329_v11, 0 }
 0x1ee   : > { %v2518_v12 = vmul.f32 %v2516_v52, %v2516_v52  ;;  %v784_v3 = vadd.s32 536870912, %v783_v6  ;;  %vm2536_vm10 = vcmp.lt.s32.totalorder %v4329_v11, 2  ;;  %vm2533_vm12 = vweird.f32 %v4082_v18 }
 0x1ef   : > { %v1320_v5 = vsub.s32 32, %v1319_v34  ;;  %v1322_v45 = vshll.u32 %v3239_v55, %v1319_v34  ;;  %v1325_v58 = vshll.u32 %v3240_v57, %v1319_v34  ;;  %v1331_v4 = vshll.u32 %v3242_v61, %v1319_v34 }
 0x1f0   : > { %v2519_v27 = vmul.f32 -0.001358992, %v2518_v12  ;;  %v2526_v38 = vmul.f32 -0.00019511016, %v2518_v12  ;;  %v785_v15 = vshrl.u32 %v784_v3, 30  ;;  %v1328_v54 = vshll.u32 %v3241_v59, %v1319_v34 }
 0x1f1   : > { %v1323_v7 = vshrl.u32 %v3240_v57, %v1320_v5  ;;  %v1326_v20 = vshrl.u32 %v3241_v59, %v1320_v5  ;;  %v1332_v53 = vshrl.u32 %v3243_v63, %v1320_v5  ;;  %v1329_v37 = vshrl.u32 %v3242_v61, %v1320_v5 }
 0x1f2   : > { %v2520_v0 = vadd.f32 0.041655596, %v2519_v27  ;;  %v2527_v35 = vadd.f32 0.008332121, %v2526_v38  ;;  %v786_v25 = vshll.u32 %v785_v15, 30  ;;  %v1334_v47 = vshll.u32 %v3243_v63, %v1319_v34 }
 0x1f3   : > { %v1335_v31 = vshrl.u32 %v3244_v8, %v1320_v5  ;;  %v809_v40 = vsub.s32 4, %v785_v15  ;;  %v1324_v49 = vor.u32 %v1323_v7, %v1322_v45  ;;  %v1327_v10 = vor.u32 %v1326_v20, %v1325_v58 }
 0x1f4   : > { %v2521_v50 = vmul.f32 %v2520_v0, %v2518_v12  ;;  %v2528_v51 = vmul.f32 %v2527_v35, %v2518_v12  ;;  %v4345_v22 = vsub.s32 %v783_v6, %v786_v25  ;;  %v1333_v2 = vor.u32 %v1332_v53, %v1331_v4 }
 0x1f5   : > { %vm1337_vm14 = vcmp.lt.s32.totalorder %v4347_v29, 1  ;;  %v1330_v44 = vor.u32 %v1329_v37, %v1328_v54  ;;  %vm1340_vm15 = vcmp.lt.s32.totalorder %v4347_v29, 4  ;;  %v1355_v1 = vshrl.u32 %v4326_v36, 16 }
 0x1f6   : > { %v2522_v60 = vadd.f32 -0.4999988, %v2521_v50  ;;  %v2529_v26 = vadd.f32 -0.16666654, %v2528_v51  ;;  %vm788_vm13 = vcmp.lt.s32.totalorder %v4345_v22, 0  ;;  %v789_v62 = vsub.s32 0, %v4345_v22 }
 0x1f7   : > { %vm4364_vm2 = vcmp.le.f32.partialorder %v685_v48, 0.7853982  ;;  %v1336_v30 = vor.u32 %v1335_v31, %v1334_v47  ;;  %vm1339_vm0 = vcmp.lt.s32.totalorder %v4347_v29, 3  ;;  %v1321_v56 = vshrl.u32 %v3239_v55, %v1320_v5 }
 0x1f8   : > { %v2523_v41 = vmul.f32 %v2522_v60, %v2518_v12  ;;  %v2530_v23 = vmul.f32 %v2529_v26, %v2518_v12  ;;  %v790_v43 = vsel %vm788_vm13, %v789_v62, %v4345_v22  ;;  %v1345_v27 = vsel %vm1337_vm14, %v1324_v49, %v1327_v10 }
 0x1f9   : > { %v791_v21 = vclz %v790_v43  ;;  %v3043_v38 = vadd.s32 4294967169, %v1929_v24  ;;  %vm1338_vm1 = vcmp.lt.s32.totalorder %v4347_v29, 2  ;;  %v1346_v48 = vsel %vm1340_vm15, %v1333_v2, 920167782 }
 0x1fa   : > { %v2524_v17 = vadd.f32 1.0, %v2523_v41  ;;  %v2531_v19 = vadd.f32 1.0, %v2530_v23  ;;  %v1347_v5 = vsel %vm1339_vm0, %v1330_v44, %v1346_v48  ;;  %v1349_v35 = vsel %vm1337_vm14, %v1327_v10, %v1330_v44 }
 0x1fb   : > { %v3020_v34 = vadd.s32 4294967294, %v791_v21  ;;  %v1348_v24 = vsel %vm1338_vm1, %v1345_v27, %v1347_v5  ;;  %v1350_v50 = vsel %vm1340_vm15, %v1336_v30, 1326507024  ;;  %v1342_v7 = vsel %vm1340_vm15, %v1330_v44, 2102212464 }
 0x1fc   : > { %v2532_v32 = vmul.f32 %v2531_v19, %v2516_v52  ;;  %v2541_v12 = vxor.u32 2147483648, %v2524_v17  ;;  %v4374_v52 = vsel %vm687_vm8, %v809_v40, %v785_v15  ;;  %v1351_v4 = vsel %vm1339_vm0, %v1333_v2, %v1350_v50 }
 0x1fd   : > { %vm3021_vm3 = vcmp.lt.s32.totalorder %v3020_v34, 0  ;;  %v1378_v53 = vand.u32 65535, %v1348_v24  ;;  %v1379_v60 = vshrl.u32 %v1348_v24, 16  ;;  %v1352_v37 = vsel %vm1338_vm1, %v1349_v35, %v1351_v4 }
 0x1fe   : > { %v2538_v3 = vxor.u32 2147483648, %v2532_v32  ;;  %v2542_v0 = vsel %vm2540_vm9, %v2541_v12, %v2532_v32  ;;  %v794_v45 = vsel %vm3021_vm3, 0, %v3020_v34  ;;  %v1356_v47 = vand.u32 65535, %v1352_v37 }
 0x1ff   : > { %v795_v25 = vsub.s32 32, %v794_v45  ;;  %v799_v58 = vsub.s32 4294967266, %v794_v45  ;;  %v796_v26 = vshll.u32 %v4345_v22, %v794_v45  ;;  %v1357_v31 = vshrl.u32 %v1352_v37, 16 }
 0x200   : > { %v2539_v15 = vsel %vm2537_vm11, %v2524_v17, %v2538_v3  ;;  %v1381_v41 = vmul.u32 %v1379_v60, %v4335_v28  ;;  %v1935_v18 = vadd.s32 1, %v3043_v38  ;;  %v812_v40 = vsel %vm4364_vm2, 0, %v4374_v52 }
 0x201   : > { %v2543_v51 = vsel %vm2536_vm10, %v2539_v15, %v2542_v0  ;;  %v797_v54 = vshrl.u32 %v4331_v16, %v795_v25  ;;  %v800_v11 = vadd.s32 127, %v799_v58  ;;  %v1382_v2 = vmul.u32 %v1378_v53, %v1355_v1 }
 0x202   : > { %v2544_v20 = vsel %vm2533_vm12, nan, %v2543_v51  ;;  %v1341_v22 = vsel %vm1337_vm14, %v1321_v56, %v1324_v49  ;;  %v1343_v16 = vsel %vm1339_vm0, %v1327_v10, %v1342_v7  ;;  %v1359_v17 = vmul.u32 %v1357_v31, %v4335_v28 }
 0x203   : > { %2868 = vst [vmem:[%s3701_s7 + $0x68] sm:$0xff] %v2544_v20  ;;  %v798_v23 = vor.u32 %v797_v54, %v796_v26  ;;  %v801_v62 = vshll.u32 %v800_v11, 23  ;;  %v1360_v19 = vmul.u32 %v1356_v47, %v1355_v1  ;;  %v1380_v21 = vmul.u32 %v1378_v53, %v4335_v28 }
 0x204   : > { %v1383_v44 = vmul.u32 %v1379_v60, %v1355_v1  ;;  %v1384_v32 = vshll.u32 %v1381_v41, 16  ;;  %v1358_v30 = vmul.u32 %v1356_v47, %v4335_v28  ;;  %v1361_v34 = vmul.u32 %v1357_v31, %v1355_v1 }
 0x205   : > { %v802_v43 = vor.u32 4788187, %v801_v62  ;;  %v805_v12 = vcvt.s32.f32 %v798_v23  ;;  %v1362_v27 = vshll.u32 %v1359_v17, 16  ;;  %v1364_v3 = vshll.u32 %v1360_v19, 16 }
 0x206   : > { %v1386_v52 = vshll.u32 %v1382_v2, 16  ;;  %vm1388_vm6 = vc.u32 %v1380_v21, %v1384_v32  ;;  %v1390_v56 = vadd.s32 %v1384_v32, %v1380_v21  ;;  %vm1936_vm5 = vcmp.gt.s32.totalorder %v1935_v18, 0 }
 0x207   : > { %v803_v38 = vand.u32 2147483647, %v802_v43  ;;  %vm1366_vm4 = vc.u32 %v1358_v30, %v1362_v27  ;;  %v1368_v49 = vadd.s32 %v1362_v27, %v1358_v30  ;;  %v1389_v10 = vsel %vm1388_vm6, 1, %v3245_v14 }
 0x208   : > { %v1367_v0 = vsel %vm1366_vm4, 1, %v3245_v14  ;;  %v1391_v5 = vadd.s32 %v1389_v10, %v1383_v44  ;;  %v1385_v15 = vshrl.u32 %v1381_v41, 16  ;;  %vm1392_vm9 = vc.u32 %v1390_v56, %v1386_v52 }
 0x209   : > { %v806_v48 = vmul.f32 %v805_v12, %v803_v38  ;;  %v1369_v35 = vadd.s32 %v1367_v0, %v1361_v34  ;;  %vm1370_vm7 = vc.u32 %v1368_v49, %v1364_v3  ;;  %v1393_v45 = vsel %vm1392_vm9, 1, %v3245_v14 }
 0x20a   : > { %v1371_v1 = vsel %vm1370_vm7, 1, %v3245_v14  ;;  %v1937_v24 = vsel %vm1936_vm5, %v1935_v18, 0  ;;  %v1363_v50 = vshrl.u32 %v1359_v17, 16  ;;  %v1395_v25 = vadd.s32 %v1393_v45, %v1391_v5 }
 0x20b   : > { %v807_v28 = vxor.u32 2147483648, %v806_v48  ;;  %v1373_v51 = vadd.s32 %v1371_v1, %v1369_v35  ;;  %v1939_v58 = vand.u32 31, %v1937_v24  ;;  %v1344_v20 = vsel %vm1338_vm1, %v1341_v22, %v1343_v16 }
 0x20c   : > { %v1365_v4 = vshrl.u32 %v1360_v19, 16  ;;  %v1387_v53 = vshrl.u32 %v1382_v2, 16  ;;  %v1396_v54 = vadd.s32 %v1395_v25, %v1385_v15  ;;  %v829_v47 = vadd.s32 3, %v812_v40 }
 0x20d   : > { %v808_v7 = vsel %vm687_vm8, %v807_v28, %v806_v48  ;;  %v1374_v26 = vadd.s32 %v1373_v51, %v1363_v50  ;;  %v4426_v11 = vsub.s32 32, %v1939_v58  ;;  %v1932_v31 = vand.u32 8388607, %v1925_v39 }
 0x20e   : > { %v811_v60 = vsel %vm4364_vm2, %v4090_v42, %v808_v7  ;;  %v4432_v18 = vadd.s32 %v1390_v56, %v1386_v52  ;;  %v1397_v29 = vadd.s32 %v1396_v54, %v1387_v53  ;;  %v1398_v23 = vmul.u32 %v4326_v36, %v1344_v20 }
 0x20f   : > { %v813_v37 = vmul.f32 %v811_v60, %v811_v60  ;;  %v4430_v41 = vadd.s32 %v1374_v26, %v1365_v4  ;;  %v4435_v6 = vshrl.u32 %v1937_v24, 5  ;;  %v1945_v22 = vshll.u32 %v3240_v57, %v1939_v58 }
 0x210   : > { %v1401_v40 = vadd.s32 1, %v1397_v29  ;;  %v1946_v16 = vshrl.u32 %v3241_v59, %v4426_v11  ;;  %v1949_v17 = vshrl.u32 %v3242_v61, %v4426_v11  ;;  %v1943_v36 = vshrl.u32 %v3240_v57, %v4426_v11 }
 0x211   : > { %v814_v62 = vmul.f32 -0.001358992, %v813_v37  ;;  %v821_v2 = vmul.f32 -0.00019511016, %v813_v37  ;;  %vm1400_vm8 = vc.u32 %v4430_v41, %v4432_v18  ;;  %v1948_v21 = vshll.u32 %v3241_v59, %v1939_v58 }
 0x212   : > { %v1402_v44 = vsel %vm1400_vm8, %v1401_v40, %v1397_v29  ;;  %v1951_v32 = vshll.u32 %v3242_v61, %v1939_v58  ;;  %v1952_v12 = vshrl.u32 %v3243_v63, %v4426_v11  ;;  %v1954_v30 = vshll.u32 %v3243_v63, %v1939_v58 }
 0x213   : > { %v815_v19 = vadd.f32 0.041655596, %v814_v62  ;;  %v822_v43 = vadd.f32 0.008332121, %v821_v2  ;;  %v1403_v38 = vadd.s32 %v1402_v44, %v1398_v23  ;;  %v1955_v3 = vshrl.u32 %v3244_v8, %v4426_v11  ;;  %v353_v23 = vpop.f32.mrf.mxu3 }
 0x214   : > { %v1942_v52 = vshll.u32 %v3239_v55, %v1939_v58  ;;  %v4454_v49 = vor.u32 %v1946_v16, %v1945_v22  ;;  %v1950_v10 = vor.u32 %v1949_v17, %v1948_v21  ;;  %v1953_v56 = vor.u32 %v1952_v12, %v1951_v32 }
 0x215   : > { %v816_v34 = vmul.f32 %v815_v19, %v813_v37  ;;  %v823_v27 = vmul.f32 %v822_v43, %v813_v37  ;;  %v1404_v5 = vadd.s32 536870912, %v1403_v38  ;;  %v1956_v35 = vor.u32 %v1955_v3, %v1954_v30 }
 0x216   : > { %v830_v15 = vand.u32 3, %v829_v47  ;;  %v1933_v28 = vor.u32 8388608, %v1932_v31  ;;  %v4456_v1 = vor.u32 %v1943_v36, %v1942_v52  ;;  %vm1960_vm11 = vcmp.lt.s32.totalorder %v4435_v6, 4 }
 0x217   : > { %v817_v48 = vadd.f32 -0.4999988, %v816_v34  ;;  %v824_v0 = vadd.f32 -0.16666654, %v823_v27  ;;  %v4458_v50 = vshrl.u32 %v1404_v5, 30  ;;  %vm828_vm10 = vweird.f32 %v4090_v42 }
 0x218   : > { %vm1957_vm13 = vcmp.lt.s32.totalorder %v4435_v6, 1  ;;  %vm1959_vm12 = vcmp.lt.s32.totalorder %v4435_v6, 3  ;;  %v1966_v51 = vsel %vm1960_vm11, %v1953_v56, 920167782  ;;  %v1970_v25 = vsel %vm1960_vm11, %v1956_v35, 1326507024 }
 0x219   : > { %v818_v45 = vmul.f32 %v817_v48, %v813_v37  ;;  %v825_v24 = vmul.f32 %v824_v0, %v813_v37  ;;  %v1406_v20 = vshll.u32 %v4458_v50, 30  ;;  %v1969_v4 = vsel %vm1957_vm13, %v4454_v49, %v1950_v10 }
 0x21a   : > { %v1965_v53 = vsel %vm1957_vm13, %v4456_v1, %v4454_v49  ;;  %v1967_v26 = vsel %vm1959_vm12, %v1950_v10, %v1966_v51  ;;  %v1971_v54 = vsel %vm1959_vm12, %v1953_v56, %v1970_v25  ;;  %v4480_v37 = vshll.u32 %v1933_v28, 8 }
 0x21b   : > { %v819_v58 = vadd.f32 1.0, %v818_v45  ;;  %v826_v7 = vadd.f32 1.0, %v825_v24  ;;  %v1407_v29 = vsub.s32 %v1403_v38, %v1406_v20  ;;  %vm1958_vm14 = vcmp.lt.s32.totalorder %v4435_v6, 2 }
 0x21c   : > { %vm831_vm15 = vcmp.lt.s32.totalorder %v830_v15, 2  ;;  %vm832_vm2 = vcmp.eq.s32.totalorder %v830_v15, 0  ;;  %vm835_vm0 = vcmp.eq.s32.totalorder %v830_v15, 2  ;;  %v1972_v62 = vsel %vm1958_vm14, %v1969_v4, %v1971_v54 }
 0x21d   : > { %v827_v47 = vmul.f32 %v826_v7, %v811_v60  ;;  %v836_v31 = vxor.u32 2147483648, %v819_v58  ;;  %vm1408_vm1 = vcmp.lt.s32.totalorder %v1407_v29, 0  ;;  %v1409_v22 = vsub.s32 0, %v1407_v29 }
 0x21e   : > { %v1968_v40 = vsel %vm1958_vm14, %v1965_v53, %v1967_v26  ;;  %v1974_v16 = vand.u32 65535, %v4480_v37  ;;  %v1976_v60 = vand.u32 65535, %v1972_v62  ;;  %v1977_v17 = vshrl.u32 %v1972_v62, 16 }
 0x21f   : > { %v833_v2 = vxor.u32 2147483648, %v827_v47  ;;  %v354_v19 = vadd.f32 %v4292_v46, %v353_v23  ;;  %v837_v36 = vsel %vm835_vm0, %v836_v31, %v827_v47  ;;  %v1410_v21 = vsel %vm1408_vm1, %v1409_v22, %v1407_v29 }
 0x220   : > { %v1975_v44 = vshrl.u32 %v4480_v37, 16  ;;  %v1411_v12 = vclz %v1410_v21  ;;  %v1941_v30 = vshrl.u32 %v3239_v55, %v4426_v11  ;;  %v1999_v34 = vshrl.u32 %v1968_v40, 16 }
 0x221   : > { %v834_v43 = vsel %vm832_vm2, %v819_v58, %v833_v2  ;;  %v1979_v38 = vmul.u32 %v1977_v17, %v1974_v16  ;;  %v1998_v52 = vand.u32 65535, %v1968_v40  ;;  %v1399_v56 = vadd.s32 %v4432_v18, %v4430_v41 }
 0x222   : > { %v838_v32 = vsel %vm831_vm15, %v834_v43, %v837_v36  ;;  %v1980_v3 = vmul.u32 %v1976_v60, %v1975_v44  ;;  %v3032_v48 = vadd.s32 4294967294, %v1411_v12  ;;  %v1429_v0 = vsub.s32 4, %v4458_v50 }
 0x223   : > { %v839_v27 = vsel %vm828_vm10, nan, %v838_v32  ;;  %v1962_v5 = vsel %vm1960_vm11, %v1950_v10, 2102212464  ;;  %v1978_v35 = vmul.u32 %v1976_v60, %v1974_v16  ;;  %v1981_v15 = vmul.u32 %v1977_v17, %v1975_v44  ;;  %v320_v32 = vpop.f32.mrf.mxu0 }
 0x224   : > { %2857 = vst [vmem:[%s3701_s7 + $0x10] sm:$0xff] %v839_v27  ;;  %v1982_v11 = vshll.u32 %v1979_v38, 16  ;;  %v4501_v28 = vmul.f32 30.0, %v354_v19  ;;  %vm1307_vm3 = vcmp.lt.s32.totalorder %v4298_v13, 0  ;;  %vm3033_vm6 = vcmp.lt.s32.totalorder %v3032_v48, 0 }
 0x225   : > { %v1983_v42 = vshrl.u32 %v1979_v38, 16  ;;  %v1984_v45 = vshll.u32 %v1980_v3, 16  ;;  %v2001_v24 = vmul.u32 %v1999_v34, %v1974_v16  ;;  %v1414_v51 = vsel %vm3033_vm6, 0, %v3032_v48 }
 0x226   : > { %vm1986_vm4 = vc.u32 %v1978_v35, %v1982_v11  ;;  %v1988_v41 = vadd.s32 %v1982_v11, %v1978_v35  ;;  %v2002_v18 = vmul.u32 %v1998_v52, %v1975_v44  ;;  %v1415_v25 = vsub.s32 32, %v1414_v51 }
 0x227   : > { %v1419_v58 = vsub.s32 4294967266, %v1414_v51  ;;  %v1987_v7 = vsel %vm1986_vm4, 1, %v3245_v14  ;;  %v2000_v10 = vmul.u32 %v1998_v52, %v1974_v16  ;;  %v2003_v4 = vmul.u32 %v1999_v34, %v1975_v44 }
 0x228   : > { %v1989_v20 = vadd.s32 %v1987_v7, %v1981_v15  ;;  %vm1990_vm5 = vc.u32 %v1988_v41, %v1984_v45  ;;  %v2004_v53 = vshll.u32 %v2001_v24, 16  ;;  %v1416_v26 = vshll.u32 %v1407_v29, %v1414_v51 }
 0x229   : > { %v1417_v54 = vshrl.u32 %v1399_v56, %v1415_v25  ;;  %v1420_v47 = vadd.s32 127, %v1419_v58  ;;  %v1991_v31 = vsel %vm1990_vm5, 1, %v3245_v14  ;;  %v2006_v62 = vshll.u32 %v2002_v18, 16 }
 0x22a   : > { %v1993_v23 = vadd.s32 %v1991_v31, %v1989_v20  ;;  %vm2008_vm7 = vc.u32 %v2000_v10, %v2004_v53  ;;  %v2010_v2 = vadd.s32 %v2004_v53, %v2000_v10  ;;  %v1961_v60 = vsel %vm1957_vm13, %v1941_v30, %v4456_v1 }
 0x22b   : > { %v1418_v22 = vor.u32 %v1417_v54, %v1416_v26  ;;  %v1421_v40 = vshll.u32 %v1420_v47, 23  ;;  %v2009_v16 = vsel %vm2008_vm7, 1, %v3245_v14  ;;  %v2545_v29 = vand.u32 2147483647, %v4501_v28 }
 0x22c   : > { %v1994_v17 = vadd.s32 %v1993_v23, %v1983_v42  ;;  %v2011_v19 = vadd.s32 %v2009_v16, %v2003_v4  ;;  %vm2012_vm9 = vc.u32 %v2010_v2, %v2006_v62  ;;  %v1963_v36 = vsel %vm1959_vm12, %v4454_v49, %v1962_v5 }
 0x22d   : > { %v1422_v43 = vor.u32 4788187, %v1421_v40  ;;  %v1985_v21 = vshrl.u32 %v1980_v3, 16  ;;  %v2013_v44 = vsel %vm2012_vm9, 1, %v3245_v14  ;;  %v1430_v1 = vsel %vm1307_vm3, %v1429_v0, %v4458_v50 }
 0x22e   : > { %v2005_v12 = vshrl.u32 %v2001_v24, 16  ;;  %v2015_v30 = vadd.s32 %v2013_v44, %v2011_v19  ;;  %v2548_v34 = vand.u32 2139095040, %v4501_v28  ;;  %v1425_v38 = vcvt.s32.f32 %v1418_v22 }
 0x22f   : > { %v1423_v27 = vand.u32 2147483647, %v1422_v43  ;;  %v1995_v52 = vadd.s32 %v1994_v17, %v1985_v21  ;;  %v2007_v56 = vshrl.u32 %v2002_v18, 16  ;;  %v2552_v49 = vand.u32 8388607, %v2545_v29 }
 0x230   : > { %v2016_v48 = vadd.s32 %v2015_v30, %v2005_v12  ;;  %v2549_v35 = vshrl.u32 %v2548_v34, 23  ;;  %v321_v3 = vadd.f32 %v4292_v46, %v320_v32  ;;  %v2014_v15 = vadd.s32 %v2010_v2, %v2006_v62 }
 0x231   : > { %v1426_v5 = vmul.f32 %v1425_v38, %v1423_v27  ;;  %vm4524_vm8 = vcmp.le.f32.partialorder %v1305_v33, 0.7853982  ;;  %v1964_v0 = vsel %vm1958_vm14, %v1961_v60, %v1963_v36  ;;  %v2553_v46 = vor.u32 8388608, %v2552_v49 }
 0x232   : > { %v2017_v11 = vadd.s32 %v2016_v48, %v2007_v56  ;;  %v3055_v42 = vadd.s32 4294967169, %v2549_v35  ;;  %v1432_v24 = vsel %vm4524_vm8, 0, %v1430_v1  ;;  %vm2020_vm11 = vc.u32 %v1995_v52, %v2014_v15 }
 0x233   : > { %v1427_v45 = vxor.u32 2147483648, %v1426_v5  ;;  %v4532_v18 = vmul.f32 30.0, %v321_v3  ;;  %v2018_v25 = vmul.u32 %v4480_v37, %v1964_v0  ;;  %v1449_v10 = vadd.s32 3, %v1432_v24 }
 0x234   : > { %v2021_v51 = vadd.s32 1, %v2017_v11  ;;  %v2555_v41 = vadd.s32 1, %v3055_v42  ;;  %v4540_v26 = vshll.u32 %v2553_v46, 8  ;;  %v4547_v60 = vadd.s32 %v2014_v15, %v1995_v52 }
 0x235   : > { %v1428_v33 = vsel %vm1307_vm3, %v1427_v45, %v1426_v5  ;;  %v843_v54 = vand.u32 2139095040, %v4532_v18  ;;  %v4543_v22 = vand.u32 3, %v1449_v10  ;;  %vm1448_vm2 = vweird.f32 %v4298_v13 }
 0x236   : > { %v1431_v6 = vsel %vm4524_vm8, %v4298_v13, %v1428_v33  ;;  %v2022_v58 = vsel %vm2020_vm11, %v2021_v51, %v2017_v11  ;;  %vm2556_vm10 = vcmp.gt.s32.totalorder %v2555_v41, 0  ;;  %v4550_v16 = vand.u32 65535, %v4540_v26 }
 0x237   : > { %v1433_v7 = vmul.f32 %v1431_v6, %v1431_v6  ;;  %v2023_v20 = vadd.s32 %v2022_v58, %v2018_v25  ;;  %v2557_v4 = vsel %vm2556_vm10, %v2555_v41, 0  ;;  %v4553_v17 = vshrl.u32 %v4540_v26, 16 }
 0x238   : > { %v2559_v53 = vand.u32 31, %v2557_v4  ;;  %v4555_v19 = vshrl.u32 %v843_v54, 23  ;;  %v4558_v44 = vshrl.u32 %v2557_v4, 5  ;;  %vm1455_vm13 = vcmp.eq.s32.totalorder %v4543_v22, 2 }
 0x239   : > { %v1434_v47 = vmul.f32 -0.001358992, %v1433_v7  ;;  %v1441_v31 = vmul.f32 -0.00019511016, %v1433_v7  ;;  %v2024_v23 = vadd.s32 536870912, %v2023_v20  ;;  %vm1452_vm12 = vcmp.eq.s32.totalorder %v4543_v22, 0 }
 0x23a   : > { %v2560_v62 = vsub.s32 32, %v2559_v53  ;;  %v2562_v32 = vshll.u32 %v3239_v55, %v2559_v53  ;;  %v2565_v56 = vshll.u32 %v3240_v57, %v2559_v53  ;;  %v2568_v48 = vshll.u32 %v3241_v59, %v2559_v53 }
 0x23b   : > { %v1435_v37 = vadd.f32 0.041655596, %v1434_v47  ;;  %v1442_v2 = vadd.f32 0.008332121, %v1441_v31  ;;  %v4545_v40 = vshrl.u32 %v2024_v23, 30  ;;  %v2571_v35 = vshll.u32 %v3242_v61, %v2559_v53 }
 0x23c   : > { %v2563_v1 = vshrl.u32 %v3240_v57, %v2560_v62  ;;  %v2566_v12 = vshrl.u32 %v3241_v59, %v2560_v62  ;;  %v2569_v30 = vshrl.u32 %v3242_v61, %v2560_v62  ;;  %v2572_v52 = vshrl.u32 %v3243_v63, %v2560_v62 }
 0x23d   : > { %v1436_v43 = vmul.f32 %v1435_v37, %v1433_v7  ;;  %v1443_v36 = vmul.f32 %v1442_v2, %v1433_v7  ;;  %v2026_v21 = vshll.u32 %v4545_v40, 30  ;;  %v2575_v49 = vshrl.u32 %v3244_v8, %v2560_v62 }
 0x23e   : > { %vm1451_vm14 = vcmp.lt.s32.totalorder %v4543_v22, 2  ;;  %v2564_v50 = vor.u32 %v2563_v1, %v2562_v32  ;;  %v2567_v0 = vor.u32 %v2566_v12, %v2565_v56  ;;  %v2570_v11 = vor.u32 %v2569_v30, %v2568_v48 }
 0x23f   : > { %v1437_v34 = vadd.f32 -0.4999988, %v1436_v43  ;;  %v1444_v27 = vadd.f32 -0.16666654, %v1443_v36  ;;  %v4565_v38 = vsub.s32 %v2023_v20, %v2026_v21  ;;  %v2574_v42 = vshll.u32 %v3243_v63, %v2559_v53 }
 0x240   : > { %v2573_v46 = vor.u32 %v2572_v52, %v2571_v35  ;;  %v2049_v33 = vsub.s32 4, %v4545_v40  ;;  %v2561_v25 = vshrl.u32 %v3239_v55, %v2560_v62  ;;  %vm2577_vm0 = vcmp.lt.s32.totalorder %v4558_v44, 1 }
 0x241   : > { %v1438_v3 = vmul.f32 %v1437_v34, %v1433_v7  ;;  %v1445_v5 = vmul.f32 %v1444_v27, %v1433_v7  ;;  %vm2028_vm15 = vcmp.lt.s32.totalorder %v4565_v38, 0  ;;  %v2029_v15 = vsub.s32 0, %v4565_v38 }
 0x242   : > { %v2576_v58 = vor.u32 %v2575_v49, %v2574_v42  ;;  %vm2578_vm1 = vcmp.lt.s32.totalorder %v4558_v44, 2  ;;  %vm1927_vm3 = vcmp.lt.s32.totalorder %v4320_v9, 0  ;;  %vm2579_vm6 = vcmp.lt.s32.totalorder %v4558_v44, 3 }
 0x243   : > { %v1439_v45 = vadd.f32 1.0, %v1438_v3  ;;  %v1446_v24 = vadd.f32 1.0, %v1445_v5  ;;  %v2030_v51 = vsel %vm2028_vm15, %v2029_v15, %v4565_v38  ;;  %vm2580_vm4 = vcmp.lt.s32.totalorder %v4558_v44, 4 }
 0x244   : > { %v2031_v41 = vclz %v2030_v51  ;;  %v2585_v4 = vsel %vm2577_vm0, %v2564_v50, %v2567_v0  ;;  %v2581_v54 = vsel %vm2577_vm0, %v2561_v25, %v2564_v50  ;;  %v2582_v47 = vsel %vm2580_vm4, %v2570_v11, 2102212464 }
 0x245   : > { %v1447_v7 = vmul.f32 %v1446_v24, %v1431_v6  ;;  %v1456_v10 = vxor.u32 2147483648, %v1439_v45  ;;  %v2586_v31 = vsel %vm2580_vm4, %v2573_v46, 920167782  ;;  %v2589_v62 = vsel %vm2577_vm0, %v2567_v0, %v2570_v11 }
 0x246   : > { %v3044_v20 = vadd.s32 4294967294, %v2031_v41  ;;  %v2587_v23 = vsel %vm2579_vm6, %v2570_v11, %v2586_v31  ;;  %v2590_v36 = vsel %vm2580_vm4, %v2576_v58, 1326507024  ;;  %v2583_v12 = vsel %vm2579_vm6, %v2567_v0, %v2582_v47 }
 0x247   : > { %v1453_v53 = vxor.u32 2147483648, %v1447_v7  ;;  %v1457_v6 = vsel %vm1455_vm13, %v1456_v10, %v1447_v7  ;;  %v2588_v43 = vsel %vm2578_vm1, %v2585_v4, %v2587_v23  ;;  %v2591_v34 = vsel %vm2579_vm6, %v2573_v46, %v2590_v36 }
 0x248   : > { %vm3045_vm5 = vcmp.lt.s32.totalorder %v3044_v20, 0  ;;  %v2618_v27 = vand.u32 65535, %v2588_v43  ;;  %v2619_v52 = vshrl.u32 %v2588_v43, 16  ;;  %v2592_v35 = vsel %vm2578_vm1, %v2589_v62, %v2591_v34 }
 0x249   : > { %v1454_v37 = vsel %vm1452_vm12, %v1439_v45, %v1453_v53  ;;  %v2034_v2 = vsel %vm3045_vm5, 0, %v3044_v20  ;;  %v2596_v49 = vand.u32 65535, %v2592_v35  ;;  %v2597_v3 = vshrl.u32 %v2592_v35, 16 }
 0x24a   : > { %v1458_v21 = vsel %vm1451_vm14, %v1454_v37, %v1457_v6  ;;  %v2035_v32 = vsub.s32 32, %v2034_v2  ;;  %v2039_v1 = vsub.s32 4294967266, %v2034_v2  ;;  %v2036_v56 = vshll.u32 %v4565_v38, %v2034_v2 }
 0x24b   : > { %v1459_v30 = vsel %vm1448_vm2, nan, %v1458_v21  ;;  %v2621_v5 = vmul.u32 %v2619_v52, %v4550_v16  ;;  %v840_v13 = vand.u32 2147483647, %v4532_v18  ;;  %v2622_v0 = vmul.u32 %v2618_v27, %v4553_v17 }
 0x24c   : > { %2861 = vst [vmem:[%s3701_s7 + $0x30] sm:$0xff] %v1459_v30  ;;  %v2037_v48 = vshrl.u32 %v4547_v60, %v2035_v32  ;;  %v2040_v22 = vadd.s32 127, %v2039_v1  ;;  %v3022_v11 = vadd.s32 4294967169, %v4555_v19  ;;  %v4614_v60 = vsel %vm1927_vm3, %v2049_v33, %v4545_v40 }
 0x24d   : > { %v4618_v38 = vsel %vm2578_vm1, %v2581_v54, %v2583_v12  ;;  %v2599_v42 = vmul.u32 %v2597_v3, %v4550_v16  ;;  %v2600_v45 = vmul.u32 %v2596_v49, %v4553_v17  ;;  %vm4624_vm7 = vcmp.le.f32.partialorder %v1925_v39, 0.7853982 }
 0x24e   : > { %v2038_v15 = vor.u32 %v2037_v48, %v2036_v56  ;;  %v2041_v50 = vshll.u32 %v2040_v22, 23  ;;  %v2620_v51 = vmul.u32 %v2618_v27, %v4550_v16  ;;  %v2623_v40 = vmul.u32 %v2619_v52, %v4553_v17 }
 0x24f   : > { %v2624_v46 = vshll.u32 %v2621_v5, 16  ;;  %v2598_v44 = vmul.u32 %v2596_v49, %v4550_v16  ;;  %v2601_v33 = vmul.u32 %v2597_v3, %v4553_v17  ;;  %v2602_v25 = vshll.u32 %v2599_v42, 16 }
 0x250   : > { %v2042_v19 = vor.u32 4788187, %v2041_v50  ;;  %v2045_v41 = vcvt.s32.f32 %v2038_v15  ;;  %v2604_v7 = vshll.u32 %v2600_v45, 16  ;;  %v2626_v10 = vshll.u32 %v2622_v0, 16 }
 0x251   : > { %vm2628_vm9 = vc.u32 %v2620_v51, %v2624_v46  ;;  %vm2606_vm8 = vc.u32 %v2598_v44, %v2602_v25  ;;  %v2608_v39 = vadd.s32 %v2602_v25, %v2598_v44  ;;  %v2630_v4 = vadd.s32 %v2624_v46, %v2620_v51 }
 0x252   : > { %v2043_v58 = vand.u32 2147483647, %v2042_v19  ;;  %v2629_v20 = vsel %vm2628_vm9, 1, %v3245_v14  ;;  %v2607_v54 = vsel %vm2606_vm8, 1, %v3245_v14  ;;  %v850_v31 = vadd.s32 1, %v3022_v11 }
 0x253   : > { %v2631_v47 = vadd.s32 %v2629_v20, %v2623_v40  ;;  %v2609_v6 = vadd.s32 %v2607_v54, %v2601_v33  ;;  %vm2610_vm11 = vc.u32 %v2608_v39, %v2604_v7  ;;  %v2625_v16 = vshrl.u32 %v2621_v5, 16 }
 0x254   : > { %v2046_v53 = vmul.f32 %v2045_v41, %v2043_v58  ;;  %vm2632_vm10 = vc.u32 %v2630_v4, %v2626_v10  ;;  %v2611_v23 = vsel %vm2610_vm11, 1, %v3245_v14  ;;  %vm851_vm13 = vcmp.gt.s32.totalorder %v850_v31, 0 }
 0x255   : > { %v2633_v62 = vsel %vm2632_vm10, 1, %v3245_v14  ;;  %v2603_v37 = vshrl.u32 %v2599_v42, 16  ;;  %v2613_v2 = vadd.s32 %v2611_v23, %v2609_v6  ;;  %v852_v36 = vsel %vm851_vm13, %v850_v31, 0 }
 0x256   : > { %v2047_v17 = vxor.u32 2147483648, %v2046_v53  ;;  %v2635_v43 = vadd.s32 %v2633_v62, %v2631_v47  ;;  %v2605_v32 = vshrl.u32 %v2600_v45, 16  ;;  %v847_v1 = vand.u32 8388607, %v840_v13 }
 0x257   : > { %v854_v12 = vand.u32 31, %v852_v36  ;;  %v2614_v34 = vadd.s32 %v2613_v2, %v2603_v37  ;;  %v2627_v27 = vshrl.u32 %v2622_v0, 16  ;;  %v2052_v56 = vsel %vm4624_vm7, 0, %v4614_v60 }
 0x258   : > { %v2048_v21 = vsel %vm1927_vm3, %v2047_v17, %v2046_v53  ;;  %v2636_v52 = vadd.s32 %v2635_v43, %v2625_v16  ;;  %v2638_v22 = vmul.u32 %v4540_v26, %v4618_v38  ;;  %v4652_v3 = vadd.s32 %v2630_v4, %v2626_v10 }
 0x259   : > { %v2051_v30 = vsel %vm4624_vm7, %v4320_v9, %v2048_v21  ;;  %v4648_v35 = vsub.s32 32, %v854_v12  ;;  %v4650_v49 = vadd.s32 %v2614_v34, %v2605_v32  ;;  %v4654_v15 = vshrl.u32 %v852_v36, 5 }
 0x25a   : > { %v2053_v48 = vmul.f32 %v2051_v30, %v2051_v30  ;;  %v2637_v5 = vadd.s32 %v2636_v52, %v2627_v27  ;;  %v857_v11 = vshll.u32 %v3239_v55, %v854_v12  ;;  %v860_v42 = vshll.u32 %v3240_v57, %v854_v12 }
 0x25b   : > { %vm2640_vm12 = vc.u32 %v4650_v49, %v4652_v3  ;;  %v861_v26 = vshrl.u32 %v3241_v59, %v4648_v35  ;;  %v866_v38 = vshll.u32 %v3242_v61, %v854_v12  ;;  %v863_v19 = vshll.u32 %v3241_v59, %v854_v12 }
 0x25c   : > { %v2054_v50 = vmul.f32 -0.001358992, %v2053_v48  ;;  %v2061_v0 = vmul.f32 -0.00019511016, %v2053_v48  ;;  %v2641_v60 = vadd.s32 1, %v2637_v5  ;;  %v864_v51 = vshrl.u32 %v3242_v61, %v4648_v35 }
 0x25d   : > { %v858_v46 = vshrl.u32 %v3240_v57, %v4648_v35  ;;  %v867_v41 = vshrl.u32 %v3243_v63, %v4648_v35  ;;  %v869_v44 = vshll.u32 %v3243_v63, %v854_v12  ;;  %v848_v7 = vor.u32 8388608, %v847_v1 }
 0x25e   : > { %v2055_v45 = vadd.f32 0.041655596, %v2054_v50  ;;  %v2062_v24 = vadd.f32 0.008332121, %v2061_v0  ;;  %v2642_v40 = vsel %vm2640_vm12, %v2641_v60, %v2637_v5  ;;  %v2069_v10 = vadd.s32 3, %v2052_v56 }
 0x25f   : > { %v2643_v58 = vadd.s32 %v2642_v40, %v2638_v22  ;;  %v4671_v39 = vor.u32 %v861_v26, %v860_v42  ;;  %v868_v20 = vor.u32 %v867_v41, %v866_v38  ;;  %v870_v4 = vshrl.u32 %v3244_v8, %v4648_v35 }
 0x260   : > { %v2056_v33 = vmul.f32 %v2055_v45, %v2053_v48  ;;  %v2063_v25 = vmul.f32 %v2062_v24, %v2053_v48  ;;  %v4675_v31 = vor.u32 %v864_v51, %v863_v19  ;;  %v4677_v6 = vor.u32 %v858_v46, %v857_v11  ;;  %v332_v46 = vpop.f32.mrf.mxu1 }
 0x261   : > { %v2644_v47 = vadd.s32 536870912, %v2643_v58  ;;  %v871_v16 = vor.u32 %v870_v4, %v869_v44  ;;  %vm872_vm14 = vcmp.lt.s32.totalorder %v4654_v15, 1  ;;  %vm875_vm15 = vcmp.lt.s32.totalorder %v4654_v15, 4 }
 0x262   : > { %v2057_v53 = vadd.f32 -0.4999988, %v2056_v33  ;;  %v2064_v54 = vadd.f32 -0.16666654, %v2063_v25  ;;  %vm874_vm2 = vcmp.lt.s32.totalorder %v4654_v15, 3  ;;  %v2070_v37 = vand.u32 3, %v2069_v10 }
 0x263   : > { %v4681_v62 = vshrl.u32 %v2644_v47, 30  ;;  %v881_v2 = vsel %vm875_vm15, %v868_v20, 920167782  ;;  %v885_v43 = vsel %vm875_vm15, %v871_v16, 1326507024  ;;  %v884_v1 = vsel %vm872_vm14, %v4671_v39, %v4675_v31 }
 0x264   : > { %v2058_v17 = vmul.f32 %v2057_v53, %v2053_v48  ;;  %v2065_v23 = vmul.f32 %v2064_v54, %v2053_v48  ;;  %v880_v12 = vsel %vm872_vm14, %v4677_v6, %v4671_v39  ;;  %v882_v34 = vsel %vm874_vm2, %v4675_v31, %v881_v2  ;;  %v4721_v53 = vld [vmem:[%s5132_s2] ss:$0 sm:$0xff] }
 0x265   : > { %v2646_v32 = vshll.u32 %v4681_v62, 30  ;;  %v886_v27 = vsel %vm874_vm2, %v868_v20, %v885_v43  ;;  %v4702_v52 = vshll.u32 %v848_v7, 8  ;;  %vm873_vm0 = vcmp.lt.s32.totalorder %v4654_v15, 2  ;;  %v344_v15 = vpop.f32.mrf.mxu2 }
 0x266   : > { %v2059_v36 = vadd.f32 1.0, %v2058_v17  ;;  %v2066_v21 = vadd.f32 1.0, %v2065_v23  ;;  %vm2071_vm1 = vcmp.lt.s32.totalorder %v2070_v37, 2  ;;  %vm2072_vm3 = vcmp.eq.s32.totalorder %v2070_v37, 0 }
 0x267   : > { %v2647_v22 = vsub.s32 %v2643_v58, %v2646_v32  ;;  %v887_v5 = vsel %vm873_vm0, %v884_v1, %v886_v27  ;;  %v883_v11 = vsel %vm873_vm0, %v880_v12, %v882_v34  ;;  %vm2075_vm4 = vcmp.eq.s32.totalorder %v2070_v37, 2 }
 0x268   : > { %v2067_v56 = vmul.f32 %v2066_v21, %v2051_v30  ;;  %v2076_v48 = vxor.u32 2147483648, %v2059_v36  ;;  %v889_v42 = vand.u32 65535, %v4702_v52  ;;  %v891_v30 = vand.u32 65535, %v887_v5 }
 0x269   : > { %vm2648_vm6 = vcmp.lt.s32.totalorder %v2647_v22, 0  ;;  %v2649_v0 = vsub.s32 0, %v2647_v22  ;;  %v892_v60 = vshrl.u32 %v887_v5, 16  ;;  %v890_v24 = vshrl.u32 %v4702_v52, 16 }
 0x26a   : > { %v2073_v50 = vxor.u32 2147483648, %v2067_v56  ;;  %v2077_v38 = vsel %vm2075_vm4, %v2076_v48, %v2067_v56  ;;  %vm2068_vm5 = vweird.f32 %v4320_v9  ;;  %v914_v40 = vshrl.u32 %v883_v11, 16 }
 0x26b   : > { %v2650_v45 = vsel %vm2648_vm6, %v2649_v0, %v2647_v22  ;;  %v894_v44 = vmul.u32 %v892_v60, %v889_v42  ;;  %v895_v33 = vmul.u32 %v891_v30, %v890_v24  ;;  %v913_v25 = vand.u32 65535, %v883_v11 }
 0x26c   : > { %v2074_v26 = vsel %vm2072_vm3, %v2059_v36, %v2073_v50  ;;  %v2651_v51 = vclz %v2650_v45  ;;  %v2639_v58 = vadd.s32 %v4652_v3, %v4650_v49  ;;  %v856_v10 = vshrl.u32 %v3239_v55, %v4648_v35 }
 0x26d   : > { %v2078_v19 = vsel %vm2071_vm1, %v2074_v26, %v2077_v38  ;;  %v893_v20 = vmul.u32 %v891_v30, %v889_v42  ;;  %v896_v4 = vmul.u32 %v892_v60, %v890_v24  ;;  %v897_v9 = vshll.u32 %v894_v44, 16 }
 0x26e   : > { %v2079_v41 = vsel %vm2068_vm5, nan, %v2078_v19  ;;  %v3056_v7 = vadd.s32 4294967294, %v2651_v51  ;;  %v333_v54 = vadd.f32 %v4721_v53, %v332_v46  ;;  %v898_v47 = vshrl.u32 %v894_v44, 16 }
 0x26f   : > { %2865 = vst [vmem:[%s3701_s7 + $0x50] sm:$0xff] %v2079_v41  ;;  %v899_v16 = vshll.u32 %v895_v33, 16  ;;  %v916_v17 = vmul.u32 %v914_v40, %v889_v42  ;;  %vm901_vm9 = vc.u32 %v893_v20, %v897_v9  ;;  %v903_v49 = vadd.s32 %v897_v9, %v893_v20 }
 0x270   : > { %vm3057_vm7 = vcmp.lt.s32.totalorder %v3056_v7, 0  ;;  %v917_v3 = vmul.u32 %v913_v25, %v890_v24  ;;  %v902_v2 = vsel %vm901_vm9, 1, %v3245_v14  ;;  %v915_v43 = vmul.u32 %v913_v25, %v889_v42 }
 0x271   : > { %v2654_v23 = vsel %vm3057_vm7, 0, %v3056_v7  ;;  %vm2547_vm8 = vcmp.lt.s32.totalorder %v4501_v28, 0  ;;  %v904_v36 = vadd.s32 %v902_v2, %v896_v4  ;;  %vm905_vm11 = vc.u32 %v903_v49, %v899_v16 }
 0x272   : > { %v2655_v37 = vsub.s32 32, %v2654_v23  ;;  %v2659_v35 = vsub.s32 4294967266, %v2654_v23  ;;  %v918_v21 = vmul.u32 %v914_v40, %v890_v24  ;;  %v919_v32 = vshll.u32 %v916_v17, 16 }
 0x273   : > { %v2656_v1 = vshll.u32 %v2647_v22, %v2654_v23  ;;  %v906_v27 = vsel %vm905_vm11, 1, %v3245_v14  ;;  %v921_v48 = vshll.u32 %v917_v3, 16  ;;  %v4728_v42 = vmul.f32 30.0, %v333_v54 }
 0x274   : > { %v2657_v12 = vshrl.u32 %v2639_v58, %v2655_v37  ;;  %v2660_v34 = vadd.s32 127, %v2659_v35  ;;  %v908_v56 = vadd.s32 %v906_v27, %v904_v36  ;;  %vm923_vm10 = vc.u32 %v915_v43, %v919_v32 }
 0x275   : > { %v925_v5 = vadd.s32 %v919_v32, %v915_v43  ;;  %v924_v11 = vsel %vm923_vm10, 1, %v3245_v14  ;;  %v877_v30 = vsel %vm875_vm15, %v4675_v31, 2102212464  ;;  %v2669_v38 = vsub.s32 4, %v4681_v62 }
 0x276   : > { %v2658_v50 = vor.u32 %v2657_v12, %v2656_v1  ;;  %v2661_v0 = vshll.u32 %v2660_v34, 23  ;;  %v909_v60 = vadd.s32 %v908_v56, %v898_v47  ;;  %v926_v22 = vadd.s32 %v924_v11, %v918_v21 }
 0x277   : > { %vm927_vm13 = vc.u32 %v925_v5, %v921_v48  ;;  %v900_v45 = vshrl.u32 %v895_v33, 16  ;;  %v876_v19 = vsel %vm872_vm14, %v856_v10, %v4677_v6  ;;  %v920_v51 = vshrl.u32 %v916_v17, 16 }
 0x278   : > { %v2662_v26 = vor.u32 4788187, %v2661_v0  ;;  %v928_v24 = vsel %vm927_vm13, 1, %v3245_v14  ;;  %v1463_v46 = vand.u32 2139095040, %v4728_v42  ;;  %v2665_v44 = vcvt.s32.f32 %v2658_v50 }
 0x279   : > { %v930_v40 = vadd.s32 %v928_v24, %v926_v22  ;;  %v878_v31 = vsel %vm874_vm2, %v4671_v39, %v877_v30  ;;  %v910_v25 = vadd.s32 %v909_v60, %v900_v45  ;;  %v922_v58 = vshrl.u32 %v917_v3, 16 }
 0x27a   : > { %v2663_v41 = vand.u32 2147483647, %v2662_v26  ;;  %v1460_v33 = vand.u32 2147483647, %v4728_v42  ;;  %v1464_v20 = vshrl.u32 %v1463_v46, 23  ;;  %v2670_v6 = vsel %vm2547_vm8, %v2669_v38, %v4681_v62 }
 0x27b   : > { %v931_v7 = vadd.s32 %v930_v40, %v920_v51  ;;  %v929_v10 = vadd.s32 %v925_v5, %v921_v48  ;;  %v879_v9 = vsel %vm873_vm0, %v876_v19, %v878_v31  ;;  %vm2546_vm12 = vcmp.le.f32.partialorder %v2545_v29, 0.7853982 }
 0x27c   : > { %v2666_v4 = vmul.f32 %v2665_v44, %v2663_v41  ;;  %v3034_v47 = vadd.s32 4294967169, %v1464_v20  ;;  %v2672_v16 = vsel %vm2546_vm12, 0, %v2670_v6  ;;  %v1467_v23 = vand.u32 8388607, %v1460_v33 }
 0x27d   : > { %v932_v54 = vadd.s32 %v931_v7, %v922_v58  ;;  %vm935_vm14 = vc.u32 %v910_v25, %v929_v10  ;;  %v933_v3 = vmul.u32 %v4702_v52, %v879_v9  ;;  %v2689_v29 = vadd.s32 3, %v2672_v16 }
 0x27e   : > { %v2667_v39 = vxor.u32 2147483648, %v2666_v4  ;;  %v1470_v49 = vadd.s32 1, %v3034_v47  ;;  %v1468_v21 = vor.u32 8388608, %v1467_v23  ;;  %v345_v1 = vadd.f32 %v4721_v53, %v344_v15 }
 0x27f   : > { %v936_v17 = vadd.s32 1, %v932_v54  ;;  %v4757_v52 = vand.u32 3, %v2689_v29  ;;  %v4761_v0 = vadd.s32 %v929_v10, %v910_v25  ;;  %vm842_vm3 = vcmp.lt.s32.totalorder %v4532_v18, 0 }
 0x280   : > { %v2668_v62 = vsel %vm2547_vm8, %v2667_v39, %v2666_v4  ;;  %vm1471_vm15 = vcmp.gt.s32.totalorder %v1470_v49, 0  ;;  %v4764_v30 = vshll.u32 %v1468_v21, 8  ;;  %v4766_v60 = vmul.f32 30.0, %v345_v1 }
 0x281   : > { %v2671_v37 = vsel %vm2546_vm12, %v4501_v28, %v2668_v62  ;;  %v937_v35 = vsel %vm935_vm14, %v936_v17, %v932_v54  ;;  %v1472_v36 = vsel %vm1471_vm15, %v1470_v49, 0  ;;  %vm2695_vm2 = vcmp.eq.s32.totalorder %v4757_v52, 2 }
 0x282   : > { %v2673_v2 = vmul.f32 %v2671_v37, %v2671_v37  ;;  %v938_v43 = vadd.s32 %v937_v35, %v933_v3  ;;  %v1474_v32 = vand.u32 31, %v1472_v36  ;;  %v4777_v31 = vshrl.u32 %v1472_v36, 5 }
 0x283   : > { %vm2692_vm0 = vcmp.eq.s32.totalorder %v4757_v52, 0  ;;  %vm2691_vm1 = vcmp.lt.s32.totalorder %v4757_v52, 2  ;;  %vm2688_vm4 = vweird.f32 %v4501_v28  ;;  %v1509_v39 = vand.u32 65535, %v4764_v30 }
 0x284   : > { %v2674_v12 = vmul.f32 -0.001358992, %v2673_v2  ;;  %v2681_v34 = vmul.f32 -0.00019511016, %v2673_v2  ;;  %v939_v27 = vadd.s32 536870912, %v938_v43  ;;  %v1475_v56 = vsub.s32 32, %v1474_v32 }
 0x285   : > { %v1477_v11 = vshll.u32 %v3239_v55, %v1474_v32  ;;  %v1480_v45 = vshll.u32 %v3240_v57, %v1474_v32  ;;  %v1486_v51 = vshll.u32 %v3242_v61, %v1474_v32  ;;  %v1483_v25 = vshll.u32 %v3241_v59, %v1474_v32 }
 0x286   : > { %v2675_v48 = vadd.f32 0.041655596, %v2674_v12  ;;  %v2682_v5 = vadd.f32 0.008332121, %v2681_v34  ;;  %v4759_v50 = vshrl.u32 %v939_v27, 30  ;;  %v1478_v24 = vshrl.u32 %v3240_v57, %v1475_v56 }
 0x287   : > { %v1481_v19 = vshrl.u32 %v3241_v59, %v1475_v56  ;;  %v1487_v40 = vshrl.u32 %v3243_v63, %v1475_v56  ;;  %v1484_v58 = vshrl.u32 %v3242_v61, %v1475_v56  ;;  %v1489_v7 = vshll.u32 %v3243_v63, %v1474_v32 }
 0x288   : > { %v2676_v22 = vmul.f32 %v2675_v48, %v2673_v2  ;;  %v2683_v26 = vmul.f32 %v2682_v5, %v2673_v2  ;;  %v941_v38 = vshll.u32 %v4759_v50, 30  ;;  %v1490_v20 = vshrl.u32 %v3244_v8, %v1475_v56 }
 0x289   : > { %v1479_v9 = vor.u32 %v1478_v24, %v1477_v11  ;;  %v4789_v54 = vor.u32 %v1481_v19, %v1480_v45  ;;  %v1488_v47 = vor.u32 %v1487_v40, %v1486_v51  ;;  %vm1492_vm5 = vcmp.lt.s32.totalorder %v4777_v31, 1 }
 0x28a   : > { %v2677_v46 = vadd.f32 -0.4999988, %v2676_v22  ;;  %v2684_v41 = vadd.f32 -0.16666654, %v2683_v26  ;;  %v4775_v44 = vsub.s32 %v938_v43, %v941_v38  ;;  %v1485_v62 = vor.u32 %v1484_v58, %v1483_v25 }
 0x28b   : > { %vm1495_vm7 = vcmp.lt.s32.totalorder %v4777_v31, 4  ;;  %v1510_v3 = vshrl.u32 %v4764_v30, 16  ;;  %vm4798_vm9 = vcmp.le.f32.partialorder %v840_v13, 0.7853982  ;;  %v1491_v29 = vor.u32 %v1490_v20, %v1489_v7 }
 0x28c   : > { %v2678_v4 = vmul.f32 %v2677_v46, %v2673_v2  ;;  %v2685_v6 = vmul.f32 %v2684_v41, %v2673_v2  ;;  %vm943_vm6 = vcmp.lt.s32.totalorder %v4775_v44, 0  ;;  %v944_v10 = vsub.s32 0, %v4775_v44 }
 0x28d   : > { %vm1494_vm8 = vcmp.lt.s32.totalorder %v4777_v31, 3  ;;  %v964_v36 = vsub.s32 4, %v4759_v50  ;;  %v1500_v21 = vsel %vm1492_vm5, %v1479_v9, %v4789_v54  ;;  %v2080_v32 = vand.u32 2147483647, %v4766_v60 }
 0x28e   : > { %v2679_v16 = vadd.f32 1.0, %v2678_v4  ;;  %v2686_v17 = vadd.f32 1.0, %v2685_v6  ;;  %v945_v23 = vsel %vm943_vm6, %v944_v10, %v4775_v44  ;;  %v1476_v1 = vshrl.u32 %v3239_v55, %v1475_v56 }
 0x28f   : > { %v946_v49 = vclz %v945_v23  ;;  %vm1493_vm11 = vcmp.lt.s32.totalorder %v4777_v31, 2  ;;  %v1501_v13 = vsel %vm1495_vm7, %v1488_v47, 920167782  ;;  %v1504_v27 = vsel %vm1492_vm5, %v4789_v54, %v1485_v62 }
 0x290   : > { %v2687_v15 = vmul.f32 %v2686_v17, %v2671_v37  ;;  %v2696_v35 = vxor.u32 2147483648, %v2679_v16  ;;  %v1502_v34 = vsel %vm1494_vm8, %v1485_v62, %v1501_v13  ;;  %v1505_v11 = vsel %vm1495_vm7, %v1491_v29, 1326507024 }
 0x291   : > { %v3023_v43 = vadd.s32 4294967294, %v946_v49  ;;  %v1503_v5 = vsel %vm1493_vm11, %v1500_v21, %v1502_v34  ;;  %v4830_v45 = vsel %vm842_vm3, %v964_v36, %v4759_v50  ;;  %v1506_v19 = vsel %vm1494_vm8, %v1488_v47, %v1505_v11 }
 0x292   : > { %v2693_v37 = vxor.u32 2147483648, %v2687_v15  ;;  %v2697_v12 = vsel %vm2695_vm2, %v2696_v35, %v2687_v15  ;;  %v1533_v51 = vand.u32 65535, %v1503_v5  ;;  %v1534_v40 = vshrl.u32 %v1503_v5, 16 }
 0x293   : > { %vm3024_vm10 = vcmp.lt.s32.totalorder %v3023_v43, 0  ;;  %v1507_v25 = vsel %vm1493_vm11, %v1504_v27, %v1506_v19  ;;  %v2083_v28 = vand.u32 2139095040, %v4766_v60  ;;  %v967_v6 = vsel %vm4798_vm9, 0, %v4830_v45 }
 0x294   : > { %v2694_v56 = vsel %vm2692_vm0, %v2679_v16, %v2693_v37  ;;  %v949_v48 = vsel %vm3024_vm10, 0, %v3023_v43  ;;  %v1511_v58 = vand.u32 65535, %v1507_v25  ;;  %v1512_v50 = vshrl.u32 %v1507_v25, 16 }
 0x295   : > { %v2698_v22 = vsel %vm2691_vm1, %v2694_v56, %v2697_v12  ;;  %v950_v26 = vsub.s32 32, %v949_v48  ;;  %v954_v38 = vsub.s32 4294967266, %v949_v48  ;;  %v951_v46 = vshll.u32 %v4775_v44, %v949_v48 }
 0x296   : > { %v2699_v24 = vsel %vm2688_vm4, nan, %v2698_v22  ;;  %v1536_v7 = vmul.u32 %v1534_v40, %v1509_v39  ;;  %v1537_v10 = vmul.u32 %v1533_v51, %v1510_v3  ;;  %v1496_v44 = vsel %vm1492_vm5, %v1476_v1, %v1479_v9 }
 0x297   : > { %2869 = vst [vmem:[%s3701_s7 + $0x70] sm:$0xff] %v2699_v24  ;;  %v952_v52 = vshrl.u32 %v4761_v0, %v950_v26  ;;  %v955_v41 = vadd.s32 127, %v954_v38  ;;  %v1497_v0 = vsel %vm1495_vm7, %v1485_v62, 2102212464  ;;  %v1514_v47 = vmul.u32 %v1512_v50, %v1509_v39 }
 0x298   : > { %v1515_v16 = vmul.u32 %v1511_v58, %v1510_v3  ;;  %v1535_v23 = vmul.u32 %v1533_v51, %v1509_v39  ;;  %v1538_v49 = vmul.u32 %v1534_v40, %v1510_v3  ;;  %v1539_v15 = vshll.u32 %v1536_v7, 16 }
 0x299   : > { %v953_v20 = vor.u32 %v952_v52, %v951_v46  ;;  %v956_v4 = vshll.u32 %v955_v41, 23  ;;  %v1513_v29 = vmul.u32 %v1511_v58, %v1509_v39  ;;  %v1516_v43 = vmul.u32 %v1512_v50, %v1510_v3 }
 0x29a   : > { %v1517_v36 = vshll.u32 %v1514_v47, 16  ;;  %v1519_v37 = vshll.u32 %v1515_v16, 16  ;;  %v1541_v13 = vshll.u32 %v1537_v10, 16  ;;  %vm1543_vm13 = vc.u32 %v1535_v23, %v1539_v15 }
 0x29b   : > { %v957_v17 = vor.u32 4788187, %v956_v4  ;;  %v960_v35 = vcvt.s32.f32 %v953_v20  ;;  %v1544_v9 = vsel %vm1543_vm13, 1, %v3245_v14  ;;  %v1545_v1 = vadd.s32 %v1539_v15, %v1535_v23 }
 0x29c   : > { %vm1521_vm12 = vc.u32 %v1513_v29, %v1517_v36  ;;  %v1523_v12 = vadd.s32 %v1517_v36, %v1513_v29  ;;  %v1546_v27 = vadd.s32 %v1544_v9, %v1538_v49  ;;  %v2084_v56 = vshrl.u32 %v2083_v28, 23 }
 0x29d   : > { %v958_v21 = vand.u32 2147483647, %v957_v17  ;;  %v1522_v34 = vsel %vm1521_vm12, 1, %v3245_v14  ;;  %v1498_v39 = vsel %vm1494_vm8, %v4789_v54, %v1497_v0  ;;  %vm1547_vm15 = vc.u32 %v1545_v1, %v1541_v13 }
 0x29e   : > { %v1524_v3 = vadd.s32 %v1522_v34, %v1516_v43  ;;  %vm1525_vm14 = vc.u32 %v1523_v12, %v1519_v37  ;;  %v1548_v11 = vsel %vm1547_vm15, 1, %v3245_v14  ;;  %v3046_v22 = vadd.s32 4294967169, %v2084_v56 }
 0x29f   : > { %v961_v62 = vmul.f32 %v960_v35, %v958_v21  ;;  %v1526_v5 = vsel %vm1525_vm14, 1, %v3245_v14  ;;  %v1518_v26 = vshrl.u32 %v1514_v47, 16  ;;  %v1540_v45 = vshrl.u32 %v1536_v7, 16 }
 0x2a0   : > { %v1528_v38 = vadd.s32 %v1526_v5, %v1524_v3  ;;  %v1550_v24 = vadd.s32 %v1548_v11, %v1546_v27  ;;  %v1520_v51 = vshrl.u32 %v1515_v16, 16  ;;  %v4860_v54 = vand.u32 8388607, %v2080_v32  ;;  %v356_v11 = vpop.f32.mrf.mxu3 }
 0x2a1   : > { %v962_v48 = vxor.u32 2147483648, %v961_v62  ;;  %v2090_v40 = vadd.s32 1, %v3046_v22  ;;  %v1542_v41 = vshrl.u32 %v1537_v10, 16  ;;  %v984_v50 = vadd.s32 3, %v967_v6 }
 0x2a2   : > { %v1529_v52 = vadd.s32 %v1528_v38, %v1518_v26  ;;  %v1551_v25 = vadd.s32 %v1550_v24, %v1540_v45  ;;  %v1499_v7 = vsel %vm1493_vm11, %v1496_v44, %v1498_v39  ;;  %v4869_v20 = vadd.s32 %v1545_v1, %v1541_v13 }
 0x2a3   : > { %v963_v19 = vsel %vm842_vm3, %v962_v48, %v961_v62  ;;  %vm2091_vm2 = vcmp.gt.s32.totalorder %v2090_v40, 0  ;;  %v1553_v6 = vmul.u32 %v4764_v30, %v1499_v7  ;;  %v985_v44 = vand.u32 3, %v984_v50 }
 0x2a4   : > { %v966_v46 = vsel %vm4798_vm9, %v4532_v18, %v963_v19  ;;  %v4867_v28 = vadd.s32 %v1529_v52, %v1520_v51  ;;  %v1552_v4 = vadd.s32 %v1551_v25, %v1542_v41  ;;  %v2092_v0 = vsel %vm2091_vm2, %v2090_v40, 0 }
 0x2a5   : > { %v968_v58 = vmul.f32 %v966_v46, %v966_v46  ;;  %v2094_v17 = vand.u32 31, %v2092_v0  ;;  %v2088_v43 = vor.u32 8388608, %v4860_v54  ;;  %v4877_v36 = vshrl.u32 %v2092_v0, 5 }
 0x2a6   : > { %vm1555_vm0 = vc.u32 %v4867_v28, %v4869_v20  ;;  %v1556_v2 = vadd.s32 1, %v1552_v4  ;;  %vm987_vm1 = vcmp.eq.s32.totalorder %v985_v44, 0  ;;  %vm986_vm3 = vcmp.lt.s32.totalorder %v985_v44, 2 }
 0x2a7   : > { %v969_v47 = vmul.f32 -0.001358992, %v968_v58  ;;  %v976_v16 = vmul.f32 -0.00019511016, %v968_v58  ;;  %v4874_v31 = vsub.s32 32, %v2094_v17  ;;  %v2097_v62 = vshll.u32 %v3239_v55, %v2094_v17 }
 0x2a8   : > { %v1557_v49 = vsel %vm1555_vm0, %v1556_v2, %v1552_v4  ;;  %v2100_v34 = vshll.u32 %v3240_v57, %v2094_v17  ;;  %v2103_v27 = vshll.u32 %v3241_v59, %v2094_v17  ;;  %v2106_v56 = vshll.u32 %v3242_v61, %v2094_v17 }
 0x2a9   : > { %v970_v10 = vadd.f32 0.041655596, %v969_v47  ;;  %v977_v23 = vadd.f32 0.008332121, %v976_v16  ;;  %v1558_v29 = vadd.s32 %v1557_v49, %v1553_v6  ;;  %v2098_v21 = vshrl.u32 %v3240_v57, %v4874_v31 }
 0x2aa   : > { %v2101_v37 = vshrl.u32 %v3241_v59, %v4874_v31  ;;  %v2107_v30 = vshrl.u32 %v3243_v63, %v4874_v31  ;;  %v2104_v1 = vshrl.u32 %v3242_v61, %v4874_v31  ;;  %v2110_v5 = vshrl.u32 %v3244_v8, %v4874_v31 }
 0x2ab   : > { %v971_v15 = vmul.f32 %v970_v10, %v968_v58  ;;  %v978_v35 = vmul.f32 %v977_v23, %v968_v58  ;;  %v1559_v9 = vadd.s32 536870912, %v1558_v29  ;;  %vm983_vm6 = vweird.f32 %v4532_v18 }
 0x2ac   : > { %v4896_v22 = vor.u32 %v2098_v21, %v2097_v62  ;;  %v4898_v26 = vor.u32 %v2101_v37, %v2100_v34  ;;  %v2108_v38 = vor.u32 %v2107_v30, %v2106_v56  ;;  %v2109_v45 = vshll.u32 %v3243_v63, %v2094_v17 }
 0x2ad   : > { %v972_v13 = vadd.f32 -0.4999988, %v971_v15  ;;  %v979_v12 = vadd.f32 -0.16666654, %v978_v35  ;;  %v4891_v48 = vshrl.u32 %v1559_v9, 30  ;;  %v4902_v54 = vor.u32 %v2104_v1, %v2103_v27 }
 0x2ae   : > { %vm990_vm4 = vcmp.eq.s32.totalorder %v985_v44, 2  ;;  %v2111_v40 = vor.u32 %v2110_v5, %v2109_v45  ;;  %vm2112_vm5 = vcmp.lt.s32.totalorder %v4877_v36, 1  ;;  %v357_v52 = vadd.f32 %v4721_v53, %v356_v11 }
 0x2af   : > { %v973_v39 = vmul.f32 %v972_v13, %v968_v58  ;;  %v980_v3 = vmul.f32 %v979_v12, %v968_v58  ;;  %v1561_v51 = vshll.u32 %v4891_v48, 30  ;;  %vm2115_vm7 = vcmp.lt.s32.totalorder %v4877_v36, 4 }
 0x2b0   : > { %vm2114_vm9 = vcmp.lt.s32.totalorder %v4877_v36, 3  ;;  %v2120_v50 = vsel %vm2112_vm5, %v4896_v22, %v4898_v26  ;;  %v2121_v7 = vsel %vm2115_vm7, %v2108_v38, 920167782  ;;  %v4914_v4 = vshll.u32 %v2088_v43, 8 }
 0x2b1   : > { %v974_v24 = vadd.f32 1.0, %v973_v39  ;;  %v981_v19 = vadd.f32 1.0, %v980_v3  ;;  %v1562_v58 = vsub.s32 %v1558_v29, %v1561_v51  ;;  %vm2113_vm11 = vcmp.lt.s32.totalorder %v4877_v36, 2 }
 0x2b2   : > { %v2122_v16 = vsel %vm2114_vm9, %v4902_v54, %v2121_v7  ;;  %v2125_v17 = vsel %vm2115_vm7, %v2111_v40, 1326507024  ;;  %v2129_v29 = vand.u32 65535, %v4914_v4  ;;  %v2130_v21 = vshrl.u32 %v4914_v4, 16 }
 0x2b3   : > { %v982_v41 = vmul.f32 %v981_v19, %v966_v46  ;;  %v991_v25 = vxor.u32 2147483648, %v974_v24  ;;  %vm1563_vm8 = vcmp.lt.s32.totalorder %v1562_v58, 0  ;;  %v1564_v53 = vsub.s32 0, %v1562_v58 }
 0x2b4   : > { %v2124_v46 = vsel %vm2112_vm5, %v4898_v26, %v4902_v54  ;;  %v2123_v23 = vsel %vm2113_vm11, %v2120_v50, %v2122_v16  ;;  %v2126_v6 = vsel %vm2114_vm9, %v2108_v38, %v2125_v17  ;;  %v1554_v44 = vadd.s32 %v4869_v20, %v4867_v28 }
 0x2b5   : > { %v988_v0 = vxor.u32 2147483648, %v982_v41  ;;  %v992_v47 = vsel %vm990_vm4, %v991_v25, %v982_v41  ;;  %v1565_v10 = vsel %vm1563_vm8, %v1564_v53, %v1562_v58  ;;  %v2127_v35 = vsel %vm2113_vm11, %v2124_v46, %v2126_v6 }
 0x2b6   : > { %v1566_v15 = vclz %v1565_v10  ;;  %v2131_v37 = vand.u32 65535, %v2127_v35  ;;  %v2132_v30 = vshrl.u32 %v2127_v35, 16  ;;  %v2153_v12 = vand.u32 65535, %v2123_v23 }
 0x2b7   : > { %v989_v2 = vsel %vm987_vm1, %v974_v24, %v988_v0  ;;  %v2154_v62 = vshrl.u32 %v2123_v23, 16  ;;  %v4942_v34 = vmul.f32 30.0, %v357_v52  ;;  %v2117_v23 = vsel %vm2115_vm7, %v4902_v54, 2102212464 }
 0x2b8   : > { %v993_v49 = vsel %vm986_vm3, %v989_v2, %v992_v47  ;;  %v3035_v13 = vadd.s32 4294967294, %v1566_v15  ;;  %v2134_v9 = vmul.u32 %v2132_v30, %v2129_v29  ;;  %v2135_v1 = vmul.u32 %v2131_v37, %v2130_v21 }
 0x2b9   : > { %v994_v43 = vsel %vm983_vm6, nan, %v993_v49  ;;  %v2133_v56 = vmul.u32 %v2131_v37, %v2129_v29  ;;  %v2136_v18 = vmul.u32 %v2132_v30, %v2130_v21  ;;  %v2155_v11 = vmul.u32 %v2153_v12, %v2129_v29 }
 0x2ba   : > { %2858 = vst [vmem:[%s3701_s7 + $0x18] sm:$0xff] %v994_v43  ;;  %vm3036_vm10 = vcmp.lt.s32.totalorder %v3035_v13, 0  ;;  %v2137_v39 = vshll.u32 %v2134_v9, 16  ;;  %v2157_v38 = vmul.u32 %v2153_v12, %v2130_v21  ;;  %v2139_v45 = vshll.u32 %v2135_v1, 16 }
 0x2bb   : > { %v1569_v27 = vsel %vm3036_vm10, 0, %v3035_v13  ;;  %v2156_v19 = vmul.u32 %v2154_v62, %v2129_v29  ;;  %v2138_v20 = vshrl.u32 %v2134_v9, 16  ;;  %v2158_v53 = vmul.u32 %v2154_v62, %v2130_v21 }
 0x2bc   : > { %v1570_v3 = vsub.s32 32, %v1569_v27  ;;  %v1574_v5 = vsub.s32 4294967266, %v1569_v27  ;;  %vm2141_vm13 = vc.u32 %v2133_v56, %v2137_v39  ;;  %v2143_v24 = vadd.s32 %v2137_v39, %v2133_v56 }
 0x2bd   : > { %v1571_v51 = vshll.u32 %v1562_v58, %v1569_v27  ;;  %v2142_v28 = vsel %vm2141_vm13, 1, %v3245_v14  ;;  %v2159_v25 = vshll.u32 %v2156_v19, 16  ;;  %v2161_v47 = vshll.u32 %v2157_v38, 16 }
 0x2be   : > { %v1572_v40 = vshrl.u32 %v1554_v44, %v1570_v3  ;;  %v1575_v41 = vadd.s32 127, %v1574_v5  ;;  %v2144_v52 = vadd.s32 %v2142_v28, %v2136_v18  ;;  %vm2145_vm12 = vc.u32 %v2143_v24, %v2139_v45 }
 0x2bf   : > { %v2146_v0 = vsel %vm2145_vm12, 1, %v3245_v14  ;;  %vm2163_vm14 = vc.u32 %v2155_v11, %v2159_v25  ;;  %v2165_v16 = vadd.s32 %v2159_v25, %v2155_v11  ;;  %v1584_v58 = vsub.s32 4, %v4891_v48 }
 0x2c0   : > { %v1573_v50 = vor.u32 %v1572_v40, %v1571_v51  ;;  %v1576_v7 = vshll.u32 %v1575_v41, 23  ;;  %v2148_v46 = vadd.s32 %v2146_v0, %v2144_v52  ;;  %v2096_v2 = vshrl.u32 %v3239_v55, %v4874_v31 }
 0x2c1   : > { %v2164_v10 = vsel %vm2163_vm14, 1, %v3245_v14  ;;  %vm2167_vm15 = vc.u32 %v2165_v16, %v2161_v47  ;;  %v2140_v29 = vshrl.u32 %v2135_v1, 16  ;;  %vm1462_vm2 = vcmp.lt.s32.totalorder %v4728_v42, 0 }
 0x2c2   : > { %v1577_v17 = vor.u32 4788187, %v1576_v7  ;;  %v2149_v6 = vadd.s32 %v2148_v46, %v2138_v20  ;;  %v2166_v49 = vadd.s32 %v2164_v10, %v2158_v53  ;;  %v1580_v35 = vcvt.s32.f32 %v1573_v50 }
 0x2c3   : > { %v2168_v43 = vsel %vm2167_vm15, 1, %v3245_v14  ;;  %v2160_v21 = vshrl.u32 %v2156_v19, 16  ;;  %v2703_v31 = vand.u32 2139095040, %v4942_v34  ;;  %v2116_v13 = vsel %vm2112_vm5, %v2096_v2, %v4896_v22 }
 0x2c4   : > { %v1578_v15 = vand.u32 2147483647, %v1577_v17  ;;  %v2170_v37 = vadd.s32 %v2168_v43, %v2166_v49  ;;  %v2118_v54 = vsel %vm2114_vm9, %v4898_v26, %v2117_v23  ;;  %v4962_v12 = vadd.s32 %v2149_v6, %v2140_v29 }
 0x2c5   : > { %v1585_v9 = vsel %vm1462_vm2, %v1584_v58, %v4891_v48  ;;  %v2162_v1 = vshrl.u32 %v2157_v38, 16  ;;  %v2704_v62 = vshrl.u32 %v2703_v31, 23  ;;  %v4967_v56 = vadd.s32 %v2165_v16, %v2161_v47 }
 0x2c6   : > { %v1581_v30 = vmul.f32 %v1580_v35, %v1578_v15  ;;  %v2171_v44 = vadd.s32 %v2170_v37, %v2160_v21  ;;  %vm1461_vm0 = vcmp.le.f32.partialorder %v1460_v33, 0.7853982  ;;  %v2119_v22 = vsel %vm2113_vm11, %v2116_v13, %v2118_v54 }
 0x2c7   : > { %v3058_v26 = vadd.s32 4294967169, %v2704_v62  ;;  %v1587_v3 = vsel %vm1461_vm0, 0, %v1585_v9  ;;  %vm2175_vm1 = vc.u32 %v4962_v12, %v4967_v56  ;;  %v2700_v11 = vand.u32 2147483647, %v4942_v34 }
 0x2c8   : > { %v1582_v27 = vxor.u32 2147483648, %v1581_v30  ;;  %v2172_v18 = vadd.s32 %v2171_v44, %v2162_v1  ;;  %v2173_v33 = vmul.u32 %v4914_v4, %v2119_v22  ;;  %v1604_v36 = vadd.s32 3, %v1587_v3 }
 0x2c9   : > { %v2710_v38 = vadd.s32 1, %v3058_v26  ;;  %v2707_v28 = vand.u32 8388607, %v2700_v11  ;;  %vm1603_vm5 = vweird.f32 %v4728_v42  ;;  %vm2082_vm14 = vcmp.lt.s32.totalorder %v4766_v60, 0 }
 0x2ca   : > { %v1583_v39 = vsel %vm1462_vm2, %v1582_v27, %v1581_v30  ;;  %v2176_v5 = vadd.s32 1, %v2172_v18  ;;  %v1605_v7 = vand.u32 3, %v1604_v36 }
 0x2cb   : > { %v1586_v48 = vsel %vm1461_vm0, %v4728_v42, %v1583_v39  ;;  %vm2711_vm3 = vcmp.gt.s32.totalorder %v2710_v38, 0  ;;  %v2708_v58 = vor.u32 8388608, %v2707_v28 }
 0x2cc   : > { %v1588_v45 = vmul.f32 %v1586_v48, %v1586_v48  ;;  %v2177_v24 = vsel %vm2175_vm1, %v2176_v5, %v2172_v18  ;;  %v2712_v41 = vsel %vm2711_vm3, %v2710_v38, 0  ;;  %vm1607_vm6 = vcmp.eq.s32.totalorder %v1605_v7, 0 }
 0x2cd   : > { %v2178_v40 = vadd.s32 %v2177_v24, %v2173_v33  ;;  %v2714_v20 = vand.u32 31, %v2712_v41  ;;  %v4987_v2 = vshrl.u32 %v2712_v41, 5  ;;  %vm1606_vm4 = vcmp.lt.s32.totalorder %v1605_v7, 2 }
 0x2ce   : > { %v1589_v19 = vmul.f32 -0.001358992, %v1588_v45  ;;  %v1596_v51 = vmul.f32 -0.00019511016, %v1588_v45  ;;  %vm1610_vm9 = vcmp.eq.s32.totalorder %v1605_v7, 2  ;;  %v5014_v5 = vshll.u32 %v2708_v58, 8 }
 0x2cf   : > { %v2179_v50 = vadd.s32 536870912, %v2178_v40  ;;  %v4982_v0 = vsub.s32 32, %v2714_v20  ;;  %v2717_v29 = vshll.u32 %v3239_v55, %v2714_v20  ;;  %v2720_v43 = vshll.u32 %v3240_v57, %v2714_v20 }
 0x2d0   : > { %v1590_v52 = vadd.f32 0.041655596, %v1589_v19  ;;  %v1597_v25 = vadd.f32 0.008332121, %v1596_v51  ;;  %v2726_v37 = vshll.u32 %v3242_v61, %v2714_v20  ;;  %v2723_v44 = vshll.u32 %v3241_v59, %v2714_v20 }
 0x2d1   : > { %v4984_v4 = vshrl.u32 %v2179_v50, 30  ;;  %v2718_v10 = vshrl.u32 %v3240_v57, %v4982_v0  ;;  %v2721_v23 = vshrl.u32 %v3241_v59, %v4982_v0  ;;  %v2727_v6 = vshrl.u32 %v3243_v63, %v4982_v0 }
 0x2d2   : > { %v1591_v53 = vmul.f32 %v1590_v52, %v1588_v45  ;;  %v1598_v46 = vmul.f32 %v1597_v25, %v1588_v45  ;;  %v2724_v21 = vshrl.u32 %v3242_v61, %v4982_v0  ;;  %v2730_v31 = vshrl.u32 %v3244_v8, %v4982_v0 }
 0x2d3   : > { %v2181_v17 = vshll.u32 %v4984_v4, 30  ;;  %v5003_v9 = vor.u32 %v2718_v10, %v2717_v29  ;;  %v5005_v1 = vor.u32 %v2721_v23, %v2720_v43  ;;  %v2728_v62 = vor.u32 %v2727_v6, %v2726_v37 }
 0x2d4   : > { %v1592_v47 = vadd.f32 -0.4999988, %v1591_v53  ;;  %v1599_v16 = vadd.f32 -0.16666654, %v1598_v46  ;;  %v2729_v18 = vshll.u32 %v3243_v63, %v2714_v20  ;;  %v2174_v61 = vadd.s32 %v4967_v56, %v4962_v12 }
 0x2d5   : > { %v2182_v35 = vsub.s32 %v2178_v40, %v2181_v17  ;;  %v5011_v26 = vor.u32 %v2724_v21, %v2723_v44  ;;  %vm2732_vm8 = vcmp.lt.s32.totalorder %v4987_v2, 1  ;;  %vm2733_vm11 = vcmp.lt.s32.totalorder %v4987_v2, 2 }
 0x2d6   : > { %v1593_v49 = vmul.f32 %v1592_v47, %v1588_v45  ;;  %v1600_v15 = vmul.f32 %v1599_v16, %v1588_v45  ;;  %v2731_v3 = vor.u32 %v2730_v31, %v2729_v18  ;;  %vm2735_vm10 = vcmp.lt.s32.totalorder %v4987_v2, 4 }
 0x2d7   : > { %vm2183_vm7 = vcmp.lt.s32.totalorder %v2182_v35, 0  ;;  %v2184_v54 = vsub.s32 0, %v2182_v35  ;;  %v2740_v63 = vsel %vm2732_vm8, %v5003_v9, %v5005_v1  ;;  %vm2734_vm13 = vcmp.lt.s32.totalorder %v4987_v2, 3 }
 0x2d8   : > { %v1594_v30 = vadd.f32 1.0, %v1593_v49  ;;  %v1601_v13 = vadd.f32 1.0, %v1600_v15  ;;  %v2744_v33 = vsel %vm2732_vm8, %v5005_v1, %v5011_v26  ;;  %v2745_v51 = vsel %vm2735_vm10, %v2731_v3, 1326507024 }
 0x2d9   : > { %v2185_v22 = vsel %vm2183_vm7, %v2184_v54, %v2182_v35  ;;  %v2746_v28 = vsel %vm2734_vm13, %v2728_v62, %v2745_v51  ;;  %v2749_v20 = vand.u32 65535, %v5014_v5  ;;  %v2750_v16 = vshrl.u32 %v5014_v5, 16 }
 0x2da   : > { %v1602_v57 = vmul.f32 %v1601_v13, %v1586_v48  ;;  %v1611_v27 = vxor.u32 2147483648, %v1594_v30  ;;  %v2186_v8 = vclz %v2185_v22  ;;  %v2741_v48 = vsel %vm2735_vm10, %v2728_v62, 920167782 }
 0x2db   : > { %v2742_v45 = vsel %vm2734_vm13, %v5011_v26, %v2741_v48  ;;  %v2747_v42 = vsel %vm2733_vm11, %v2744_v33, %v2746_v28  ;;  %v2737_v3 = vsel %vm2735_vm10, %v5011_v26, 2102212464  ;;  %vm5059_vm3 = vcmp.le.f32.partialorder %v2080_v32, 0.7853982 }
 0x2dc   : > { %v1608_v39 = vxor.u32 2147483648, %v1602_v57  ;;  %v3047_v59 = vadd.s32 4294967294, %v2186_v8  ;;  %v1612_v56 = vsel %vm1610_vm9, %v1611_v27, %v1602_v57  ;;  %v2743_v19 = vsel %vm2733_vm11, %v2740_v63, %v2742_v45 }
 0x2dd   : > { %v2773_v25 = vand.u32 65535, %v2743_v19  ;;  %v2774_v50 = vshrl.u32 %v2743_v19, 16  ;;  %v2751_v46 = vand.u32 65535, %v2747_v42  ;;  %v2752_v47 = vshrl.u32 %v2747_v42, 16 }
 0x2de   : > { %v1609_v12 = vsel %vm1607_vm6, %v1594_v30, %v1608_v39  ;;  %vm3048_vm12 = vcmp.lt.s32.totalorder %v3047_v59, 0  ;;  %v2716_v39 = vshrl.u32 %v3239_v55, %v4982_v0  ;;  %v2738_v33 = vsel %vm2734_vm13, %v5005_v1, %v2737_v3 }
 0x2df   : > { %v1613_v38 = vsel %vm1606_vm4, %v1609_v12, %v1612_v56  ;;  %v2189_v24 = vsel %vm3048_vm12, 0, %v3047_v59  ;;  %v2776_v17 = vmul.u32 %v2774_v50, %v2749_v20  ;;  %v2754_v23 = vmul.u32 %v2752_v47, %v2749_v20 }
 0x2e0   : > { %v1614_v36 = vsel %vm1603_vm5, nan, %v1613_v38  ;;  %v2190_v40 = vsub.s32 32, %v2189_v24  ;;  %v2194_v41 = vsub.s32 4294967266, %v2189_v24  ;;  %v2191_v52 = vshll.u32 %v2182_v35, %v2189_v24 }
 0x2e1   : > { %2862 = vst [vmem:[%s3701_s7 + $0x38] sm:$0xff] %v1614_v36  ;;  %v2755_v6 = vmul.u32 %v2751_v46, %v2750_v16  ;;  %v2777_v49 = vmul.u32 %v2773_v25, %v2750_v16  ;;  %v2779_v15 = vshll.u32 %v2776_v17, 16  ;;  %v2753_v29 = vmul.u32 %v2751_v46, %v2749_v20 }
 0x2e2   : > { %v2192_v7 = vshrl.u32 %v2174_v61, %v2190_v40  ;;  %v2195_v53 = vadd.s32 127, %v2194_v41  ;;  %v2757_v43 = vshll.u32 %v2754_v23, 16  ;;  %v2775_v21 = vmul.u32 %v2773_v25, %v2749_v20 }
 0x2e3   : > { %v2756_v31 = vmul.u32 %v2752_v47, %v2750_v16  ;;  %v2759_v30 = vshll.u32 %v2755_v6, 16  ;;  %v2778_v13 = vmul.u32 %v2774_v50, %v2750_v16  ;;  %v2781_v57 = vshll.u32 %v2777_v49, 16 }
 0x2e4   : > { %v2193_v58 = vor.u32 %v2192_v7, %v2191_v52  ;;  %v2196_v10 = vshll.u32 %v2195_v53, 23  ;;  %vm2761_vm15 = vc.u32 %v2753_v29, %v2757_v43  ;;  %v2763_v44 = vadd.s32 %v2757_v43, %v2753_v29 }
 0x2e5   : > { %vm2783_vm2 = vc.u32 %v2775_v21, %v2779_v15  ;;  %v2762_v62 = vsel %vm2761_vm15, 1, %v3245_v14  ;;  %v2785_v22 = vadd.s32 %v2779_v15, %v2775_v21  ;;  %v2758_v12 = vshrl.u32 %v2754_v23, 16 }
 0x2e6   : > { %v2197_v35 = vor.u32 4788187, %v2196_v10  ;;  %v2200_v37 = vcvt.s32.f32 %v2193_v58  ;;  %v2784_v27 = vsel %vm2783_vm2, 1, %v3245_v14  ;;  %v2764_v61 = vadd.s32 %v2762_v62, %v2756_v31 }
 0x2e7   : > { %vm2765_vm0 = vc.u32 %v2763_v44, %v2759_v30  ;;  %v2786_v8 = vadd.s32 %v2784_v27, %v2778_v13  ;;  %vm2787_vm1 = vc.u32 %v2785_v22, %v2781_v57  ;;  %v2736_v55 = vsel %vm2732_vm8, %v2716_v39, %v5003_v9 }
 0x2e8   : > { %v2198_v54 = vand.u32 2147483647, %v2197_v35  ;;  %v2766_v59 = vsel %vm2765_vm0, 1, %v3245_v14  ;;  %v2788_v48 = vsel %vm2787_vm1, 1, %v3245_v14  ;;  %v2780_v0 = vshrl.u32 %v2776_v17, 16 }
 0x2e9   : > { %v2768_v56 = vadd.s32 %v2766_v59, %v2764_v61  ;;  %v2790_v26 = vadd.s32 %v2788_v48, %v2786_v8  ;;  %v2760_v14 = vshrl.u32 %v2755_v6, 16  ;;  %v2204_v32 = vsub.s32 4, %v4984_v4 }
 0x2ea   : > { %v2201_v18 = vmul.f32 %v2200_v37, %v2198_v54  ;;  %v2782_v19 = vshrl.u32 %v2777_v49, 16  ;;  %v2789_v41 = vadd.s32 %v2785_v22, %v2781_v57  ;;  %v2739_v28 = vsel %vm2733_vm11, %v2736_v55, %v2738_v33 }
 0x2eb   : > { %v2769_v36 = vadd.s32 %v2768_v56, %v2758_v12  ;;  %v2791_v51 = vadd.s32 %v2790_v26, %v2780_v0  ;;  %v2205_v1 = vsel %vm2082_vm14, %v2204_v32, %v4984_v4  ;;  %v2793_v53 = vmul.u32 %v5014_v5, %v2739_v28 }
 0x2ec   : > { %v2202_v63 = vxor.u32 2147483648, %v2201_v18  ;;  %v2207_v47 = vsel %vm5059_vm3, 0, %v2205_v1  ;;  %vm2223_vm8 = vweird.f32 %v4766_v60  ;;  %vm2702_vm10 = vcmp.lt.s32.totalorder %v4942_v34, 0 }
 0x2ed   : > { %v2770_v40 = vadd.s32 %v2769_v36, %v2760_v14  ;;  %v2792_v20 = vadd.s32 %v2791_v51, %v2782_v19  ;;  %v2224_v6 = vadd.s32 3, %v2207_v47  ;;  %vm2701_vm13 = vcmp.le.f32.partialorder %v2700_v11, 0.7853982 }
 0x2ee   : > { %v2203_v45 = vsel %vm2082_vm14, %v2202_v63, %v2201_v18  ;;  %vm2843_vm2 = vweird.f32 %v4942_v34 }
 0x2ef   : > { %v2206_v24 = vsel %vm5059_vm3, %v4766_v60, %v2203_v45  ;;  %vm2795_vm6 = vc.u32 %v2770_v40, %v2789_v41  ;;  %v2796_v25 = vadd.s32 1, %v2792_v20  ;;  %v2225_v21 = vand.u32 3, %v2224_v6 }
 0x2f0   : > { %v2208_v9 = vmul.f32 %v2206_v24, %v2206_v24  ;;  %v2794_v8 = vadd.s32 %v2789_v41, %v2770_v40 }
 0x2f1   : > { %v2797_v46 = vsel %vm2795_vm6, %v2796_v25, %v2792_v20  ;;  %vm2227_vm5 = vcmp.eq.s32.totalorder %v2225_v21, 0  ;;  %vm2230_vm7 = vcmp.eq.s32.totalorder %v2225_v21, 2  ;;  %vm2226_vm9 = vcmp.lt.s32.totalorder %v2225_v21, 2 }
 0x2f2   : > { %v2209_v52 = vmul.f32 -0.001358992, %v2208_v9  ;;  %v2216_v42 = vmul.f32 -0.00019511016, %v2208_v9  ;;  %v2798_v17 = vadd.s32 %v2797_v46, %v2793_v53 }
 0x2f4   : > { %v2210_v50 = vadd.f32 0.041655596, %v2209_v52  ;;  %v2217_v7 = vadd.f32 0.008332121, %v2216_v42  ;;  %v2799_v23 = vadd.s32 536870912, %v2798_v17 }
 0x2f6   : > { %v2211_v16 = vmul.f32 %v2210_v50, %v2208_v9  ;;  %v2218_v2 = vmul.f32 %v2217_v7, %v2208_v9  ;;  %v2800_v35 = vshrl.u32 %v2799_v23, 30 }
 0x2f8   : > { %v2212_v58 = vadd.f32 -0.4999988, %v2211_v16  ;;  %v2219_v10 = vadd.f32 -0.16666654, %v2218_v2  ;;  %v2801_v43 = vshll.u32 %v2800_v35, 30  ;;  %v2824_v33 = vsub.s32 4, %v2800_v35 }
 0x2fa   : > { %v2213_v49 = vmul.f32 %v2212_v58, %v2208_v9  ;;  %v2220_v15 = vmul.f32 %v2219_v10, %v2208_v9  ;;  %v2802_v31 = vsub.s32 %v2798_v17, %v2801_v43  ;;  %v2825_v19 = vsel %vm2702_vm10, %v2824_v33, %v2800_v35 }
 0x2fb   : > { %v2827_v40 = vsel %vm2701_vm13, 0, %v2825_v19 }
 0x2fc   : > { %v2214_v4 = vadd.f32 1.0, %v2213_v49  ;;  %v2221_v29 = vadd.f32 1.0, %v2220_v15  ;;  %vm2803_vm4 = vcmp.lt.s32.totalorder %v2802_v31, 0  ;;  %v2804_v13 = vsub.s32 0, %v2802_v31 }
 0x2fd   : > { %v2844_v42 = vadd.s32 3, %v2827_v40 }
 0x2fe   : > { %v2222_v37 = vmul.f32 %v2221_v29, %v2206_v24  ;;  %v2231_v5 = vxor.u32 2147483648, %v2214_v4  ;;  %v2805_v62 = vsel %vm2803_vm4, %v2804_v13, %v2802_v31 }
 0x2ff   : > { %v2806_v27 = vclz %v2805_v62  ;;  %v2845_v7 = vand.u32 3, %v2844_v42 }
 0x300   : > { %v2228_v30 = vxor.u32 2147483648, %v2222_v37  ;;  %v2232_v44 = vsel %vm2230_vm7, %v2231_v5, %v2222_v37 }
 0x301   : > { %v3059_v18 = vadd.s32 4294967294, %v2806_v27  ;;  %vm2847_vm12 = vcmp.eq.s32.totalorder %v2845_v7, 0  ;;  %vm2850_vm14 = vcmp.eq.s32.totalorder %v2845_v7, 2  ;;  %vm2846_vm15 = vcmp.lt.s32.totalorder %v2845_v7, 2 }
 0x302   : > { %v2229_v54 = vsel %vm2227_vm5, %v2214_v4, %v2228_v30 }
 0x303   : > { %v2233_v57 = vsel %vm2226_vm9, %v2229_v54, %v2232_v44  ;;  %vm3060_vm11 = vcmp.lt.s32.totalorder %v3059_v18, 0 }
 0x304   : > { %v2234_v22 = vsel %vm2223_vm8, nan, %v2233_v57  ;;  %v2809_v61 = vsel %vm3060_vm11, 0, %v3059_v18 }
 0x305   : > { %2866 = vst [vmem:[%s3701_s7 + $0x58] sm:$0xff] %v2234_v22  ;;  %v2810_v39 = vsub.s32 32, %v2809_v61  ;;  %v2814_v3 = vsub.s32 4294967266, %v2809_v61  ;;  %v2811_v59 = vshll.u32 %v2802_v31, %v2809_v61 }
 0x307   : > { %v2812_v63 = vshrl.u32 %v2794_v8, %v2810_v39  ;;  %v2815_v12 = vadd.s32 127, %v2814_v3 }
 0x309   : > { %v2813_v56 = vor.u32 %v2812_v63, %v2811_v59  ;;  %v2816_v48 = vshll.u32 %v2815_v12, 23 }
 0x30b   : > { %v2817_v38 = vor.u32 4788187, %v2816_v48  ;;  %v2820_v0 = vcvt.s32.f32 %v2813_v56 }
 0x30d   : > { %v2818_v55 = vand.u32 2147483647, %v2817_v38 }
 0x30f   : > { %v2821_v26 = vmul.f32 %v2820_v0, %v2818_v55 }
 0x311   : > { %v2822_v60 = vxor.u32 2147483648, %v2821_v26 }
 0x313   : > { %v2823_v45 = vsel %vm2702_vm10, %v2822_v60, %v2821_v26 }
 0x314   : > { %v2826_v14 = vsel %vm2701_vm13, %v4942_v34, %v2823_v45 }
 0x315   : > { %v2828_v36 = vmul.f32 %v2826_v14, %v2826_v14 }
 0x317   : > { %v2829_v32 = vmul.f32 -0.001358992, %v2828_v36  ;;  %v2836_v24 = vmul.f32 -0.00019511016, %v2828_v36 }
 0x319   : > { %v2830_v51 = vadd.f32 0.041655596, %v2829_v32  ;;  %v2837_v9 = vadd.f32 0.008332121, %v2836_v24 }
 0x31b   : > { %v2831_v41 = vmul.f32 %v2830_v51, %v2828_v36  ;;  %v2838_v28 = vmul.f32 %v2837_v9, %v2828_v36 }
 0x31d   : > { %v2832_v20 = vadd.f32 -0.4999988, %v2831_v41  ;;  %v2839_v52 = vadd.f32 -0.16666654, %v2838_v28 }
 0x31f   : > { %v2833_v11 = vmul.f32 %v2832_v20, %v2828_v36  ;;  %v2840_v1 = vmul.f32 %v2839_v52, %v2828_v36 }
 0x321   : > { %v2834_v25 = vadd.f32 1.0, %v2833_v11  ;;  %v2841_v50 = vadd.f32 1.0, %v2840_v1 }
 0x323   : > { %v2842_v53 = vmul.f32 %v2841_v50, %v2826_v14  ;;  %v2851_v46 = vxor.u32 2147483648, %v2834_v25 }
 0x325   : > { %v2848_v47 = vxor.u32 2147483648, %v2842_v53  ;;  %v2852_v2 = vsel %vm2850_vm14, %v2851_v46, %v2842_v53 }
 0x327   : > { %v2849_v16 = vsel %vm2847_vm12, %v2834_v25, %v2848_v47 }
 0x328   : > { %v2853_v17 = vsel %vm2846_vm15, %v2849_v16, %v2852_v2 }
 0x329   : > { %v2854_v58 = vsel %vm2843_vm2, nan, %v2853_v17 }
 0x32a   : > { %2870 = vst [vmem:[%s3701_s7 + $0x78] sm:$0xff] %v2854_v58 }
 0x32b   : > { %3186 = shalt.err (!%p3183_p5)
}
 0x32c   : > { %s3246_s5 = smov 128   ;;  %s3247_s7 = smov 8  }
 0x32d   : > { %3091 = dma.vmem_to_hbm [thread:$0]  (%p3308_p4), %s2886_s28, 2048, %s2888_s29, %s2872_s15, %s3246_s5, %s3246_s5, %s3247_s7  }
 0x32e PF: > { %p3097_p6 = scmp.ge.s32.totalorder %s3237_s17, 2  ;;  %s2902_s18 = sand.u32 1, %s3217_s12  }
 0x32f   : > { %s2903_s19 = scalar_lea.sflag [#allocation3], %s2902_s18 }
 0x330   : > { %p3094_p7 = pnand %p3097_p6, %p3315_p8 }
 0x332   : > { %p3095_p9 = pneg %p3094_p7 }
 0x334   : > { %3212 = dma.done.wait (%p3095_p9), %s2903_s19, 2048  }
 0x335   : > { %3214 = vsyncadd (%p3095_p9), %s2903_s19, 4294965248  ;;  %s16_s17 = sadd.s32 1, %s3237_s17   ;;  %s5156_s12 = smov %s3221_s13 }
 0x336   : > { %p13_p10 = scmp.ge.s32.totalorder %s16_s17, 4   ;;  %s5157_s13 = smov %s3225_s14 }
 0x337   : > { %s5158_s14 = smov %s3321_s25  ;;  %s5159_s15 = smov %s3233_s16 }
 0x338   : > { %s5160_s16 = smov %s5162_s20  ;;  %15 = sbr.rel (!%p13_p10) target bundleno = 4 (0x4), region = 73 }
 0x33d   :  { %2909 = vsyncpa [#allocation3], 1 }
 0x33e   :  { %2911 = vsyncpa [#allocation3 + $0x1], 1 }

// kernel: tpu_custom_call.1
= control target key start
LH: loop header
LB: loop body
LE: loop exit
PB: predicated region body
PF: predicated region fallthrough
CT: control target
= control target key end

     0   :  { %8 = vsyncpa [#allocation3], 0  ;;  %s5130_s0 = inlined_call_operand.vmem [shape: f32[256,64], index: 0, kind: input, shape index: {}]   ;;  %s5131_s1 = inlined_call_operand.vmem [shape: f32[64,128], index: 1, kind: input, shape index: {}]   ;;  %s5132_s2 = inlined_call_operand.vmem [shape: f32[1,128], index: 2, kind: input, shape index: {}]   ;;  %s5133_s3 = inlined_call_operand.hbm [shape: f32[256,128], index: 3, kind: output, shape index: {}]  }
   0x1   :  { %10 = vsyncpa [#allocation3 + $0x1], 0  ;;  %s3268_s12 = smov 0   ;;  %s3270_s13 = smov 0  }
   0x2   :  { %s3272_s14 = smov 0   ;;  %s3274_s15 = smov 0  }
   0x3   :  { %s3276_s16 = smov 0   ;;  %s3278_s17 = smov 0  }
   0x4 LB: > { %s2987_s18 = sadd.s32 4294967295, %s3237_s17   ;;  %s2988_s19 = sadd.s32 4294967294, %s3237_s17   ;;  %s3237_s17 = sphi %s3278_s17, %s16_s17   ;;  %s3233_s16 = sphi %s3276_s16, %s5160_s16   ;;  %s3229_s15 = sphi %s3274_s15, %s5159_s15   ;;  %s3225_s14 = sphi %s3272_s14, %s5158_s14   ;;  %s3221_s13 = sphi %s3270_s13, %s5157_s13   ;;  %s3217_s12 = sphi %s3268_s12, %s5156_s12  }
   0x5   : > { %s28_s20 = sadd.s32 1, %s3233_s16  ;;  %s115_s21 = sadd.s32 1, %s3225_s14 }
   0x6   : > { %p30_p0 = scmp.ge.s32.totalorder %s28_s20, 2  ;;  %p125_p1 = scmp.ne.s32.totalorder %s3225_s14, %s3221_s13 }
   0x7   : > { %p126_p2 = scmp.eq.s32.totalorder %s2987_s18, 1  ;;  %p131_p3 = scmp.ne.s32.totalorder %s3221_s13, %s3217_s12 }
   0x8   : > { %s5162_s20 = smov (%p30_p0, %s28_s20), 0  ;;  %p132_p5 = scmp.eq.s32.totalorder %s2988_s19, 1 }
   0x9   : > { %p3308_p4 = por %p126_p2, %p125_p1  ;;  %s110_s23 = ssub.s32 %s3233_s16, %s5162_s20 }
   0xa   : > { %p2993_p6 = scmp.ge.s32.totalorder %s3237_s17, 1  ;;  %p113_p7 = scmp.eq.s32.totalorder %s110_s23, 0 }
   0xb   : > { %p3315_p8 = por %p132_p5, %p131_p3  ;;  %p172_p9 = scmp.lt.s32.totalorder %s3237_s17, 3 }
   0xc   : > { %s3321_s25 = scalar_select %p113_p7, %s3225_s14, %s115_s21  }
   0xd   : > { %p173_p10 = pnand %p2993_p6, %p172_p9 }
   0xe   : > { %s2995_s30 = sshll.u32 (!%p173_p10), %s3229_s15, 4  ;;  %s200_s5 = sand.u32 (!%p173_p10), 1, %s3221_s13  }
   0xf   : > { %176 = sbr.rel (%p173_p10) target bundleno = 814 (0x32e), region = 32  ;;  %p204_p11 = scmp.lt.s32.totalorder (!%p173_p10), %s2995_s30, 31 }
  0x10   : > { %s2994_s6 = sshll.u32 (!%p173_p10), %s200_s5, 7  ;;  %s3066_s21 = sshll.u32 (!%p173_p10), %s3229_s15, 7 }
  0x11   : > { %s3701_s7 = scalar_lea.vmem (!%p173_p10), [#allocation2], %s2994_s6  ;;  %s2872_s15 = scalar_lea.sflag (!%p173_p10), [#allocation3], %s200_s5 }
  0x12   : > { %s2885_s28 = sshll.u32 (!%p173_p10), %s3701_s7, 4  ;;  %s3179_s9 = scalar_lea.hbm (!%p173_p10), %s5133_s3, 256  ;;  %s2886_s28 = int_to_ptr.vmem [resolvable:$true] %s2885_s28 }
  0x14   : > { %v240_v0 = vld [vmem:[%s5131_s1 + $0x38] sm:$0xff]  ;;  %v239_v1 = vld [vmem:[%s5131_s1 + $0x30] sm:$0xff]  ;;  %v238_v2 = vld [vmem:[%s5131_s1 + $0x28] sm:$0xff]  ;;  %s5164_s30 = smov (!%p204_p11, %s2995_s30), 31  ;;  %vm245_vm0 = vcmask 523264  }
  0x15   : > { %302 = vmatpush.msra.mxu0 %v240_v0  ;;  %3067 = vmatpush.msra.mxu1 %v240_v0  ;;  %v237_v3 = vld [vmem:[%s5131_s1 + $0x20] sm:$0xff]  ;;  %v236_v4 = vld [vmem:[%s5131_s1 + $0x18] sm:$0xff]  ;;  %v235_v5 = vld [vmem:[%s5131_s1 + $0x10] sm:$0xff]  ;;  %s2996_s18 = sshll.u32 %s5164_s30, 3  ;;  %v3239_v55 = vmov 683565275  }
  0x16   : > { %3068 = vmatpush.msra.mxu2 %v240_v0  ;;  %3069 = vmatpush.msra.mxu3 %v240_v0  ;;  %v234_v6 = vld [vmem:[%s5131_s1 + $0x8] sm:$0xff]  ;;  %s3348_s27 = scalar_lea.vmem %s5130_s0, %s2996_s18  ;;  %v233_v7 = vld [vmem:[%s5131_s1] sm:$0xff]  ;;  %v3240_v57 = vmov 2475754826   ;;  %v3241_v59 = vmov 2131351028  }
  0x17   : > { %303 = vmatpush.msra.mxu0 %v239_v1  ;;  %3070 = vmatpush.msra.mxu1 %v239_v1  ;;  %v217_v8 = vld [vmem:[%s3348_s27] sm:$0xff]  ;;  %v218_v12 = vld [vmem:[%s3348_s27 + $0x8] sm:$0xff]  ;;  %v219_v16 = vld [vmem:[%s3348_s27 + $0x10] sm:$0xff]  ;;  %v3242_v61 = vmov 2102212464  }
  0x18   : > { %3071 = vmatpush.msra.mxu2 %v239_v1  ;;  %3072 = vmatpush.msra.mxu3 %v239_v1  ;;  %v221_v9 = vld [vmem:[%s3348_s27 + $0x20] sm:$0xff]  ;;  %v222_v13 = vld [vmem:[%s3348_s27 + $0x28] sm:$0xff]  ;;  %v223_v17 = vld [vmem:[%s3348_s27 + $0x30] sm:$0xff]  ;;  %v3243_v63 = vmov 920167782  }
  0x19   : > { %304 = vmatpush.msra.mxu0 %v238_v2  ;;  %3073 = vmatpush.msra.mxu1 %v238_v2  ;;  %v225_v10 = vld [vmem:[%s3348_s27 + $0x40] sm:$0xff]  ;;  %v226_v14 = vld [vmem:[%s3348_s27 + $0x48] sm:$0xff]  ;;  %v227_v18 = vld [vmem:[%s3348_s27 + $0x50] sm:$0xff] }
  0x1a   : > { %3074 = vmatpush.msra.mxu2 %v238_v2  ;;  %3075 = vmatpush.msra.mxu3 %v238_v2  ;;  %v229_v11 = vld [vmem:[%s3348_s27 + $0x60] sm:$0xff]  ;;  %v230_v15 = vld [vmem:[%s3348_s27 + $0x68] sm:$0xff]  ;;  %v231_v19 = vld [vmem:[%s3348_s27 + $0x70] sm:$0xff] }
  0x1b   : > { %305 = vmatpush.msra.mxu0 %v237_v3  ;;  %3076 = vmatpush.msra.mxu1 %v237_v3  ;;  %v220_v20 = vld [vmem:[%s3348_s27 + $0x18] sm:$0xff]  ;;  %v3388_v24 = vld [vmem:[%s5132_s2] ss:$0 sm:$0xff] }
  0x1c   : > { %3077 = vmatpush.msra.mxu2 %v237_v3  ;;  %3078 = vmatpush.msra.mxu3 %v237_v3  ;;  %v224_v21 = vld [vmem:[%s3348_s27 + $0x38] sm:$0xff] }
  0x1d   : > { %306 = vmatpush.msra.mxu0 %v236_v4  ;;  %3079 = vmatpush.msra.mxu1 %v236_v4  ;;  %v228_v22 = vld [vmem:[%s3348_s27 + $0x58] sm:$0xff] }
  0x1e   : > { %3080 = vmatpush.msra.mxu2 %v236_v4  ;;  %3081 = vmatpush.msra.mxu3 %v236_v4  ;;  %v232_v23 = vld [vmem:[%s3348_s27 + $0x78] sm:$0xff]  ;;  %s2884_s27 = scalar_lea.hbm %s5133_s3, %s3066_s21 }
  0x1f   : > { %307 = vmatpush.msra.mxu0 %v235_v5  ;;  %3082 = vmatpush.msra.mxu1 %v235_v5  ;;  %s2887_s29 = sshll.u32 %s2884_s27, 4  ;;  %s2888_s29 = int_to_ptr.hbm [resolvable:$true] %s2887_s29 }
  0x20   : > { %3083 = vmatpush.msra.mxu2 %v235_v5  ;;  %3084 = vmatpush.msra.mxu3 %v235_v5  ;;  %s3173_s30 = sshra.s32 %s2888_s29, 4  ;;  %s3174_s30 = int_to_ptr.hbm [resolvable:$true] %s3173_s30 }
  0x21   : > { %308 = vmatpush.msra.mxu0 %v234_v6  ;;  %3085 = vmatpush.msra.mxu1 %v234_v6  ;;  %s3175_s4 = scalar_lea.hbm %s3174_s30, 128  ;;  %p3180_p1 = scmp.lt.s32.totalorder %s3174_s30, %s5133_s3 }
  0x22   : > { %3086 = vmatpush.msra.mxu2 %v234_v6  ;;  %3087 = vmatpush.msra.mxu3 %v234_v6  ;;  %p3176_p12 = scmp.ne.s32.totalorder %s3174_s30, %s3175_s4  ;;  %p3181_p2 = scmp.lt.s32.totalorder %s3179_s9, %s3175_s4 }
  0x23   : > { %309 = vmatpush.msra.mxu0 %v233_v7  ;;  %3088 = vmatpush.msra.mxu1 %v233_v7 }
  0x24   : > { %3089 = vmatpush.msra.mxu2 %v233_v7  ;;  %3090 = vmatpush.msra.mxu3 %v233_v7  ;;  %p3177_p13 = pnand %p3176_p12, %p3308_p4  ;;  %p3182_p3 = por %p3181_p2, %p3180_p1 }
  0x25   : > { %2997 = vmatmul.msk.f32.vlgmr.msra.gmra.mxu0 %vm245_vm0, %v217_v8  ;;  %3001 = vmatmul.msk.f32.vlgmr.msra.gmra.mxu1 %vm245_vm0, %v221_v9  ;;  %v3244_v8 = vmov 1326507024  }
  0x26   : > { %3005 = vmatmul.msk.f32.vlgmr.msra.gmra.mxu2 %vm245_vm0, %v225_v10  ;;  %3009 = vmatmul.msk.f32.vlgmr.msra.gmra.mxu3 %vm245_vm0, %v229_v11  ;;  %p3178_p0 = pneg %p3177_p13 }
  0x28   : > { %p3183_p5 = pnand %p3182_p3, %p3178_p0 }
  0x2d   : > { %2998 = vmatmul.msk.f32.gmra.mxu0 %vm245_vm0, %v218_v12  ;;  %3002 = vmatmul.msk.f32.gmra.mxu1 %vm245_vm0, %v222_v13 }
  0x2e   : > { %3006 = vmatmul.msk.f32.gmra.mxu2 %vm245_vm0, %v226_v14  ;;  %3010 = vmatmul.msk.f32.gmra.mxu3 %vm245_vm0, %v230_v15 }
  0x35   : > { %2999 = vmatmul.msk.f32.gmra.mxu0 %vm245_vm0, %v219_v16  ;;  %3003 = vmatmul.msk.f32.gmra.mxu1 %vm245_vm0, %v223_v17 }
  0x36   : > { %3007 = vmatmul.msk.f32.gmra.mxu2 %vm245_vm0, %v227_v18  ;;  %3011 = vmatmul.msk.f32.gmra.mxu3 %vm245_vm0, %v231_v19 }
  0x3d   : > { %3000 = vmatmul.msk.f32.gmra.mxu0 %vm245_vm0, %v220_v20  ;;  %3004 = vmatmul.msk.f32.gmra.mxu1 %vm245_vm0, %v224_v21 }
  0x3e   : > { %3008 = vmatmul.msk.f32.gmra.mxu2 %vm245_vm0, %v228_v22  ;;  %3012 = vmatmul.msk.f32.gmra.mxu3 %vm245_vm0, %v232_v23 }
  0xa2   : > { %v311_v25 = vpop.f32.mrf.mxu0  ;;  %v323_v26 = vpop.f32.mrf.mxu1 }
  0xa3   : > { %v312_v27 = vadd.f32 %v3388_v24, %v311_v25  ;;  %v324_v28 = vadd.f32 %v3388_v24, %v323_v26 }
  0xa5   : > { %v3392_v29 = vmul.f32 30.0, %v312_v27  ;;  %v3394_v30 = vmul.f32 30.0, %v324_v28 }
  0xa7   : > { %v375_v31 = vand.u32 2147483647, %v3392_v29  ;;  %v378_v32 = vand.u32 2139095040, %v3392_v29  ;;  %v995_v33 = vand.u32 2147483647, %v3394_v30  ;;  %v998_v34 = vand.u32 2139095040, %v3394_v30 }
  0xa9   : > { %v379_v35 = vshrl.u32 %v378_v32, 23  ;;  %v382_v36 = vand.u32 8388607, %v375_v31  ;;  %v999_v37 = vshrl.u32 %v998_v34, 23  ;;  %v335_v39 = vpop.f32.mrf.mxu2  ;;  %v1002_v42 = vand.u32 8388607, %v995_v33 }
  0xaa   : > { %v336_v45 = vadd.f32 %v3388_v24, %v335_v39 }
  0xab   : > { %v3013_v38 = vadd.s32 4294967169, %v379_v35  ;;  %v383_v40 = vor.u32 8388608, %v382_v36  ;;  %v3025_v41 = vadd.s32 4294967169, %v999_v37  ;;  %v1003_v48 = vor.u32 8388608, %v1002_v42 }
  0xac   : > { %v3411_v53 = vmul.f32 30.0, %v336_v45 }
  0xad   : > { %v385_v43 = vadd.s32 1, %v3013_v38  ;;  %v1005_v44 = vadd.s32 1, %v3025_v41  ;;  %v3405_v47 = vshll.u32 %v383_v40, 8  ;;  %v3419_v2 = vshll.u32 %v1003_v48, 8 }
  0xae   : > { %v1618_v16 = vand.u32 2139095040, %v3411_v53 }
  0xaf   : > { %vm386_vm1 = vcmp.gt.s32.totalorder %v385_v43, 0  ;;  %vm1006_vm2 = vcmp.gt.s32.totalorder %v1005_v44, 0  ;;  %v424_v1 = vand.u32 65535, %v3405_v47  ;;  %v425_v6 = vshrl.u32 %v3405_v47, 16 }
  0xb0   : > { %v387_v46 = vsel %vm386_vm1, %v385_v43, 0  ;;  %v1007_v50 = vsel %vm1006_vm2, %v1005_v44, 0  ;;  %v3463_v36 = vand.u32 65535, %v3419_v2 }
  0xb1   : > { %v389_v49 = vand.u32 31, %v387_v46  ;;  %v3407_v51 = vshrl.u32 %v387_v46, 5  ;;  %v3409_v52 = vand.u32 31, %v1007_v50  ;;  %v3469_v43 = vshrl.u32 %v1007_v50, 5 }
  0xb3   : > { %v390_v54 = vsub.s32 32, %v389_v49  ;;  %v392_v56 = vshll.u32 %v3239_v55, %v389_v49  ;;  %v395_v58 = vshll.u32 %v3240_v57, %v389_v49  ;;  %v398_v60 = vshll.u32 %v3241_v59, %v389_v49 }
  0xb4   : > { %v401_v62 = vshll.u32 %v3242_v61, %v389_v49  ;;  %v404_v0 = vshll.u32 %v3243_v63, %v389_v49  ;;  %vm407_vm3 = vcmp.lt.s32.totalorder %v3407_v51, 1  ;;  %vm410_vm4 = vcmp.lt.s32.totalorder %v3407_v51, 4 }
  0xb5   : > { %v393_v3 = vshrl.u32 %v3240_v57, %v390_v54  ;;  %v396_v4 = vshrl.u32 %v3241_v59, %v390_v54  ;;  %v399_v5 = vshrl.u32 %v3242_v61, %v390_v54  ;;  %v402_v7 = vshrl.u32 %v3243_v63, %v390_v54 }
  0xb6   : > { %v405_v9 = vshrl.u32 %v3244_v8, %v390_v54  ;;  %v3430_v13 = vsub.s32 32, %v3409_v52  ;;  %vm409_vm5 = vcmp.lt.s32.totalorder %v3407_v51, 3  ;;  %v391_v17 = vshrl.u32 %v3239_v55, %v390_v54 }
  0xb7   : > { %v394_v10 = vor.u32 %v393_v3, %v392_v56  ;;  %v397_v11 = vor.u32 %v396_v4, %v395_v58  ;;  %v400_v12 = vor.u32 %v399_v5, %v398_v60  ;;  %v403_v14 = vor.u32 %v402_v7, %v401_v62 }
  0xb8   : > { %v406_v15 = vor.u32 %v405_v9, %v404_v0  ;;  %vm408_vm6 = vcmp.lt.s32.totalorder %v3407_v51, 2  ;;  %v1012_v22 = vshll.u32 %v3239_v55, %v3409_v52  ;;  %v1015_v23 = vshll.u32 %v3240_v57, %v3409_v52 }
  0xb9   : > { %v415_v18 = vsel %vm407_vm3, %v394_v10, %v397_v11  ;;  %v419_v19 = vsel %vm407_vm3, %v397_v11, %v400_v12  ;;  %v416_v20 = vsel %vm410_vm4, %v403_v14, 920167782  ;;  %v412_v25 = vsel %vm410_vm4, %v400_v12, 2102212464 }
  0xba   : > { %v420_v21 = vsel %vm410_vm4, %v406_v15, 1326507024  ;;  %v417_v26 = vsel %vm409_vm5, %v400_v12, %v416_v20  ;;  %v1013_v28 = vshrl.u32 %v3240_v57, %v3430_v13  ;;  %v1016_v35 = vshrl.u32 %v3241_v59, %v3430_v13 }
  0xbb   : > { %v421_v27 = vsel %vm409_vm5, %v403_v14, %v420_v21  ;;  %v418_v32 = vsel %vm408_vm6, %v415_v18, %v417_v26  ;;  %v411_v41 = vsel %vm407_vm3, %v391_v17, %v394_v10  ;;  %v413_v42 = vsel %vm409_vm5, %v397_v11, %v412_v25 }
  0xbc   : > { %v422_v34 = vsel %vm408_vm6, %v419_v19, %v421_v27  ;;  %v448_v39 = vand.u32 65535, %v418_v32  ;;  %v449_v40 = vshrl.u32 %v418_v32, 16  ;;  %v3471_v44 = vor.u32 %v1013_v28, %v1012_v22 }
  0xbd   : > { %v426_v37 = vand.u32 65535, %v422_v34  ;;  %v427_v38 = vshrl.u32 %v422_v34, 16  ;;  %v3473_v48 = vor.u32 %v1016_v35, %v1015_v23  ;;  %v1018_v49 = vshll.u32 %v3241_v59, %v3409_v52 }
  0xbe   : > { %v451_v56 = vmul.u32 %v449_v40, %v424_v1  ;;  %v452_v58 = vmul.u32 %v448_v39, %v425_v6  ;;  %v1019_v60 = vshrl.u32 %v3242_v61, %v3430_v13  ;;  %v450_v3 = vmul.u32 %v448_v39, %v424_v1 }
  0xbf   : > { %v429_v45 = vmul.u32 %v427_v38, %v424_v1  ;;  %v430_v46 = vmul.u32 %v426_v37, %v425_v6  ;;  %v428_v54 = vmul.u32 %v426_v37, %v424_v1  ;;  %v431_v62 = vmul.u32 %v427_v38, %v425_v6 }
  0xc0   : > { %v453_v50 = vmul.u32 %v449_v40, %v425_v6  ;;  %v454_v9 = vshll.u32 %v451_v56, 16  ;;  %v456_v11 = vshll.u32 %v452_v58, 16  ;;  %v1021_v12 = vshll.u32 %v3242_v61, %v3409_v52 }
  0xc1   : > { %v432_v0 = vshll.u32 %v429_v45, 16  ;;  %v433_v4 = vshrl.u32 %v429_v45, 16  ;;  %v434_v5 = vshll.u32 %v430_v46, 16  ;;  %v435_v7 = vshrl.u32 %v430_v46, 16 }
  0xc2   : > { %v3245_v14 = vmov 0   ;;  %vm458_vm8 = vc.u32 %v450_v3, %v454_v9  ;;  %v460_v17 = vadd.s32 %v454_v9, %v450_v3  ;;  %v1022_v18 = vshrl.u32 %v3243_v63, %v3430_v13 }
  0xc3   : > { %vm436_vm7 = vc.u32 %v428_v54, %v432_v0  ;;  %v438_v10 = vadd.s32 %v432_v0, %v428_v54  ;;  %v459_v6 = vsel %vm458_vm8, 1, %v3245_v14  ;;  %v1024_v19 = vshll.u32 %v3243_v63, %v3409_v52 }
  0xc4   : > { %v437_v15 = vsel %vm436_vm7, 1, %v3245_v14  ;;  %v461_v21 = vadd.s32 %v459_v6, %v453_v50  ;;  %vm462_vm10 = vc.u32 %v460_v17, %v456_v11  ;;  %v1020_v22 = vor.u32 %v1019_v60, %v1018_v49 }
  0xc5   : > { %v439_v1 = vadd.s32 %v437_v15, %v431_v62  ;;  %vm440_vm9 = vc.u32 %v438_v10, %v434_v5  ;;  %v463_v25 = vsel %vm462_vm10, 1, %v3245_v14  ;;  %v1023_v26 = vor.u32 %v1022_v18, %v1021_v12 }
  0xc6   : > { %v441_v20 = vsel %vm440_vm9, 1, %v3245_v14  ;;  %v1025_v27 = vshrl.u32 %v3244_v8, %v3430_v13  ;;  %v455_v28 = vshrl.u32 %v451_v56, 16  ;;  %v465_v32 = vadd.s32 %v463_v25, %v461_v21 }
  0xc7   : > { %v443_v23 = vadd.s32 %v441_v20, %v439_v1  ;;  %vm1027_vm11 = vcmp.lt.s32.totalorder %v3469_v43, 1  ;;  %vm1029_vm12 = vcmp.lt.s32.totalorder %v3469_v43, 3  ;;  %v457_v52 = vshrl.u32 %v452_v58, 16 }
  0xc8   : > { %v1026_v35 = vor.u32 %v1025_v27, %v1024_v19  ;;  %vm1030_vm13 = vcmp.lt.s32.totalorder %v3469_v43, 4  ;;  %v3494_v37 = vadd.s32 %v460_v17, %v456_v11  ;;  %v466_v38 = vadd.s32 %v465_v32, %v455_v28 }
  0xc9   : > { %v444_v34 = vadd.s32 %v443_v23, %v433_v4  ;;  %v1035_v39 = vsel %vm1027_vm11, %v3471_v44, %v3473_v48  ;;  %v1036_v40 = vsel %vm1030_vm13, %v1023_v26, 920167782  ;;  %vm1028_vm14 = vcmp.lt.s32.totalorder %v3469_v43, 2 }
  0xca   : > { %v1037_v46 = vsel %vm1029_vm12, %v1020_v22, %v1036_v40  ;;  %v1039_v49 = vsel %vm1027_vm11, %v3473_v48, %v1020_v22  ;;  %v414_v54 = vsel %vm408_vm6, %v411_v41, %v413_v42  ;;  %v467_v56 = vadd.s32 %v466_v38, %v457_v52 }
  0xcb   : > { %v3502_v45 = vadd.s32 %v444_v34, %v435_v7  ;;  %v1038_v58 = vsel %vm1028_vm14, %v1035_v39, %v1037_v46  ;;  %v1040_v60 = vsel %vm1030_vm13, %v1026_v35, 1326507024  ;;  %v1045_v0 = vshrl.u32 %v3419_v2, 16 }
  0xcc   : > { %v1041_v62 = vsel %vm1029_vm12, %v1023_v26, %v1040_v60  ;;  %v1068_v3 = vand.u32 65535, %v1038_v58  ;;  %v471_v50 = vadd.s32 1, %v467_v56  ;;  %v1069_v41 = vshrl.u32 %v1038_v58, 16 }
  0xcd   : > { %vm470_vm15 = vc.u32 %v3502_v45, %v3494_v37  ;;  %v1042_v51 = vsel %vm1028_vm14, %v1039_v49, %v1041_v62  ;;  %v1619_v42 = vshrl.u32 %v1618_v16, 23  ;;  %v468_v4 = vmul.u32 %v3405_v47, %v414_v54 }
  0xce   : > { %v1046_v5 = vand.u32 65535, %v1042_v51  ;;  %v1047_v7 = vshrl.u32 %v1042_v51, 16  ;;  %v1615_v9 = vand.u32 2147483647, %v3411_v53  ;;  %v472_v10 = vsel %vm470_vm15, %v471_v50, %v467_v56 }
  0xcf   : > { %v1011_v11 = vshrl.u32 %v3239_v55, %v3430_v13  ;;  %v1071_v12 = vmul.u32 %v1069_v41, %v3463_v36  ;;  %v1072_v15 = vmul.u32 %v1068_v3, %v1045_v0  ;;  %v473_v17 = vadd.s32 %v472_v10, %v468_v4 }
  0xd0   : > { %v1032_v18 = vsel %vm1030_vm13, %v1020_v22, 2102212464  ;;  %v1049_v1 = vmul.u32 %v1047_v7, %v3463_v36  ;;  %v1050_v16 = vmul.u32 %v1046_v5, %v1045_v0  ;;  %v1070_v47 = vmul.u32 %v1068_v3, %v3463_v36 }
  0xd1   : > { %v1073_v6 = vmul.u32 %v1069_v41, %v1045_v0  ;;  %v1074_v19 = vshll.u32 %v1071_v12, 16  ;;  %v3037_v20 = vadd.s32 4294967169, %v1619_v42  ;;  %v474_v21 = vadd.s32 536870912, %v473_v17 }
  0xd2   : > { %v1048_v23 = vmul.u32 %v1046_v5, %v3463_v36  ;;  %v1051_v25 = vmul.u32 %v1047_v7, %v1045_v0  ;;  %v1052_v13 = vshll.u32 %v1049_v1, 16  ;;  %v1054_v26 = vshll.u32 %v1050_v16, 16 }
  0xd3   : > { %v1076_v27 = vshll.u32 %v1072_v15, 16  ;;  %vm1078_vm0 = vc.u32 %v1070_v47, %v1074_v19  ;;  %v1080_v28 = vadd.s32 %v1074_v19, %v1070_v47  ;;  %v475_v32 = vshrl.u32 %v474_v21, 30 }
  0xd4   : > { %vm1056_vm1 = vc.u32 %v1048_v23, %v1052_v13  ;;  %v1058_v22 = vadd.s32 %v1052_v13, %v1048_v23  ;;  %v1079_v34 = vsel %vm1078_vm0, 1, %v3245_v14  ;;  %v1622_v38 = vand.u32 8388607, %v1615_v9 }
  0xd5   : > { %v1057_v52 = vsel %vm1056_vm1, 1, %v3245_v14  ;;  %v1081_v35 = vadd.s32 %v1079_v34, %v1073_v6  ;;  %vm1082_vm2 = vc.u32 %v1080_v28, %v1076_v27  ;;  %v476_v39 = vshll.u32 %v475_v32, 30 }
  0xd6   : > { %v1031_v36 = vsel %vm1027_vm11, %v1011_v11, %v3471_v44  ;;  %v1059_v40 = vadd.s32 %v1057_v52, %v1051_v25  ;;  %vm1060_vm3 = vc.u32 %v1058_v22, %v1054_v26  ;;  %v1033_v46 = vsel %vm1029_vm12, %v3473_v48, %v1032_v18 }
  0xd7   : > { %v1061_v49 = vsel %vm1060_vm3, 1, %v3245_v14  ;;  %v1083_v54 = vsel %vm1082_vm2, 1, %v3245_v14  ;;  %v1625_v56 = vadd.s32 1, %v3037_v20  ;;  %v477_v58 = vsub.s32 %v473_v17, %v476_v39 }
  0xd8   : > { %v1053_v60 = vshrl.u32 %v1049_v1, 16  ;;  %v1063_v62 = vadd.s32 %v1061_v49, %v1059_v40  ;;  %v1085_v0 = vadd.s32 %v1083_v54, %v1081_v35  ;;  %vm377_vm4 = vcmp.lt.s32.totalorder %v3392_v29, 0 }
  0xd9   : > { %v499_v3 = vsub.s32 4, %v475_v32  ;;  %v1075_v50 = vshrl.u32 %v1071_v12, 16  ;;  %vm1626_vm5 = vcmp.gt.s32.totalorder %v1625_v56, 0  ;;  %vm478_vm6 = vcmp.lt.s32.totalorder %v477_v58, 0 }
  0xda   : > { %v479_v44 = vsub.s32 0, %v477_v58  ;;  %v1055_v51 = vshrl.u32 %v1050_v16, 16  ;;  %v1064_v41 = vadd.s32 %v1063_v62, %v1053_v60  ;;  %v1034_v48 = vsel %vm1028_vm14, %v1031_v36, %v1033_v46 }
  0xdb   : > { %v1077_v42 = vshrl.u32 %v1072_v15, 16  ;;  %v1086_v4 = vadd.s32 %v1085_v0, %v1075_v50  ;;  %v1627_v5 = vsel %vm1626_vm5, %v1625_v56, 0  ;;  %v3552_v11 = vadd.s32 %v1080_v28, %v1076_v27 }
  0xdc   : > { %v480_v7 = vsel %vm478_vm6, %v479_v44, %v477_v58  ;;  %v3550_v10 = vadd.s32 %v1064_v41, %v1055_v51  ;;  %v1623_v17 = vor.u32 8388608, %v1622_v38  ;;  %v500_v12 = vsel %vm377_vm4, %v499_v3, %v475_v32 }
  0xdd   : > { %v481_v18 = vclz %v480_v7  ;;  %v1087_v1 = vadd.s32 %v1086_v4, %v1077_v42  ;;  %v1629_v47 = vand.u32 31, %v1627_v5  ;;  %vm3558_vm7 = vcmp.le.f32.partialorder %v375_v31, 0.7853982 }
  0xde   : > { %v469_v15 = vadd.s32 %v3494_v37, %v3502_v45  ;;  %v1088_v16 = vmul.u32 %v3419_v2, %v1034_v48  ;;  %vm1090_vm8 = vc.u32 %v3550_v10, %v3552_v11  ;;  %v502_v21 = vsel %vm3558_vm7, 0, %v500_v12 }
  0xdf   : > { %v3014_v6 = vadd.s32 4294967294, %v481_v18  ;;  %v1091_v19 = vadd.s32 1, %v1087_v1  ;;  %v1630_v20 = vsub.s32 32, %v1629_v47  ;;  %v3569_v23 = vshrl.u32 %v1627_v5, 5 }
  0xe0   : > { %v1632_v31 = vshll.u32 %v3239_v55, %v1629_v47  ;;  %v3572_v25 = vshll.u32 %v1623_v17, 8  ;;  %v1635_v2 = vshll.u32 %v3240_v57, %v1629_v47  ;;  %v1638_v28 = vshll.u32 %v3241_v59, %v1629_v47 }
  0xe1   : > { %vm3015_vm9 = vcmp.lt.s32.totalorder %v3014_v6, 0  ;;  %v1092_v13 = vsel %vm1090_vm8, %v1091_v19, %v1087_v1  ;;  %v1633_v37 = vshrl.u32 %v3240_v57, %v1630_v20  ;;  %v1636_v27 = vshrl.u32 %v3241_v59, %v1630_v20 }
  0xe2   : > { %v484_v45 = vsel %vm3015_vm9, 0, %v3014_v6  ;;  %v1093_v26 = vadd.s32 %v1092_v13, %v1088_v16  ;;  %v1639_v34 = vshrl.u32 %v3242_v61, %v1630_v20  ;;  %v1641_v52 = vshll.u32 %v3242_v61, %v1629_v47  ;;  %v347_v13 = vpop.f32.mrf.mxu3 }
  0xe3   : > { %v485_v32 = vsub.s32 32, %v484_v45  ;;  %v489_v22 = vsub.s32 4294967266, %v484_v45  ;;  %v486_v35 = vshll.u32 %v477_v58, %v484_v45  ;;  %v1634_v39 = vor.u32 %v1633_v37, %v1632_v31 }
  0xe4   : > { %v1094_v38 = vadd.s32 536870912, %v1093_v26  ;;  %v1642_v36 = vshrl.u32 %v3243_v63, %v1630_v20  ;;  %v1637_v49 = vor.u32 %v1636_v27, %v1635_v2  ;;  %v1645_v54 = vshrl.u32 %v3244_v8, %v1630_v20 }
  0xe5   : > { %v487_v40 = vshrl.u32 %v469_v15, %v485_v32  ;;  %v490_v46 = vadd.s32 127, %v489_v22  ;;  %v519_v56 = vadd.s32 3, %v502_v21  ;;  %v1640_v50 = vor.u32 %v1639_v34, %v1638_v28 }
  0xe6   : > { %v1095_v60 = vshrl.u32 %v1094_v38, 30  ;;  %v1643_v62 = vor.u32 %v1642_v36, %v1641_v52  ;;  %v1644_v44 = vshll.u32 %v3243_v63, %v1629_v47  ;;  %vm997_vm10 = vcmp.lt.s32.totalorder %v3394_v30, 0 }
  0xe7   : > { %v488_v0 = vor.u32 %v487_v40, %v486_v35  ;;  %v491_v3 = vshll.u32 %v490_v46, 23  ;;  %vm1647_vm11 = vcmp.lt.s32.totalorder %v3569_v23, 1  ;;  %v1664_v51 = vand.u32 65535, %v3572_v25 }
  0xe8   : > { %v1096_v58 = vshll.u32 %v1095_v60, 30  ;;  %v1665_v41 = vshrl.u32 %v3572_v25, 16  ;;  %v1646_v42 = vor.u32 %v1645_v54, %v1644_v44  ;;  %vm1650_vm12 = vcmp.lt.s32.totalorder %v3569_v23, 4 }
  0xe9   : > { %v492_v48 = vor.u32 4788187, %v491_v3  ;;  %v1655_v4 = vsel %vm1647_vm11, %v1634_v39, %v1637_v49  ;;  %v3590_v5 = vand.u32 3, %v519_v56  ;;  %vm1649_vm13 = vcmp.lt.s32.totalorder %v3569_v23, 3 }
  0xea   : > { %v3592_v7 = vsub.s32 %v1093_v26, %v1096_v58  ;;  %v1656_v17 = vsel %vm1650_vm12, %v1643_v62, 920167782  ;;  %v495_v12 = vcvt.s32.f32 %v488_v0  ;;  %vm1648_vm14 = vcmp.lt.s32.totalorder %v3569_v23, 2 }
  0xeb   : > { %v493_v18 = vand.u32 2147483647, %v492_v48  ;;  %v1657_v1 = vsel %vm1649_vm13, %v1640_v50, %v1656_v17  ;;  %v1631_v15 = vshrl.u32 %v3239_v55, %v1630_v20  ;;  %v1119_v19 = vsub.s32 4, %v1095_v60 }
  0xec   : > { %vm1098_vm15 = vcmp.lt.s32.totalorder %v3592_v7, 0  ;;  %v1099_v47 = vsub.s32 0, %v3592_v7  ;;  %v1658_v16 = vsel %vm1648_vm14, %v1655_v4, %v1657_v1  ;;  %v1659_v21 = vsel %vm1647_vm11, %v1637_v49, %v1640_v50 }
  0xed   : > { %v496_v6 = vmul.f32 %v495_v12, %v493_v18  ;;  %v1660_v31 = vsel %vm1650_vm12, %v1646_v42, 1326507024  ;;  %v1652_v2 = vsel %vm1650_vm12, %v1640_v50, 2102212464  ;;  %v1688_v45 = vand.u32 65535, %v1658_v16 }
  0xee   : > { %v1100_v37 = vsel %vm1098_vm15, %v1099_v47, %v3592_v7  ;;  %v1661_v20 = vsel %vm1649_vm13, %v1643_v62, %v1660_v31  ;;  %v1689_v32 = vshrl.u32 %v1658_v16, 16  ;;  %v1089_v22 = vadd.s32 %v3552_v11, %v3550_v10 }
  0xef   : > { %v497_v26 = vxor.u32 2147483648, %v496_v6  ;;  %v1101_v27 = vclz %v1100_v37  ;;  %v1662_v28 = vsel %vm1648_vm14, %v1659_v21, %v1661_v20  ;;  %v3620_v34 = vsel %vm1647_vm11, %v1631_v15, %v1634_v39 }
  0xf0   : > { %v1666_v52 = vand.u32 65535, %v1662_v28  ;;  %v3623_v35 = vadd.f32 %v3388_v24, %v347_v13  ;;  %v3629_v40 = vsel %vm997_vm10, %v1119_v19, %v1095_v60  ;;  %v1667_v46 = vshrl.u32 %v1662_v28, 16 }
  0xf1   : > { %v498_v38 = vsel %vm377_vm4, %v497_v26, %v496_v6  ;;  %v3026_v36 = vadd.s32 4294967294, %v1101_v27  ;;  %v3638_v11 = vsel %vm1649_vm13, %v1637_v49, %v1652_v2  ;;  %v1690_v54 = vmul.u32 %v1688_v45, %v1664_v51 }
  0xf2   : > { %v3634_v10 = vsel %vm3558_vm7, %v3392_v29, %v498_v38  ;;  %v1670_v39 = vmul.u32 %v1666_v52, %v1665_v41  ;;  %v1669_v62 = vmul.u32 %v1667_v46, %v1664_v51  ;;  %v3642_v0 = vmul.u32 %v1689_v32, %v1664_v51 }
  0xf3   : > { %v503_v56 = vmul.f32 %v3634_v10, %v3634_v10  ;;  %vm3027_vm0 = vcmp.lt.s32.totalorder %v3026_v36, 0  ;;  %v1668_v3 = vmul.u32 %v1666_v52, %v1664_v51  ;;  %v1671_v50 = vmul.u32 %v1667_v46, %v1665_v41 }
  0xf4   : > { %v1104_v60 = vsel %vm3027_vm0, 0, %v3026_v36  ;;  %v3644_v44 = vmul.u32 %v1688_v45, %v1665_v41  ;;  %v1674_v42 = vshll.u32 %v1670_v39, 16  ;;  %v1672_v4 = vshll.u32 %v1669_v62, 16 }
  0xf5   : > { %v504_v43 = vmul.f32 -0.001358992, %v503_v56  ;;  %v511_v58 = vmul.f32 -0.00019511016, %v503_v56  ;;  %v1105_v48 = vsub.s32 32, %v1104_v60  ;;  %v1109_v49 = vsub.s32 4294967266, %v1104_v60 }
  0xf6   : > { %v1675_v17 = vshrl.u32 %v1670_v39, 16  ;;  %v1693_v18 = vmul.u32 %v1689_v32, %v1665_v41  ;;  %v1106_v47 = vshll.u32 %v3592_v7, %v1104_v60  ;;  %vm3649_vm1 = vcmp.le.f32.partialorder %v995_v33, 0.7853982 }
  0xf7   : > { %v505_v12 = vadd.f32 0.041655596, %v504_v43  ;;  %v512_v1 = vadd.f32 0.008332121, %v511_v58  ;;  %v1107_v15 = vshrl.u32 %v1089_v22, %v1105_v48  ;;  %v1110_v16 = vadd.s32 127, %v1109_v49 }
  0xf8   : > { %vm1676_vm2 = vc.u32 %v1668_v3, %v1672_v4  ;;  %v1678_v6 = vadd.s32 %v1672_v4, %v1668_v3  ;;  %v1694_v19 = vshll.u32 %v3642_v0, 16  ;;  %v1673_v2 = vshrl.u32 %v1669_v62, 16 }
  0xf9   : > { %v506_v21 = vmul.f32 %v505_v12, %v503_v56  ;;  %v513_v31 = vmul.f32 %v512_v1, %v503_v56  ;;  %v1108_v13 = vor.u32 %v1107_v15, %v1106_v47  ;;  %v1677_v41 = vsel %vm1676_vm2, 1, %v3245_v14 }
  0xfa   : > { %v1111_v37 = vshll.u32 %v1110_v16, 23  ;;  %v1679_v7 = vadd.s32 %v1677_v41, %v1671_v50  ;;  %vm1680_vm3 = vc.u32 %v1678_v6, %v1674_v42  ;;  %v1696_v26 = vshll.u32 %v3644_v44, 16  ;;  %v314_v42 = vpop.f32.mrf.mxu0 }
  0xfb   : > { %v507_v20 = vadd.f32 -0.4999988, %v506_v21  ;;  %v514_v45 = vadd.f32 -0.16666654, %v513_v31  ;;  %v1681_v33 = vsel %vm1680_vm3, 1, %v3245_v14  ;;  %vm522_vm4 = vcmp.eq.s32.totalorder %v3590_v5, 0 }
  0xfc   : > { %v1112_v27 = vor.u32 4788187, %v1111_v37  ;;  %v1683_v28 = vadd.s32 %v1681_v33, %v1679_v7  ;;  %vm1698_vm5 = vc.u32 %v1690_v54, %v1694_v19  ;;  %v1700_v32 = vadd.s32 %v1694_v19, %v1690_v54 }
  0xfd   : > { %v508_v22 = vmul.f32 %v507_v20, %v503_v56  ;;  %v515_v52 = vmul.f32 %v514_v45, %v503_v56  ;;  %vm521_vm6 = vcmp.lt.s32.totalorder %v3590_v5, 2  ;;  %v1115_v38 = vcvt.s32.f32 %v1108_v13 }
  0xfe   : > { %v1699_v36 = vsel %vm1698_vm5, 1, %v3245_v14  ;;  %vm518_vm7 = vweird.f32 %v3392_v29  ;;  %v1113_v46 = vand.u32 2147483647, %v1112_v27  ;;  %v1684_v39 = vadd.s32 %v1683_v28, %v1673_v2 }
  0xff   : > { %v1701_v62 = vadd.s32 %v1699_v36, %v1693_v18  ;;  %vm1702_vm8 = vc.u32 %v1700_v32, %v1696_v26  ;;  %v509_v60 = vadd.f32 1.0, %v508_v22  ;;  %v516_v3 = vadd.f32 1.0, %v515_v52 }
 0x100   : > { %v1695_v50 = vshrl.u32 %v3642_v0, 16  ;;  %v1703_v54 = vsel %vm1702_vm8, 1, %v3245_v14  ;;  %v1116_v56 = vmul.f32 %v1115_v38, %v1113_v46  ;;  %v3664_v43 = vadd.s32 %v1684_v39, %v1675_v17 }
 0x101   : > { %v1705_v58 = vadd.s32 %v1703_v54, %v1701_v62  ;;  %v3667_v48 = vmul.f32 30.0, %v3623_v35  ;;  %v517_v49 = vmul.f32 %v516_v3, %v3634_v10  ;;  %vm525_vm9 = vcmp.eq.s32.totalorder %v3590_v5, 2 }
 0x102   : > { %v526_v4 = vxor.u32 2147483648, %v509_v60  ;;  %v1122_v18 = vsel %vm3649_vm1, 0, %v3629_v40  ;;  %v1117_v0 = vxor.u32 2147483648, %v1116_v56  ;;  %v1697_v17 = vshrl.u32 %v3644_v44, 16 }
 0x103   : > { %v1704_v12 = vadd.s32 %v1700_v32, %v1696_v26  ;;  %v1706_v1 = vadd.s32 %v1705_v58, %v1695_v50  ;;  %v523_v47 = vxor.u32 2147483648, %v517_v49  ;;  %v1654_v35 = vsel %vm1648_vm14, %v3620_v34, %v3638_v11 }
 0x104   : > { %v2235_v10 = vand.u32 2147483647, %v3667_v48  ;;  %v315_v15 = vadd.f32 %v3388_v24, %v314_v42  ;;  %v1118_v40 = vsel %vm997_vm10, %v1117_v0, %v1116_v56  ;;  %v2238_v44 = vand.u32 2139095040, %v3667_v48 }
 0x105   : > { %v1707_v16 = vadd.s32 %v1706_v1, %v1697_v17  ;;  %vm1710_vm11 = vc.u32 %v3664_v43, %v1704_v12  ;;  %v524_v6 = vsel %vm522_vm4, %v509_v60, %v523_v47  ;;  %v527_v19 = vsel %vm525_vm9, %v526_v4, %v517_v49 }
 0x106   : > { %v1121_v23 = vsel %vm3649_vm1, %v3394_v30, %v1118_v40  ;;  %v2242_v24 = vand.u32 8388607, %v2235_v10  ;;  %v528_v34 = vsel %vm521_vm6, %v524_v6, %v527_v19  ;;  %v2239_v31 = vshrl.u32 %v2238_v44, 23 }
 0x107   : > { %v1123_v11 = vmul.f32 %v1121_v23, %v1121_v23  ;;  %v1711_v21 = vadd.s32 1, %v1707_v16  ;;  %v529_v13 = vsel %vm518_vm7, nan, %v528_v34  ;;  %v1139_v41 = vadd.s32 3, %v1122_v18 }
 0x108   : > { %v1708_v37 = vmul.u32 %v3572_v25, %v1654_v35  ;;  %2855 = vst [vmem:[%s3701_s7] sm:$0xff] %v529_v13  ;;  %v3049_v5 = vadd.s32 4294967169, %v2239_v31  ;;  %v3706_v45 = vmul.f32 30.0, %v315_v15  ;;  %v2243_v29 = vor.u32 8388608, %v2242_v24 }
 0x109   : > { %v1124_v51 = vmul.f32 -0.001358992, %v1123_v11  ;;  %v1131_v2 = vmul.f32 -0.00019511016, %v1123_v11  ;;  %v1712_v7 = vsel %vm1710_vm11, %v1711_v21, %v1707_v16  ;;  %v1140_v22 = vand.u32 3, %v1139_v41 }
 0x10a   : > { %v1713_v20 = vadd.s32 %v1712_v7, %v1708_v37  ;;  %v2245_v27 = vadd.s32 1, %v3049_v5  ;;  %v533_v36 = vand.u32 2139095040, %v3706_v45  ;;  %v3709_v60 = vshll.u32 %v2243_v29, 8 }
 0x10b   : > { %v1125_v33 = vadd.f32 0.041655596, %v1124_v51  ;;  %v1132_v26 = vadd.f32 0.008332121, %v1131_v2  ;;  %vm1617_vm12 = vcmp.lt.s32.totalorder %v3411_v53, 0  ;;  %vm1141_vm13 = vcmp.lt.s32.totalorder %v1140_v22, 2 }
 0x10c   : > { %v1714_v28 = vadd.s32 536870912, %v1713_v20  ;;  %vm2246_vm10 = vcmp.gt.s32.totalorder %v2245_v27, 0  ;;  %v530_v50 = vand.u32 2147483647, %v3706_v45  ;;  %vm1142_vm14 = vcmp.eq.s32.totalorder %v1140_v22, 0 }
 0x10d   : > { %v1126_v32 = vmul.f32 %v1125_v33, %v1123_v11  ;;  %v1133_v25 = vmul.f32 %v1132_v26, %v1123_v11  ;;  %v2247_v38 = vsel %vm2246_vm10, %v2245_v27, 0  ;;  %vm1138_vm15 = vweird.f32 %v3394_v30 }
 0x10e   : > { %v1715_v52 = vshrl.u32 %v1714_v28, 30  ;;  %v2249_v62 = vand.u32 31, %v2247_v38  ;;  %vm1145_vm0 = vcmp.eq.s32.totalorder %v1140_v22, 2  ;;  %v1709_v42 = vadd.s32 %v1704_v12, %v3664_v43 }
 0x10f   : > { %v1127_v46 = vadd.f32 -0.4999988, %v1126_v32  ;;  %v1134_v39 = vadd.f32 -0.16666654, %v1133_v25  ;;  %v534_v4 = vshrl.u32 %v533_v36, 23  ;;  %v3716_v1 = vand.u32 65535, %v3709_v60 }
 0x110   : > { %v1716_v3 = vshll.u32 %v1715_v52, 30  ;;  %v2250_v58 = vsub.s32 32, %v2249_v62  ;;  %v1739_v17 = vsub.s32 4, %v1715_v52  ;;  %v3721_v15 = vand.u32 8388607, %v530_v50 }
 0x111   : > { %v1128_v54 = vmul.f32 %v1127_v46, %v1123_v11  ;;  %v1135_v56 = vmul.f32 %v1134_v39, %v1123_v11  ;;  %v3723_v44 = vshrl.u32 %v2247_v38, 5  ;;  %v2252_v6 = vshll.u32 %v3239_v55, %v2249_v62 }
 0x112   : > { %v1717_v49 = vsub.s32 %v1713_v20, %v1716_v3  ;;  %v2253_v35 = vshrl.u32 %v3240_v57, %v2250_v58  ;;  %v2259_v43 = vshrl.u32 %v3242_v61, %v2250_v58  ;;  %v2256_v19 = vshrl.u32 %v3241_v59, %v2250_v58 }
 0x113   : > { %v1129_v18 = vadd.f32 1.0, %v1128_v54  ;;  %v1136_v0 = vadd.f32 1.0, %v1135_v56  ;;  %v3016_v24 = vadd.s32 4294967169, %v534_v4  ;;  %v3730_v21 = vsel %vm1617_vm12, %v1739_v17, %v1715_v52 }
 0x114   : > { %vm1718_vm1 = vcmp.lt.s32.totalorder %v1717_v49, 0  ;;  %v1719_v47 = vsub.s32 0, %v1717_v49  ;;  %v2258_v31 = vshll.u32 %v3241_v59, %v2249_v62  ;;  %v2254_v13 = vor.u32 %v2253_v35, %v2252_v6 }
 0x115   : > { %v1137_v40 = vmul.f32 %v1136_v0, %v1121_v23  ;;  %v1146_v16 = vxor.u32 2147483648, %v1129_v18  ;;  %v2255_v41 = vshll.u32 %v3240_v57, %v2249_v62  ;;  %v2261_v37 = vshll.u32 %v3242_v61, %v2249_v62 }
 0x116   : > { %v1720_v12 = vsel %vm1718_vm1, %v1719_v47, %v1717_v49  ;;  %v2260_v7 = vor.u32 %v2259_v43, %v2258_v31  ;;  %v2262_v5 = vshrl.u32 %v3243_v63, %v2250_v58  ;;  %v2264_v26 = vshll.u32 %v3243_v63, %v2249_v62 }
 0x117   : > { %v1143_v34 = vxor.u32 2147483648, %v1137_v40  ;;  %v1721_v11 = vclz %v1720_v12  ;;  %v1147_v23 = vsel %vm1145_vm0, %v1146_v16, %v1137_v40  ;;  %v2257_v33 = vor.u32 %v2256_v19, %v2255_v41 }
 0x118   : > { %v2265_v29 = vshrl.u32 %v3244_v8, %v2250_v58  ;;  %vm3745_vm2 = vcmp.le.f32.partialorder %v1615_v9, 0.7853982  ;;  %v2251_v32 = vshrl.u32 %v3239_v55, %v2250_v58  ;;  %v2263_v25 = vor.u32 %v2262_v5, %v2261_v37 }
 0x119   : > { %v1144_v51 = vsel %vm1142_vm14, %v1129_v18, %v1143_v34  ;;  %v3038_v2 = vadd.s32 4294967294, %v1721_v11  ;;  %vm2267_vm4 = vcmp.lt.s32.totalorder %v3723_v44, 1  ;;  %vm2270_vm5 = vcmp.lt.s32.totalorder %v3723_v44, 4 }
 0x11a   : > { %v1148_v20 = vsel %vm1141_vm13, %v1144_v51, %v1147_v23  ;;  %v2266_v52 = vor.u32 %v2265_v29, %v2264_v26  ;;  %vm2268_vm6 = vcmp.lt.s32.totalorder %v3723_v44, 2  ;;  %v2272_v9 = vsel %vm2270_vm5, %v2260_v7, 2102212464 }
 0x11b   : > { %v1149_v27 = vsel %vm1138_vm15, nan, %v1148_v20  ;;  %vm3039_vm3 = vcmp.lt.s32.totalorder %v3038_v2, 0  ;;  %vm2269_vm7 = vcmp.lt.s32.totalorder %v3723_v44, 3  ;;  %v2275_v46 = vsel %vm2267_vm4, %v2254_v13, %v2257_v33 }
 0x11c   : > { %2859 = vst [vmem:[%s3701_s7 + $0x20] sm:$0xff] %v1149_v27  ;;  %v1724_v22 = vsel %vm3039_vm3, 0, %v3038_v2  ;;  %v2276_v39 = vsel %vm2270_vm5, %v2263_v25, 920167782  ;;  %v2279_v56 = vsel %vm2267_vm4, %v2257_v33, %v2260_v7  ;;  %v2271_v58 = vsel %vm2267_vm4, %v2251_v32, %v2254_v13 }
 0x11d   : > { %v1725_v38 = vsub.s32 32, %v1724_v22  ;;  %v1729_v30 = vsub.s32 4294967266, %v1724_v22  ;;  %v1726_v36 = vshll.u32 %v1717_v49, %v1724_v22  ;;  %v2277_v54 = vsel %vm2269_vm7, %v2260_v7, %v2276_v39 }
 0x11e   : > { %v2273_v4 = vsel %vm2269_vm7, %v2257_v33, %v2272_v9  ;;  %v2278_v18 = vsel %vm2268_vm6, %v2275_v46, %v2277_v54  ;;  %v2280_v0 = vsel %vm2270_vm5, %v2266_v52, 1326507024  ;;  %v540_v43 = vadd.s32 1, %v3016_v24 }
 0x11f   : > { %v1727_v62 = vshrl.u32 %v1709_v42, %v1725_v38  ;;  %v1730_v3 = vadd.s32 127, %v1729_v30  ;;  %v2281_v47 = vsel %vm2269_vm7, %v2263_v25, %v2280_v0  ;;  %v2308_v35 = vand.u32 65535, %v2278_v18 }
 0x120   : > { %v2282_v40 = vsel %vm2268_vm6, %v2279_v56, %v2281_v47  ;;  %v2285_v42 = vshrl.u32 %v3709_v60, 16  ;;  %v2309_v16 = vshrl.u32 %v2278_v18, 16  ;;  %v538_v34 = vor.u32 8388608, %v3721_v15 }
 0x121   : > { %v1728_v17 = vor.u32 %v1727_v62, %v1726_v36  ;;  %v1731_v49 = vshll.u32 %v1730_v3, 23  ;;  %v2286_v6 = vand.u32 65535, %v2282_v40  ;;  %v2287_v19 = vshrl.u32 %v2282_v40, 16 }
 0x122   : > { %v1742_v11 = vsel %vm3745_vm2, 0, %v3730_v21  ;;  %v3772_v31 = vsel %vm2268_vm6, %v2271_v58, %v2273_v4  ;;  %v2311_v23 = vmul.u32 %v2309_v16, %v3716_v1  ;;  %v2312_v13 = vmul.u32 %v2308_v35, %v2285_v42 }
 0x123   : > { %v1732_v12 = vor.u32 4788187, %v1731_v49  ;;  %v1735_v37 = vcvt.s32.f32 %v1728_v17  ;;  %v2289_v24 = vmul.u32 %v2287_v19, %v3716_v1  ;;  %v2290_v51 = vmul.u32 %v2286_v6, %v2285_v42 }
 0x124   : > { %v2310_v2 = vmul.u32 %v2308_v35, %v3716_v1  ;;  %v2313_v7 = vmul.u32 %v2309_v16, %v2285_v42  ;;  %v2314_v5 = vshll.u32 %v2311_v23, 16  ;;  %vm541_vm8 = vcmp.gt.s32.totalorder %v540_v43, 0 }
 0x125   : > { %v1733_v41 = vand.u32 2147483647, %v1732_v12  ;;  %v2288_v21 = vmul.u32 %v2286_v6, %v3716_v1  ;;  %v2291_v33 = vmul.u32 %v2287_v19, %v2285_v42  ;;  %v2292_v44 = vshll.u32 %v2289_v24, 16 }
 0x126   : > { %v2294_v26 = vshll.u32 %v2290_v51, 16  ;;  %v2316_v29 = vshll.u32 %v2312_v13, 16  ;;  %vm2318_vm9 = vc.u32 %v2310_v2, %v2314_v5  ;;  %v2320_v27 = vadd.s32 %v2314_v5, %v2310_v2 }
 0x127   : > { %v1736_v20 = vmul.f32 %v1735_v37, %v1733_v41  ;;  %vm2296_vm11 = vc.u32 %v2288_v21, %v2292_v44  ;;  %v2298_v25 = vadd.s32 %v2292_v44, %v2288_v21  ;;  %v2319_v22 = vsel %vm2318_vm9, 1, %v3245_v14 }
 0x128   : > { %v2297_v52 = vsel %vm2296_vm11, 1, %v3245_v14  ;;  %v2315_v38 = vshrl.u32 %v2311_v23, 16  ;;  %v2321_v30 = vadd.s32 %v2319_v22, %v2313_v7  ;;  %vm2322_vm10 = vc.u32 %v2320_v27, %v2316_v29 }
 0x129   : > { %v1737_v32 = vxor.u32 2147483648, %v1736_v20  ;;  %v2299_v1 = vadd.s32 %v2297_v52, %v2291_v33  ;;  %vm2300_vm13 = vc.u32 %v2298_v25, %v2294_v26  ;;  %v2323_v36 = vsel %vm2322_vm10, 1, %v3245_v14 }
 0x12a   : > { %v2301_v39 = vsel %vm2300_vm13, 1, %v3245_v14  ;;  %v2325_v62 = vadd.s32 %v2323_v36, %v2321_v30  ;;  %v542_v3 = vsel %vm541_vm8, %v540_v43, 0  ;;  %v2293_v56 = vshrl.u32 %v2289_v24, 16 }
 0x12b   : > { %v1738_v9 = vsel %vm1617_vm12, %v1737_v32, %v1736_v20  ;;  %v2303_v58 = vadd.s32 %v2301_v39, %v2299_v1  ;;  %v544_v4 = vand.u32 31, %v542_v3  ;;  %v1759_v18 = vadd.s32 3, %v1742_v11 }
 0x12c   : > { %v1741_v46 = vsel %vm3745_vm2, %v3411_v53, %v1738_v9  ;;  %v2295_v0 = vshrl.u32 %v2290_v51, 16  ;;  %v2317_v17 = vshrl.u32 %v2312_v13, 16  ;;  %v2326_v49 = vadd.s32 %v2325_v62, %v2315_v38 }
 0x12d   : > { %v1743_v54 = vmul.f32 %v1741_v46, %v1741_v46  ;;  %v2304_v40 = vadd.s32 %v2303_v58, %v2293_v56  ;;  %v545_v42 = vsub.s32 32, %v544_v4  ;;  %v3788_v16 = vadd.s32 %v2320_v27, %v2316_v29 }
 0x12e   : > { %v2327_v28 = vadd.s32 %v2326_v49, %v2317_v17  ;;  %v2328_v12 = vmul.u32 %v3709_v60, %v3772_v31  ;;  %v547_v43 = vshll.u32 %v3239_v55, %v544_v4  ;;  %v550_v11 = vshll.u32 %v3240_v57, %v544_v4 }
 0x12f   : > { %v1744_v47 = vmul.f32 -0.001358992, %v1743_v54  ;;  %v1751_v35 = vmul.f32 -0.00019511016, %v1743_v54  ;;  %v3793_v23 = vadd.s32 %v2304_v40, %v2295_v0  ;;  %v548_v41 = vshrl.u32 %v3240_v57, %v545_v42 }
 0x130   : > { %v2331_v13 = vadd.s32 1, %v2327_v28  ;;  %v551_v37 = vshrl.u32 %v3241_v59, %v545_v42  ;;  %v553_v24 = vshll.u32 %v3241_v59, %v544_v4  ;;  %v554_v60 = vshrl.u32 %v3242_v61, %v545_v42 }
 0x131   : > { %v1745_v6 = vadd.f32 0.041655596, %v1744_v47  ;;  %v1752_v19 = vadd.f32 0.008332121, %v1751_v35  ;;  %vm2330_vm12 = vc.u32 %v3793_v23, %v3788_v16  ;;  %v1760_v31 = vand.u32 3, %v1759_v18 }
 0x132   : > { %v2332_v7 = vsel %vm2330_vm12, %v2331_v13, %v2327_v28  ;;  %v3802_v5 = vshrl.u32 %v542_v3, 5  ;;  %v549_v20 = vor.u32 %v548_v41, %v547_v43  ;;  %v556_v26 = vshll.u32 %v3242_v61, %v544_v4 }
 0x133   : > { %v1746_v51 = vmul.f32 %v1745_v6, %v1743_v54  ;;  %v1753_v2 = vmul.f32 %v1752_v19, %v1743_v54  ;;  %v2333_v44 = vadd.s32 %v2332_v7, %v2328_v12  ;;  %v3805_v29 = vor.u32 %v551_v37, %v550_v11 }
 0x134   : > { %v557_v27 = vshrl.u32 %v3243_v63, %v545_v42  ;;  %v559_v32 = vshll.u32 %v3243_v63, %v544_v4  ;;  %v560_v25 = vshrl.u32 %v3244_v8, %v545_v42  ;;  %v555_v30 = vor.u32 %v554_v60, %v553_v24 }
 0x135   : > { %v1747_v21 = vadd.f32 -0.4999988, %v1746_v51  ;;  %v1754_v33 = vadd.f32 -0.16666654, %v1753_v2  ;;  %v2334_v38 = vadd.s32 536870912, %v2333_v44  ;;  %vm562_vm14 = vcmp.lt.s32.totalorder %v3802_v5, 1 }
 0x136   : > { %v558_v9 = vor.u32 %v557_v27, %v556_v26  ;;  %v561_v1 = vor.u32 %v560_v25, %v559_v32  ;;  %vm565_vm15 = vcmp.lt.s32.totalorder %v3802_v5, 4  ;;  %vm564_vm0 = vcmp.lt.s32.totalorder %v3802_v5, 3 }
 0x137   : > { %v1748_v22 = vmul.f32 %v1747_v21, %v1743_v54  ;;  %v1755_v52 = vmul.f32 %v1754_v33, %v1743_v54  ;;  %v3812_v62 = vshrl.u32 %v2334_v38, 30  ;;  %vm1758_vm1 = vweird.f32 %v3411_v53 }
 0x138   : > { %vm1761_vm2 = vcmp.lt.s32.totalorder %v1760_v31, 2  ;;  %v571_v3 = vsel %vm565_vm15, %v558_v9, 920167782  ;;  %v570_v4 = vsel %vm562_vm14, %v549_v20, %v3805_v29  ;;  %vm1762_vm3 = vcmp.eq.s32.totalorder %v1760_v31, 0 }
 0x139   : > { %v1749_v36 = vadd.f32 1.0, %v1748_v22  ;;  %v1756_v39 = vadd.f32 1.0, %v1755_v52  ;;  %v2336_v58 = vshll.u32 %v3812_v62, 30  ;;  %v572_v18 = vsel %vm564_vm0, %v555_v30, %v571_v3  ;;  %v3857_v52 = vld [vmem:[%s5132_s2] ss:$0 sm:$0xff] }
 0x13a   : > { %v575_v0 = vsel %vm565_vm15, %v561_v1, 1326507024  ;;  %v3828_v17 = vshll.u32 %v538_v34, 8  ;;  %vm563_vm4 = vcmp.lt.s32.totalorder %v3802_v5, 2  ;;  %v574_v47 = vsel %vm562_vm14, %v3805_v29, %v555_v30 }
 0x13b   : > { %v1757_v54 = vmul.f32 %v1756_v39, %v1741_v46  ;;  %v1766_v56 = vxor.u32 2147483648, %v1749_v36  ;;  %v2337_v46 = vsub.s32 %v2333_v44, %v2336_v58  ;;  %vm1765_vm5 = vcmp.eq.s32.totalorder %v1760_v31, 2  ;;  %v326_v31 = vpop.f32.mrf.mxu1 }
 0x13c   : > { %v546_v35 = vshrl.u32 %v3239_v55, %v545_v42  ;;  %v573_v40 = vsel %vm563_vm4, %v570_v4, %v572_v18  ;;  %v576_v15 = vsel %vm564_vm0, %v558_v9, %v575_v0  ;;  %v579_v19 = vand.u32 65535, %v3828_v17 }
 0x13d   : > { %v1763_v49 = vxor.u32 2147483648, %v1757_v54  ;;  %v1767_v28 = vsel %vm1765_vm5, %v1766_v56, %v1757_v54  ;;  %vm2338_vm6 = vcmp.lt.s32.totalorder %v2337_v46, 0  ;;  %v2339_v12 = vsub.s32 0, %v2337_v46 }
 0x13e   : > { %v577_v6 = vsel %vm563_vm4, %v574_v47, %v576_v15  ;;  %v604_v11 = vshrl.u32 %v573_v40, 16  ;;  %v603_v37 = vand.u32 65535, %v573_v40  ;;  %v580_v51 = vshrl.u32 %v3828_v17, 16 }
 0x13f   : > { %v1764_v34 = vsel %vm1762_vm3, %v1749_v36, %v1763_v49  ;;  %v2340_v13 = vsel %vm2338_vm6, %v2339_v12, %v2337_v46  ;;  %v581_v41 = vand.u32 65535, %v577_v6  ;;  %v582_v2 = vshrl.u32 %v577_v6, 16  ;;  %v338_v12 = vpop.f32.mrf.mxu2 }
 0x140   : > { %v1768_v43 = vsel %vm1761_vm2, %v1764_v34, %v1767_v28  ;;  %v2341_v24 = vclz %v2340_v13  ;;  %v606_v60 = vmul.u32 %v604_v11, %v579_v19  ;;  %v2329_v7 = vadd.s32 %v3788_v16, %v3793_v23 }
 0x141   : > { %v1769_v42 = vsel %vm1758_vm1, nan, %v1768_v43  ;;  %v566_v21 = vsel %vm562_vm14, %v546_v35, %v549_v20  ;;  %v567_v53 = vsel %vm565_vm15, %v555_v30, 2102212464  ;;  %v2359_v44 = vsub.s32 4, %v3812_v62 }
 0x142   : > { %2863 = vst [vmem:[%s3701_s7 + $0x40] sm:$0xff] %v1769_v42  ;;  %v3050_v33 = vadd.s32 4294967294, %v2341_v24  ;;  %v584_v26 = vmul.u32 %v582_v2, %v579_v19  ;;  %v585_v27 = vmul.u32 %v581_v41, %v580_v51  ;;  %v605_v32 = vmul.u32 %v603_v37, %v579_v19 }
 0x143   : > { %v607_v25 = vmul.u32 %v603_v37, %v580_v51  ;;  %v609_v22 = vshll.u32 %v606_v60, 16  ;;  %v327_v16 = vadd.f32 %v3857_v52, %v326_v31  ;;  %v583_v23 = vmul.u32 %v581_v41, %v579_v19 }
 0x144   : > { %vm3051_vm7 = vcmp.lt.s32.totalorder %v3050_v33, 0  ;;  %v586_v20 = vmul.u32 %v582_v2, %v580_v51  ;;  %v587_v38 = vshll.u32 %v584_v26, 16  ;;  %v589_v9 = vshll.u32 %v585_v27, 16 }
 0x145   : > { %v2344_v30 = vsel %vm3051_vm7, 0, %v3050_v33  ;;  %v608_v1 = vmul.u32 %v604_v11, %v580_v51  ;;  %v611_v36 = vshll.u32 %v607_v25, 16  ;;  %vm613_vm9 = vc.u32 %v605_v32, %v609_v22 }
 0x146   : > { %v2345_v39 = vsub.s32 32, %v2344_v30  ;;  %v2346_v3 = vshll.u32 %v2337_v46, %v2344_v30  ;;  %v2349_v54 = vsub.s32 4294967266, %v2344_v30  ;;  %vm591_vm8 = vc.u32 %v583_v23, %v587_v38 }
 0x147   : > { %v592_v56 = vsel %vm591_vm8, 1, %v3245_v14  ;;  %v593_v58 = vadd.s32 %v587_v38, %v583_v23  ;;  %v615_v4 = vadd.s32 %v609_v22, %v605_v32  ;;  %v614_v47 = vsel %vm613_vm9, 1, %v3245_v14 }
 0x148   : > { %v2347_v18 = vshrl.u32 %v2329_v7, %v2345_v39  ;;  %v2350_v0 = vadd.s32 127, %v2349_v54  ;;  %v594_v49 = vadd.s32 %v592_v56, %v586_v20  ;;  %v610_v35 = vshrl.u32 %v606_v60, 16 }
 0x149   : > { %vm595_vm11 = vc.u32 %v593_v58, %v589_v9  ;;  %v616_v40 = vadd.s32 %v614_v47, %v608_v1  ;;  %vm617_vm10 = vc.u32 %v615_v4, %v611_v36  ;;  %v588_v43 = vshrl.u32 %v584_v26, 16 }
 0x14a   : > { %v2348_v15 = vor.u32 %v2347_v18, %v2346_v3  ;;  %v2351_v34 = vshll.u32 %v2350_v0, 23  ;;  %v596_v46 = vsel %vm595_vm11, 1, %v3245_v14  ;;  %v618_v28 = vsel %vm617_vm10, 1, %v3245_v14 }
 0x14b   : > { %v598_v6 = vadd.s32 %v596_v46, %v594_v49  ;;  %v620_v19 = vadd.s32 %v618_v28, %v616_v40  ;;  %v3864_v11 = vmul.f32 30.0, %v327_v16  ;;  %v568_v13 = vsel %vm564_vm0, %v3805_v29, %v567_v53 }
 0x14c   : > { %v2352_v42 = vor.u32 4788187, %v2351_v34  ;;  %v590_v41 = vshrl.u32 %v585_v27, 16  ;;  %v612_v37 = vshrl.u32 %v607_v25, 16  ;;  %v339_v60 = vadd.f32 %v3857_v52, %v338_v12 }
 0x14d   : > { %v599_v24 = vadd.s32 %v598_v6, %v588_v43  ;;  %v621_v51 = vadd.s32 %v620_v19, %v610_v35  ;;  %v1150_v2 = vand.u32 2147483647, %v3864_v11  ;;  %vm2237_vm13 = vcmp.lt.s32.totalorder %v3667_v48, 0 }
 0x14e   : > { %v2353_v31 = vand.u32 2147483647, %v2352_v42  ;;  %v2355_v7 = vcvt.s32.f32 %v2348_v15  ;;  %v1153_v33 = vand.u32 2139095040, %v3864_v11  ;;  %v569_v26 = vsel %vm563_vm4, %v566_v21, %v568_v13 }
 0x14f   : > { %v600_v32 = vadd.s32 %v599_v24, %v590_v41  ;;  %v619_v22 = vadd.s32 %v615_v4, %v611_v36  ;;  %v622_v29 = vadd.s32 %v621_v51, %v612_v37  ;;  %v2360_v27 = vsel %vm2237_vm13, %v2359_v44, %v3812_v62 }
 0x150   : > { %v2356_v53 = vmul.f32 %v2355_v7, %v2353_v31  ;;  %v1154_v25 = vshrl.u32 %v1153_v33, 23  ;;  %v1157_v16 = vand.u32 8388607, %v1150_v2  ;;  %v3880_v20 = vmul.f32 30.0, %v339_v60 }
 0x151   : > { %vm625_vm12 = vc.u32 %v600_v32, %v619_v22  ;;  %v626_v23 = vadd.s32 1, %v622_v29  ;;  %vm2236_vm14 = vcmp.le.f32.partialorder %v2235_v10, 0.7853982  ;;  %v623_v21 = vmul.u32 %v3828_v17, %v569_v26 }
 0x152   : > { %v2357_v5 = vxor.u32 2147483648, %v2356_v53  ;;  %v3028_v38 = vadd.s32 4294967169, %v1154_v25  ;;  %v2362_v30 = vsel %vm2236_vm14, 0, %v2360_v27  ;;  %v1158_v1 = vor.u32 8388608, %v1157_v16 }
 0x153   : > { %v627_v9 = vsel %vm625_vm12, %v626_v23, %v622_v29  ;;  %v1773_v3 = vand.u32 2139095040, %v3880_v20  ;;  %v2379_v56 = vadd.s32 3, %v2362_v30  ;;  %v1770_v17 = vand.u32 2147483647, %v3880_v20 }
 0x154   : > { %v2358_v62 = vsel %vm2237_vm13, %v2357_v5, %v2356_v53  ;;  %v628_v44 = vadd.s32 %v627_v9, %v623_v21  ;;  %v1160_v36 = vadd.s32 1, %v3028_v38  ;;  %v3890_v49 = vshll.u32 %v1158_v1, 8 }
 0x155   : > { %v2361_v39 = vsel %vm2236_vm14, %v3667_v48, %v2358_v62  ;;  %vm532_vm0 = vcmp.lt.s32.totalorder %v3706_v45, 0  ;;  %v1774_v35 = vshrl.u32 %v1773_v3, 23  ;;  %v3893_v34 = vand.u32 3, %v2379_v56 }
 0x156   : > { %v2363_v54 = vmul.f32 %v2361_v39, %v2361_v39  ;;  %v629_v58 = vadd.s32 536870912, %v628_v44  ;;  %vm1161_vm15 = vcmp.gt.s32.totalorder %v1160_v36, 0  ;;  %vm3897_vm1 = vcmp.le.f32.partialorder %v530_v50, 0.7853982 }
 0x157   : > { %v1162_v10 = vsel %vm1161_vm15, %v1160_v36, 0  ;;  %v624_v12 = vadd.s32 %v619_v22, %v600_v32  ;;  %v3903_v19 = vand.u32 8388607, %v1770_v17  ;;  %v3908_v37 = vand.u32 65535, %v3890_v49 }
 0x158   : > { %v2364_v4 = vmul.f32 -0.001358992, %v2363_v54  ;;  %v2371_v18 = vmul.f32 -0.00019511016, %v2363_v54  ;;  %v630_v0 = vshrl.u32 %v629_v58, 30  ;;  %v1164_v47 = vand.u32 31, %v1162_v10 }
 0x159   : > { %v3910_v24 = vshrl.u32 %v1162_v10, 5  ;;  %v3914_v51 = vshrl.u32 %v3890_v49, 16  ;;  %v3040_v60 = vadd.s32 4294967169, %v1774_v35  ;;  %vm2382_vm3 = vcmp.eq.s32.totalorder %v3893_v34, 0 }
 0x15a   : > { %v2365_v40 = vadd.f32 0.041655596, %v2364_v4  ;;  %v2372_v15 = vadd.f32 0.008332121, %v2371_v18  ;;  %v631_v28 = vshll.u32 %v630_v0, 30  ;;  %v654_v43 = vsub.s32 4, %v630_v0 }
 0x15b   : > { %v1165_v6 = vsub.s32 32, %v1164_v47  ;;  %v1167_v50 = vshll.u32 %v3239_v55, %v1164_v47  ;;  %vm2385_vm4 = vcmp.eq.s32.totalorder %v3893_v34, 2  ;;  %v1170_v22 = vshll.u32 %v3240_v57, %v1164_v47 }
 0x15c   : > { %v2366_v42 = vmul.f32 %v2365_v40, %v2363_v54  ;;  %v2373_v13 = vmul.f32 %v2372_v15, %v2363_v54  ;;  %v3905_v41 = vsub.s32 %v628_v44, %v631_v28  ;;  %v655_v26 = vsel %vm532_vm0, %v654_v43, %v630_v0 }
 0x15d   : > { %v1168_v32 = vshrl.u32 %v3240_v57, %v1165_v6  ;;  %v1171_v29 = vshrl.u32 %v3241_v59, %v1165_v6  ;;  %vm2381_vm5 = vcmp.lt.s32.totalorder %v3893_v34, 2  ;;  %v1176_v16 = vshll.u32 %v3242_v61, %v1164_v47 }
 0x15e   : > { %v2367_v31 = vadd.f32 -0.4999988, %v2366_v42  ;;  %v2374_v7 = vadd.f32 -0.16666654, %v2373_v13  ;;  %vm633_vm2 = vcmp.lt.s32.totalorder %v3905_v41, 0  ;;  %v634_v33 = vsub.s32 0, %v3905_v41 }
 0x15f   : > { %vm2378_vm6 = vweird.f32 %v3667_v48  ;;  %v1173_v5 = vshll.u32 %v3241_v59, %v1164_v47  ;;  %v1174_v21 = vshrl.u32 %v3242_v61, %v1165_v6  ;;  %v1177_v38 = vshrl.u32 %v3243_v63, %v1165_v6 }
 0x160   : > { %v2368_v53 = vmul.f32 %v2367_v31, %v2363_v54  ;;  %v2375_v27 = vmul.f32 %v2374_v7, %v2363_v54  ;;  %v635_v25 = vsel %vm633_vm2, %v634_v33, %v3905_v41  ;;  %v1179_v62 = vshll.u32 %v3243_v63, %v1164_v47 }
 0x161   : > { %v636_v23 = vclz %v635_v25  ;;  %v1180_v44 = vshrl.u32 %v3244_v8, %v1165_v6  ;;  %v657_v36 = vsel %vm3897_vm1, 0, %v655_v26  ;;  %v1169_v3 = vor.u32 %v1168_v32, %v1167_v50 }
 0x162   : > { %v2369_v30 = vadd.f32 1.0, %v2368_v53  ;;  %v2376_v9 = vadd.f32 1.0, %v2375_v27  ;;  %v1780_v54 = vadd.s32 1, %v3040_v60  ;;  %v1172_v10 = vor.u32 %v1171_v29, %v1170_v22 }
 0x163   : > { %v3017_v1 = vadd.s32 4294967294, %v636_v23  ;;  %v1178_v4 = vor.u32 %v1177_v38, %v1176_v16  ;;  %v1166_v18 = vshrl.u32 %v3239_v55, %v1165_v6  ;;  %v1175_v0 = vor.u32 %v1174_v21, %v1173_v5 }
 0x164   : > { %v2377_v56 = vmul.f32 %v2376_v9, %v2361_v39  ;;  %v2386_v58 = vxor.u32 2147483648, %v2369_v30  ;;  %vm1182_vm8 = vcmp.lt.s32.totalorder %v3910_v24, 1  ;;  %v1181_v40 = vor.u32 %v1180_v44, %v1179_v62 }
 0x165   : > { %vm3018_vm7 = vcmp.lt.s32.totalorder %v3017_v1, 0  ;;  %vm1185_vm9 = vcmp.lt.s32.totalorder %v3910_v24, 4  ;;  %vm1183_vm11 = vcmp.lt.s32.totalorder %v3910_v24, 2  ;;  %vm1184_vm10 = vcmp.lt.s32.totalorder %v3910_v24, 3 }
 0x166   : > { %v2383_v35 = vxor.u32 2147483648, %v2377_v56  ;;  %v639_v47 = vsel %vm3018_vm7, 0, %v3017_v1  ;;  %v2387_v43 = vsel %vm2385_vm4, %v2386_v58, %v2377_v56  ;;  %v1190_v6 = vsel %vm1182_vm8, %v1169_v3, %v1172_v10 }
 0x167   : > { %v640_v15 = vsub.s32 32, %v639_v47  ;;  %v644_v28 = vsub.s32 4294967266, %v639_v47  ;;  %v1191_v42 = vsel %vm1185_vm9, %v1178_v4, 920167782  ;;  %v641_v50 = vshll.u32 %v3905_v41, %v639_v47 }
 0x168   : > { %v2384_v39 = vsel %vm2382_vm3, %v2369_v30, %v2383_v35  ;;  %v1187_v33 = vsel %vm1185_vm9, %v1175_v0, 2102212464  ;;  %v1192_v26 = vsel %vm1184_vm10, %v1175_v0, %v1191_v42  ;;  %v1194_v32 = vsel %vm1182_vm8, %v1172_v10, %v1175_v0 }
 0x169   : > { %v2388_v13 = vsel %vm2381_vm5, %v2384_v39, %v2387_v43  ;;  %v642_v60 = vshrl.u32 %v624_v12, %v640_v15  ;;  %v645_v31 = vadd.s32 127, %v644_v28  ;;  %v1193_v41 = vsel %vm1183_vm11, %v1190_v6, %v1192_v26 }
 0x16a   : > { %v2389_v7 = vsel %vm2378_vm6, nan, %v2388_v13  ;;  %v1195_v12 = vsel %vm1185_vm9, %v1181_v40, 1326507024  ;;  %v674_v48 = vadd.s32 3, %v657_v36  ;;  %v1223_v53 = vand.u32 65535, %v1193_v41 }
 0x16b   : > { %2867 = vst [vmem:[%s3701_s7 + $0x60] sm:$0xff] %v2389_v7  ;;  %v643_v22 = vor.u32 %v642_v60, %v641_v50  ;;  %v646_v34 = vshll.u32 %v645_v31, 23  ;;  %v1196_v29 = vsel %vm1184_vm10, %v1178_v4, %v1195_v12  ;;  %v1224_v27 = vshrl.u32 %v1193_v41, 16 }
 0x16c   : > { %v1186_v16 = vsel %vm1182_vm8, %v1166_v18, %v1169_v3  ;;  %v1188_v23 = vsel %vm1184_vm10, %v1172_v10, %v1187_v33  ;;  %v1197_v5 = vsel %vm1183_vm11, %v1194_v32, %v1196_v29  ;;  %v1778_v9 = vor.u32 8388608, %v3903_v19 }
 0x16d   : > { %v647_v25 = vor.u32 4788187, %v646_v34  ;;  %v1201_v21 = vand.u32 65535, %v1197_v5  ;;  %v1202_v38 = vshrl.u32 %v1197_v5, 16  ;;  %v1226_v30 = vmul.u32 %v1224_v27, %v3908_v37 }
 0x16e   : > { %v650_v44 = vcvt.s32.f32 %v643_v22  ;;  %v1227_v1 = vmul.u32 %v1223_v53, %v3914_v51  ;;  %vm1781_vm13 = vcmp.gt.s32.totalorder %v1780_v54, 0  ;;  %v3976_v36 = vand.u32 3, %v674_v48 }
 0x16f   : > { %v648_v62 = vand.u32 2147483647, %v647_v25  ;;  %v3980_v3 = vsel %vm1183_vm11, %v1186_v16, %v1188_v23  ;;  %v1204_v56 = vmul.u32 %v1202_v38, %v3908_v37  ;;  %v1205_v58 = vmul.u32 %v1201_v21, %v3914_v51 }
 0x170   : > { %v1225_v4 = vmul.u32 %v1223_v53, %v3908_v37  ;;  %v1228_v18 = vmul.u32 %v1224_v27, %v3914_v51  ;;  %v1229_v0 = vshll.u32 %v1226_v30, 16  ;;  %v1203_v35 = vmul.u32 %v1201_v21, %v3908_v37 }
 0x171   : > { %v651_v10 = vmul.f32 %v650_v44, %v648_v62  ;;  %v1206_v47 = vmul.u32 %v1202_v38, %v3914_v51  ;;  %v1207_v40 = vshll.u32 %v1204_v56, 16  ;;  %v1782_v15 = vsel %vm1781_vm13, %v1780_v54, 0 }
 0x172   : > { %v1231_v24 = vshll.u32 %v1227_v1, 16  ;;  %vm1233_vm12 = vc.u32 %v1225_v4, %v1229_v0  ;;  %v1235_v39 = vadd.s32 %v1229_v0, %v1225_v4  ;;  %v1209_v43 = vshll.u32 %v1205_v58, 16 }
 0x173   : > { %v652_v28 = vxor.u32 2147483648, %v651_v10  ;;  %vm1211_vm14 = vc.u32 %v1203_v35, %v1207_v40  ;;  %v1213_v6 = vadd.s32 %v1207_v40, %v1203_v35  ;;  %v1234_v42 = vsel %vm1233_vm12, 1, %v3245_v14 }
 0x174   : > { %v1212_v50 = vsel %vm1211_vm14, 1, %v3245_v14  ;;  %v1236_v60 = vadd.s32 %v1234_v42, %v1228_v18  ;;  %vm1237_vm15 = vc.u32 %v1235_v39, %v1231_v24  ;;  %v1230_v33 = vshrl.u32 %v1226_v30, 16 }
 0x175   : > { %v653_v13 = vsel %vm532_vm0, %v652_v28, %v651_v10  ;;  %v1214_v51 = vadd.s32 %v1212_v50, %v1206_v47  ;;  %vm1215_vm2 = vc.u32 %v1213_v6, %v1209_v43  ;;  %v1238_v54 = vsel %vm1237_vm15, 1, %v3245_v14 }
 0x176   : > { %v656_v37 = vsel %vm3897_vm1, %v3706_v45, %v653_v13  ;;  %v1216_v7 = vsel %vm1215_vm2, 1, %v3245_v14  ;;  %v1240_v26 = vadd.s32 %v1238_v54, %v1236_v60  ;;  %v1208_v32 = vshrl.u32 %v1204_v56, 16 }
 0x177   : > { %v658_v31 = vmul.f32 %v656_v37, %v656_v37  ;;  %v1218_v22 = vadd.s32 %v1216_v7, %v1214_v51  ;;  %v1243_v34 = vmul.u32 %v3890_v49, %v3980_v3  ;;  %v1784_v41 = vand.u32 31, %v1782_v15 }
 0x178   : > { %v1232_v29 = vshrl.u32 %v1227_v1, 16  ;;  %v1241_v46 = vadd.s32 %v1240_v26, %v1230_v33  ;;  %v1210_v53 = vshrl.u32 %v1205_v58, 16  ;;  %v3999_v25 = vadd.s32 %v1235_v39, %v1231_v24 }
 0x179   : > { %v659_v12 = vmul.f32 -0.001358992, %v658_v31  ;;  %v666_v48 = vmul.f32 -0.00019511016, %v658_v31  ;;  %v1219_v27 = vadd.s32 %v1218_v22, %v1208_v32  ;;  %v4001_v16 = vsub.s32 32, %v1784_v41 }
 0x17a   : > { %v1242_v21 = vadd.s32 %v1241_v46, %v1232_v29  ;;  %v1787_v38 = vshll.u32 %v3239_v55, %v1784_v41  ;;  %v1790_v62 = vshll.u32 %v3240_v57, %v1784_v41  ;;  %v4015_v10 = vshrl.u32 %v1782_v15, 5 }
 0x17b   : > { %v660_v23 = vadd.f32 0.041655596, %v659_v12  ;;  %v667_v5 = vadd.f32 0.008332121, %v666_v48  ;;  %v4004_v30 = vadd.s32 %v1219_v27, %v1210_v53  ;;  %v1788_v49 = vshrl.u32 %v3240_v57, %v4001_v16 }
 0x17c   : > { %v1791_v44 = vshrl.u32 %v3241_v59, %v4001_v16  ;;  %v1246_v56 = vadd.s32 1, %v1242_v21  ;;  %v1794_v58 = vshrl.u32 %v3242_v61, %v4001_v16  ;;  %v1793_v18 = vshll.u32 %v3241_v59, %v1784_v41 }
 0x17d   : > { %v661_v1 = vmul.f32 %v660_v23, %v658_v31  ;;  %v668_v3 = vmul.f32 %v667_v5, %v658_v31  ;;  %vm1245_vm0 = vc.u32 %v4004_v30, %v3999_v25  ;;  %v4017_v4 = vor.u32 %v1788_v49, %v1787_v38 }
 0x17e   : > { %v1247_v47 = vsel %vm1245_vm0, %v1246_v56, %v1242_v21  ;;  %v1792_v40 = vor.u32 %v1791_v44, %v1790_v62  ;;  %v1795_v24 = vor.u32 %v1794_v58, %v1793_v18  ;;  %v1796_v39 = vshll.u32 %v3242_v61, %v1784_v41 }
 0x17f   : > { %v662_v0 = vadd.f32 -0.4999988, %v661_v1  ;;  %v669_v35 = vadd.f32 -0.16666654, %v668_v3  ;;  %v1248_v28 = vadd.s32 %v1247_v47, %v1243_v34  ;;  %v1797_v43 = vshrl.u32 %v3243_v63, %v4001_v16 }
 0x180   : > { %v1799_v15 = vshll.u32 %v3243_v63, %v1784_v41  ;;  %v1800_v13 = vshrl.u32 %v3244_v8, %v4001_v16  ;;  %vm1802_vm1 = vcmp.lt.s32.totalorder %v4015_v10, 1  ;;  %vm1803_vm3 = vcmp.lt.s32.totalorder %v4015_v10, 2 }
 0x181   : > { %v663_v6 = vmul.f32 %v662_v0, %v658_v31  ;;  %v670_v42 = vmul.f32 %v669_v35, %v658_v31  ;;  %v1249_v50 = vadd.s32 536870912, %v1248_v28  ;;  %v1798_v60 = vor.u32 %v1797_v43, %v1796_v39 }
 0x182   : > { %v1801_v7 = vor.u32 %v1800_v13, %v1799_v15  ;;  %vm1805_vm4 = vcmp.lt.s32.totalorder %v4015_v10, 4  ;;  %vm1804_vm5 = vcmp.lt.s32.totalorder %v4015_v10, 3  ;;  %v1810_v31 = vsel %vm1802_vm1, %v4017_v4, %v1792_v40 }
 0x183   : > { %v664_v51 = vadd.f32 1.0, %v663_v6  ;;  %v671_v54 = vadd.f32 1.0, %v670_v42  ;;  %v4029_v33 = vshrl.u32 %v1249_v50, 30  ;;  %v1811_v26 = vsel %vm1805_vm4, %v1798_v60, 920167782 }
 0x184   : > { %v1812_v34 = vsel %vm1804_vm5, %v1795_v24, %v1811_v26  ;;  %v1814_v41 = vsel %vm1802_vm1, %v1792_v40, %v1795_v24  ;;  %vm673_vm6 = vweird.f32 %v3706_v45  ;;  %v1815_v29 = vsel %vm1805_vm4, %v1801_v7, 1326507024 }
 0x185   : > { %v672_v32 = vmul.f32 %v671_v54, %v656_v37  ;;  %v681_v22 = vxor.u32 2147483648, %v664_v51  ;;  %v1251_v12 = vshll.u32 %v4029_v33, 30  ;;  %v1813_v48 = vsel %vm1803_vm3, %v1810_v31, %v1812_v34 }
 0x186   : > { %vm676_vm7 = vcmp.lt.s32.totalorder %v3976_v36, 2  ;;  %v1816_v46 = vsel %vm1804_vm5, %v1798_v60, %v1815_v29  ;;  %v4052_v53 = vshll.u32 %v1778_v9, 8  ;;  %vm677_vm8 = vcmp.eq.s32.totalorder %v3976_v36, 0 }
 0x187   : > { %v678_v37 = vxor.u32 2147483648, %v672_v32  ;;  %vm680_vm9 = vcmp.eq.s32.totalorder %v3976_v36, 2  ;;  %v1252_v27 = vsub.s32 %v1248_v28, %v1251_v12  ;;  %v1817_v23 = vsel %vm1803_vm3, %v1814_v41, %v1816_v46  ;;  %v317_v46 = vpop.f32.mrf.mxu0 }
 0x188   : > { %v682_v21 = vsel %vm680_vm9, %v681_v22, %v672_v32  ;;  %v1807_v38 = vsel %vm1805_vm4, %v1795_v24, 2102212464  ;;  %v1843_v49 = vand.u32 65535, %v1813_v48  ;;  %v1819_v9 = vand.u32 65535, %v4052_v53 }
 0x189   : > { %v679_v5 = vsel %vm677_vm8, %v664_v51, %v678_v37  ;;  %vm1253_vm11 = vcmp.lt.s32.totalorder %v1252_v27, 0  ;;  %v1254_v19 = vsub.s32 0, %v1252_v27  ;;  %v1820_v36 = vshrl.u32 %v4052_v53, 16  ;;  %v350_v37 = vpop.f32.mrf.mxu3 }
 0x18a   : > { %v683_v62 = vsel %vm676_vm7, %v679_v5, %v682_v21  ;;  %v1821_v1 = vand.u32 65535, %v1817_v23  ;;  %v1822_v3 = vshrl.u32 %v1817_v23, 16  ;;  %v1786_v58 = vshrl.u32 %v3239_v55, %v4001_v16 }
 0x18b   : > { %v684_v44 = vsel %vm673_vm6, nan, %v683_v62  ;;  %v1255_v56 = vsel %vm1253_vm11, %v1254_v19, %v1252_v27  ;;  %v1844_v18 = vshrl.u32 %v1813_v48, 16  ;;  %v1244_v28 = vadd.s32 %v3999_v25, %v4004_v30 }
 0x18c   : > { %2856 = vst [vmem:[%s3701_s7 + $0x8] sm:$0xff] %v684_v44  ;;  %v1256_v0 = vclz %v1255_v56  ;;  %v1824_v35 = vmul.u32 %v1822_v3, %v1819_v9  ;;  %v1825_v47 = vmul.u32 %v1821_v1, %v1820_v36  ;;  %v1274_v24 = vsub.s32 4, %v4029_v33 }
 0x18d   : > { %v1806_v45 = vsel %vm1802_vm1, %v1786_v58, %v4017_v4  ;;  %v1808_v39 = vsel %vm1804_vm5, %v1792_v40, %v1807_v38  ;;  %v1823_v6 = vmul.u32 %v1821_v1, %v1819_v9  ;;  %v1847_v16 = vmul.u32 %v1843_v49, %v1820_v36 }
 0x18e   : > { %v3029_v43 = vadd.s32 4294967294, %v1256_v0  ;;  %v1827_v42 = vshll.u32 %v1824_v35, 16  ;;  %v1826_v15 = vmul.u32 %v1822_v3, %v1820_v36  ;;  %v1828_v13 = vshrl.u32 %v1824_v35, 16 }
 0x18f   : > { %v1845_v50 = vmul.u32 %v1843_v49, %v1819_v9  ;;  %v1846_v60 = vmul.u32 %v1844_v18, %v1819_v9  ;;  %v1829_v51 = vshll.u32 %v1825_v47, 16  ;;  %v1848_v7 = vmul.u32 %v1844_v18, %v1820_v36 }
 0x190   : > { %vm3030_vm10 = vcmp.lt.s32.totalorder %v3029_v43, 0  ;;  %vm1831_vm13 = vc.u32 %v1823_v6, %v1827_v42  ;;  %v1833_v25 = vadd.s32 %v1827_v42, %v1823_v6  ;;  %v1851_v32 = vshll.u32 %v1847_v16, 16 }
 0x191   : > { %v1259_v30 = vsel %vm3030_vm10, 0, %v3029_v43  ;;  %v1832_v54 = vsel %vm1831_vm13, 1, %v3245_v14  ;;  %v1849_v4 = vshll.u32 %v1846_v60, 16  ;;  %v1830_v23 = vshrl.u32 %v1825_v47, 16 }
 0x192   : > { %v1260_v31 = vsub.s32 32, %v1259_v30  ;;  %v1264_v26 = vsub.s32 4294967266, %v1259_v30  ;;  %v1834_v40 = vadd.s32 %v1832_v54, %v1826_v15  ;;  %v1261_v22 = vshll.u32 %v1252_v27, %v1259_v30 }
 0x193   : > { %vm1835_vm12 = vc.u32 %v1833_v25, %v1829_v51  ;;  %vm1853_vm14 = vc.u32 %v1845_v50, %v1849_v4  ;;  %v1855_v34 = vadd.s32 %v1849_v4, %v1845_v50  ;;  %v1850_v62 = vshrl.u32 %v1846_v60, 16 }
 0x194   : > { %v1262_v41 = vshrl.u32 %v1244_v28, %v1260_v31  ;;  %v1265_v12 = vadd.s32 127, %v1264_v26  ;;  %v1836_v48 = vsel %vm1835_vm12, 1, %v3245_v14  ;;  %v1854_v29 = vsel %vm1853_vm14, 1, %v3245_v14 }
 0x195   : > { %v1838_v5 = vadd.s32 %v1836_v48, %v1834_v40  ;;  %v1856_v21 = vadd.s32 %v1854_v29, %v1848_v7  ;;  %vm1857_vm15 = vc.u32 %v1855_v34, %v1851_v32  ;;  %v351_v44 = vadd.f32 %v3857_v52, %v350_v37 }
 0x196   : > { %v1263_v38 = vor.u32 %v1262_v41, %v1261_v22  ;;  %v1266_v49 = vshll.u32 %v1265_v12, 23  ;;  %v1858_v27 = vsel %vm1857_vm15, 1, %v3245_v14  ;;  %v318_v36 = vadd.f32 %v3857_v52, %v317_v46 }
 0x197   : > { %v1839_v19 = vadd.s32 %v1838_v5, %v1828_v13  ;;  %v1860_v9 = vadd.s32 %v1858_v27, %v1856_v21  ;;  %vm1152_vm2 = vcmp.lt.s32.totalorder %v3864_v11, 0  ;;  %v1852_v56 = vshrl.u32 %v1847_v16, 16 }
 0x198   : > { %v1267_v1 = vor.u32 4788187, %v1266_v49  ;;  %v4082_v18 = vmul.f32 30.0, %v351_v44  ;;  %v1270_v35 = vcvt.s32.f32 %v1263_v38  ;;  %v1809_v47 = vsel %vm1803_vm3, %v1806_v45, %v1808_v39 }
 0x199   : > { %v1840_v3 = vadd.s32 %v1839_v19, %v1830_v23  ;;  %v1861_v58 = vadd.s32 %v1860_v9, %v1850_v62  ;;  %v1859_v28 = vadd.s32 %v1855_v34, %v1851_v32  ;;  %v1275_v43 = vsel %vm1152_vm2, %v1274_v24, %v4029_v33 }
 0x19a   : > { %v1268_v0 = vand.u32 2147483647, %v1267_v1  ;;  %v2390_v52 = vand.u32 2147483647, %v4082_v18  ;;  %v4090_v42 = vmul.f32 30.0, %v318_v36  ;;  %v2393_v16 = vand.u32 2139095040, %v4082_v18 }
 0x19b   : > { %v1862_v6 = vadd.s32 %v1861_v58, %v1852_v56  ;;  %vm1865_vm0 = vc.u32 %v1840_v3, %v1859_v28  ;;  %vm1151_vm1 = vcmp.le.f32.partialorder %v1150_v2, 0.7853982  ;;  %v1863_v33 = vmul.u32 %v4052_v53, %v1809_v47 }
 0x19c   : > { %v1271_v15 = vmul.f32 %v1270_v35, %v1268_v0  ;;  %v2397_v10 = vand.u32 8388607, %v2390_v52  ;;  %v1277_v39 = vsel %vm1151_vm1, 0, %v1275_v43  ;;  %v2394_v24 = vshrl.u32 %v2393_v16, 23 }
 0x19d   : > { %v1866_v13 = vadd.s32 1, %v1862_v6  ;;  %v688_v60 = vand.u32 2139095040, %v4090_v42  ;;  %v1294_v2 = vadd.s32 3, %v1277_v39  ;;  %v685_v48 = vand.u32 2147483647, %v4090_v42 }
 0x19e   : > { %v1272_v45 = vxor.u32 2147483648, %v1271_v15  ;;  %v3052_v30 = vadd.s32 4294967169, %v2394_v24  ;;  %v2398_v7 = vor.u32 8388608, %v2397_v10  ;;  %vm4109_vm4 = vcmp.le.f32.partialorder %v1770_v17, 0.7853982 }
 0x19f   : > { %v1867_v50 = vsel %vm1865_vm0, %v1866_v13, %v1862_v6  ;;  %v689_v40 = vshrl.u32 %v688_v60, 23  ;;  %v4102_v34 = vand.u32 3, %v1294_v2  ;;  %vm1772_vm5 = vcmp.lt.s32.totalorder %v3880_v20, 0 }
 0x1a0   : > { %v1273_v51 = vsel %vm1152_vm2, %v1272_v45, %v1271_v15  ;;  %v1868_v25 = vadd.s32 %v1867_v50, %v1863_v33  ;;  %v2400_v26 = vadd.s32 1, %v3052_v30  ;;  %v4104_v12 = vshll.u32 %v2398_v7, 8 }
 0x1a1   : > { %v1276_v54 = vsel %vm1151_vm1, %v3864_v11, %v1273_v51  ;;  %v3019_v38 = vadd.s32 4294967169, %v689_v40  ;;  %v1864_v27 = vadd.s32 %v1859_v28, %v1840_v3  ;;  %vm1300_vm6 = vcmp.eq.s32.totalorder %v4102_v34, 2 }
 0x1a2   : > { %v1278_v4 = vmul.f32 %v1276_v54, %v1276_v54  ;;  %v1869_v31 = vadd.s32 536870912, %v1868_v25  ;;  %vm2401_vm3 = vcmp.gt.s32.totalorder %v2400_v26, 0  ;;  %v4122_v17 = vand.u32 65535, %v4104_v12 }
 0x1a3   : > { %v2402_v41 = vsel %vm2401_vm3, %v2400_v26, 0  ;;  %v4126_v36 = vand.u32 8388607, %v685_v48  ;;  %vm1297_vm8 = vcmp.eq.s32.totalorder %v4102_v34, 0  ;;  %v4135_v47 = vadd.s32 1, %v3019_v38 }
 0x1a4   : > { %v1279_v32 = vmul.f32 -0.001358992, %v1278_v4  ;;  %v1286_v22 = vmul.f32 -0.00019511016, %v1278_v4  ;;  %v1870_v53 = vshrl.u32 %v1869_v31, 30  ;;  %v2404_v21 = vand.u32 31, %v2402_v41 }
 0x1a5   : > { %v4131_v58 = vshrl.u32 %v2402_v41, 5  ;;  %vm1296_vm9 = vcmp.lt.s32.totalorder %v4102_v34, 2  ;;  %vm1293_vm11 = vweird.f32 %v3864_v11  ;;  %vm696_vm2 = vcmp.gt.s32.totalorder %v4135_v47, 0 }
 0x1a6   : > { %v1280_v29 = vadd.f32 0.041655596, %v1279_v32  ;;  %v1287_v37 = vadd.f32 0.008332121, %v1286_v22  ;;  %v1871_v46 = vshll.u32 %v1870_v53, 30  ;;  %v1894_v23 = vsub.s32 4, %v1870_v53 }
 0x1a7   : > { %v2405_v44 = vsub.s32 32, %v2404_v21  ;;  %v2407_v10 = vshll.u32 %v3239_v55, %v2404_v21  ;;  %v2410_v45 = vshll.u32 %v3240_v57, %v2404_v21  ;;  %v2413_v24 = vshll.u32 %v3241_v59, %v2404_v21 }
 0x1a8   : > { %v1281_v49 = vmul.f32 %v1280_v29, %v1278_v4  ;;  %v1288_v62 = vmul.f32 %v1287_v37, %v1278_v4  ;;  %v4114_v19 = vsub.s32 %v1868_v25, %v1871_v46  ;;  %v4119_v9 = vsel %vm1772_vm5, %v1894_v23, %v1870_v53 }
 0x1a9   : > { %v2408_v0 = vshrl.u32 %v3240_v57, %v2405_v44  ;;  %v2411_v35 = vshrl.u32 %v3241_v59, %v2405_v44  ;;  %v1897_v15 = vsel %vm4109_vm4, 0, %v4119_v9  ;;  %v2406_v13 = vshrl.u32 %v3239_v55, %v2405_v44 }
 0x1aa   : > { %v1282_v1 = vadd.f32 -0.4999988, %v1281_v49  ;;  %v1289_v56 = vadd.f32 -0.16666654, %v1288_v62  ;;  %vm1873_vm7 = vcmp.lt.s32.totalorder %v4114_v19, 0  ;;  %v1874_v3 = vsub.s32 0, %v4114_v19 }
 0x1ab   : > { %v2414_v50 = vshrl.u32 %v3242_v61, %v2405_v44  ;;  %v2409_v51 = vor.u32 %v2408_v0, %v2407_v10  ;;  %v2412_v25 = vor.u32 %v2411_v35, %v2410_v45  ;;  %v2416_v30 = vshll.u32 %v3242_v61, %v2404_v21 }
 0x1ac   : > { %v1283_v28 = vmul.f32 %v1282_v1, %v1278_v4  ;;  %v1290_v43 = vmul.f32 %v1289_v56, %v1278_v4  ;;  %v1875_v6 = vsel %vm1873_vm7, %v1874_v3, %v4114_v19  ;;  %v2417_v31 = vshrl.u32 %v3243_v63, %v2405_v44 }
 0x1ad   : > { %v1876_v16 = vclz %v1875_v6  ;;  %v2415_v4 = vor.u32 %v2414_v50, %v2413_v24  ;;  %v2419_v26 = vshll.u32 %v3243_v63, %v2404_v21  ;;  %v2420_v40 = vshrl.u32 %v3244_v8, %v2405_v44 }
 0x1ae   : > { %v1284_v39 = vadd.f32 1.0, %v1283_v28  ;;  %v1291_v33 = vadd.f32 1.0, %v1290_v43  ;;  %vm2422_vm13 = vcmp.lt.s32.totalorder %v4131_v58, 1  ;;  %v2418_v41 = vor.u32 %v2417_v31, %v2416_v30 }
 0x1af   : > { %v3041_v60 = vadd.s32 4294967294, %v1876_v16  ;;  %v2421_v46 = vor.u32 %v2420_v40, %v2419_v26  ;;  %vm2423_vm12 = vcmp.lt.s32.totalorder %v4131_v58, 2  ;;  %vm2424_vm14 = vcmp.lt.s32.totalorder %v4131_v58, 3 }
 0x1b0   : > { %v1292_v2 = vmul.f32 %v1291_v33, %v1276_v54  ;;  %v1301_v7 = vxor.u32 2147483648, %v1284_v39  ;;  %vm2425_vm15 = vcmp.lt.s32.totalorder %v4131_v58, 4  ;;  %v2426_v62 = vsel %vm2422_vm13, %v2406_v13, %v2409_v51 }
 0x1b1   : > { %vm3042_vm10 = vcmp.lt.s32.totalorder %v3041_v60, 0  ;;  %v2427_v9 = vsel %vm2425_vm15, %v2415_v4, 2102212464  ;;  %v2430_v44 = vsel %vm2422_vm13, %v2409_v51, %v2412_v25  ;;  %v2431_v1 = vsel %vm2425_vm15, %v2418_v41, 920167782 }
 0x1b2   : > { %v1298_v32 = vxor.u32 2147483648, %v1292_v2  ;;  %v1302_v22 = vsel %vm1300_vm6, %v1301_v7, %v1292_v2  ;;  %v1879_v53 = vsel %vm3042_vm10, 0, %v3041_v60  ;;  %v2432_v3 = vsel %vm2424_vm14, %v2415_v4, %v2431_v1 }
 0x1b3   : > { %v1880_v29 = vsub.s32 32, %v1879_v53  ;;  %v1881_v54 = vshll.u32 %v4114_v19, %v1879_v53  ;;  %v1884_v37 = vsub.s32 4294967266, %v1879_v53  ;;  %v1914_v11 = vadd.s32 3, %v1897_v15 }
 0x1b4   : > { %v1299_v23 = vsel %vm1297_vm8, %v1284_v39, %v1298_v32  ;;  %v2433_v0 = vsel %vm2423_vm12, %v2430_v44, %v2432_v3  ;;  %v2434_v35 = vsel %vm2422_vm13, %v2412_v25, %v2415_v4  ;;  %v2435_v28 = vsel %vm2425_vm15, %v2421_v46, 1326507024 }
 0x1b5   : > { %v1303_v21 = vsel %vm1296_vm9, %v1299_v23, %v1302_v22  ;;  %v1882_v38 = vshrl.u32 %v1864_v27, %v1880_v29  ;;  %v1885_v49 = vadd.s32 127, %v1884_v37  ;;  %v2428_v27 = vsel %vm2424_vm14, %v2412_v25, %v2427_v9 }
 0x1b6   : > { %v1304_v19 = vsel %vm1293_vm11, nan, %v1303_v21  ;;  %v4186_v6 = vsel %vm2423_vm12, %v2426_v62, %v2428_v27  ;;  %v2436_v16 = vsel %vm2424_vm14, %v2418_v41, %v2435_v28  ;;  %v2463_v13 = vand.u32 65535, %v2433_v0 }
 0x1b7   : > { %2860 = vst [vmem:[%s3701_s7 + $0x28] sm:$0xff] %v1304_v19  ;;  %v1883_v34 = vor.u32 %v1882_v38, %v1881_v54  ;;  %v1886_v56 = vshll.u32 %v1885_v49, 23  ;;  %v2437_v15 = vsel %vm2423_vm12, %v2434_v35, %v2436_v16  ;;  %v2440_v10 = vshrl.u32 %v4104_v12, 16 }
 0x1b8   : > { %v2464_v45 = vshrl.u32 %v2433_v0, 16  ;;  %v2441_v24 = vand.u32 65535, %v2437_v15  ;;  %v2442_v50 = vshrl.u32 %v2437_v15, 16  ;;  %v4194_v60 = vand.u32 3, %v1914_v11 }
 0x1b9   : > { %v1887_v43 = vor.u32 4788187, %v1886_v56  ;;  %v1890_v33 = vcvt.s32.f32 %v1883_v34  ;;  %v2467_v25 = vmul.u32 %v2463_v13, %v2440_v10  ;;  %v2483_v30 = vmul.u32 %v4104_v12, %v4186_v6 }
 0x1ba   : > { %v2466_v51 = vmul.u32 %v2464_v45, %v4122_v17  ;;  %v2444_v58 = vmul.u32 %v2442_v50, %v4122_v17  ;;  %v2445_v7 = vmul.u32 %v2441_v24, %v2440_v10  ;;  %v697_v4 = vsel %vm696_vm2, %v4135_v47, 0 }
 0x1bb   : > { %v1888_v39 = vand.u32 2147483647, %v1887_v43  ;;  %v2465_v31 = vmul.u32 %v2463_v13, %v4122_v17  ;;  %v2468_v26 = vmul.u32 %v2464_v45, %v2440_v10  ;;  %v4202_v32 = vshrl.u32 %v697_v4, 5 }
 0x1bc   : > { %v2469_v40 = vshll.u32 %v2466_v51, 16  ;;  %v2443_v53 = vmul.u32 %v2441_v24, %v4122_v17  ;;  %v2446_v41 = vmul.u32 %v2442_v50, %v2440_v10  ;;  %v2447_v29 = vshll.u32 %v2444_v58, 16 }
 0x1bd   : > { %v1891_v2 = vmul.f32 %v1890_v33, %v1888_v39  ;;  %v2449_v54 = vshll.u32 %v2445_v7, 16  ;;  %v2471_v37 = vshll.u32 %v2467_v25, 16  ;;  %v2470_v1 = vshrl.u32 %v2466_v51, 16 }
 0x1be   : > { %vm2473_vm0 = vc.u32 %v2465_v31, %v2469_v40  ;;  %v2475_v46 = vadd.s32 %v2469_v40, %v2465_v31  ;;  %vm2451_vm1 = vc.u32 %v2443_v53, %v2447_v29  ;;  %v2453_v47 = vadd.s32 %v2447_v29, %v2443_v53 }
 0x1bf   : > { %v1892_v22 = vxor.u32 2147483648, %v1891_v2  ;;  %v2474_v21 = vsel %vm2473_vm0, 1, %v3245_v14  ;;  %v2452_v49 = vsel %vm2451_vm1, 1, %v3245_v14  ;;  %v699_v56 = vand.u32 31, %v697_v4 }
 0x1c0   : > { %v2476_v17 = vadd.s32 %v2474_v21, %v2468_v26  ;;  %vm2477_vm3 = vc.u32 %v2475_v46, %v2471_v37  ;;  %v2454_v19 = vadd.s32 %v2452_v49, %v2446_v41  ;;  %vm2455_vm6 = vc.u32 %v2453_v47, %v2449_v54 }
 0x1c1   : > { %v1893_v23 = vsel %vm1772_vm5, %v1892_v22, %v1891_v2  ;;  %v2478_v9 = vsel %vm2477_vm3, 1, %v3245_v14  ;;  %v2456_v44 = vsel %vm2455_vm6, 1, %v3245_v14  ;;  %v2448_v11 = vshrl.u32 %v2444_v58, 16 }
 0x1c2   : > { %v1896_v38 = vsel %vm4109_vm4, %v3880_v20, %v1893_v23  ;;  %v2480_v34 = vadd.s32 %v2478_v9, %v2476_v17  ;;  %v2458_v0 = vadd.s32 %v2456_v44, %v2454_v19  ;;  %v2450_v5 = vshrl.u32 %v2445_v7, 16 }
 0x1c3   : > { %v1898_v62 = vmul.f32 %v1896_v38, %v1896_v38  ;;  %v2472_v35 = vshrl.u32 %v2467_v25, 16  ;;  %v4214_v43 = vsub.s32 32, %v699_v56  ;;  %v4216_v10 = vadd.s32 %v2475_v46, %v2471_v37 }
 0x1c4   : > { %v2481_v28 = vadd.s32 %v2480_v34, %v2470_v1  ;;  %v2459_v15 = vadd.s32 %v2458_v0, %v2448_v11  ;;  %v702_v39 = vshll.u32 %v3239_v55, %v699_v56  ;;  %v705_v24 = vshll.u32 %v3240_v57, %v699_v56 }
 0x1c5   : > { %v1899_v27 = vmul.f32 -0.001358992, %v1898_v62  ;;  %v1906_v3 = vmul.f32 -0.00019511016, %v1898_v62  ;;  %v703_v33 = vshrl.u32 %v3240_v57, %v4214_v43  ;;  %v708_v25 = vshll.u32 %v3241_v59, %v699_v56 }
 0x1c6   : > { %v2482_v45 = vadd.s32 %v2481_v28, %v2472_v35  ;;  %v4222_v2 = vadd.s32 %v2459_v15, %v2450_v5  ;;  %v706_v7 = vshrl.u32 %v3241_v59, %v4214_v43  ;;  %v709_v4 = vshrl.u32 %v3242_v61, %v4214_v43 }
 0x1c7   : > { %v1900_v16 = vadd.f32 0.041655596, %v1899_v27  ;;  %v1907_v13 = vadd.f32 0.008332121, %v1906_v3  ;;  %v711_v31 = vshll.u32 %v3242_v61, %v699_v56  ;;  %vm717_vm5 = vcmp.lt.s32.totalorder %v4202_v32, 1 }
 0x1c8   : > { %v2486_v58 = vadd.s32 1, %v2482_v45  ;;  %vm2485_vm4 = vc.u32 %v4222_v2, %v4216_v10  ;;  %v4233_v53 = vor.u32 %v703_v33, %v702_v39  ;;  %v712_v41 = vshrl.u32 %v3243_v63, %v4214_v43 }
 0x1c9   : > { %v1901_v50 = vmul.f32 %v1900_v16, %v1898_v62  ;;  %v1908_v51 = vmul.f32 %v1907_v13, %v1898_v62  ;;  %v714_v29 = vshll.u32 %v3243_v63, %v699_v56  ;;  %v715_v23 = vshrl.u32 %v3244_v8, %v4214_v43 }
 0x1ca   : > { %v2487_v22 = vsel %vm2485_vm4, %v2486_v58, %v2482_v45  ;;  %v4243_v47 = vor.u32 %v706_v7, %v705_v24  ;;  %v710_v21 = vor.u32 %v709_v4, %v708_v25  ;;  %v713_v49 = vor.u32 %v712_v41, %v711_v31 }
 0x1cb   : > { %v1902_v26 = vadd.f32 -0.4999988, %v1901_v50  ;;  %v1909_v40 = vadd.f32 -0.16666654, %v1908_v51  ;;  %v2488_v46 = vadd.s32 %v2487_v22, %v2483_v30  ;;  %vm720_vm7 = vcmp.lt.s32.totalorder %v4202_v32, 4 }
 0x1cc   : > { %v716_v44 = vor.u32 %v715_v23, %v714_v29  ;;  %v693_v1 = vor.u32 8388608, %v4126_v36  ;;  %vm719_vm8 = vcmp.lt.s32.totalorder %v4202_v32, 3  ;;  %v726_v12 = vsel %vm720_vm7, %v713_v49, 920167782 }
 0x1cd   : > { %v1903_v54 = vmul.f32 %v1902_v26, %v1898_v62  ;;  %v1910_v37 = vmul.f32 %v1909_v40, %v1898_v62  ;;  %v2489_v9 = vadd.s32 536870912, %v2488_v46  ;;  %vm1916_vm9 = vcmp.lt.s32.totalorder %v4194_v60, 2 }
 0x1ce   : > { %vm1917_vm11 = vcmp.eq.s32.totalorder %v4194_v60, 0  ;;  %v729_v34 = vsel %vm717_vm5, %v4243_v47, %v710_v21  ;;  %v730_v36 = vsel %vm720_vm7, %v716_v44, 1326507024  ;;  %v727_v3 = vsel %vm719_vm8, %v710_v21, %v726_v12 }
 0x1cf   : > { %v1904_v17 = vadd.f32 1.0, %v1903_v54  ;;  %v1911_v19 = vadd.f32 1.0, %v1910_v37  ;;  %v4250_v62 = vshrl.u32 %v2489_v9, 30  ;;  %vm1920_vm10 = vcmp.eq.s32.totalorder %v4194_v60, 2 }
 0x1d0   : > { %vm718_vm13 = vcmp.lt.s32.totalorder %v4202_v32, 2  ;;  %v731_v11 = vsel %vm719_vm8, %v713_v49, %v730_v36  ;;  %v4270_v0 = vshll.u32 %v693_v1, 8  ;;  %vm1913_vm12 = vweird.f32 %v3880_v20  ;;  %v329_v20 = vpop.f32.mrf.mxu1 }
 0x1d1   : > { %v1912_v6 = vmul.f32 %v1911_v19, %v1896_v38  ;;  %v1921_v30 = vxor.u32 2147483648, %v1904_v17  ;;  %v2491_v27 = vshll.u32 %v4250_v62, 30  ;;  %v725_v38 = vsel %vm717_vm5, %v4233_v53, %v4243_v47 }
 0x1d2   : > { %v732_v16 = vsel %vm718_vm13, %v729_v34, %v731_v11  ;;  %v728_v15 = vsel %vm718_vm13, %v725_v38, %v727_v3  ;;  %v734_v33 = vand.u32 65535, %v4270_v0  ;;  %v735_v24 = vshrl.u32 %v4270_v0, 16 }
 0x1d3   : > { %v1918_v56 = vxor.u32 2147483648, %v1912_v6  ;;  %v1922_v35 = vsel %vm1920_vm10, %v1921_v30, %v1912_v6  ;;  %v2492_v28 = vsub.s32 %v2488_v46, %v2491_v27  ;;  %v736_v50 = vand.u32 65535, %v732_v16  ;;  %v4292_v46 = vld [vmem:[%s5132_s2] ss:$0 sm:$0xff] }
 0x1d4   : > { %v737_v51 = vshrl.u32 %v732_v16, 16  ;;  %v758_v58 = vand.u32 65535, %v728_v15  ;;  %v759_v7 = vshrl.u32 %v728_v15, 16  ;;  %v2484_v26 = vadd.s32 %v4216_v10, %v4222_v2 }
 0x1d5   : > { %v1919_v5 = vsel %vm1917_vm11, %v1904_v17, %v1918_v56  ;;  %vm2493_vm14 = vcmp.lt.s32.totalorder %v2492_v28, 0  ;;  %v2494_v39 = vsub.s32 0, %v2492_v28  ;;  %v740_v31 = vmul.u32 %v736_v50, %v735_v24 }
 0x1d6   : > { %v1923_v13 = vsel %vm1916_vm9, %v1919_v5, %v1922_v35  ;;  %v739_v60 = vmul.u32 %v737_v51, %v734_v33  ;;  %v2514_v40 = vsub.s32 4, %v4250_v62  ;;  %v701_v22 = vshrl.u32 %v3239_v55, %v4214_v43 }
 0x1d7   : > { %v1924_v45 = vsel %vm1913_vm12, nan, %v1923_v13  ;;  %v2495_v25 = vsel %vm2493_vm14, %v2494_v39, %v2492_v28  ;;  %v722_v41 = vsel %vm720_vm7, %v710_v21, 2102212464  ;;  %v738_v54 = vmul.u32 %v736_v50, %v734_v33 }
 0x1d8   : > { %2864 = vst [vmem:[%s3701_s7 + $0x48] sm:$0xff] %v1924_v45  ;;  %v2496_v4 = vclz %v2495_v25  ;;  %v742_v37 = vshll.u32 %v739_v60, 16  ;;  %v330_v23 = vadd.f32 %v4292_v46, %v329_v20  ;;  %v741_v49 = vmul.u32 %v737_v51, %v735_v24 }
 0x1d9   : > { %v743_v10 = vshrl.u32 %v739_v60, 16  ;;  %v761_v2 = vmul.u32 %v759_v7, %v734_v33  ;;  %v762_v17 = vmul.u32 %v758_v58, %v735_v24  ;;  %v744_v19 = vshll.u32 %v740_v31, 16 }
 0x1da   : > { %v3053_v29 = vadd.s32 4294967294, %v2496_v4  ;;  %vm746_vm2 = vc.u32 %v738_v54, %v742_v37  ;;  %v748_v43 = vadd.s32 %v742_v37, %v738_v54  ;;  %v760_v44 = vmul.u32 %v758_v58, %v734_v33  ;;  %v341_v58 = vpop.f32.mrf.mxu2 }
 0x1db   : > { %v747_v21 = vsel %vm746_vm2, 1, %v3245_v14  ;;  %v764_v1 = vshll.u32 %v761_v2, 16  ;;  %v763_v34 = vmul.u32 %v759_v7, %v735_v24  ;;  %v766_v56 = vshll.u32 %v762_v17, 16 }
 0x1dc   : > { %vm3054_vm15 = vcmp.lt.s32.totalorder %v3053_v29, 0  ;;  %v749_v30 = vadd.s32 %v747_v21, %v741_v49  ;;  %vm750_vm0 = vc.u32 %v748_v43, %v744_v19  ;;  %v4298_v13 = vmul.f32 30.0, %v330_v23 }
 0x1dd   : > { %v2499_v9 = vsel %vm3054_vm15, 0, %v3053_v29  ;;  %vm768_vm1 = vc.u32 %v760_v44, %v764_v1  ;;  %v751_v3 = vsel %vm750_vm0, 1, %v3245_v14  ;;  %v770_v35 = vadd.s32 %v764_v1, %v760_v44 }
 0x1de   : > { %v2500_v12 = vsub.s32 32, %v2499_v9  ;;  %v2504_v6 = vsub.s32 4294967266, %v2499_v9  ;;  %v2501_v36 = vshll.u32 %v2492_v28, %v2499_v9  ;;  %v769_v11 = vsel %vm768_vm1, 1, %v3245_v14 }
 0x1df   : > { %v753_v5 = vadd.s32 %v751_v3, %v749_v30  ;;  %v771_v16 = vadd.s32 %v769_v11, %v763_v34  ;;  %vm2392_vm3 = vcmp.lt.s32.totalorder %v4082_v18, 0  ;;  %v721_v28 = vsel %vm717_vm5, %v701_v22, %v4233_v53 }
 0x1e0   : > { %v2502_v27 = vshrl.u32 %v2484_v26, %v2500_v12  ;;  %v2505_v38 = vadd.s32 127, %v2504_v6  ;;  %vm772_vm6 = vc.u32 %v770_v35, %v766_v56  ;;  %v1305_v33 = vand.u32 2147483647, %v4298_v13 }
 0x1e1   : > { %v754_v39 = vadd.s32 %v753_v5, %v743_v10  ;;  %v723_v50 = vsel %vm719_vm8, %v4243_v47, %v722_v41  ;;  %v745_v51 = vshrl.u32 %v740_v31, 16  ;;  %v773_v25 = vsel %vm772_vm6, 1, %v3245_v14 }
 0x1e2   : > { %v2503_v15 = vor.u32 %v2502_v27, %v2501_v36  ;;  %v2506_v45 = vshll.u32 %v2505_v38, 23  ;;  %v2515_v7 = vsel %vm2392_vm3, %v2514_v40, %v4250_v62  ;;  %v765_v20 = vshrl.u32 %v761_v2, 16 }
 0x1e3   : > { %v775_v4 = vadd.s32 %v773_v25, %v771_v16  ;;  %v1308_v53 = vand.u32 2139095040, %v4298_v13  ;;  %v755_v22 = vadd.s32 %v754_v39, %v745_v51  ;;  %v767_v29 = vshrl.u32 %v762_v17, 16 }
 0x1e4   : > { %v2507_v24 = vor.u32 4788187, %v2506_v45  ;;  %v2510_v26 = vcvt.s32.f32 %v2503_v15  ;;  %v1312_v47 = vand.u32 8388607, %v1305_v33  ;;  %v342_v31 = vadd.f32 %v4292_v46, %v341_v58 }
 0x1e5   : > { %v776_v54 = vadd.s32 %v775_v4, %v765_v20  ;;  %v1309_v37 = vshrl.u32 %v1308_v53, 23  ;;  %v774_v23 = vadd.s32 %v770_v35, %v766_v56  ;;  %vm2391_vm4 = vcmp.le.f32.partialorder %v2390_v52, 0.7853982 }
 0x1e6   : > { %v2508_v60 = vand.u32 2147483647, %v2507_v24  ;;  %v724_v62 = vsel %vm718_vm13, %v721_v28, %v723_v50  ;;  %v2517_v2 = vsel %vm2391_vm4, 0, %v2515_v7  ;;  %v1313_v19 = vor.u32 8388608, %v1312_v47 }
 0x1e7   : > { %v777_v40 = vadd.s32 %v776_v54, %v767_v29  ;;  %v3031_v49 = vadd.s32 4294967169, %v1309_v37  ;;  %vm780_vm5 = vc.u32 %v755_v22, %v774_v23  ;;  %v4320_v9 = vmul.f32 30.0, %v342_v31 }
 0x1e8   : > { %v2511_v41 = vmul.f32 %v2510_v26, %v2508_v60  ;;  %v778_v44 = vmul.u32 %v4270_v0, %v724_v62  ;;  %v2534_v1 = vadd.s32 3, %v2517_v2  ;;  %v4326_v36 = vshll.u32 %v1313_v19, 8 }
 0x1e9   : > { %v781_v17 = vadd.s32 1, %v777_v40  ;;  %v1315_v43 = vadd.s32 1, %v3031_v49  ;;  %v1928_v56 = vand.u32 2139095040, %v4320_v9  ;;  %v4331_v16 = vadd.s32 %v774_v23, %v755_v22 }
 0x1ea   : > { %v2512_v10 = vxor.u32 2147483648, %v2511_v41  ;;  %v4329_v11 = vand.u32 3, %v2534_v1  ;;  %v4335_v28 = vand.u32 65535, %v4326_v36  ;;  %v1925_v39 = vand.u32 2147483647, %v4320_v9 }
 0x1eb   : > { %v782_v32 = vsel %vm780_vm5, %v781_v17, %v777_v40  ;;  %vm1316_vm7 = vcmp.gt.s32.totalorder %v1315_v43, 0  ;;  %v1929_v24 = vshrl.u32 %v1928_v56, 23  ;;  %vm687_vm8 = vcmp.lt.s32.totalorder %v4090_v42, 0 }
 0x1ec   : > { %v2513_v21 = vsel %vm2392_vm3, %v2512_v10, %v2511_v41  ;;  %v783_v6 = vadd.s32 %v782_v32, %v778_v44  ;;  %v1317_v30 = vsel %vm1316_vm7, %v1315_v43, 0  ;;  %vm2540_vm9 = vcmp.eq.s32.totalorder %v4329_v11, 2 }
 0x1ed   : > { %v2516_v52 = vsel %vm2391_vm4, %v4082_v18, %v2513_v21  ;;  %v1319_v34 = vand.u32 31, %v1317_v30  ;;  %v4347_v29 = vshrl.u32 %v1317_v30, 5  ;;  %vm2537_vm11 = vcmp.eq.s32.totalorder %v4329_v11, 0 }
 0x1ee   : > { %v2518_v12 = vmul.f32 %v2516_v52, %v2516_v52  ;;  %v784_v3 = vadd.s32 536870912, %v783_v6  ;;  %vm2536_vm10 = vcmp.lt.s32.totalorder %v4329_v11, 2  ;;  %vm2533_vm12 = vweird.f32 %v4082_v18 }
 0x1ef   : > { %v1320_v5 = vsub.s32 32, %v1319_v34  ;;  %v1322_v45 = vshll.u32 %v3239_v55, %v1319_v34  ;;  %v1325_v58 = vshll.u32 %v3240_v57, %v1319_v34  ;;  %v1331_v4 = vshll.u32 %v3242_v61, %v1319_v34 }
 0x1f0   : > { %v2519_v27 = vmul.f32 -0.001358992, %v2518_v12  ;;  %v2526_v38 = vmul.f32 -0.00019511016, %v2518_v12  ;;  %v785_v15 = vshrl.u32 %v784_v3, 30  ;;  %v1328_v54 = vshll.u32 %v3241_v59, %v1319_v34 }
 0x1f1   : > { %v1323_v7 = vshrl.u32 %v3240_v57, %v1320_v5  ;;  %v1326_v20 = vshrl.u32 %v3241_v59, %v1320_v5  ;;  %v1332_v53 = vshrl.u32 %v3243_v63, %v1320_v5  ;;  %v1329_v37 = vshrl.u32 %v3242_v61, %v1320_v5 }
 0x1f2   : > { %v2520_v0 = vadd.f32 0.041655596, %v2519_v27  ;;  %v2527_v35 = vadd.f32 0.008332121, %v2526_v38  ;;  %v786_v25 = vshll.u32 %v785_v15, 30  ;;  %v1334_v47 = vshll.u32 %v3243_v63, %v1319_v34 }
 0x1f3   : > { %v1335_v31 = vshrl.u32 %v3244_v8, %v1320_v5  ;;  %v809_v40 = vsub.s32 4, %v785_v15  ;;  %v1324_v49 = vor.u32 %v1323_v7, %v1322_v45  ;;  %v1327_v10 = vor.u32 %v1326_v20, %v1325_v58 }
 0x1f4   : > { %v2521_v50 = vmul.f32 %v2520_v0, %v2518_v12  ;;  %v2528_v51 = vmul.f32 %v2527_v35, %v2518_v12  ;;  %v4345_v22 = vsub.s32 %v783_v6, %v786_v25  ;;  %v1333_v2 = vor.u32 %v1332_v53, %v1331_v4 }
 0x1f5   : > { %vm1337_vm14 = vcmp.lt.s32.totalorder %v4347_v29, 1  ;;  %v1330_v44 = vor.u32 %v1329_v37, %v1328_v54  ;;  %vm1340_vm15 = vcmp.lt.s32.totalorder %v4347_v29, 4  ;;  %v1355_v1 = vshrl.u32 %v4326_v36, 16 }
 0x1f6   : > { %v2522_v60 = vadd.f32 -0.4999988, %v2521_v50  ;;  %v2529_v26 = vadd.f32 -0.16666654, %v2528_v51  ;;  %vm788_vm13 = vcmp.lt.s32.totalorder %v4345_v22, 0  ;;  %v789_v62 = vsub.s32 0, %v4345_v22 }
 0x1f7   : > { %vm4364_vm2 = vcmp.le.f32.partialorder %v685_v48, 0.7853982  ;;  %v1336_v30 = vor.u32 %v1335_v31, %v1334_v47  ;;  %vm1339_vm0 = vcmp.lt.s32.totalorder %v4347_v29, 3  ;;  %v1321_v56 = vshrl.u32 %v3239_v55, %v1320_v5 }
 0x1f8   : > { %v2523_v41 = vmul.f32 %v2522_v60, %v2518_v12  ;;  %v2530_v23 = vmul.f32 %v2529_v26, %v2518_v12  ;;  %v790_v43 = vsel %vm788_vm13, %v789_v62, %v4345_v22  ;;  %v1345_v27 = vsel %vm1337_vm14, %v1324_v49, %v1327_v10 }
 0x1f9   : > { %v791_v21 = vclz %v790_v43  ;;  %v3043_v38 = vadd.s32 4294967169, %v1929_v24  ;;  %vm1338_vm1 = vcmp.lt.s32.totalorder %v4347_v29, 2  ;;  %v1346_v48 = vsel %vm1340_vm15, %v1333_v2, 920167782 }
 0x1fa   : > { %v2524_v17 = vadd.f32 1.0, %v2523_v41  ;;  %v2531_v19 = vadd.f32 1.0, %v2530_v23  ;;  %v1347_v5 = vsel %vm1339_vm0, %v1330_v44, %v1346_v48  ;;  %v1349_v35 = vsel %vm1337_vm14, %v1327_v10, %v1330_v44 }
 0x1fb   : > { %v3020_v34 = vadd.s32 4294967294, %v791_v21  ;;  %v1348_v24 = vsel %vm1338_vm1, %v1345_v27, %v1347_v5  ;;  %v1350_v50 = vsel %vm1340_vm15, %v1336_v30, 1326507024  ;;  %v1342_v7 = vsel %vm1340_vm15, %v1330_v44, 2102212464 }
 0x1fc   : > { %v2532_v32 = vmul.f32 %v2531_v19, %v2516_v52  ;;  %v2541_v12 = vxor.u32 2147483648, %v2524_v17  ;;  %v4374_v52 = vsel %vm687_vm8, %v809_v40, %v785_v15  ;;  %v1351_v4 = vsel %vm1339_vm0, %v1333_v2, %v1350_v50 }
 0x1fd   : > { %vm3021_vm3 = vcmp.lt.s32.totalorder %v3020_v34, 0  ;;  %v1378_v53 = vand.u32 65535, %v1348_v24  ;;  %v1379_v60 = vshrl.u32 %v1348_v24, 16  ;;  %v1352_v37 = vsel %vm1338_vm1, %v1349_v35, %v1351_v4 }
 0x1fe   : > { %v2538_v3 = vxor.u32 2147483648, %v2532_v32  ;;  %v2542_v0 = vsel %vm2540_vm9, %v2541_v12, %v2532_v32  ;;  %v794_v45 = vsel %vm3021_vm3, 0, %v3020_v34  ;;  %v1356_v47 = vand.u32 65535, %v1352_v37 }
 0x1ff   : > { %v795_v25 = vsub.s32 32, %v794_v45  ;;  %v799_v58 = vsub.s32 4294967266, %v794_v45  ;;  %v796_v26 = vshll.u32 %v4345_v22, %v794_v45  ;;  %v1357_v31 = vshrl.u32 %v1352_v37, 16 }
 0x200   : > { %v2539_v15 = vsel %vm2537_vm11, %v2524_v17, %v2538_v3  ;;  %v1381_v41 = vmul.u32 %v1379_v60, %v4335_v28  ;;  %v1935_v18 = vadd.s32 1, %v3043_v38  ;;  %v812_v40 = vsel %vm4364_vm2, 0, %v4374_v52 }
 0x201   : > { %v2543_v51 = vsel %vm2536_vm10, %v2539_v15, %v2542_v0  ;;  %v797_v54 = vshrl.u32 %v4331_v16, %v795_v25  ;;  %v800_v11 = vadd.s32 127, %v799_v58  ;;  %v1382_v2 = vmul.u32 %v1378_v53, %v1355_v1 }
 0x202   : > { %v2544_v20 = vsel %vm2533_vm12, nan, %v2543_v51  ;;  %v1341_v22 = vsel %vm1337_vm14, %v1321_v56, %v1324_v49  ;;  %v1343_v16 = vsel %vm1339_vm0, %v1327_v10, %v1342_v7  ;;  %v1359_v17 = vmul.u32 %v1357_v31, %v4335_v28 }
 0x203   : > { %2868 = vst [vmem:[%s3701_s7 + $0x68] sm:$0xff] %v2544_v20  ;;  %v798_v23 = vor.u32 %v797_v54, %v796_v26  ;;  %v801_v62 = vshll.u32 %v800_v11, 23  ;;  %v1360_v19 = vmul.u32 %v1356_v47, %v1355_v1  ;;  %v1380_v21 = vmul.u32 %v1378_v53, %v4335_v28 }
 0x204   : > { %v1383_v44 = vmul.u32 %v1379_v60, %v1355_v1  ;;  %v1384_v32 = vshll.u32 %v1381_v41, 16  ;;  %v1358_v30 = vmul.u32 %v1356_v47, %v4335_v28  ;;  %v1361_v34 = vmul.u32 %v1357_v31, %v1355_v1 }
 0x205   : > { %v802_v43 = vor.u32 4788187, %v801_v62  ;;  %v805_v12 = vcvt.s32.f32 %v798_v23  ;;  %v1362_v27 = vshll.u32 %v1359_v17, 16  ;;  %v1364_v3 = vshll.u32 %v1360_v19, 16 }
 0x206   : > { %v1386_v52 = vshll.u32 %v1382_v2, 16  ;;  %vm1388_vm6 = vc.u32 %v1380_v21, %v1384_v32  ;;  %v1390_v56 = vadd.s32 %v1384_v32, %v1380_v21  ;;  %vm1936_vm5 = vcmp.gt.s32.totalorder %v1935_v18, 0 }
 0x207   : > { %v803_v38 = vand.u32 2147483647, %v802_v43  ;;  %vm1366_vm4 = vc.u32 %v1358_v30, %v1362_v27  ;;  %v1368_v49 = vadd.s32 %v1362_v27, %v1358_v30  ;;  %v1389_v10 = vsel %vm1388_vm6, 1, %v3245_v14 }
 0x208   : > { %v1367_v0 = vsel %vm1366_vm4, 1, %v3245_v14  ;;  %v1391_v5 = vadd.s32 %v1389_v10, %v1383_v44  ;;  %v1385_v15 = vshrl.u32 %v1381_v41, 16  ;;  %vm1392_vm9 = vc.u32 %v1390_v56, %v1386_v52 }
 0x209   : > { %v806_v48 = vmul.f32 %v805_v12, %v803_v38  ;;  %v1369_v35 = vadd.s32 %v1367_v0, %v1361_v34  ;;  %vm1370_vm7 = vc.u32 %v1368_v49, %v1364_v3  ;;  %v1393_v45 = vsel %vm1392_vm9, 1, %v3245_v14 }
 0x20a   : > { %v1371_v1 = vsel %vm1370_vm7, 1, %v3245_v14  ;;  %v1937_v24 = vsel %vm1936_vm5, %v1935_v18, 0  ;;  %v1363_v50 = vshrl.u32 %v1359_v17, 16  ;;  %v1395_v25 = vadd.s32 %v1393_v45, %v1391_v5 }
 0x20b   : > { %v807_v28 = vxor.u32 2147483648, %v806_v48  ;;  %v1373_v51 = vadd.s32 %v1371_v1, %v1369_v35  ;;  %v1939_v58 = vand.u32 31, %v1937_v24  ;;  %v1344_v20 = vsel %vm1338_vm1, %v1341_v22, %v1343_v16 }
 0x20c   : > { %v1365_v4 = vshrl.u32 %v1360_v19, 16  ;;  %v1387_v53 = vshrl.u32 %v1382_v2, 16  ;;  %v1396_v54 = vadd.s32 %v1395_v25, %v1385_v15  ;;  %v829_v47 = vadd.s32 3, %v812_v40 }
 0x20d   : > { %v808_v7 = vsel %vm687_vm8, %v807_v28, %v806_v48  ;;  %v1374_v26 = vadd.s32 %v1373_v51, %v1363_v50  ;;  %v4426_v11 = vsub.s32 32, %v1939_v58  ;;  %v1932_v31 = vand.u32 8388607, %v1925_v39 }
 0x20e   : > { %v811_v60 = vsel %vm4364_vm2, %v4090_v42, %v808_v7  ;;  %v4432_v18 = vadd.s32 %v1390_v56, %v1386_v52  ;;  %v1397_v29 = vadd.s32 %v1396_v54, %v1387_v53  ;;  %v1398_v23 = vmul.u32 %v4326_v36, %v1344_v20 }
 0x20f   : > { %v813_v37 = vmul.f32 %v811_v60, %v811_v60  ;;  %v4430_v41 = vadd.s32 %v1374_v26, %v1365_v4  ;;  %v4435_v6 = vshrl.u32 %v1937_v24, 5  ;;  %v1945_v22 = vshll.u32 %v3240_v57, %v1939_v58 }
 0x210   : > { %v1401_v40 = vadd.s32 1, %v1397_v29  ;;  %v1946_v16 = vshrl.u32 %v3241_v59, %v4426_v11  ;;  %v1949_v17 = vshrl.u32 %v3242_v61, %v4426_v11  ;;  %v1943_v36 = vshrl.u32 %v3240_v57, %v4426_v11 }
 0x211   : > { %v814_v62 = vmul.f32 -0.001358992, %v813_v37  ;;  %v821_v2 = vmul.f32 -0.00019511016, %v813_v37  ;;  %vm1400_vm8 = vc.u32 %v4430_v41, %v4432_v18  ;;  %v1948_v21 = vshll.u32 %v3241_v59, %v1939_v58 }
 0x212   : > { %v1402_v44 = vsel %vm1400_vm8, %v1401_v40, %v1397_v29  ;;  %v1951_v32 = vshll.u32 %v3242_v61, %v1939_v58  ;;  %v1952_v12 = vshrl.u32 %v3243_v63, %v4426_v11  ;;  %v1954_v30 = vshll.u32 %v3243_v63, %v1939_v58 }
 0x213   : > { %v815_v19 = vadd.f32 0.041655596, %v814_v62  ;;  %v822_v43 = vadd.f32 0.008332121, %v821_v2  ;;  %v1403_v38 = vadd.s32 %v1402_v44, %v1398_v23  ;;  %v1955_v3 = vshrl.u32 %v3244_v8, %v4426_v11  ;;  %v353_v23 = vpop.f32.mrf.mxu3 }
 0x214   : > { %v1942_v52 = vshll.u32 %v3239_v55, %v1939_v58  ;;  %v4454_v49 = vor.u32 %v1946_v16, %v1945_v22  ;;  %v1950_v10 = vor.u32 %v1949_v17, %v1948_v21  ;;  %v1953_v56 = vor.u32 %v1952_v12, %v1951_v32 }
 0x215   : > { %v816_v34 = vmul.f32 %v815_v19, %v813_v37  ;;  %v823_v27 = vmul.f32 %v822_v43, %v813_v37  ;;  %v1404_v5 = vadd.s32 536870912, %v1403_v38  ;;  %v1956_v35 = vor.u32 %v1955_v3, %v1954_v30 }
 0x216   : > { %v830_v15 = vand.u32 3, %v829_v47  ;;  %v1933_v28 = vor.u32 8388608, %v1932_v31  ;;  %v4456_v1 = vor.u32 %v1943_v36, %v1942_v52  ;;  %vm1960_vm11 = vcmp.lt.s32.totalorder %v4435_v6, 4 }
 0x217   : > { %v817_v48 = vadd.f32 -0.4999988, %v816_v34  ;;  %v824_v0 = vadd.f32 -0.16666654, %v823_v27  ;;  %v4458_v50 = vshrl.u32 %v1404_v5, 30  ;;  %vm828_vm10 = vweird.f32 %v4090_v42 }
 0x218   : > { %vm1957_vm13 = vcmp.lt.s32.totalorder %v4435_v6, 1  ;;  %vm1959_vm12 = vcmp.lt.s32.totalorder %v4435_v6, 3  ;;  %v1966_v51 = vsel %vm1960_vm11, %v1953_v56, 920167782  ;;  %v1970_v25 = vsel %vm1960_vm11, %v1956_v35, 1326507024 }
 0x219   : > { %v818_v45 = vmul.f32 %v817_v48, %v813_v37  ;;  %v825_v24 = vmul.f32 %v824_v0, %v813_v37  ;;  %v1406_v20 = vshll.u32 %v4458_v50, 30  ;;  %v1969_v4 = vsel %vm1957_vm13, %v4454_v49, %v1950_v10 }
 0x21a   : > { %v1965_v53 = vsel %vm1957_vm13, %v4456_v1, %v4454_v49  ;;  %v1967_v26 = vsel %vm1959_vm12, %v1950_v10, %v1966_v51  ;;  %v1971_v54 = vsel %vm1959_vm12, %v1953_v56, %v1970_v25  ;;  %v4480_v37 = vshll.u32 %v1933_v28, 8 }
 0x21b   : > { %v819_v58 = vadd.f32 1.0, %v818_v45  ;;  %v826_v7 = vadd.f32 1.0, %v825_v24  ;;  %v1407_v29 = vsub.s32 %v1403_v38, %v1406_v20  ;;  %vm1958_vm14 = vcmp.lt.s32.totalorder %v4435_v6, 2 }
 0x21c   : > { %vm831_vm15 = vcmp.lt.s32.totalorder %v830_v15, 2  ;;  %vm832_vm2 = vcmp.eq.s32.totalorder %v830_v15, 0  ;;  %vm835_vm0 = vcmp.eq.s32.totalorder %v830_v15, 2  ;;  %v1972_v62 = vsel %vm1958_vm14, %v1969_v4, %v1971_v54 }
 0x21d   : > { %v827_v47 = vmul.f32 %v826_v7, %v811_v60  ;;  %v836_v31 = vxor.u32 2147483648, %v819_v58  ;;  %vm1408_vm1 = vcmp.lt.s32.totalorder %v1407_v29, 0  ;;  %v1409_v22 = vsub.s32 0, %v1407_v29 }
 0x21e   : > { %v1968_v40 = vsel %vm1958_vm14, %v1965_v53, %v1967_v26  ;;  %v1974_v16 = vand.u32 65535, %v4480_v37  ;;  %v1976_v60 = vand.u32 65535, %v1972_v62  ;;  %v1977_v17 = vshrl.u32 %v1972_v62, 16 }
 0x21f   : > { %v833_v2 = vxor.u32 2147483648, %v827_v47  ;;  %v354_v19 = vadd.f32 %v4292_v46, %v353_v23  ;;  %v837_v36 = vsel %vm835_vm0, %v836_v31, %v827_v47  ;;  %v1410_v21 = vsel %vm1408_vm1, %v1409_v22, %v1407_v29 }
 0x220   : > { %v1975_v44 = vshrl.u32 %v4480_v37, 16  ;;  %v1411_v12 = vclz %v1410_v21  ;;  %v1941_v30 = vshrl.u32 %v3239_v55, %v4426_v11  ;;  %v1999_v34 = vshrl.u32 %v1968_v40, 16 }
 0x221   : > { %v834_v43 = vsel %vm832_vm2, %v819_v58, %v833_v2  ;;  %v1979_v38 = vmul.u32 %v1977_v17, %v1974_v16  ;;  %v1998_v52 = vand.u32 65535, %v1968_v40  ;;  %v1399_v56 = vadd.s32 %v4432_v18, %v4430_v41 }
 0x222   : > { %v838_v32 = vsel %vm831_vm15, %v834_v43, %v837_v36  ;;  %v1980_v3 = vmul.u32 %v1976_v60, %v1975_v44  ;;  %v3032_v48 = vadd.s32 4294967294, %v1411_v12  ;;  %v1429_v0 = vsub.s32 4, %v4458_v50 }
 0x223   : > { %v839_v27 = vsel %vm828_vm10, nan, %v838_v32  ;;  %v1962_v5 = vsel %vm1960_vm11, %v1950_v10, 2102212464  ;;  %v1978_v35 = vmul.u32 %v1976_v60, %v1974_v16  ;;  %v1981_v15 = vmul.u32 %v1977_v17, %v1975_v44  ;;  %v320_v32 = vpop.f32.mrf.mxu0 }
 0x224   : > { %2857 = vst [vmem:[%s3701_s7 + $0x10] sm:$0xff] %v839_v27  ;;  %v1982_v11 = vshll.u32 %v1979_v38, 16  ;;  %v4501_v28 = vmul.f32 30.0, %v354_v19  ;;  %vm1307_vm3 = vcmp.lt.s32.totalorder %v4298_v13, 0  ;;  %vm3033_vm6 = vcmp.lt.s32.totalorder %v3032_v48, 0 }
 0x225   : > { %v1983_v42 = vshrl.u32 %v1979_v38, 16  ;;  %v1984_v45 = vshll.u32 %v1980_v3, 16  ;;  %v2001_v24 = vmul.u32 %v1999_v34, %v1974_v16  ;;  %v1414_v51 = vsel %vm3033_vm6, 0, %v3032_v48 }
 0x226   : > { %vm1986_vm4 = vc.u32 %v1978_v35, %v1982_v11  ;;  %v1988_v41 = vadd.s32 %v1982_v11, %v1978_v35  ;;  %v2002_v18 = vmul.u32 %v1998_v52, %v1975_v44  ;;  %v1415_v25 = vsub.s32 32, %v1414_v51 }
 0x227   : > { %v1419_v58 = vsub.s32 4294967266, %v1414_v51  ;;  %v1987_v7 = vsel %vm1986_vm4, 1, %v3245_v14  ;;  %v2000_v10 = vmul.u32 %v1998_v52, %v1974_v16  ;;  %v2003_v4 = vmul.u32 %v1999_v34, %v1975_v44 }
 0x228   : > { %v1989_v20 = vadd.s32 %v1987_v7, %v1981_v15  ;;  %vm1990_vm5 = vc.u32 %v1988_v41, %v1984_v45  ;;  %v2004_v53 = vshll.u32 %v2001_v24, 16  ;;  %v1416_v26 = vshll.u32 %v1407_v29, %v1414_v51 }
 0x229   : > { %v1417_v54 = vshrl.u32 %v1399_v56, %v1415_v25  ;;  %v1420_v47 = vadd.s32 127, %v1419_v58  ;;  %v1991_v31 = vsel %vm1990_vm5, 1, %v3245_v14  ;;  %v2006_v62 = vshll.u32 %v2002_v18, 16 }
 0x22a   : > { %v1993_v23 = vadd.s32 %v1991_v31, %v1989_v20  ;;  %vm2008_vm7 = vc.u32 %v2000_v10, %v2004_v53  ;;  %v2010_v2 = vadd.s32 %v2004_v53, %v2000_v10  ;;  %v1961_v60 = vsel %vm1957_vm13, %v1941_v30, %v4456_v1 }
 0x22b   : > { %v1418_v22 = vor.u32 %v1417_v54, %v1416_v26  ;;  %v1421_v40 = vshll.u32 %v1420_v47, 23  ;;  %v2009_v16 = vsel %vm2008_vm7, 1, %v3245_v14  ;;  %v2545_v29 = vand.u32 2147483647, %v4501_v28 }
 0x22c   : > { %v1994_v17 = vadd.s32 %v1993_v23, %v1983_v42  ;;  %v2011_v19 = vadd.s32 %v2009_v16, %v2003_v4  ;;  %vm2012_vm9 = vc.u32 %v2010_v2, %v2006_v62  ;;  %v1963_v36 = vsel %vm1959_vm12, %v4454_v49, %v1962_v5 }
 0x22d   : > { %v1422_v43 = vor.u32 4788187, %v1421_v40  ;;  %v1985_v21 = vshrl.u32 %v1980_v3, 16  ;;  %v2013_v44 = vsel %vm2012_vm9, 1, %v3245_v14  ;;  %v1430_v1 = vsel %vm1307_vm3, %v1429_v0, %v4458_v50 }
 0x22e   : > { %v2005_v12 = vshrl.u32 %v2001_v24, 16  ;;  %v2015_v30 = vadd.s32 %v2013_v44, %v2011_v19  ;;  %v2548_v34 = vand.u32 2139095040, %v4501_v28  ;;  %v1425_v38 = vcvt.s32.f32 %v1418_v22 }
 0x22f   : > { %v1423_v27 = vand.u32 2147483647, %v1422_v43  ;;  %v1995_v52 = vadd.s32 %v1994_v17, %v1985_v21  ;;  %v2007_v56 = vshrl.u32 %v2002_v18, 16  ;;  %v2552_v49 = vand.u32 8388607, %v2545_v29 }
 0x230   : > { %v2016_v48 = vadd.s32 %v2015_v30, %v2005_v12  ;;  %v2549_v35 = vshrl.u32 %v2548_v34, 23  ;;  %v321_v3 = vadd.f32 %v4292_v46, %v320_v32  ;;  %v2014_v15 = vadd.s32 %v2010_v2, %v2006_v62 }
 0x231   : > { %v1426_v5 = vmul.f32 %v1425_v38, %v1423_v27  ;;  %vm4524_vm8 = vcmp.le.f32.partialorder %v1305_v33, 0.7853982  ;;  %v1964_v0 = vsel %vm1958_vm14, %v1961_v60, %v1963_v36  ;;  %v2553_v46 = vor.u32 8388608, %v2552_v49 }
 0x232   : > { %v2017_v11 = vadd.s32 %v2016_v48, %v2007_v56  ;;  %v3055_v42 = vadd.s32 4294967169, %v2549_v35  ;;  %v1432_v24 = vsel %vm4524_vm8, 0, %v1430_v1  ;;  %vm2020_vm11 = vc.u32 %v1995_v52, %v2014_v15 }
 0x233   : > { %v1427_v45 = vxor.u32 2147483648, %v1426_v5  ;;  %v4532_v18 = vmul.f32 30.0, %v321_v3  ;;  %v2018_v25 = vmul.u32 %v4480_v37, %v1964_v0  ;;  %v1449_v10 = vadd.s32 3, %v1432_v24 }
 0x234   : > { %v2021_v51 = vadd.s32 1, %v2017_v11  ;;  %v2555_v41 = vadd.s32 1, %v3055_v42  ;;  %v4540_v26 = vshll.u32 %v2553_v46, 8  ;;  %v4547_v60 = vadd.s32 %v2014_v15, %v1995_v52 }
 0x235   : > { %v1428_v33 = vsel %vm1307_vm3, %v1427_v45, %v1426_v5  ;;  %v843_v54 = vand.u32 2139095040, %v4532_v18  ;;  %v4543_v22 = vand.u32 3, %v1449_v10  ;;  %vm1448_vm2 = vweird.f32 %v4298_v13 }
 0x236   : > { %v1431_v6 = vsel %vm4524_vm8, %v4298_v13, %v1428_v33  ;;  %v2022_v58 = vsel %vm2020_vm11, %v2021_v51, %v2017_v11  ;;  %vm2556_vm10 = vcmp.gt.s32.totalorder %v2555_v41, 0  ;;  %v4550_v16 = vand.u32 65535, %v4540_v26 }
 0x237   : > { %v1433_v7 = vmul.f32 %v1431_v6, %v1431_v6  ;;  %v2023_v20 = vadd.s32 %v2022_v58, %v2018_v25  ;;  %v2557_v4 = vsel %vm2556_vm10, %v2555_v41, 0  ;;  %v4553_v17 = vshrl.u32 %v4540_v26, 16 }
 0x238   : > { %v2559_v53 = vand.u32 31, %v2557_v4  ;;  %v4555_v19 = vshrl.u32 %v843_v54, 23  ;;  %v4558_v44 = vshrl.u32 %v2557_v4, 5  ;;  %vm1455_vm13 = vcmp.eq.s32.totalorder %v4543_v22, 2 }
 0x239   : > { %v1434_v47 = vmul.f32 -0.001358992, %v1433_v7  ;;  %v1441_v31 = vmul.f32 -0.00019511016, %v1433_v7  ;;  %v2024_v23 = vadd.s32 536870912, %v2023_v20  ;;  %vm1452_vm12 = vcmp.eq.s32.totalorder %v4543_v22, 0 }
 0x23a   : > { %v2560_v62 = vsub.s32 32, %v2559_v53  ;;  %v2562_v32 = vshll.u32 %v3239_v55, %v2559_v53  ;;  %v2565_v56 = vshll.u32 %v3240_v57, %v2559_v53  ;;  %v2568_v48 = vshll.u32 %v3241_v59, %v2559_v53 }
 0x23b   : > { %v1435_v37 = vadd.f32 0.041655596, %v1434_v47  ;;  %v1442_v2 = vadd.f32 0.008332121, %v1441_v31  ;;  %v4545_v40 = vshrl.u32 %v2024_v23, 30  ;;  %v2571_v35 = vshll.u32 %v3242_v61, %v2559_v53 }
 0x23c   : > { %v2563_v1 = vshrl.u32 %v3240_v57, %v2560_v62  ;;  %v2566_v12 = vshrl.u32 %v3241_v59, %v2560_v62  ;;  %v2569_v30 = vshrl.u32 %v3242_v61, %v2560_v62  ;;  %v2572_v52 = vshrl.u32 %v3243_v63, %v2560_v62 }
 0x23d   : > { %v1436_v43 = vmul.f32 %v1435_v37, %v1433_v7  ;;  %v1443_v36 = vmul.f32 %v1442_v2, %v1433_v7  ;;  %v2026_v21 = vshll.u32 %v4545_v40, 30  ;;  %v2575_v49 = vshrl.u32 %v3244_v8, %v2560_v62 }
 0x23e   : > { %vm1451_vm14 = vcmp.lt.s32.totalorder %v4543_v22, 2  ;;  %v2564_v50 = vor.u32 %v2563_v1, %v2562_v32  ;;  %v2567_v0 = vor.u32 %v2566_v12, %v2565_v56  ;;  %v2570_v11 = vor.u32 %v2569_v30, %v2568_v48 }
 0x23f   : > { %v1437_v34 = vadd.f32 -0.4999988, %v1436_v43  ;;  %v1444_v27 = vadd.f32 -0.16666654, %v1443_v36  ;;  %v4565_v38 = vsub.s32 %v2023_v20, %v2026_v21  ;;  %v2574_v42 = vshll.u32 %v3243_v63, %v2559_v53 }
 0x240   : > { %v2573_v46 = vor.u32 %v2572_v52, %v2571_v35  ;;  %v2049_v33 = vsub.s32 4, %v4545_v40  ;;  %v2561_v25 = vshrl.u32 %v3239_v55, %v2560_v62  ;;  %vm2577_vm0 = vcmp.lt.s32.totalorder %v4558_v44, 1 }
 0x241   : > { %v1438_v3 = vmul.f32 %v1437_v34, %v1433_v7  ;;  %v1445_v5 = vmul.f32 %v1444_v27, %v1433_v7  ;;  %vm2028_vm15 = vcmp.lt.s32.totalorder %v4565_v38, 0  ;;  %v2029_v15 = vsub.s32 0, %v4565_v38 }
 0x242   : > { %v2576_v58 = vor.u32 %v2575_v49, %v2574_v42  ;;  %vm2578_vm1 = vcmp.lt.s32.totalorder %v4558_v44, 2  ;;  %vm1927_vm3 = vcmp.lt.s32.totalorder %v4320_v9, 0  ;;  %vm2579_vm6 = vcmp.lt.s32.totalorder %v4558_v44, 3 }
 0x243   : > { %v1439_v45 = vadd.f32 1.0, %v1438_v3  ;;  %v1446_v24 = vadd.f32 1.0, %v1445_v5  ;;  %v2030_v51 = vsel %vm2028_vm15, %v2029_v15, %v4565_v38  ;;  %vm2580_vm4 = vcmp.lt.s32.totalorder %v4558_v44, 4 }
 0x244   : > { %v2031_v41 = vclz %v2030_v51  ;;  %v2585_v4 = vsel %vm2577_vm0, %v2564_v50, %v2567_v0  ;;  %v2581_v54 = vsel %vm2577_vm0, %v2561_v25, %v2564_v50  ;;  %v2582_v47 = vsel %vm2580_vm4, %v2570_v11, 2102212464 }
 0x245   : > { %v1447_v7 = vmul.f32 %v1446_v24, %v1431_v6  ;;  %v1456_v10 = vxor.u32 2147483648, %v1439_v45  ;;  %v2586_v31 = vsel %vm2580_vm4, %v2573_v46, 920167782  ;;  %v2589_v62 = vsel %vm2577_vm0, %v2567_v0, %v2570_v11 }
 0x246   : > { %v3044_v20 = vadd.s32 4294967294, %v2031_v41  ;;  %v2587_v23 = vsel %vm2579_vm6, %v2570_v11, %v2586_v31  ;;  %v2590_v36 = vsel %vm2580_vm4, %v2576_v58, 1326507024  ;;  %v2583_v12 = vsel %vm2579_vm6, %v2567_v0, %v2582_v47 }
 0x247   : > { %v1453_v53 = vxor.u32 2147483648, %v1447_v7  ;;  %v1457_v6 = vsel %vm1455_vm13, %v1456_v10, %v1447_v7  ;;  %v2588_v43 = vsel %vm2578_vm1, %v2585_v4, %v2587_v23  ;;  %v2591_v34 = vsel %vm2579_vm6, %v2573_v46, %v2590_v36 }
 0x248   : > { %vm3045_vm5 = vcmp.lt.s32.totalorder %v3044_v20, 0  ;;  %v2618_v27 = vand.u32 65535, %v2588_v43  ;;  %v2619_v52 = vshrl.u32 %v2588_v43, 16  ;;  %v2592_v35 = vsel %vm2578_vm1, %v2589_v62, %v2591_v34 }
 0x249   : > { %v1454_v37 = vsel %vm1452_vm12, %v1439_v45, %v1453_v53  ;;  %v2034_v2 = vsel %vm3045_vm5, 0, %v3044_v20  ;;  %v2596_v49 = vand.u32 65535, %v2592_v35  ;;  %v2597_v3 = vshrl.u32 %v2592_v35, 16 }
 0x24a   : > { %v1458_v21 = vsel %vm1451_vm14, %v1454_v37, %v1457_v6  ;;  %v2035_v32 = vsub.s32 32, %v2034_v2  ;;  %v2039_v1 = vsub.s32 4294967266, %v2034_v2  ;;  %v2036_v56 = vshll.u32 %v4565_v38, %v2034_v2 }
 0x24b   : > { %v1459_v30 = vsel %vm1448_vm2, nan, %v1458_v21  ;;  %v2621_v5 = vmul.u32 %v2619_v52, %v4550_v16  ;;  %v840_v13 = vand.u32 2147483647, %v4532_v18  ;;  %v2622_v0 = vmul.u32 %v2618_v27, %v4553_v17 }
 0x24c   : > { %2861 = vst [vmem:[%s3701_s7 + $0x30] sm:$0xff] %v1459_v30  ;;  %v2037_v48 = vshrl.u32 %v4547_v60, %v2035_v32  ;;  %v2040_v22 = vadd.s32 127, %v2039_v1  ;;  %v3022_v11 = vadd.s32 4294967169, %v4555_v19  ;;  %v4614_v60 = vsel %vm1927_vm3, %v2049_v33, %v4545_v40 }
 0x24d   : > { %v4618_v38 = vsel %vm2578_vm1, %v2581_v54, %v2583_v12  ;;  %v2599_v42 = vmul.u32 %v2597_v3, %v4550_v16  ;;  %v2600_v45 = vmul.u32 %v2596_v49, %v4553_v17  ;;  %vm4624_vm7 = vcmp.le.f32.partialorder %v1925_v39, 0.7853982 }
 0x24e   : > { %v2038_v15 = vor.u32 %v2037_v48, %v2036_v56  ;;  %v2041_v50 = vshll.u32 %v2040_v22, 23  ;;  %v2620_v51 = vmul.u32 %v2618_v27, %v4550_v16  ;;  %v2623_v40 = vmul.u32 %v2619_v52, %v4553_v17 }
 0x24f   : > { %v2624_v46 = vshll.u32 %v2621_v5, 16  ;;  %v2598_v44 = vmul.u32 %v2596_v49, %v4550_v16  ;;  %v2601_v33 = vmul.u32 %v2597_v3, %v4553_v17  ;;  %v2602_v25 = vshll.u32 %v2599_v42, 16 }
 0x250   : > { %v2042_v19 = vor.u32 4788187, %v2041_v50  ;;  %v2045_v41 = vcvt.s32.f32 %v2038_v15  ;;  %v2604_v7 = vshll.u32 %v2600_v45, 16  ;;  %v2626_v10 = vshll.u32 %v2622_v0, 16 }
 0x251   : > { %vm2628_vm9 = vc.u32 %v2620_v51, %v2624_v46  ;;  %vm2606_vm8 = vc.u32 %v2598_v44, %v2602_v25  ;;  %v2608_v39 = vadd.s32 %v2602_v25, %v2598_v44  ;;  %v2630_v4 = vadd.s32 %v2624_v46, %v2620_v51 }
 0x252   : > { %v2043_v58 = vand.u32 2147483647, %v2042_v19  ;;  %v2629_v20 = vsel %vm2628_vm9, 1, %v3245_v14  ;;  %v2607_v54 = vsel %vm2606_vm8, 1, %v3245_v14  ;;  %v850_v31 = vadd.s32 1, %v3022_v11 }
 0x253   : > { %v2631_v47 = vadd.s32 %v2629_v20, %v2623_v40  ;;  %v2609_v6 = vadd.s32 %v2607_v54, %v2601_v33  ;;  %vm2610_vm11 = vc.u32 %v2608_v39, %v2604_v7  ;;  %v2625_v16 = vshrl.u32 %v2621_v5, 16 }
 0x254   : > { %v2046_v53 = vmul.f32 %v2045_v41, %v2043_v58  ;;  %vm2632_vm10 = vc.u32 %v2630_v4, %v2626_v10  ;;  %v2611_v23 = vsel %vm2610_vm11, 1, %v3245_v14  ;;  %vm851_vm13 = vcmp.gt.s32.totalorder %v850_v31, 0 }
 0x255   : > { %v2633_v62 = vsel %vm2632_vm10, 1, %v3245_v14  ;;  %v2603_v37 = vshrl.u32 %v2599_v42, 16  ;;  %v2613_v2 = vadd.s32 %v2611_v23, %v2609_v6  ;;  %v852_v36 = vsel %vm851_vm13, %v850_v31, 0 }
 0x256   : > { %v2047_v17 = vxor.u32 2147483648, %v2046_v53  ;;  %v2635_v43 = vadd.s32 %v2633_v62, %v2631_v47  ;;  %v2605_v32 = vshrl.u32 %v2600_v45, 16  ;;  %v847_v1 = vand.u32 8388607, %v840_v13 }
 0x257   : > { %v854_v12 = vand.u32 31, %v852_v36  ;;  %v2614_v34 = vadd.s32 %v2613_v2, %v2603_v37  ;;  %v2627_v27 = vshrl.u32 %v2622_v0, 16  ;;  %v2052_v56 = vsel %vm4624_vm7, 0, %v4614_v60 }
 0x258   : > { %v2048_v21 = vsel %vm1927_vm3, %v2047_v17, %v2046_v53  ;;  %v2636_v52 = vadd.s32 %v2635_v43, %v2625_v16  ;;  %v2638_v22 = vmul.u32 %v4540_v26, %v4618_v38  ;;  %v4652_v3 = vadd.s32 %v2630_v4, %v2626_v10 }
 0x259   : > { %v2051_v30 = vsel %vm4624_vm7, %v4320_v9, %v2048_v21  ;;  %v4648_v35 = vsub.s32 32, %v854_v12  ;;  %v4650_v49 = vadd.s32 %v2614_v34, %v2605_v32  ;;  %v4654_v15 = vshrl.u32 %v852_v36, 5 }
 0x25a   : > { %v2053_v48 = vmul.f32 %v2051_v30, %v2051_v30  ;;  %v2637_v5 = vadd.s32 %v2636_v52, %v2627_v27  ;;  %v857_v11 = vshll.u32 %v3239_v55, %v854_v12  ;;  %v860_v42 = vshll.u32 %v3240_v57, %v854_v12 }
 0x25b   : > { %vm2640_vm12 = vc.u32 %v4650_v49, %v4652_v3  ;;  %v861_v26 = vshrl.u32 %v3241_v59, %v4648_v35  ;;  %v866_v38 = vshll.u32 %v3242_v61, %v854_v12  ;;  %v863_v19 = vshll.u32 %v3241_v59, %v854_v12 }
 0x25c   : > { %v2054_v50 = vmul.f32 -0.001358992, %v2053_v48  ;;  %v2061_v0 = vmul.f32 -0.00019511016, %v2053_v48  ;;  %v2641_v60 = vadd.s32 1, %v2637_v5  ;;  %v864_v51 = vshrl.u32 %v3242_v61, %v4648_v35 }
 0x25d   : > { %v858_v46 = vshrl.u32 %v3240_v57, %v4648_v35  ;;  %v867_v41 = vshrl.u32 %v3243_v63, %v4648_v35  ;;  %v869_v44 = vshll.u32 %v3243_v63, %v854_v12  ;;  %v848_v7 = vor.u32 8388608, %v847_v1 }
 0x25e   : > { %v2055_v45 = vadd.f32 0.041655596, %v2054_v50  ;;  %v2062_v24 = vadd.f32 0.008332121, %v2061_v0  ;;  %v2642_v40 = vsel %vm2640_vm12, %v2641_v60, %v2637_v5  ;;  %v2069_v10 = vadd.s32 3, %v2052_v56 }
 0x25f   : > { %v2643_v58 = vadd.s32 %v2642_v40, %v2638_v22  ;;  %v4671_v39 = vor.u32 %v861_v26, %v860_v42  ;;  %v868_v20 = vor.u32 %v867_v41, %v866_v38  ;;  %v870_v4 = vshrl.u32 %v3244_v8, %v4648_v35 }
 0x260   : > { %v2056_v33 = vmul.f32 %v2055_v45, %v2053_v48  ;;  %v2063_v25 = vmul.f32 %v2062_v24, %v2053_v48  ;;  %v4675_v31 = vor.u32 %v864_v51, %v863_v19  ;;  %v4677_v6 = vor.u32 %v858_v46, %v857_v11  ;;  %v332_v46 = vpop.f32.mrf.mxu1 }
 0x261   : > { %v2644_v47 = vadd.s32 536870912, %v2643_v58  ;;  %v871_v16 = vor.u32 %v870_v4, %v869_v44  ;;  %vm872_vm14 = vcmp.lt.s32.totalorder %v4654_v15, 1  ;;  %vm875_vm15 = vcmp.lt.s32.totalorder %v4654_v15, 4 }
 0x262   : > { %v2057_v53 = vadd.f32 -0.4999988, %v2056_v33  ;;  %v2064_v54 = vadd.f32 -0.16666654, %v2063_v25  ;;  %vm874_vm2 = vcmp.lt.s32.totalorder %v4654_v15, 3  ;;  %v2070_v37 = vand.u32 3, %v2069_v10 }
 0x263   : > { %v4681_v62 = vshrl.u32 %v2644_v47, 30  ;;  %v881_v2 = vsel %vm875_vm15, %v868_v20, 920167782  ;;  %v885_v43 = vsel %vm875_vm15, %v871_v16, 1326507024  ;;  %v884_v1 = vsel %vm872_vm14, %v4671_v39, %v4675_v31 }
 0x264   : > { %v2058_v17 = vmul.f32 %v2057_v53, %v2053_v48  ;;  %v2065_v23 = vmul.f32 %v2064_v54, %v2053_v48  ;;  %v880_v12 = vsel %vm872_vm14, %v4677_v6, %v4671_v39  ;;  %v882_v34 = vsel %vm874_vm2, %v4675_v31, %v881_v2  ;;  %v4721_v53 = vld [vmem:[%s5132_s2] ss:$0 sm:$0xff] }
 0x265   : > { %v2646_v32 = vshll.u32 %v4681_v62, 30  ;;  %v886_v27 = vsel %vm874_vm2, %v868_v20, %v885_v43  ;;  %v4702_v52 = vshll.u32 %v848_v7, 8  ;;  %vm873_vm0 = vcmp.lt.s32.totalorder %v4654_v15, 2  ;;  %v344_v15 = vpop.f32.mrf.mxu2 }
 0x266   : > { %v2059_v36 = vadd.f32 1.0, %v2058_v17  ;;  %v2066_v21 = vadd.f32 1.0, %v2065_v23  ;;  %vm2071_vm1 = vcmp.lt.s32.totalorder %v2070_v37, 2  ;;  %vm2072_vm3 = vcmp.eq.s32.totalorder %v2070_v37, 0 }
 0x267   : > { %v2647_v22 = vsub.s32 %v2643_v58, %v2646_v32  ;;  %v887_v5 = vsel %vm873_vm0, %v884_v1, %v886_v27  ;;  %v883_v11 = vsel %vm873_vm0, %v880_v12, %v882_v34  ;;  %vm2075_vm4 = vcmp.eq.s32.totalorder %v2070_v37, 2 }
 0x268   : > { %v2067_v56 = vmul.f32 %v2066_v21, %v2051_v30  ;;  %v2076_v48 = vxor.u32 2147483648, %v2059_v36  ;;  %v889_v42 = vand.u32 65535, %v4702_v52  ;;  %v891_v30 = vand.u32 65535, %v887_v5 }
 0x269   : > { %vm2648_vm6 = vcmp.lt.s32.totalorder %v2647_v22, 0  ;;  %v2649_v0 = vsub.s32 0, %v2647_v22  ;;  %v892_v60 = vshrl.u32 %v887_v5, 16  ;;  %v890_v24 = vshrl.u32 %v4702_v52, 16 }
 0x26a   : > { %v2073_v50 = vxor.u32 2147483648, %v2067_v56  ;;  %v2077_v38 = vsel %vm2075_vm4, %v2076_v48, %v2067_v56  ;;  %vm2068_vm5 = vweird.f32 %v4320_v9  ;;  %v914_v40 = vshrl.u32 %v883_v11, 16 }
 0x26b   : > { %v2650_v45 = vsel %vm2648_vm6, %v2649_v0, %v2647_v22  ;;  %v894_v44 = vmul.u32 %v892_v60, %v889_v42  ;;  %v895_v33 = vmul.u32 %v891_v30, %v890_v24  ;;  %v913_v25 = vand.u32 65535, %v883_v11 }
 0x26c   : > { %v2074_v26 = vsel %vm2072_vm3, %v2059_v36, %v2073_v50  ;;  %v2651_v51 = vclz %v2650_v45  ;;  %v2639_v58 = vadd.s32 %v4652_v3, %v4650_v49  ;;  %v856_v10 = vshrl.u32 %v3239_v55, %v4648_v35 }
 0x26d   : > { %v2078_v19 = vsel %vm2071_vm1, %v2074_v26, %v2077_v38  ;;  %v893_v20 = vmul.u32 %v891_v30, %v889_v42  ;;  %v896_v4 = vmul.u32 %v892_v60, %v890_v24  ;;  %v897_v9 = vshll.u32 %v894_v44, 16 }
 0x26e   : > { %v2079_v41 = vsel %vm2068_vm5, nan, %v2078_v19  ;;  %v3056_v7 = vadd.s32 4294967294, %v2651_v51  ;;  %v333_v54 = vadd.f32 %v4721_v53, %v332_v46  ;;  %v898_v47 = vshrl.u32 %v894_v44, 16 }
 0x26f   : > { %2865 = vst [vmem:[%s3701_s7 + $0x50] sm:$0xff] %v2079_v41  ;;  %v899_v16 = vshll.u32 %v895_v33, 16  ;;  %v916_v17 = vmul.u32 %v914_v40, %v889_v42  ;;  %vm901_vm9 = vc.u32 %v893_v20, %v897_v9  ;;  %v903_v49 = vadd.s32 %v897_v9, %v893_v20 }
 0x270   : > { %vm3057_vm7 = vcmp.lt.s32.totalorder %v3056_v7, 0  ;;  %v917_v3 = vmul.u32 %v913_v25, %v890_v24  ;;  %v902_v2 = vsel %vm901_vm9, 1, %v3245_v14  ;;  %v915_v43 = vmul.u32 %v913_v25, %v889_v42 }
 0x271   : > { %v2654_v23 = vsel %vm3057_vm7, 0, %v3056_v7  ;;  %vm2547_vm8 = vcmp.lt.s32.totalorder %v4501_v28, 0  ;;  %v904_v36 = vadd.s32 %v902_v2, %v896_v4  ;;  %vm905_vm11 = vc.u32 %v903_v49, %v899_v16 }
 0x272   : > { %v2655_v37 = vsub.s32 32, %v2654_v23  ;;  %v2659_v35 = vsub.s32 4294967266, %v2654_v23  ;;  %v918_v21 = vmul.u32 %v914_v40, %v890_v24  ;;  %v919_v32 = vshll.u32 %v916_v17, 16 }
 0x273   : > { %v2656_v1 = vshll.u32 %v2647_v22, %v2654_v23  ;;  %v906_v27 = vsel %vm905_vm11, 1, %v3245_v14  ;;  %v921_v48 = vshll.u32 %v917_v3, 16  ;;  %v4728_v42 = vmul.f32 30.0, %v333_v54 }
 0x274   : > { %v2657_v12 = vshrl.u32 %v2639_v58, %v2655_v37  ;;  %v2660_v34 = vadd.s32 127, %v2659_v35  ;;  %v908_v56 = vadd.s32 %v906_v27, %v904_v36  ;;  %vm923_vm10 = vc.u32 %v915_v43, %v919_v32 }
 0x275   : > { %v925_v5 = vadd.s32 %v919_v32, %v915_v43  ;;  %v924_v11 = vsel %vm923_vm10, 1, %v3245_v14  ;;  %v877_v30 = vsel %vm875_vm15, %v4675_v31, 2102212464  ;;  %v2669_v38 = vsub.s32 4, %v4681_v62 }
 0x276   : > { %v2658_v50 = vor.u32 %v2657_v12, %v2656_v1  ;;  %v2661_v0 = vshll.u32 %v2660_v34, 23  ;;  %v909_v60 = vadd.s32 %v908_v56, %v898_v47  ;;  %v926_v22 = vadd.s32 %v924_v11, %v918_v21 }
 0x277   : > { %vm927_vm13 = vc.u32 %v925_v5, %v921_v48  ;;  %v900_v45 = vshrl.u32 %v895_v33, 16  ;;  %v876_v19 = vsel %vm872_vm14, %v856_v10, %v4677_v6  ;;  %v920_v51 = vshrl.u32 %v916_v17, 16 }
 0x278   : > { %v2662_v26 = vor.u32 4788187, %v2661_v0  ;;  %v928_v24 = vsel %vm927_vm13, 1, %v3245_v14  ;;  %v1463_v46 = vand.u32 2139095040, %v4728_v42  ;;  %v2665_v44 = vcvt.s32.f32 %v2658_v50 }
 0x279   : > { %v930_v40 = vadd.s32 %v928_v24, %v926_v22  ;;  %v878_v31 = vsel %vm874_vm2, %v4671_v39, %v877_v30  ;;  %v910_v25 = vadd.s32 %v909_v60, %v900_v45  ;;  %v922_v58 = vshrl.u32 %v917_v3, 16 }
 0x27a   : > { %v2663_v41 = vand.u32 2147483647, %v2662_v26  ;;  %v1460_v33 = vand.u32 2147483647, %v4728_v42  ;;  %v1464_v20 = vshrl.u32 %v1463_v46, 23  ;;  %v2670_v6 = vsel %vm2547_vm8, %v2669_v38, %v4681_v62 }
 0x27b   : > { %v931_v7 = vadd.s32 %v930_v40, %v920_v51  ;;  %v929_v10 = vadd.s32 %v925_v5, %v921_v48  ;;  %v879_v9 = vsel %vm873_vm0, %v876_v19, %v878_v31  ;;  %vm2546_vm12 = vcmp.le.f32.partialorder %v2545_v29, 0.7853982 }
 0x27c   : > { %v2666_v4 = vmul.f32 %v2665_v44, %v2663_v41  ;;  %v3034_v47 = vadd.s32 4294967169, %v1464_v20  ;;  %v2672_v16 = vsel %vm2546_vm12, 0, %v2670_v6  ;;  %v1467_v23 = vand.u32 8388607, %v1460_v33 }
 0x27d   : > { %v932_v54 = vadd.s32 %v931_v7, %v922_v58  ;;  %vm935_vm14 = vc.u32 %v910_v25, %v929_v10  ;;  %v933_v3 = vmul.u32 %v4702_v52, %v879_v9  ;;  %v2689_v29 = vadd.s32 3, %v2672_v16 }
 0x27e   : > { %v2667_v39 = vxor.u32 2147483648, %v2666_v4  ;;  %v1470_v49 = vadd.s32 1, %v3034_v47  ;;  %v1468_v21 = vor.u32 8388608, %v1467_v23  ;;  %v345_v1 = vadd.f32 %v4721_v53, %v344_v15 }
 0x27f   : > { %v936_v17 = vadd.s32 1, %v932_v54  ;;  %v4757_v52 = vand.u32 3, %v2689_v29  ;;  %v4761_v0 = vadd.s32 %v929_v10, %v910_v25  ;;  %vm842_vm3 = vcmp.lt.s32.totalorder %v4532_v18, 0 }
 0x280   : > { %v2668_v62 = vsel %vm2547_vm8, %v2667_v39, %v2666_v4  ;;  %vm1471_vm15 = vcmp.gt.s32.totalorder %v1470_v49, 0  ;;  %v4764_v30 = vshll.u32 %v1468_v21, 8  ;;  %v4766_v60 = vmul.f32 30.0, %v345_v1 }
 0x281   : > { %v2671_v37 = vsel %vm2546_vm12, %v4501_v28, %v2668_v62  ;;  %v937_v35 = vsel %vm935_vm14, %v936_v17, %v932_v54  ;;  %v1472_v36 = vsel %vm1471_vm15, %v1470_v49, 0  ;;  %vm2695_vm2 = vcmp.eq.s32.totalorder %v4757_v52, 2 }
 0x282   : > { %v2673_v2 = vmul.f32 %v2671_v37, %v2671_v37  ;;  %v938_v43 = vadd.s32 %v937_v35, %v933_v3  ;;  %v1474_v32 = vand.u32 31, %v1472_v36  ;;  %v4777_v31 = vshrl.u32 %v1472_v36, 5 }
 0x283   : > { %vm2692_vm0 = vcmp.eq.s32.totalorder %v4757_v52, 0  ;;  %vm2691_vm1 = vcmp.lt.s32.totalorder %v4757_v52, 2  ;;  %vm2688_vm4 = vweird.f32 %v4501_v28  ;;  %v1509_v39 = vand.u32 65535, %v4764_v30 }
 0x284   : > { %v2674_v12 = vmul.f32 -0.001358992, %v2673_v2  ;;  %v2681_v34 = vmul.f32 -0.00019511016, %v2673_v2  ;;  %v939_v27 = vadd.s32 536870912, %v938_v43  ;;  %v1475_v56 = vsub.s32 32, %v1474_v32 }
 0x285   : > { %v1477_v11 = vshll.u32 %v3239_v55, %v1474_v32  ;;  %v1480_v45 = vshll.u32 %v3240_v57, %v1474_v32  ;;  %v1486_v51 = vshll.u32 %v3242_v61, %v1474_v32  ;;  %v1483_v25 = vshll.u32 %v3241_v59, %v1474_v32 }
 0x286   : > { %v2675_v48 = vadd.f32 0.041655596, %v2674_v12  ;;  %v2682_v5 = vadd.f32 0.008332121, %v2681_v34  ;;  %v4759_v50 = vshrl.u32 %v939_v27, 30  ;;  %v1478_v24 = vshrl.u32 %v3240_v57, %v1475_v56 }
 0x287   : > { %v1481_v19 = vshrl.u32 %v3241_v59, %v1475_v56  ;;  %v1487_v40 = vshrl.u32 %v3243_v63, %v1475_v56  ;;  %v1484_v58 = vshrl.u32 %v3242_v61, %v1475_v56  ;;  %v1489_v7 = vshll.u32 %v3243_v63, %v1474_v32 }
 0x288   : > { %v2676_v22 = vmul.f32 %v2675_v48, %v2673_v2  ;;  %v2683_v26 = vmul.f32 %v2682_v5, %v2673_v2  ;;  %v941_v38 = vshll.u32 %v4759_v50, 30  ;;  %v1490_v20 = vshrl.u32 %v3244_v8, %v1475_v56 }
 0x289   : > { %v1479_v9 = vor.u32 %v1478_v24, %v1477_v11  ;;  %v4789_v54 = vor.u32 %v1481_v19, %v1480_v45  ;;  %v1488_v47 = vor.u32 %v1487_v40, %v1486_v51  ;;  %vm1492_vm5 = vcmp.lt.s32.totalorder %v4777_v31, 1 }
 0x28a   : > { %v2677_v46 = vadd.f32 -0.4999988, %v2676_v22  ;;  %v2684_v41 = vadd.f32 -0.16666654, %v2683_v26  ;;  %v4775_v44 = vsub.s32 %v938_v43, %v941_v38  ;;  %v1485_v62 = vor.u32 %v1484_v58, %v1483_v25 }
 0x28b   : > { %vm1495_vm7 = vcmp.lt.s32.totalorder %v4777_v31, 4  ;;  %v1510_v3 = vshrl.u32 %v4764_v30, 16  ;;  %vm4798_vm9 = vcmp.le.f32.partialorder %v840_v13, 0.7853982  ;;  %v1491_v29 = vor.u32 %v1490_v20, %v1489_v7 }
 0x28c   : > { %v2678_v4 = vmul.f32 %v2677_v46, %v2673_v2  ;;  %v2685_v6 = vmul.f32 %v2684_v41, %v2673_v2  ;;  %vm943_vm6 = vcmp.lt.s32.totalorder %v4775_v44, 0  ;;  %v944_v10 = vsub.s32 0, %v4775_v44 }
 0x28d   : > { %vm1494_vm8 = vcmp.lt.s32.totalorder %v4777_v31, 3  ;;  %v964_v36 = vsub.s32 4, %v4759_v50  ;;  %v1500_v21 = vsel %vm1492_vm5, %v1479_v9, %v4789_v54  ;;  %v2080_v32 = vand.u32 2147483647, %v4766_v60 }
 0x28e   : > { %v2679_v16 = vadd.f32 1.0, %v2678_v4  ;;  %v2686_v17 = vadd.f32 1.0, %v2685_v6  ;;  %v945_v23 = vsel %vm943_vm6, %v944_v10, %v4775_v44  ;;  %v1476_v1 = vshrl.u32 %v3239_v55, %v1475_v56 }
 0x28f   : > { %v946_v49 = vclz %v945_v23  ;;  %vm1493_vm11 = vcmp.lt.s32.totalorder %v4777_v31, 2  ;;  %v1501_v13 = vsel %vm1495_vm7, %v1488_v47, 920167782  ;;  %v1504_v27 = vsel %vm1492_vm5, %v4789_v54, %v1485_v62 }
 0x290   : > { %v2687_v15 = vmul.f32 %v2686_v17, %v2671_v37  ;;  %v2696_v35 = vxor.u32 2147483648, %v2679_v16  ;;  %v1502_v34 = vsel %vm1494_vm8, %v1485_v62, %v1501_v13  ;;  %v1505_v11 = vsel %vm1495_vm7, %v1491_v29, 1326507024 }
 0x291   : > { %v3023_v43 = vadd.s32 4294967294, %v946_v49  ;;  %v1503_v5 = vsel %vm1493_vm11, %v1500_v21, %v1502_v34  ;;  %v4830_v45 = vsel %vm842_vm3, %v964_v36, %v4759_v50  ;;  %v1506_v19 = vsel %vm1494_vm8, %v1488_v47, %v1505_v11 }
 0x292   : > { %v2693_v37 = vxor.u32 2147483648, %v2687_v15  ;;  %v2697_v12 = vsel %vm2695_vm2, %v2696_v35, %v2687_v15  ;;  %v1533_v51 = vand.u32 65535, %v1503_v5  ;;  %v1534_v40 = vshrl.u32 %v1503_v5, 16 }
 0x293   : > { %vm3024_vm10 = vcmp.lt.s32.totalorder %v3023_v43, 0  ;;  %v1507_v25 = vsel %vm1493_vm11, %v1504_v27, %v1506_v19  ;;  %v2083_v28 = vand.u32 2139095040, %v4766_v60  ;;  %v967_v6 = vsel %vm4798_vm9, 0, %v4830_v45 }
 0x294   : > { %v2694_v56 = vsel %vm2692_vm0, %v2679_v16, %v2693_v37  ;;  %v949_v48 = vsel %vm3024_vm10, 0, %v3023_v43  ;;  %v1511_v58 = vand.u32 65535, %v1507_v25  ;;  %v1512_v50 = vshrl.u32 %v1507_v25, 16 }
 0x295   : > { %v2698_v22 = vsel %vm2691_vm1, %v2694_v56, %v2697_v12  ;;  %v950_v26 = vsub.s32 32, %v949_v48  ;;  %v954_v38 = vsub.s32 4294967266, %v949_v48  ;;  %v951_v46 = vshll.u32 %v4775_v44, %v949_v48 }
 0x296   : > { %v2699_v24 = vsel %vm2688_vm4, nan, %v2698_v22  ;;  %v1536_v7 = vmul.u32 %v1534_v40, %v1509_v39  ;;  %v1537_v10 = vmul.u32 %v1533_v51, %v1510_v3  ;;  %v1496_v44 = vsel %vm1492_vm5, %v1476_v1, %v1479_v9 }
 0x297   : > { %2869 = vst [vmem:[%s3701_s7 + $0x70] sm:$0xff] %v2699_v24  ;;  %v952_v52 = vshrl.u32 %v4761_v0, %v950_v26  ;;  %v955_v41 = vadd.s32 127, %v954_v38  ;;  %v1497_v0 = vsel %vm1495_vm7, %v1485_v62, 2102212464  ;;  %v1514_v47 = vmul.u32 %v1512_v50, %v1509_v39 }
 0x298   : > { %v1515_v16 = vmul.u32 %v1511_v58, %v1510_v3  ;;  %v1535_v23 = vmul.u32 %v1533_v51, %v1509_v39  ;;  %v1538_v49 = vmul.u32 %v1534_v40, %v1510_v3  ;;  %v1539_v15 = vshll.u32 %v1536_v7, 16 }
 0x299   : > { %v953_v20 = vor.u32 %v952_v52, %v951_v46  ;;  %v956_v4 = vshll.u32 %v955_v41, 23  ;;  %v1513_v29 = vmul.u32 %v1511_v58, %v1509_v39  ;;  %v1516_v43 = vmul.u32 %v1512_v50, %v1510_v3 }
 0x29a   : > { %v1517_v36 = vshll.u32 %v1514_v47, 16  ;;  %v1519_v37 = vshll.u32 %v1515_v16, 16  ;;  %v1541_v13 = vshll.u32 %v1537_v10, 16  ;;  %vm1543_vm13 = vc.u32 %v1535_v23, %v1539_v15 }
 0x29b   : > { %v957_v17 = vor.u32 4788187, %v956_v4  ;;  %v960_v35 = vcvt.s32.f32 %v953_v20  ;;  %v1544_v9 = vsel %vm1543_vm13, 1, %v3245_v14  ;;  %v1545_v1 = vadd.s32 %v1539_v15, %v1535_v23 }
 0x29c   : > { %vm1521_vm12 = vc.u32 %v1513_v29, %v1517_v36  ;;  %v1523_v12 = vadd.s32 %v1517_v36, %v1513_v29  ;;  %v1546_v27 = vadd.s32 %v1544_v9, %v1538_v49  ;;  %v2084_v56 = vshrl.u32 %v2083_v28, 23 }
 0x29d   : > { %v958_v21 = vand.u32 2147483647, %v957_v17  ;;  %v1522_v34 = vsel %vm1521_vm12, 1, %v3245_v14  ;;  %v1498_v39 = vsel %vm1494_vm8, %v4789_v54, %v1497_v0  ;;  %vm1547_vm15 = vc.u32 %v1545_v1, %v1541_v13 }
 0x29e   : > { %v1524_v3 = vadd.s32 %v1522_v34, %v1516_v43  ;;  %vm1525_vm14 = vc.u32 %v1523_v12, %v1519_v37  ;;  %v1548_v11 = vsel %vm1547_vm15, 1, %v3245_v14  ;;  %v3046_v22 = vadd.s32 4294967169, %v2084_v56 }
 0x29f   : > { %v961_v62 = vmul.f32 %v960_v35, %v958_v21  ;;  %v1526_v5 = vsel %vm1525_vm14, 1, %v3245_v14  ;;  %v1518_v26 = vshrl.u32 %v1514_v47, 16  ;;  %v1540_v45 = vshrl.u32 %v1536_v7, 16 }
 0x2a0   : > { %v1528_v38 = vadd.s32 %v1526_v5, %v1524_v3  ;;  %v1550_v24 = vadd.s32 %v1548_v11, %v1546_v27  ;;  %v1520_v51 = vshrl.u32 %v1515_v16, 16  ;;  %v4860_v54 = vand.u32 8388607, %v2080_v32  ;;  %v356_v11 = vpop.f32.mrf.mxu3 }
 0x2a1   : > { %v962_v48 = vxor.u32 2147483648, %v961_v62  ;;  %v2090_v40 = vadd.s32 1, %v3046_v22  ;;  %v1542_v41 = vshrl.u32 %v1537_v10, 16  ;;  %v984_v50 = vadd.s32 3, %v967_v6 }
 0x2a2   : > { %v1529_v52 = vadd.s32 %v1528_v38, %v1518_v26  ;;  %v1551_v25 = vadd.s32 %v1550_v24, %v1540_v45  ;;  %v1499_v7 = vsel %vm1493_vm11, %v1496_v44, %v1498_v39  ;;  %v4869_v20 = vadd.s32 %v1545_v1, %v1541_v13 }
 0x2a3   : > { %v963_v19 = vsel %vm842_vm3, %v962_v48, %v961_v62  ;;  %vm2091_vm2 = vcmp.gt.s32.totalorder %v2090_v40, 0  ;;  %v1553_v6 = vmul.u32 %v4764_v30, %v1499_v7  ;;  %v985_v44 = vand.u32 3, %v984_v50 }
 0x2a4   : > { %v966_v46 = vsel %vm4798_vm9, %v4532_v18, %v963_v19  ;;  %v4867_v28 = vadd.s32 %v1529_v52, %v1520_v51  ;;  %v1552_v4 = vadd.s32 %v1551_v25, %v1542_v41  ;;  %v2092_v0 = vsel %vm2091_vm2, %v2090_v40, 0 }
 0x2a5   : > { %v968_v58 = vmul.f32 %v966_v46, %v966_v46  ;;  %v2094_v17 = vand.u32 31, %v2092_v0  ;;  %v2088_v43 = vor.u32 8388608, %v4860_v54  ;;  %v4877_v36 = vshrl.u32 %v2092_v0, 5 }
 0x2a6   : > { %vm1555_vm0 = vc.u32 %v4867_v28, %v4869_v20  ;;  %v1556_v2 = vadd.s32 1, %v1552_v4  ;;  %vm987_vm1 = vcmp.eq.s32.totalorder %v985_v44, 0  ;;  %vm986_vm3 = vcmp.lt.s32.totalorder %v985_v44, 2 }
 0x2a7   : > { %v969_v47 = vmul.f32 -0.001358992, %v968_v58  ;;  %v976_v16 = vmul.f32 -0.00019511016, %v968_v58  ;;  %v4874_v31 = vsub.s32 32, %v2094_v17  ;;  %v2097_v62 = vshll.u32 %v3239_v55, %v2094_v17 }
 0x2a8   : > { %v1557_v49 = vsel %vm1555_vm0, %v1556_v2, %v1552_v4  ;;  %v2100_v34 = vshll.u32 %v3240_v57, %v2094_v17  ;;  %v2103_v27 = vshll.u32 %v3241_v59, %v2094_v17  ;;  %v2106_v56 = vshll.u32 %v3242_v61, %v2094_v17 }
 0x2a9   : > { %v970_v10 = vadd.f32 0.041655596, %v969_v47  ;;  %v977_v23 = vadd.f32 0.008332121, %v976_v16  ;;  %v1558_v29 = vadd.s32 %v1557_v49, %v1553_v6  ;;  %v2098_v21 = vshrl.u32 %v3240_v57, %v4874_v31 }
 0x2aa   : > { %v2101_v37 = vshrl.u32 %v3241_v59, %v4874_v31  ;;  %v2107_v30 = vshrl.u32 %v3243_v63, %v4874_v31  ;;  %v2104_v1 = vshrl.u32 %v3242_v61, %v4874_v31  ;;  %v2110_v5 = vshrl.u32 %v3244_v8, %v4874_v31 }
 0x2ab   : > { %v971_v15 = vmul.f32 %v970_v10, %v968_v58  ;;  %v978_v35 = vmul.f32 %v977_v23, %v968_v58  ;;  %v1559_v9 = vadd.s32 536870912, %v1558_v29  ;;  %vm983_vm6 = vweird.f32 %v4532_v18 }
 0x2ac   : > { %v4896_v22 = vor.u32 %v2098_v21, %v2097_v62  ;;  %v4898_v26 = vor.u32 %v2101_v37, %v2100_v34  ;;  %v2108_v38 = vor.u32 %v2107_v30, %v2106_v56  ;;  %v2109_v45 = vshll.u32 %v3243_v63, %v2094_v17 }
 0x2ad   : > { %v972_v13 = vadd.f32 -0.4999988, %v971_v15  ;;  %v979_v12 = vadd.f32 -0.16666654, %v978_v35  ;;  %v4891_v48 = vshrl.u32 %v1559_v9, 30  ;;  %v4902_v54 = vor.u32 %v2104_v1, %v2103_v27 }
 0x2ae   : > { %vm990_vm4 = vcmp.eq.s32.totalorder %v985_v44, 2  ;;  %v2111_v40 = vor.u32 %v2110_v5, %v2109_v45  ;;  %vm2112_vm5 = vcmp.lt.s32.totalorder %v4877_v36, 1  ;;  %v357_v52 = vadd.f32 %v4721_v53, %v356_v11 }
 0x2af   : > { %v973_v39 = vmul.f32 %v972_v13, %v968_v58  ;;  %v980_v3 = vmul.f32 %v979_v12, %v968_v58  ;;  %v1561_v51 = vshll.u32 %v4891_v48, 30  ;;  %vm2115_vm7 = vcmp.lt.s32.totalorder %v4877_v36, 4 }
 0x2b0   : > { %vm2114_vm9 = vcmp.lt.s32.totalorder %v4877_v36, 3  ;;  %v2120_v50 = vsel %vm2112_vm5, %v4896_v22, %v4898_v26  ;;  %v2121_v7 = vsel %vm2115_vm7, %v2108_v38, 920167782  ;;  %v4914_v4 = vshll.u32 %v2088_v43, 8 }
 0x2b1   : > { %v974_v24 = vadd.f32 1.0, %v973_v39  ;;  %v981_v19 = vadd.f32 1.0, %v980_v3  ;;  %v1562_v58 = vsub.s32 %v1558_v29, %v1561_v51  ;;  %vm2113_vm11 = vcmp.lt.s32.totalorder %v4877_v36, 2 }
 0x2b2   : > { %v2122_v16 = vsel %vm2114_vm9, %v4902_v54, %v2121_v7  ;;  %v2125_v17 = vsel %vm2115_vm7, %v2111_v40, 1326507024  ;;  %v2129_v29 = vand.u32 65535, %v4914_v4  ;;  %v2130_v21 = vshrl.u32 %v4914_v4, 16 }
 0x2b3   : > { %v982_v41 = vmul.f32 %v981_v19, %v966_v46  ;;  %v991_v25 = vxor.u32 2147483648, %v974_v24  ;;  %vm1563_vm8 = vcmp.lt.s32.totalorder %v1562_v58, 0  ;;  %v1564_v53 = vsub.s32 0, %v1562_v58 }
 0x2b4   : > { %v2124_v46 = vsel %vm2112_vm5, %v4898_v26, %v4902_v54  ;;  %v2123_v23 = vsel %vm2113_vm11, %v2120_v50, %v2122_v16  ;;  %v2126_v6 = vsel %vm2114_vm9, %v2108_v38, %v2125_v17  ;;  %v1554_v44 = vadd.s32 %v4869_v20, %v4867_v28 }
 0x2b5   : > { %v988_v0 = vxor.u32 2147483648, %v982_v41  ;;  %v992_v47 = vsel %vm990_vm4, %v991_v25, %v982_v41  ;;  %v1565_v10 = vsel %vm1563_vm8, %v1564_v53, %v1562_v58  ;;  %v2127_v35 = vsel %vm2113_vm11, %v2124_v46, %v2126_v6 }
 0x2b6   : > { %v1566_v15 = vclz %v1565_v10  ;;  %v2131_v37 = vand.u32 65535, %v2127_v35  ;;  %v2132_v30 = vshrl.u32 %v2127_v35, 16  ;;  %v2153_v12 = vand.u32 65535, %v2123_v23 }
 0x2b7   : > { %v989_v2 = vsel %vm987_vm1, %v974_v24, %v988_v0  ;;  %v2154_v62 = vshrl.u32 %v2123_v23, 16  ;;  %v4942_v34 = vmul.f32 30.0, %v357_v52  ;;  %v2117_v23 = vsel %vm2115_vm7, %v4902_v54, 2102212464 }
 0x2b8   : > { %v993_v49 = vsel %vm986_vm3, %v989_v2, %v992_v47  ;;  %v3035_v13 = vadd.s32 4294967294, %v1566_v15  ;;  %v2134_v9 = vmul.u32 %v2132_v30, %v2129_v29  ;;  %v2135_v1 = vmul.u32 %v2131_v37, %v2130_v21 }
 0x2b9   : > { %v994_v43 = vsel %vm983_vm6, nan, %v993_v49  ;;  %v2133_v56 = vmul.u32 %v2131_v37, %v2129_v29  ;;  %v2136_v18 = vmul.u32 %v2132_v30, %v2130_v21  ;;  %v2155_v11 = vmul.u32 %v2153_v12, %v2129_v29 }
 0x2ba   : > { %2858 = vst [vmem:[%s3701_s7 + $0x18] sm:$0xff] %v994_v43  ;;  %vm3036_vm10 = vcmp.lt.s32.totalorder %v3035_v13, 0  ;;  %v2137_v39 = vshll.u32 %v2134_v9, 16  ;;  %v2157_v38 = vmul.u32 %v2153_v12, %v2130_v21  ;;  %v2139_v45 = vshll.u32 %v2135_v1, 16 }
 0x2bb   : > { %v1569_v27 = vsel %vm3036_vm10, 0, %v3035_v13  ;;  %v2156_v19 = vmul.u32 %v2154_v62, %v2129_v29  ;;  %v2138_v20 = vshrl.u32 %v2134_v9, 16  ;;  %v2158_v53 = vmul.u32 %v2154_v62, %v2130_v21 }
 0x2bc   : > { %v1570_v3 = vsub.s32 32, %v1569_v27  ;;  %v1574_v5 = vsub.s32 4294967266, %v1569_v27  ;;  %vm2141_vm13 = vc.u32 %v2133_v56, %v2137_v39  ;;  %v2143_v24 = vadd.s32 %v2137_v39, %v2133_v56 }
 0x2bd   : > { %v1571_v51 = vshll.u32 %v1562_v58, %v1569_v27  ;;  %v2142_v28 = vsel %vm2141_vm13, 1, %v3245_v14  ;;  %v2159_v25 = vshll.u32 %v2156_v19, 16  ;;  %v2161_v47 = vshll.u32 %v2157_v38, 16 }
 0x2be   : > { %v1572_v40 = vshrl.u32 %v1554_v44, %v1570_v3  ;;  %v1575_v41 = vadd.s32 127, %v1574_v5  ;;  %v2144_v52 = vadd.s32 %v2142_v28, %v2136_v18  ;;  %vm2145_vm12 = vc.u32 %v2143_v24, %v2139_v45 }
 0x2bf   : > { %v2146_v0 = vsel %vm2145_vm12, 1, %v3245_v14  ;;  %vm2163_vm14 = vc.u32 %v2155_v11, %v2159_v25  ;;  %v2165_v16 = vadd.s32 %v2159_v25, %v2155_v11  ;;  %v1584_v58 = vsub.s32 4, %v4891_v48 }
 0x2c0   : > { %v1573_v50 = vor.u32 %v1572_v40, %v1571_v51  ;;  %v1576_v7 = vshll.u32 %v1575_v41, 23  ;;  %v2148_v46 = vadd.s32 %v2146_v0, %v2144_v52  ;;  %v2096_v2 = vshrl.u32 %v3239_v55, %v4874_v31 }
 0x2c1   : > { %v2164_v10 = vsel %vm2163_vm14, 1, %v3245_v14  ;;  %vm2167_vm15 = vc.u32 %v2165_v16, %v2161_v47  ;;  %v2140_v29 = vshrl.u32 %v2135_v1, 16  ;;  %vm1462_vm2 = vcmp.lt.s32.totalorder %v4728_v42, 0 }
 0x2c2   : > { %v1577_v17 = vor.u32 4788187, %v1576_v7  ;;  %v2149_v6 = vadd.s32 %v2148_v46, %v2138_v20  ;;  %v2166_v49 = vadd.s32 %v2164_v10, %v2158_v53  ;;  %v1580_v35 = vcvt.s32.f32 %v1573_v50 }
 0x2c3   : > { %v2168_v43 = vsel %vm2167_vm15, 1, %v3245_v14  ;;  %v2160_v21 = vshrl.u32 %v2156_v19, 16  ;;  %v2703_v31 = vand.u32 2139095040, %v4942_v34  ;;  %v2116_v13 = vsel %vm2112_vm5, %v2096_v2, %v4896_v22 }
 0x2c4   : > { %v1578_v15 = vand.u32 2147483647, %v1577_v17  ;;  %v2170_v37 = vadd.s32 %v2168_v43, %v2166_v49  ;;  %v2118_v54 = vsel %vm2114_vm9, %v4898_v26, %v2117_v23  ;;  %v4962_v12 = vadd.s32 %v2149_v6, %v2140_v29 }
 0x2c5   : > { %v1585_v9 = vsel %vm1462_vm2, %v1584_v58, %v4891_v48  ;;  %v2162_v1 = vshrl.u32 %v2157_v38, 16  ;;  %v2704_v62 = vshrl.u32 %v2703_v31, 23  ;;  %v4967_v56 = vadd.s32 %v2165_v16, %v2161_v47 }
 0x2c6   : > { %v1581_v30 = vmul.f32 %v1580_v35, %v1578_v15  ;;  %v2171_v44 = vadd.s32 %v2170_v37, %v2160_v21  ;;  %vm1461_vm0 = vcmp.le.f32.partialorder %v1460_v33, 0.7853982  ;;  %v2119_v22 = vsel %vm2113_vm11, %v2116_v13, %v2118_v54 }
 0x2c7   : > { %v3058_v26 = vadd.s32 4294967169, %v2704_v62  ;;  %v1587_v3 = vsel %vm1461_vm0, 0, %v1585_v9  ;;  %vm2175_vm1 = vc.u32 %v4962_v12, %v4967_v56  ;;  %v2700_v11 = vand.u32 2147483647, %v4942_v34 }
 0x2c8   : > { %v1582_v27 = vxor.u32 2147483648, %v1581_v30  ;;  %v2172_v18 = vadd.s32 %v2171_v44, %v2162_v1  ;;  %v2173_v33 = vmul.u32 %v4914_v4, %v2119_v22  ;;  %v1604_v36 = vadd.s32 3, %v1587_v3 }
 0x2c9   : > { %v2710_v38 = vadd.s32 1, %v3058_v26  ;;  %v2707_v28 = vand.u32 8388607, %v2700_v11  ;;  %vm1603_vm5 = vweird.f32 %v4728_v42  ;;  %vm2082_vm14 = vcmp.lt.s32.totalorder %v4766_v60, 0 }
 0x2ca   : > { %v1583_v39 = vsel %vm1462_vm2, %v1582_v27, %v1581_v30  ;;  %v2176_v5 = vadd.s32 1, %v2172_v18  ;;  %v1605_v7 = vand.u32 3, %v1604_v36 }
 0x2cb   : > { %v1586_v48 = vsel %vm1461_vm0, %v4728_v42, %v1583_v39  ;;  %vm2711_vm3 = vcmp.gt.s32.totalorder %v2710_v38, 0  ;;  %v2708_v58 = vor.u32 8388608, %v2707_v28 }
 0x2cc   : > { %v1588_v45 = vmul.f32 %v1586_v48, %v1586_v48  ;;  %v2177_v24 = vsel %vm2175_vm1, %v2176_v5, %v2172_v18  ;;  %v2712_v41 = vsel %vm2711_vm3, %v2710_v38, 0  ;;  %vm1607_vm6 = vcmp.eq.s32.totalorder %v1605_v7, 0 }
 0x2cd   : > { %v2178_v40 = vadd.s32 %v2177_v24, %v2173_v33  ;;  %v2714_v20 = vand.u32 31, %v2712_v41  ;;  %v4987_v2 = vshrl.u32 %v2712_v41, 5  ;;  %vm1606_vm4 = vcmp.lt.s32.totalorder %v1605_v7, 2 }
 0x2ce   : > { %v1589_v19 = vmul.f32 -0.001358992, %v1588_v45  ;;  %v1596_v51 = vmul.f32 -0.00019511016, %v1588_v45  ;;  %vm1610_vm9 = vcmp.eq.s32.totalorder %v1605_v7, 2  ;;  %v5014_v5 = vshll.u32 %v2708_v58, 8 }
 0x2cf   : > { %v2179_v50 = vadd.s32 536870912, %v2178_v40  ;;  %v4982_v0 = vsub.s32 32, %v2714_v20  ;;  %v2717_v29 = vshll.u32 %v3239_v55, %v2714_v20  ;;  %v2720_v43 = vshll.u32 %v3240_v57, %v2714_v20 }
 0x2d0   : > { %v1590_v52 = vadd.f32 0.041655596, %v1589_v19  ;;  %v1597_v25 = vadd.f32 0.008332121, %v1596_v51  ;;  %v2726_v37 = vshll.u32 %v3242_v61, %v2714_v20  ;;  %v2723_v44 = vshll.u32 %v3241_v59, %v2714_v20 }
 0x2d1   : > { %v4984_v4 = vshrl.u32 %v2179_v50, 30  ;;  %v2718_v10 = vshrl.u32 %v3240_v57, %v4982_v0  ;;  %v2721_v23 = vshrl.u32 %v3241_v59, %v4982_v0  ;;  %v2727_v6 = vshrl.u32 %v3243_v63, %v4982_v0 }
 0x2d2   : > { %v1591_v53 = vmul.f32 %v1590_v52, %v1588_v45  ;;  %v1598_v46 = vmul.f32 %v1597_v25, %v1588_v45  ;;  %v2724_v21 = vshrl.u32 %v3242_v61, %v4982_v0  ;;  %v2730_v31 = vshrl.u32 %v3244_v8, %v4982_v0 }
 0x2d3   : > { %v2181_v17 = vshll.u32 %v4984_v4, 30  ;;  %v5003_v9 = vor.u32 %v2718_v10, %v2717_v29  ;;  %v5005_v1 = vor.u32 %v2721_v23, %v2720_v43  ;;  %v2728_v62 = vor.u32 %v2727_v6, %v2726_v37 }
 0x2d4   : > { %v1592_v47 = vadd.f32 -0.4999988, %v1591_v53  ;;  %v1599_v16 = vadd.f32 -0.16666654, %v1598_v46  ;;  %v2729_v18 = vshll.u32 %v3243_v63, %v2714_v20  ;;  %v2174_v61 = vadd.s32 %v4967_v56, %v4962_v12 }
 0x2d5   : > { %v2182_v35 = vsub.s32 %v2178_v40, %v2181_v17  ;;  %v5011_v26 = vor.u32 %v2724_v21, %v2723_v44  ;;  %vm2732_vm8 = vcmp.lt.s32.totalorder %v4987_v2, 1  ;;  %vm2733_vm11 = vcmp.lt.s32.totalorder %v4987_v2, 2 }
 0x2d6   : > { %v1593_v49 = vmul.f32 %v1592_v47, %v1588_v45  ;;  %v1600_v15 = vmul.f32 %v1599_v16, %v1588_v45  ;;  %v2731_v3 = vor.u32 %v2730_v31, %v2729_v18  ;;  %vm2735_vm10 = vcmp.lt.s32.totalorder %v4987_v2, 4 }
 0x2d7   : > { %vm2183_vm7 = vcmp.lt.s32.totalorder %v2182_v35, 0  ;;  %v2184_v54 = vsub.s32 0, %v2182_v35  ;;  %v2740_v63 = vsel %vm2732_vm8, %v5003_v9, %v5005_v1  ;;  %vm2734_vm13 = vcmp.lt.s32.totalorder %v4987_v2, 3 }
 0x2d8   : > { %v1594_v30 = vadd.f32 1.0, %v1593_v49  ;;  %v1601_v13 = vadd.f32 1.0, %v1600_v15  ;;  %v2744_v33 = vsel %vm2732_vm8, %v5005_v1, %v5011_v26  ;;  %v2745_v51 = vsel %vm2735_vm10, %v2731_v3, 1326507024 }
 0x2d9   : > { %v2185_v22 = vsel %vm2183_vm7, %v2184_v54, %v2182_v35  ;;  %v2746_v28 = vsel %vm2734_vm13, %v2728_v62, %v2745_v51  ;;  %v2749_v20 = vand.u32 65535, %v5014_v5  ;;  %v2750_v16 = vshrl.u32 %v5014_v5, 16 }
 0x2da   : > { %v1602_v57 = vmul.f32 %v1601_v13, %v1586_v48  ;;  %v1611_v27 = vxor.u32 2147483648, %v1594_v30  ;;  %v2186_v8 = vclz %v2185_v22  ;;  %v2741_v48 = vsel %vm2735_vm10, %v2728_v62, 920167782 }
 0x2db   : > { %v2742_v45 = vsel %vm2734_vm13, %v5011_v26, %v2741_v48  ;;  %v2747_v42 = vsel %vm2733_vm11, %v2744_v33, %v2746_v28  ;;  %v2737_v3 = vsel %vm2735_vm10, %v5011_v26, 2102212464  ;;  %vm5059_vm3 = vcmp.le.f32.partialorder %v2080_v32, 0.7853982 }
 0x2dc   : > { %v1608_v39 = vxor.u32 2147483648, %v1602_v57  ;;  %v3047_v59 = vadd.s32 4294967294, %v2186_v8  ;;  %v1612_v56 = vsel %vm1610_vm9, %v1611_v27, %v1602_v57  ;;  %v2743_v19 = vsel %vm2733_vm11, %v2740_v63, %v2742_v45 }
 0x2dd   : > { %v2773_v25 = vand.u32 65535, %v2743_v19  ;;  %v2774_v50 = vshrl.u32 %v2743_v19, 16  ;;  %v2751_v46 = vand.u32 65535, %v2747_v42  ;;  %v2752_v47 = vshrl.u32 %v2747_v42, 16 }
 0x2de   : > { %v1609_v12 = vsel %vm1607_vm6, %v1594_v30, %v1608_v39  ;;  %vm3048_vm12 = vcmp.lt.s32.totalorder %v3047_v59, 0  ;;  %v2716_v39 = vshrl.u32 %v3239_v55, %v4982_v0  ;;  %v2738_v33 = vsel %vm2734_vm13, %v5005_v1, %v2737_v3 }
 0x2df   : > { %v1613_v38 = vsel %vm1606_vm4, %v1609_v12, %v1612_v56  ;;  %v2189_v24 = vsel %vm3048_vm12, 0, %v3047_v59  ;;  %v2776_v17 = vmul.u32 %v2774_v50, %v2749_v20  ;;  %v2754_v23 = vmul.u32 %v2752_v47, %v2749_v20 }
 0x2e0   : > { %v1614_v36 = vsel %vm1603_vm5, nan, %v1613_v38  ;;  %v2190_v40 = vsub.s32 32, %v2189_v24  ;;  %v2194_v41 = vsub.s32 4294967266, %v2189_v24  ;;  %v2191_v52 = vshll.u32 %v2182_v35, %v2189_v24 }
 0x2e1   : > { %2862 = vst [vmem:[%s3701_s7 + $0x38] sm:$0xff] %v1614_v36  ;;  %v2755_v6 = vmul.u32 %v2751_v46, %v2750_v16  ;;  %v2777_v49 = vmul.u32 %v2773_v25, %v2750_v16  ;;  %v2779_v15 = vshll.u32 %v2776_v17, 16  ;;  %v2753_v29 = vmul.u32 %v2751_v46, %v2749_v20 }
 0x2e2   : > { %v2192_v7 = vshrl.u32 %v2174_v61, %v2190_v40  ;;  %v2195_v53 = vadd.s32 127, %v2194_v41  ;;  %v2757_v43 = vshll.u32 %v2754_v23, 16  ;;  %v2775_v21 = vmul.u32 %v2773_v25, %v2749_v20 }
 0x2e3   : > { %v2756_v31 = vmul.u32 %v2752_v47, %v2750_v16  ;;  %v2759_v30 = vshll.u32 %v2755_v6, 16  ;;  %v2778_v13 = vmul.u32 %v2774_v50, %v2750_v16  ;;  %v2781_v57 = vshll.u32 %v2777_v49, 16 }
 0x2e4   : > { %v2193_v58 = vor.u32 %v2192_v7, %v2191_v52  ;;  %v2196_v10 = vshll.u32 %v2195_v53, 23  ;;  %vm2761_vm15 = vc.u32 %v2753_v29, %v2757_v43  ;;  %v2763_v44 = vadd.s32 %v2757_v43, %v2753_v29 }
 0x2e5   : > { %vm2783_vm2 = vc.u32 %v2775_v21, %v2779_v15  ;;  %v2762_v62 = vsel %vm2761_vm15, 1, %v3245_v14  ;;  %v2785_v22 = vadd.s32 %v2779_v15, %v2775_v21  ;;  %v2758_v12 = vshrl.u32 %v2754_v23, 16 }
 0x2e6   : > { %v2197_v35 = vor.u32 4788187, %v2196_v10  ;;  %v2200_v37 = vcvt.s32.f32 %v2193_v58  ;;  %v2784_v27 = vsel %vm2783_vm2, 1, %v3245_v14  ;;  %v2764_v61 = vadd.s32 %v2762_v62, %v2756_v31 }
 0x2e7   : > { %vm2765_vm0 = vc.u32 %v2763_v44, %v2759_v30  ;;  %v2786_v8 = vadd.s32 %v2784_v27, %v2778_v13  ;;  %vm2787_vm1 = vc.u32 %v2785_v22, %v2781_v57  ;;  %v2736_v55 = vsel %vm2732_vm8, %v2716_v39, %v5003_v9 }
 0x2e8   : > { %v2198_v54 = vand.u32 2147483647, %v2197_v35  ;;  %v2766_v59 = vsel %vm2765_vm0, 1, %v3245_v14  ;;  %v2788_v48 = vsel %vm2787_vm1, 1, %v3245_v14  ;;  %v2780_v0 = vshrl.u32 %v2776_v17, 16 }
 0x2e9   : > { %v2768_v56 = vadd.s32 %v2766_v59, %v2764_v61  ;;  %v2790_v26 = vadd.s32 %v2788_v48, %v2786_v8  ;;  %v2760_v14 = vshrl.u32 %v2755_v6, 16  ;;  %v2204_v32 = vsub.s32 4, %v4984_v4 }
 0x2ea   : > { %v2201_v18 = vmul.f32 %v2200_v37, %v2198_v54  ;;  %v2782_v19 = vshrl.u32 %v2777_v49, 16  ;;  %v2789_v41 = vadd.s32 %v2785_v22, %v2781_v57  ;;  %v2739_v28 = vsel %vm2733_vm11, %v2736_v55, %v2738_v33 }
 0x2eb   : > { %v2769_v36 = vadd.s32 %v2768_v56, %v2758_v12  ;;  %v2791_v51 = vadd.s32 %v2790_v26, %v2780_v0  ;;  %v2205_v1 = vsel %vm2082_vm14, %v2204_v32, %v4984_v4  ;;  %v2793_v53 = vmul.u32 %v5014_v5, %v2739_v28 }
 0x2ec   : > { %v2202_v63 = vxor.u32 2147483648, %v2201_v18  ;;  %v2207_v47 = vsel %vm5059_vm3, 0, %v2205_v1  ;;  %vm2223_vm8 = vweird.f32 %v4766_v60  ;;  %vm2702_vm10 = vcmp.lt.s32.totalorder %v4942_v34, 0 }
 0x2ed   : > { %v2770_v40 = vadd.s32 %v2769_v36, %v2760_v14  ;;  %v2792_v20 = vadd.s32 %v2791_v51, %v2782_v19  ;;  %v2224_v6 = vadd.s32 3, %v2207_v47  ;;  %vm2701_vm13 = vcmp.le.f32.partialorder %v2700_v11, 0.7853982 }
 0x2ee   : > { %v2203_v45 = vsel %vm2082_vm14, %v2202_v63, %v2201_v18  ;;  %vm2843_vm2 = vweird.f32 %v4942_v34 }
 0x2ef   : > { %v2206_v24 = vsel %vm5059_vm3, %v4766_v60, %v2203_v45  ;;  %vm2795_vm6 = vc.u32 %v2770_v40, %v2789_v41  ;;  %v2796_v25 = vadd.s32 1, %v2792_v20  ;;  %v2225_v21 = vand.u32 3, %v2224_v6 }
 0x2f0   : > { %v2208_v9 = vmul.f32 %v2206_v24, %v2206_v24  ;;  %v2794_v8 = vadd.s32 %v2789_v41, %v2770_v40 }
 0x2f1   : > { %v2797_v46 = vsel %vm2795_vm6, %v2796_v25, %v2792_v20  ;;  %vm2227_vm5 = vcmp.eq.s32.totalorder %v2225_v21, 0  ;;  %vm2230_vm7 = vcmp.eq.s32.totalorder %v2225_v21, 2  ;;  %vm2226_vm9 = vcmp.lt.s32.totalorder %v2225_v21, 2 }
 0x2f2   : > { %v2209_v52 = vmul.f32 -0.001358992, %v2208_v9  ;;  %v2216_v42 = vmul.f32 -0.00019511016, %v2208_v9  ;;  %v2798_v17 = vadd.s32 %v2797_v46, %v2793_v53 }
 0x2f4   : > { %v2210_v50 = vadd.f32 0.041655596, %v2209_v52  ;;  %v2217_v7 = vadd.f32 0.008332121, %v2216_v42  ;;  %v2799_v23 = vadd.s32 536870912, %v2798_v17 }
 0x2f6   : > { %v2211_v16 = vmul.f32 %v2210_v50, %v2208_v9  ;;  %v2218_v2 = vmul.f32 %v2217_v7, %v2208_v9  ;;  %v2800_v35 = vshrl.u32 %v2799_v23, 30 }
 0x2f8   : > { %v2212_v58 = vadd.f32 -0.4999988, %v2211_v16  ;;  %v2219_v10 = vadd.f32 -0.16666654, %v2218_v2  ;;  %v2801_v43 = vshll.u32 %v2800_v35, 30  ;;  %v2824_v33 = vsub.s32 4, %v2800_v35 }
 0x2fa   : > { %v2213_v49 = vmul.f32 %v2212_v58, %v2208_v9  ;;  %v2220_v15 = vmul.f32 %v2219_v10, %v2208_v9  ;;  %v2802_v31 = vsub.s32 %v2798_v17, %v2801_v43  ;;  %v2825_v19 = vsel %vm2702_vm10, %v2824_v33, %v2800_v35 }
 0x2fb   : > { %v2827_v40 = vsel %vm2701_vm13, 0, %v2825_v19 }
 0x2fc   : > { %v2214_v4 = vadd.f32 1.0, %v2213_v49  ;;  %v2221_v29 = vadd.f32 1.0, %v2220_v15  ;;  %vm2803_vm4 = vcmp.lt.s32.totalorder %v2802_v31, 0  ;;  %v2804_v13 = vsub.s32 0, %v2802_v31 }
 0x2fd   : > { %v2844_v42 = vadd.s32 3, %v2827_v40 }
 0x2fe   : > { %v2222_v37 = vmul.f32 %v2221_v29, %v2206_v24  ;;  %v2231_v5 = vxor.u32 2147483648, %v2214_v4  ;;  %v2805_v62 = vsel %vm2803_vm4, %v2804_v13, %v2802_v31 }
 0x2ff   : > { %v2806_v27 = vclz %v2805_v62  ;;  %v2845_v7 = vand.u32 3, %v2844_v42 }
 0x300   : > { %v2228_v30 = vxor.u32 2147483648, %v2222_v37  ;;  %v2232_v44 = vsel %vm2230_vm7, %v2231_v5, %v2222_v37 }
 0x301   : > { %v3059_v18 = vadd.s32 4294967294, %v2806_v27  ;;  %vm2847_vm12 = vcmp.eq.s32.totalorder %v2845_v7, 0  ;;  %vm2850_vm14 = vcmp.eq.s32.totalorder %v2845_v7, 2  ;;  %vm2846_vm15 = vcmp.lt.s32.totalorder %v2845_v7, 2 }
 0x302   : > { %v2229_v54 = vsel %vm2227_vm5, %v2214_v4, %v2228_v30 }
 0x303   : > { %v2233_v57 = vsel %vm2226_vm9, %v2229_v54, %v2232_v44  ;;  %vm3060_vm11 = vcmp.lt.s32.totalorder %v3059_v18, 0 }
 0x304   : > { %v2234_v22 = vsel %vm2223_vm8, nan, %v2233_v57  ;;  %v2809_v61 = vsel %vm3060_vm11, 0, %v3059_v18 }
 0x305   : > { %2866 = vst [vmem:[%s3701_s7 + $0x58] sm:$0xff] %v2234_v22  ;;  %v2810_v39 = vsub.s32 32, %v2809_v61  ;;  %v2814_v3 = vsub.s32 4294967266, %v2809_v61  ;;  %v2811_v59 = vshll.u32 %v2802_v31, %v2809_v61 }
 0x307   : > { %v2812_v63 = vshrl.u32 %v2794_v8, %v2810_v39  ;;  %v2815_v12 = vadd.s32 127, %v2814_v3 }
 0x309   : > { %v2813_v56 = vor.u32 %v2812_v63, %v2811_v59  ;;  %v2816_v48 = vshll.u32 %v2815_v12, 23 }
 0x30b   : > { %v2817_v38 = vor.u32 4788187, %v2816_v48  ;;  %v2820_v0 = vcvt.s32.f32 %v2813_v56 }
 0x30d   : > { %v2818_v55 = vand.u32 2147483647, %v2817_v38 }
 0x30f   : > { %v2821_v26 = vmul.f32 %v2820_v0, %v2818_v55 }
 0x311   : > { %v2822_v60 = vxor.u32 2147483648, %v2821_v26 }
 0x313   : > { %v2823_v45 = vsel %vm2702_vm10, %v2822_v60, %v2821_v26 }
 0x314   : > { %v2826_v14 = vsel %vm2701_vm13, %v4942_v34, %v2823_v45 }
 0x315   : > { %v2828_v36 = vmul.f32 %v2826_v14, %v2826_v14 }
 0x317   : > { %v2829_v32 = vmul.f32 -0.001358992, %v2828_v36  ;;  %v2836_v24 = vmul.f32 -0.00019511016, %v2828_v36 }
 0x319   : > { %v2830_v51 = vadd.f32 0.041655596, %v2829_v32  ;;  %v2837_v9 = vadd.f32 0.008332121, %v2836_v24 }
 0x31b   : > { %v2831_v41 = vmul.f32 %v2830_v51, %v2828_v36  ;;  %v2838_v28 = vmul.f32 %v2837_v9, %v2828_v36 }
 0x31d   : > { %v2832_v20 = vadd.f32 -0.4999988, %v2831_v41  ;;  %v2839_v52 = vadd.f32 -0.16666654, %v2838_v28 }
 0x31f   : > { %v2833_v11 = vmul.f32 %v2832_v20, %v2828_v36  ;;  %v2840_v1 = vmul.f32 %v2839_v52, %v2828_v36 }
 0x321   : > { %v2834_v25 = vadd.f32 1.0, %v2833_v11  ;;  %v2841_v50 = vadd.f32 1.0, %v2840_v1 }
 0x323   : > { %v2842_v53 = vmul.f32 %v2841_v50, %v2826_v14  ;;  %v2851_v46 = vxor.u32 2147483648, %v2834_v25 }
 0x325   : > { %v2848_v47 = vxor.u32 2147483648, %v2842_v53  ;;  %v2852_v2 = vsel %vm2850_vm14, %v2851_v46, %v2842_v53 }
 0x327   : > { %v2849_v16 = vsel %vm2847_vm12, %v2834_v25, %v2848_v47 }
 0x328   : > { %v2853_v17 = vsel %vm2846_vm15, %v2849_v16, %v2852_v2 }
 0x329   : > { %v2854_v58 = vsel %vm2843_vm2, nan, %v2853_v17 }
 0x32a   : > { %2870 = vst [vmem:[%s3701_s7 + $0x78] sm:$0xff] %v2854_v58 }
 0x32b   : > { %3186 = shalt.err (!%p3183_p5)
}
 0x32c   : > { %s3246_s5 = smov 128   ;;  %s3247_s7 = smov 8  }
 0x32d   : > { %3091 = dma.vmem_to_hbm [thread:$0]  (%p3308_p4), %s2886_s28, 2048, %s2888_s29, %s2872_s15, %s3246_s5, %s3246_s5, %s3247_s7  }
 0x32e PF: > { %p3097_p6 = scmp.ge.s32.totalorder %s3237_s17, 2  ;;  %s2902_s18 = sand.u32 1, %s3217_s12  }
 0x32f   : > { %s2903_s19 = scalar_lea.sflag [#allocation3], %s2902_s18 }
 0x330   : > { %p3094_p7 = pnand %p3097_p6, %p3315_p8 }
 0x332   : > { %p3095_p9 = pneg %p3094_p7 }
 0x334   : > { %3212 = dma.done.wait (%p3095_p9), %s2903_s19, 2048  }
 0x335   : > { %3214 = vsyncadd (%p3095_p9), %s2903_s19, 4294965248  ;;  %s16_s17 = sadd.s32 1, %s3237_s17   ;;  %s5156_s12 = smov %s3221_s13 }
 0x336   : > { %p13_p10 = scmp.ge.s32.totalorder %s16_s17, 4   ;;  %s5157_s13 = smov %s3225_s14 }
 0x337   : > { %s5158_s14 = smov %s3321_s25  ;;  %s5159_s15 = smov %s3233_s16 }
 0x338   : > { %s5160_s16 = smov %s5162_s20  ;;  %15 = sbr.rel (!%p13_p10) target bundleno = 4 (0x4), region = 73 }
 0x33d   :  { %2909 = vsyncpa [#allocation3], 1 }
 0x33e   :  { %2911 = vsyncpa [#allocation3 + $0x1], 1 }

</bundles_post_ra>
